<compile_context>
chip_gen: v7x
topology: tpu7x:2x2x1
jax: 0.10.0
libtpu: 0.0.40
codegen_flags: <defaults>
</compile_context>

<pallas_src>
import functools

import jax
import jax.numpy as jnp
from jax.experimental import pallas as pl
from jax.experimental.pallas import tpu as pltpu

LANE = 128                       # TPU lane width (fc feature padding)
KSIZE = 5                        # conv kernel size of the module
SPAD = (KSIZE - 1) // 2          # 'same' spatial padding of the 5x5 convs
K1PAD = 128                      # conv1 packed contraction: 25 real taps -> 128 lanes
COMPUTE_DTYPE = jnp.bfloat16     # MXU operand dtype (f32 accumulation)


def _round_up(x, m):
    return (x + m - 1) // m * m


# --------------------------- fused whole-network kernel ---------------------------

def _fused_forward_kernel(xp_ref,
                          w1_ref, b1_ref, w2_ref, b2_ref, w3_ref, b3_ref,
                          w4_ref, b4_ref, wf1_ref, bf1_ref, wf2_ref, bf2_ref,
                          o_ref, a1_ref, a2_ref, a3_ref, *, B, K, H1, W1):
    """One batch block end-to-end.  xp_ref: (B, H1*W1, K1PAD) packed conv1 patches.
       a1/a2/a3: halo-padded VMEM scratch between conv layers (real channel width).
       o_ref: (B, 128) sigmoid outputs (lane-dense)."""
    dt = a1_ref.dtype
    pad = (K - 1) // 2
    C1 = a1_ref.shape[-1]
    C2 = a2_ref.shape[-1]
    C3 = a3_ref.shape[-1]
    C4 = wf1_ref.shape[0]        # fc1 in-features == c4 (1x1 spatial after pool4)

    # Zero the halo-padded inter-layer scratch; the interiors are overwritten below.
    # (Done every step so it is correct when the parallel grid is split across cores.)
    a1_ref[...] = jnp.zeros_like(a1_ref)
    a2_ref[...] = jnp.zeros_like(a2_ref)
    a3_ref[...] = jnp.zeros_like(a3_ref)

    # ---- conv1: 25 taps packed into the contraction dim -> ONE MXU matmul ----
    M1 = B * H1 * W1
    h = jnp.dot(xp_ref[...].reshape(M1, xp_ref.shape[-1]), w1_ref[...],
                preferred_element_type=jnp.float32)                 # (M1, C1)
    h = jnp.maximum(h + b1_ref[...], 0.0)                           # bias + ReLU
    H2, W2 = H1 // 2, W1 // 2
    h = h.reshape(B * H1 * W2, 2, C1)                               # 2x2/stride-2 maxpool
    h = jnp.maximum(h[:, 0, :], h[:, 1, :])
    h = h.reshape(B, H2, 2, W2, C1)
    h = jnp.maximum(h[:, :, 0], h[:, :, 1])                         # (B, H2, W2, C1)
    a1_ref[:, pad:pad + H2, pad:pad + W2, :] = h.astype(dt)

    # ---- conv2..conv4: shifted-tap matmuls at the real channel width ----
    def conv_pool(a_ref, w_ref, b_ref, Ho, Wo, Cin, Cout):
        M = B * Ho * Wo
        acc = jnp.zeros((M, Cout), jnp.float32)
        for kh in range(K):
            for kw in range(K):
                patch = a_ref[:, kh:kh + Ho, kw:kw + Wo, :].reshape(M, Cin)
                acc = acc + jnp.dot(patch, w_ref[kh * K + kw],
                                    preferred_element_type=jnp.float32)
        acc = jnp.maximum(acc + b_ref[...], 0.0)                     # bias + ReLU
        Hq, Wq = Ho // 2, Wo // 2
        a = acc.reshape(B * Ho * Wq, 2, Cout)
        a = jnp.maximum(a[:, 0, :], a[:, 1, :])
        a = a.reshape(B, Hq, 2, Wq, Cout)
        return jnp.maximum(a[:, :, 0], a[:, :, 1])                   # (B, Hq, Wq, Cout)

    p2 = conv_pool(a1_ref, w2_ref, b2_ref, H2, W2, C1, C2)
    H3, W3 = H2 // 2, W2 // 2
    a2_ref[:, pad:pad + H3, pad:pad + W3, :] = p2.astype(dt)

    p3 = conv_pool(a2_ref, w3_ref, b3_ref, H3, W3, C2, C3)
    H4, W4 = H3 // 2, W3 // 2
    a3_ref[:, pad:pad + H4, pad:pad + W4, :] = p3.astype(dt)

    p4 = conv_pool(a3_ref, w4_ref, b4_ref, H4, W4, C3, C4)           # (B, 1, 1, C4)

    # ---- flatten -> fc1 -> ReLU -> fc2 -> sigmoid ----
    # NHWC flatten equals PyTorch's NCHW flatten because the spatial extent is 1x1.
    flat = p4.reshape(B, C4).astype(dt)
    hh = jnp.dot(flat, wf1_ref[...], preferred_element_type=jnp.float32)
    hh = jnp.maximum(hh + bf1_ref[...], 0.0)
    # TODO(synk): nn.Dropout is identity in eval mode; train-time Bernoulli masking omitted.
    z = jnp.dot(hh.astype(dt), wf2_ref[...], preferred_element_type=jnp.float32)
    z = z + bf2_ref[...]
    s = pl.reciprocal(1.0 + jnp.exp(-z), approx=True)                # sigmoid on EUP
    o_ref[...] = jnp.minimum(jnp.maximum(s, 0.0), 1.0).astype(o_ref.dtype)


# --------------------------- parameter layout / init ---------------------------

def _prep_conv1_packed(w_oihw, b, k_pad):
    """(Cout, 1, KH, KW) -> packed (k_pad, Cout): taps folded into the contraction dim."""
    Cout, Cin, KH, KW = w_oihw.shape
    w = jnp.transpose(w_oihw, (2, 3, 1, 0)).reshape(KH * KW * Cin, Cout)
    w = jnp.pad(w, ((0, k_pad - KH * KW * Cin), (0, 0)))
    return w.astype(COMPUTE_DTYPE), b.reshape(1, Cout).astype(jnp.float32)


def _prep_conv_taps(w_oihw, b):
    """(Cout, Cin, KH, KW) -> (KH*KW, Cin, Cout) at the REAL channel width (no zero K)."""
    Cout, Cin, KH, KW = w_oihw.shape
    w = jnp.transpose(w_oihw, (2, 3, 1, 0)).reshape(KH * KW, Cin, Cout)
    return w.astype(COMPUTE_DTYPE), b.reshape(1, Cout).astype(jnp.float32)


def _prep_fc(w_oi, b, k_pad, n_pad):
    """nn.Linear (out, in) -> (k_pad, n_pad) matmul layout + (1, n_pad) f32 bias."""
    out_f, in_f = w_oi.shape
    w = jnp.pad(w_oi.T, ((0, k_pad - in_f), (0, n_pad - out_f)))
    bp = jnp.pad(b, (0, n_pad - out_f)).reshape(1, n_pad)
    return w.astype(COMPUTE_DTYPE), bp.astype(jnp.float32)


def init_params(key, *, D_out=10, c1=16, c2=32, c3=64, c4=64):
    K = KSIZE
    ks = jax.random.split(key, 6)

    def kaiming(k, shape, fan_in, a=0.0):
        gain = (2.0 / (1.0 + a * a)) ** 0.5
        return (gain / fan_in ** 0.5) * jax.random.normal(k, shape, jnp.float32)

    conv1_w = kaiming(ks[0], (c1, 1, K, K), 1 * K * K, a=0.1)
    conv2_w = kaiming(ks[1], (c2, c1, K, K), c1 * K * K, a=0.1)
    conv3_w = kaiming(ks[2], (c3, c2, K, K), c2 * K * K, a=0.1)
    conv4_w = kaiming(ks[3], (c4, c3, K, K), c3 * K * K, a=0.1)
    fc1_in = 1 * 1 * c4                    # (h_out4//2)*(w_out4//2)*c4 for D_in=(16,16)
    fc1_w = kaiming(ks[4], (200, fc1_in), fc1_in)
    fc2_w = kaiming(ks[5], (D_out, 200), 200)

    p = {}
    p["conv1_w"], p["conv1_b"] = _prep_conv1_packed(conv1_w, jnp.zeros((c1,), jnp.float32), K1PAD)
    p["conv2_w"], p["conv2_b"] = _prep_conv_taps(conv2_w, jnp.zeros((c2,), jnp.float32))
    p["conv3_w"], p["conv3_b"] = _prep_conv_taps(conv3_w, jnp.zeros((c3,), jnp.float32))
    p["conv4_w"], p["conv4_b"] = _prep_conv_taps(conv4_w, jnp.zeros((c4,), jnp.float32))
    n1 = _round_up(200, LANE)              # 256
    n2 = _round_up(D_out, LANE)            # 128
    p["fc1_w"], p["fc1_b"] = _prep_fc(fc1_w, jnp.zeros((200,), jnp.float32), fc1_in, n1)
    p["fc2_w"], p["fc2_b"] = _prep_fc(fc2_w, jnp.zeros((D_out,), jnp.float32), n1, n2)
    return p


# --------------------------- full forward (eval mode) ---------------------------

def conv_lassonet_forward(params, x_nchw, d_out=10):
    N, Cin, H, W = x_nchw.shape
    assert Cin == 1, "ConvLassoNet conv1 has a single input channel"
    K = KSIZE
    pad = SPAD
    # Geometry: 'same' 5x5 convs + 2x2/stride-2 pools.  D_in=(16,16): sum < 84 so the
    # module picks nn.Conv2d; spatial ends 1x1 after the 4th pool (required for fc1 layout).
    H1, W1 = H, W
    H2, W2 = H1 // 2, W1 // 2
    H3, W3 = H2 // 2, W2 // 2
    H4, W4 = H3 // 2, W3 // 2
    assert H4 // 2 == 1 and W4 // 2 == 1, "fc1 layout assumes 1x1 spatial after the 4th pool"

    K1p, c1 = params["conv1_w"].shape
    c2 = params["conv2_w"].shape[2]
    c3 = params["conv3_w"].shape[2]
    c4 = params["conv4_w"].shape[2]
    n1 = params["fc1_w"].shape[1]
    n2 = params["fc2_w"].shape[1]
    kk = K * K

    # conv1 tap-packed im2col in the wrapper (pure XLA, tiny 1-channel input).  This is
    # the ONLY HBM-resident activation; it is lane-dense (K1p = 128) and smaller than the
    # previously channel-padded raw input.
    x = x_nchw.reshape(N, H1, W1).astype(jnp.float32)
    xpad = jnp.pad(x, ((0, 0), (pad, pad), (pad, pad)))
    cols = [xpad[:, kh:kh + H1, kw:kw + W1] for kh in range(K) for kw in range(K)]
    patches = jnp.stack(cols, axis=-1).reshape(N, H1 * W1, kk)
    patches = jnp.pad(patches, ((0, 0), (0, 0), (0, K1p - kk))).astype(COMPUTE_DTYPE)

    # Batch blocking: fold the batch into the matmul M dim; keep >= 2 blocks so both
    # v7x TensorCores get work, cap B_TILE at 8 to bound live accumulator size.
    if N >= 16:
        bt = 8
    elif N >= 2:
        bt = N // 2
    else:
        bt = 1
    nb = pl.cdiv(N, bt)
    n_padded = nb * bt
    if n_padded != N:
        patches = jnp.pad(patches, ((0, n_padded - N), (0, 0), (0, 0)))

    kern = functools.partial(_fused_forward_kernel, B=bt, K=K, H1=H1, W1=W1)

    out = pl.pallas_call(
        kern,
        out_shape=jax.ShapeDtypeStruct((nb, bt, n2), jnp.float32),
        grid=(nb,),
        in_specs=[
            pl.BlockSpec((bt, H1 * W1, K1p), lambda n: (n, 0, 0)),   # packed conv1 patches
            pl.BlockSpec((K1p, c1), lambda n: (0, 0)),               # conv1 w (tap-packed)
            pl.BlockSpec((1, c1), lambda n: (0, 0)),
            pl.BlockSpec((kk, c1, c2), lambda n: (0, 0, 0)),         # conv2 taps
            pl.BlockSpec((1, c2), lambda n: (0, 0)),
            pl.BlockSpec((kk, c2, c3), lambda n: (0, 0, 0)),         # conv3 taps
            pl.BlockSpec((1, c3), lambda n: (0, 0)),
            pl.BlockSpec((kk, c3, c4), lambda n: (0, 0, 0)),         # conv4 taps
            pl.BlockSpec((1, c4), lambda n: (0, 0)),
            pl.BlockSpec((c4, n1), lambda n: (0, 0)),                # fc1
            pl.BlockSpec((1, n1), lambda n: (0, 0)),
            pl.BlockSpec((n1, n2), lambda n: (0, 0)),                # fc2
            pl.BlockSpec((1, n2), lambda n: (0, 0)),
        ],
        out_specs=pl.BlockSpec((None, bt, n2), lambda n: (n, 0, 0)),
        scratch_shapes=[
            pltpu.VMEM((bt, H2 + 2 * pad, W2 + 2 * pad, c1), COMPUTE_DTYPE),  # conv2 input
            pltpu.VMEM((bt, H3 + 2 * pad, W3 + 2 * pad, c2), COMPUTE_DTYPE),  # conv3 input
            pltpu.VMEM((bt, H4 + 2 * pad, W4 + 2 * pad, c3), COMPUTE_DTYPE),  # conv4 input
        ],
        compiler_params=pltpu.CompilerParams(dimension_semantics=("parallel",)),
    )(patches,
      params["conv1_w"], params["conv1_b"],
      params["conv2_w"], params["conv2_b"],
      params["conv3_w"], params["conv3_b"],
      params["conv4_w"], params["conv4_b"],
      params["fc1_w"], params["fc1_b"],
      params["fc2_w"], params["fc2_b"])

    return out.reshape(n_padded, n2)[:N, :d_out]       # drop batch + lane padding


if __name__ == "__main__":
    key = jax.random.PRNGKey(0)
    k_x, k_p = jax.random.split(key)

    # D_in=(16,16): sum < 84 so the module would pick Conv2d; input channels = 1.
    x = jax.random.normal(k_x, (2, 1, 16, 16), jnp.float32)
    params = init_params(k_p, D_out=10)

    fwd = jax.jit(conv_lassonet_forward, static_argnames=("d_out",))
    y = fwd(params, x, d_out=10)
    y = jax.block_until_ready(y)

    assert y.shape == (2, 10)
    assert bool(jnp.all(jnp.isfinite(y)))
    assert bool(jnp.all((y >= 0.0) & (y <= 1.0)))       # sigmoid output range
    print("KERNEL_OK")
</pallas_src>

<mosaic_0001>
module attributes {stable_mosaic.version = 11 : i64} {
  func.func @_fused_forward_kernel(%arg0: i32, %arg1: memref<1x256x128xbf16, #tpu.memory_space<vmem>>, %arg2: memref<128x16xbf16, #tpu.memory_space<vmem>>, %arg3: memref<1x16xf32, #tpu.memory_space<vmem>>, %arg4: memref<25x16x32xbf16, #tpu.memory_space<vmem>>, %arg5: memref<1x32xf32, #tpu.memory_space<vmem>>, %arg6: memref<25x32x64xbf16, #tpu.memory_space<vmem>>, %arg7: memref<1x64xf32, #tpu.memory_space<vmem>>, %arg8: memref<25x64x64xbf16, #tpu.memory_space<vmem>>, %arg9: memref<1x64xf32, #tpu.memory_space<vmem>>, %arg10: memref<64x256xbf16, #tpu.memory_space<vmem>>, %arg11: memref<1x256xf32, #tpu.memory_space<vmem>>, %arg12: memref<256x128xbf16, #tpu.memory_space<vmem>>, %arg13: memref<1x128xf32, #tpu.memory_space<vmem>>, %arg14: memref<1x1x128xf32, #tpu.memory_space<vmem>>, %arg15: memref<1x12x12x16xbf16, #tpu.memory_space<vmem>>, %arg16: memref<1x8x8x32xbf16, #tpu.memory_space<vmem>>, %arg17: memref<1x6x6x64xbf16, #tpu.memory_space<vmem>>) attributes {dimension_semantics = [#tpu.dimension_semantics<parallel>], iteration_bounds = array<i64: 2>, scalar_prefetch = 0 : i64, scratch_operands = 3 : i64, tpu.core_type = #tpu.core_type<tc>, window_params = [{transform_indices = @transform_0, window_bounds = array<i64: 1, 256, 128>}, {pipeline_mode = #tpu.pipeline_mode<synchronous>, transform_indices = @transform_1, window_bounds = array<i64: 128, 16>}, {pipeline_mode = #tpu.pipeline_mode<synchronous>, transform_indices = @transform_2, window_bounds = array<i64: 1, 16>}, {pipeline_mode = #tpu.pipeline_mode<synchronous>, transform_indices = @transform_3, window_bounds = array<i64: 25, 16, 32>}, {pipeline_mode = #tpu.pipeline_mode<synchronous>, transform_indices = @transform_4, window_bounds = array<i64: 1, 32>}, {pipeline_mode = #tpu.pipeline_mode<synchronous>, transform_indices = @transform_5, window_bounds = array<i64: 25, 32, 64>}, {pipeline_mode = #tpu.pipeline_mode<synchronous>, transform_indices = @transform_6, window_bounds = array<i64: 1, 64>}, {pipeline_mode = #tpu.pipeline_mode<synchronous>, transform_indices = @transform_7, window_bounds = array<i64: 25, 64, 64>}, {pipeline_mode = #tpu.pipeline_mode<synchronous>, transform_indices = @transform_8, window_bounds = array<i64: 1, 64>}, {pipeline_mode = #tpu.pipeline_mode<synchronous>, transform_indices = @transform_9, window_bounds = array<i64: 64, 256>}, {pipeline_mode = #tpu.pipeline_mode<synchronous>, transform_indices = @transform_10, window_bounds = array<i64: 1, 256>}, {pipeline_mode = #tpu.pipeline_mode<synchronous>, transform_indices = @transform_11, window_bounds = array<i64: 256, 128>}, {pipeline_mode = #tpu.pipeline_mode<synchronous>, transform_indices = @transform_12, window_bounds = array<i64: 1, 128>}, {transform_indices = @transform_13, window_bounds = array<i64: 1, 1, 128>}]} {
    %cst = arith.constant 0.000000e+00 : bf16
    %0 = vector.broadcast %cst : bf16 to vector<1x12x12x16xbf16>
    %c0 = arith.constant 0 : index
    %c0_0 = arith.constant 0 : index
    %c0_1 = arith.constant 0 : index
    %c0_2 = arith.constant 0 : index
    %1 = vector.load %arg15[%c0, %c0_0, %c0_1, %c0_2] : memref<1x12x12x16xbf16, #tpu.memory_space<vmem>>, vector<1x12x12x16xbf16>
    tpu.vector_store %arg15[%c0, %c0_0, %c0_1, %c0_2], %0 {strides = array<i32>} : memref<1x12x12x16xbf16, #tpu.memory_space<vmem>>, vector<1x12x12x16xbf16>,
    %cst_3 = arith.constant 0.000000e+00 : bf16
    %2 = vector.broadcast %cst_3 : bf16 to vector<1x8x8x32xbf16>
    %c0_4 = arith.constant 0 : index
    %c0_5 = arith.constant 0 : index
    %c0_6 = arith.constant 0 : index
    %c0_7 = arith.constant 0 : index
    %3 = vector.load %arg16[%c0_4, %c0_5, %c0_6, %c0_7] : memref<1x8x8x32xbf16, #tpu.memory_space<vmem>>, vector<1x8x8x32xbf16>
    tpu.vector_store %arg16[%c0_4, %c0_5, %c0_6, %c0_7], %2 {strides = array<i32>} : memref<1x8x8x32xbf16, #tpu.memory_space<vmem>>, vector<1x8x8x32xbf16>,
    %cst_8 = arith.constant 0.000000e+00 : bf16
    %4 = vector.broadcast %cst_8 : bf16 to vector<1x6x6x64xbf16>
    %c0_9 = arith.constant 0 : index
    %c0_10 = arith.constant 0 : index
    %c0_11 = arith.constant 0 : index
    %c0_12 = arith.constant 0 : index
    %5 = vector.load %arg17[%c0_9, %c0_10, %c0_11, %c0_12] : memref<1x6x6x64xbf16, #tpu.memory_space<vmem>>, vector<1x6x6x64xbf16>
    tpu.vector_store %arg17[%c0_9, %c0_10, %c0_11, %c0_12], %4 {strides = array<i32>} : memref<1x6x6x64xbf16, #tpu.memory_space<vmem>>, vector<1x6x6x64xbf16>,
    %c0_13 = arith.constant 0 : index
    %c0_14 = arith.constant 0 : index
    %c0_15 = arith.constant 0 : index
    %6 = vector.load %arg1[%c0_13, %c0_14, %c0_15] : memref<1x256x128xbf16, #tpu.memory_space<vmem>>, vector<1x256x128xbf16>
    %7 = vector.shape_cast %6 : vector<1x256x128xbf16> to vector<256x128xbf16>
    %c0_16 = arith.constant 0 : index
    %c0_17 = arith.constant 0 : index
    %8 = vector.load %arg2[%c0_16, %c0_17] : memref<128x16xbf16, #tpu.memory_space<vmem>>, vector<128x16xbf16>
    %cst_18 = arith.constant dense<0.000000e+00> : vector<256x16xf32>
    %9 = tpu.matmul %7, %8, %cst_18 {dimension_numbers = #tpu.dot_dimension_numbers<[1], [0], [0], [1], [0, 0, 1, 1], [], []>} : vector<256x128xbf16>, vector<128x16xbf16>, vector<256x16xf32> -> vector<256x16xf32>
    %c0_19 = arith.constant 0 : index
    %c0_20 = arith.constant 0 : index
    %10 = vector.load %arg3[%c0_19, %c0_20] : memref<1x16xf32, #tpu.memory_space<vmem>>, vector<1x16xf32>
    %11 = vector.broadcast %10 : vector<1x16xf32> to vector<256x16xf32>
    %12 = arith.addf %9, %11 : vector<256x16xf32>
    %cst_21 = arith.constant 0.000000e+00 : f32
    %13 = vector.broadcast %cst_21 : f32 to vector<256x16xf32>
    %14 = arith.maximumf %12, %13 : vector<256x16xf32>
    %15 = vector.shape_cast %14 : vector<256x16xf32> to vector<128x2x16xf32>
    %16 = vector.extract_strided_slice %15 {offsets = [0, 0, 0], sizes = [128, 1, 16], strides = [1, 1, 1]} : vector<128x2x16xf32> to vector<128x1x16xf32>
    %17 = vector.shape_cast %16 : vector<128x1x16xf32> to vector<128x16xf32>
    %18 = vector.extract_strided_slice %15 {offsets = [0, 1, 0], sizes = [128, 1, 16], strides = [1, 1, 1]} : vector<128x2x16xf32> to vector<128x1x16xf32>
    %19 = vector.shape_cast %18 : vector<128x1x16xf32> to vector<128x16xf32>
    %20 = arith.maximumf %17, %19 : vector<128x16xf32>
    %21 = vector.shape_cast %20 : vector<128x16xf32> to vector<1x8x2x8x16xf32>
    %22 = vector.extract_strided_slice %21 {offsets = [0, 0, 0, 0, 0], sizes = [1, 8, 1, 8, 16], strides = [1, 1, 1, 1, 1]} : vector<1x8x2x8x16xf32> to vector<1x8x1x8x16xf32>
    %23 = vector.shape_cast %22 : vector<1x8x1x8x16xf32> to vector<1x8x8x16xf32>
    %24 = vector.extract_strided_slice %21 {offsets = [0, 0, 1, 0, 0], sizes = [1, 8, 1, 8, 16], strides = [1, 1, 1, 1, 1]} : vector<1x8x2x8x16xf32> to vector<1x8x1x8x16xf32>
    %25 = vector.shape_cast %24 : vector<1x8x1x8x16xf32> to vector<1x8x8x16xf32>
    %26 = arith.maximumf %23, %25 : vector<1x8x8x16xf32>
    %27 = arith.truncf %26 : vector<1x8x8x16xf32> to vector<1x8x8x16xbf16>
    %c0_22 = arith.constant 0 : index
    %c2 = arith.constant 2 : index
    %c2_23 = arith.constant 2 : index
    %c0_24 = arith.constant 0 : index
    %28 = vector.load %arg15[%c0_22, %c2, %c2_23, %c0_24] : memref<1x12x12x16xbf16, #tpu.memory_space<vmem>>, vector<1x8x8x16xbf16>
    tpu.vector_store %arg15[%c0_22, %c2, %c2_23, %c0_24], %27 {strides = array<i32>} : memref<1x12x12x16xbf16, #tpu.memory_space<vmem>>, vector<1x8x8x16xbf16>,
    %cst_25 = arith.constant 0.000000e+00 : f32
    %29 = vector.broadcast %cst_25 : f32 to vector<64x32xf32>
    %c0_26 = arith.constant 0 : index
    %c0_27 = arith.constant 0 : index
    %c0_28 = arith.constant 0 : index
    %c0_29 = arith.constant 0 : index
    %30 = vector.load %arg15[%c0_26, %c0_27, %c0_28, %c0_29] : memref<1x12x12x16xbf16, #tpu.memory_space<vmem>>, vector<1x8x8x16xbf16>
    %31 = vector.shape_cast %30 : vector<1x8x8x16xbf16> to vector<64x16xbf16>
    %c0_30 = arith.constant 0 : index
    %c0_31 = arith.constant 0 : index
    %c0_32 = arith.constant 0 : index
    %32 = vector.load %arg4[%c0_30, %c0_31, %c0_32] : memref<25x16x32xbf16, #tpu.memory_space<vmem>>, vector<1x16x32xbf16>
    %33 = vector.shape_cast %32 : vector<1x16x32xbf16> to vector<16x32xbf16>
    %cst_33 = arith.constant dense<0.000000e+00> : vector<64x32xf32>
    %34 = tpu.matmul %31, %33, %cst_33 {dimension_numbers = #tpu.dot_dimension_numbers<[1], [0], [0], [1], [0, 0, 1, 1], [], []>} : vector<64x16xbf16>, vector<16x32xbf16>, vector<64x32xf32> -> vector<64x32xf32>
    %35 = arith.addf %29, %34 : vector<64x32xf32>
    %c0_34 = arith.constant 0 : index
    %c0_35 = arith.constant 0 : index
    %c1 = arith.constant 1 : index
    %c0_36 = arith.constant 0 : index
    %36 = vector.load %arg15[%c0_34, %c0_35, %c1, %c0_36] : memref<1x12x12x16xbf16, #tpu.memory_space<vmem>>, vector<1x8x8x16xbf16>
    %37 = vector.shape_cast %36 : vector<1x8x8x16xbf16> to vector<64x16xbf16>
    %c1_37 = arith.constant 1 : index
    %c0_38 = arith.constant 0 : index
    %c0_39 = arith.constant 0 : index
    %38 = vector.load %arg4[%c1_37, %c0_38, %c0_39] : memref<25x16x32xbf16, #tpu.memory_space<vmem>>, vector<1x16x32xbf16>
    %39 = vector.shape_cast %38 : vector<1x16x32xbf16> to vector<16x32xbf16>
    %cst_40 = arith.constant dense<0.000000e+00> : vector<64x32xf32>
    %40 = tpu.matmul %37, %39, %cst_40 {dimension_numbers = #tpu.dot_dimension_numbers<[1], [0], [0], [1], [0, 0, 1, 1], [], []>} : vector<64x16xbf16>, vector<16x32xbf16>, vector<64x32xf32> -> vector<64x32xf32>
    %41 = arith.addf %35, %40 : vector<64x32xf32>
    %c0_41 = arith.constant 0 : index
    %c0_42 = arith.constant 0 : index
    %c2_43 = arith.constant 2 : index
    %c0_44 = arith.constant 0 : index
    %42 = vector.load %arg15[%c0_41, %c0_42, %c2_43, %c0_44] : memref<1x12x12x16xbf16, #tpu.memory_space<vmem>>, vector<1x8x8x16xbf16>
    %43 = vector.shape_cast %42 : vector<1x8x8x16xbf16> to vector<64x16xbf16>
    %c2_45 = arith.constant 2 : index
    %c0_46 = arith.constant 0 : index
    %c0_47 = arith.constant 0 : index
    %44 = vector.load %arg4[%c2_45, %c0_46, %c0_47] : memref<25x16x32xbf16, #tpu.memory_space<vmem>>, vector<1x16x32xbf16>
    %45 = vector.shape_cast %44 : vector<1x16x32xbf16> to vector<16x32xbf16>
    %cst_48 = arith.constant dense<0.000000e+00> : vector<64x32xf32>
    %46 = tpu.matmul %43, %45, %cst_48 {dimension_numbers = #tpu.dot_dimension_numbers<[1], [0], [0], [1], [0, 0, 1, 1], [], []>} : vector<64x16xbf16>, vector<16x32xbf16>, vector<64x32xf32> -> vector<64x32xf32>
    %47 = arith.addf %41, %46 : vector<64x32xf32>
    %c0_49 = arith.constant 0 : index
    %c0_50 = arith.constant 0 : index
    %c3 = arith.constant 3 : index
    %c0_51 = arith.constant 0 : index
    %48 = vector.load %arg15[%c0_49, %c0_50, %c3, %c0_51] : memref<1x12x12x16xbf16, #tpu.memory_space<vmem>>, vector<1x8x8x16xbf16>
    %49 = vector.shape_cast %48 : vector<1x8x8x16xbf16> to vector<64x16xbf16>
    %c3_52 = arith.constant 3 : index
    %c0_53 = arith.constant 0 : index
    %c0_54 = arith.constant 0 : index
    %50 = vector.load %arg4[%c3_52, %c0_53, %c0_54] : memref<25x16x32xbf16, #tpu.memory_space<vmem>>, vector<1x16x32xbf16>
    %51 = vector.shape_cast %50 : vector<1x16x32xbf16> to vector<16x32xbf16>
    %cst_55 = arith.constant dense<0.000000e+00> : vector<64x32xf32>
    %52 = tpu.matmul %49, %51, %cst_55 {dimension_numbers = #tpu.dot_dimension_numbers<[1], [0], [0], [1], [0, 0, 1, 1], [], []>} : vector<64x16xbf16>, vector<16x32xbf16>, vector<64x32xf32> -> vector<64x32xf32>
    %53 = arith.addf %47, %52 : vector<64x32xf32>
    %c0_56 = arith.constant 0 : index
    %c0_57 = arith.constant 0 : index
    %c4 = arith.constant 4 : index
    %c0_58 = arith.constant 0 : index
    %54 = vector.load %arg15[%c0_56, %c0_57, %c4, %c0_58] : memref<1x12x12x16xbf16, #tpu.memory_space<vmem>>, vector<1x8x8x16xbf16>
    %55 = vector.shape_cast %54 : vector<1x8x8x16xbf16> to vector<64x16xbf16>
    %c4_59 = arith.constant 4 : index
    %c0_60 = arith.constant 0 : index
    %c0_61 = arith.constant 0 : index
    %56 = vector.load %arg4[%c4_59, %c0_60, %c0_61] : memref<25x16x32xbf16, #tpu.memory_space<vmem>>, vector<1x16x32xbf16>
    %57 = vector.shape_cast %56 : vector<1x16x32xbf16> to vector<16x32xbf16>
    %cst_62 = arith.constant dense<0.000000e+00> : vector<64x32xf32>
    %58 = tpu.matmul %55, %57, %cst_62 {dimension_numbers = #tpu.dot_dimension_numbers<[1], [0], [0], [1], [0, 0, 1, 1], [], []>} : vector<64x16xbf16>, vector<16x32xbf16>, vector<64x32xf32> -> vector<64x32xf32>
    %59 = arith.addf %53, %58 : vector<64x32xf32>
    %c0_63 = arith.constant 0 : index
    %c1_64 = arith.constant 1 : index
    %c0_65 = arith.constant 0 : index
    %c0_66 = arith.constant 0 : index
    %60 = vector.load %arg15[%c0_63, %c1_64, %c0_65, %c0_66] : memref<1x12x12x16xbf16, #tpu.memory_space<vmem>>, vector<1x8x8x16xbf16>
    %61 = vector.shape_cast %60 : vector<1x8x8x16xbf16> to vector<64x16xbf16>
    %c5 = arith.constant 5 : index
    %c0_67 = arith.constant 0 : index
    %c0_68 = arith.constant 0 : index
    %62 = vector.load %arg4[%c5, %c0_67, %c0_68] : memref<25x16x32xbf16, #tpu.memory_space<vmem>>, vector<1x16x32xbf16>
    %63 = vector.shape_cast %62 : vector<1x16x32xbf16> to vector<16x32xbf16>
    %cst_69 = arith.constant dense<0.000000e+00> : vector<64x32xf32>
    %64 = tpu.matmul %61, %63, %cst_69 {dimension_numbers = #tpu.dot_dimension_numbers<[1], [0], [0], [1], [0, 0, 1, 1], [], []>} : vector<64x16xbf16>, vector<16x32xbf16>, vector<64x32xf32> -> vector<64x32xf32>
    %65 = arith.addf %59, %64 : vector<64x32xf32>
    %c0_70 = arith.constant 0 : index
    %c1_71 = arith.constant 1 : index
    %c1_72 = arith.constant 1 : index
    %c0_73 = arith.constant 0 : index
    %66 = vector.load %arg15[%c0_70, %c1_71, %c1_72, %c0_73] : memref<1x12x12x16xbf16, #tpu.memory_space<vmem>>, vector<1x8x8x16xbf16>
    %67 = vector.shape_cast %66 : vector<1x8x8x16xbf16> to vector<64x16xbf16>
    %c6 = arith.constant 6 : index
    %c0_74 = arith.constant 0 : index
    %c0_75 = arith.constant 0 : index
    %68 = vector.load %arg4[%c6, %c0_74, %c0_75] : memref<25x16x32xbf16, #tpu.memory_space<vmem>>, vector<1x16x32xbf16>
    %69 = vector.shape_cast %68 : vector<1x16x32xbf16> to vector<16x32xbf16>
    %cst_76 = arith.constant dense<0.000000e+00> : vector<64x32xf32>
    %70 = tpu.matmul %67, %69, %cst_76 {dimension_numbers = #tpu.dot_dimension_numbers<[1], [0], [0], [1], [0, 0, 1, 1], [], []>} : vector<64x16xbf16>, vector<16x32xbf16>, vector<64x32xf32> -> vector<64x32xf32>
    %71 = arith.addf %65, %70 : vector<64x32xf32>
    %c0_77 = arith.constant 0 : index
    %c1_78 = arith.constant 1 : index
    %c2_79 = arith.constant 2 : index
    %c0_80 = arith.constant 0 : index
    %72 = vector.load %arg15[%c0_77, %c1_78, %c2_79, %c0_80] : memref<1x12x12x16xbf16, #tpu.memory_space<vmem>>, vector<1x8x8x16xbf16>
    %73 = vector.shape_cast %72 : vector<1x8x8x16xbf16> to vector<64x16xbf16>
    %c7 = arith.constant 7 : index
    %c0_81 = arith.constant 0 : index
    %c0_82 = arith.constant 0 : index
    %74 = vector.load %arg4[%c7, %c0_81, %c0_82] : memref<25x16x32xbf16, #tpu.memory_space<vmem>>, vector<1x16x32xbf16>
    %75 = vector.shape_cast %74 : vector<1x16x32xbf16> to vector<16x32xbf16>
    %cst_83 = arith.constant dense<0.000000e+00> : vector<64x32xf32>
    %76 = tpu.matmul %73, %75, %cst_83 {dimension_numbers = #tpu.dot_dimension_numbers<[1], [0], [0], [1], [0, 0, 1, 1], [], []>} : vector<64x16xbf16>, vector<16x32xbf16>, vector<64x32xf32> -> vector<64x32xf32>
    %77 = arith.addf %71, %76 : vector<64x32xf32>
    %c0_84 = arith.constant 0 : index
    %c1_85 = arith.constant 1 : index
    %c3_86 = arith.constant 3 : index
    %c0_87 = arith.constant 0 : index
    %78 = vector.load %arg15[%c0_84, %c1_85, %c3_86, %c0_87] : memref<1x12x12x16xbf16, #tpu.memory_space<vmem>>, vector<1x8x8x16xbf16>
    %79 = vector.shape_cast %78 : vector<1x8x8x16xbf16> to vector<64x16xbf16>
    %c8 = arith.constant 8 : index
    %c0_88 = arith.constant 0 : index
    %c0_89 = arith.constant 0 : index
    %80 = vector.load %arg4[%c8, %c0_88, %c0_89] : memref<25x16x32xbf16, #tpu.memory_space<vmem>>, vector<1x16x32xbf16>
    %81 = vector.shape_cast %80 : vector<1x16x32xbf16> to vector<16x32xbf16>
    %cst_90 = arith.constant dense<0.000000e+00> : vector<64x32xf32>
    %82 = tpu.matmul %79, %81, %cst_90 {dimension_numbers = #tpu.dot_dimension_numbers<[1], [0], [0], [1], [0, 0, 1, 1], [], []>} : vector<64x16xbf16>, vector<16x32xbf16>, vector<64x32xf32> -> vector<64x32xf32>
    %83 = arith.addf %77, %82 : vector<64x32xf32>
    %c0_91 = arith.constant 0 : index
    %c1_92 = arith.constant 1 : index
    %c4_93 = arith.constant 4 : index
    %c0_94 = arith.constant 0 : index
    %84 = vector.load %arg15[%c0_91, %c1_92, %c4_93, %c0_94] : memref<1x12x12x16xbf16, #tpu.memory_space<vmem>>, vector<1x8x8x16xbf16>
    %85 = vector.shape_cast %84 : vector<1x8x8x16xbf16> to vector<64x16xbf16>
    %c9 = arith.constant 9 : index
    %c0_95 = arith.constant 0 : index
    %c0_96 = arith.constant 0 : index
    %86 = vector.load %arg4[%c9, %c0_95, %c0_96] : memref<25x16x32xbf16, #tpu.memory_space<vmem>>, vector<1x16x32xbf16>
    %87 = vector.shape_cast %86 : vector<1x16x32xbf16> to vector<16x32xbf16>
    %cst_97 = arith.constant dense<0.000000e+00> : vector<64x32xf32>
    %88 = tpu.matmul %85, %87, %cst_97 {dimension_numbers = #tpu.dot_dimension_numbers<[1], [0], [0], [1], [0, 0, 1, 1], [], []>} : vector<64x16xbf16>, vector<16x32xbf16>, vector<64x32xf32> -> vector<64x32xf32>
    %89 = arith.addf %83, %88 : vector<64x32xf32>
    %c0_98 = arith.constant 0 : index
    %c2_99 = arith.constant 2 : index
    %c0_100 = arith.constant 0 : index
    %c0_101 = arith.constant 0 : index
    %90 = vector.load %arg15[%c0_98, %c2_99, %c0_100, %c0_101] : memref<1x12x12x16xbf16, #tpu.memory_space<vmem>>, vector<1x8x8x16xbf16>
    %91 = vector.shape_cast %90 : vector<1x8x8x16xbf16> to vector<64x16xbf16>
    %c10 = arith.constant 10 : index
    %c0_102 = arith.constant 0 : index
    %c0_103 = arith.constant 0 : index
    %92 = vector.load %arg4[%c10, %c0_102, %c0_103] : memref<25x16x32xbf16, #tpu.memory_space<vmem>>, vector<1x16x32xbf16>
    %93 = vector.shape_cast %92 : vector<1x16x32xbf16> to vector<16x32xbf16>
    %cst_104 = arith.constant dense<0.000000e+00> : vector<64x32xf32>
    %94 = tpu.matmul %91, %93, %cst_104 {dimension_numbers = #tpu.dot_dimension_numbers<[1], [0], [0], [1], [0, 0, 1, 1], [], []>} : vector<64x16xbf16>, vector<16x32xbf16>, vector<64x32xf32> -> vector<64x32xf32>
    %95 = arith.addf %89, %94 : vector<64x32xf32>
    %c0_105 = arith.constant 0 : index
    %c2_106 = arith.constant 2 : index
    %c1_107 = arith.constant 1 : index
    %c0_108 = arith.constant 0 : index
    %96 = vector.load %arg15[%c0_105, %c2_106, %c1_107, %c0_108] : memref<1x12x12x16xbf16, #tpu.memory_space<vmem>>, vector<1x8x8x16xbf16>
    %97 = vector.shape_cast %96 : vector<1x8x8x16xbf16> to vector<64x16xbf16>
    %c11 = arith.constant 11 : index
    %c0_109 = arith.constant 0 : index
    %c0_110 = arith.constant 0 : index
    %98 = vector.load %arg4[%c11, %c0_109, %c0_110] : memref<25x16x32xbf16, #tpu.memory_space<vmem>>, vector<1x16x32xbf16>
    %99 = vector.shape_cast %98 : vector<1x16x32xbf16> to vector<16x32xbf16>
    %cst_111 = arith.constant dense<0.000000e+00> : vector<64x32xf32>
    %100 = tpu.matmul %97, %99, %cst_111 {dimension_numbers = #tpu.dot_dimension_numbers<[1], [0], [0], [1], [0, 0, 1, 1], [], []>} : vector<64x16xbf16>, vector<16x32xbf16>, vector<64x32xf32> -> vector<64x32xf32>
    %101 = arith.addf %95, %100 : vector<64x32xf32>
    %c0_112 = arith.constant 0 : index
    %c2_113 = arith.constant 2 : index
    %c2_114 = arith.constant 2 : index
    %c0_115 = arith.constant 0 : index
    %102 = vector.load %arg15[%c0_112, %c2_113, %c2_114, %c0_115] : memref<1x12x12x16xbf16, #tpu.memory_space<vmem>>, vector<1x8x8x16xbf16>
    %103 = vector.shape_cast %102 : vector<1x8x8x16xbf16> to vector<64x16xbf16>
    %c12 = arith.constant 12 : index
    %c0_116 = arith.constant 0 : index
    %c0_117 = arith.constant 0 : index
    %104 = vector.load %arg4[%c12, %c0_116, %c0_117] : memref<25x16x32xbf16, #tpu.memory_space<vmem>>, vector<1x16x32xbf16>
    %105 = vector.shape_cast %104 : vector<1x16x32xbf16> to vector<16x32xbf16>
    %cst_118 = arith.constant dense<0.000000e+00> : vector<64x32xf32>
    %106 = tpu.matmul %103, %105, %cst_118 {dimension_numbers = #tpu.dot_dimension_numbers<[1], [0], [0], [1], [0, 0, 1, 1], [], []>} : vector<64x16xbf16>, vector<16x32xbf16>, vector<64x32xf32> -> vector<64x32xf32>
    %107 = arith.addf %101, %106 : vector<64x32xf32>
    %c0_119 = arith.constant 0 : index
    %c2_120 = arith.constant 2 : index
    %c3_121 = arith.constant 3 : index
    %c0_122 = arith.constant 0 : index
    %108 = vector.load %arg15[%c0_119, %c2_120, %c3_121, %c0_122] : memref<1x12x12x16xbf16, #tpu.memory_space<vmem>>, vector<1x8x8x16xbf16>
    %109 = vector.shape_cast %108 : vector<1x8x8x16xbf16> to vector<64x16xbf16>
    %c13 = arith.constant 13 : index
    %c0_123 = arith.constant 0 : index
    %c0_124 = arith.constant 0 : index
    %110 = vector.load %arg4[%c13, %c0_123, %c0_124] : memref<25x16x32xbf16, #tpu.memory_space<vmem>>, vector<1x16x32xbf16>
    %111 = vector.shape_cast %110 : vector<1x16x32xbf16> to vector<16x32xbf16>
    %cst_125 = arith.constant dense<0.000000e+00> : vector<64x32xf32>
    %112 = tpu.matmul %109, %111, %cst_125 {dimension_numbers = #tpu.dot_dimension_numbers<[1], [0], [0], [1], [0, 0, 1, 1], [], []>} : vector<64x16xbf16>, vector<16x32xbf16>, vector<64x32xf32> -> vector<64x32xf32>
    %113 = arith.addf %107, %112 : vector<64x32xf32>
    %c0_126 = arith.constant 0 : index
    %c2_127 = arith.constant 2 : index
    %c4_128 = arith.constant 4 : index
    %c0_129 = arith.constant 0 : index
    %114 = vector.load %arg15[%c0_126, %c2_127, %c4_128, %c0_129] : memref<1x12x12x16xbf16, #tpu.memory_space<vmem>>, vector<1x8x8x16xbf16>
    %115 = vector.shape_cast %114 : vector<1x8x8x16xbf16> to vector<64x16xbf16>
    %c14 = arith.constant 14 : index
    %c0_130 = arith.constant 0 : index
    %c0_131 = arith.constant 0 : index
    %116 = vector.load %arg4[%c14, %c0_130, %c0_131] : memref<25x16x32xbf16, #tpu.memory_space<vmem>>, vector<1x16x32xbf16>
    %117 = vector.shape_cast %116 : vector<1x16x32xbf16> to vector<16x32xbf16>
    %cst_132 = arith.constant dense<0.000000e+00> : vector<64x32xf32>
    %118 = tpu.matmul %115, %117, %cst_132 {dimension_numbers = #tpu.dot_dimension_numbers<[1], [0], [0], [1], [0, 0, 1, 1], [], []>} : vector<64x16xbf16>, vector<16x32xbf16>, vector<64x32xf32> -> vector<64x32xf32>
    %119 = arith.addf %113, %118 : vector<64x32xf32>
    %c0_133 = arith.constant 0 : index
    %c3_134 = arith.constant 3 : index
    %c0_135 = arith.constant 0 : index
    %c0_136 = arith.constant 0 : index
    %120 = vector.load %arg15[%c0_133, %c3_134, %c0_135, %c0_136] : memref<1x12x12x16xbf16, #tpu.memory_space<vmem>>, vector<1x8x8x16xbf16>
    %121 = vector.shape_cast %120 : vector<1x8x8x16xbf16> to vector<64x16xbf16>
    %c15 = arith.constant 15 : index
    %c0_137 = arith.constant 0 : index
    %c0_138 = arith.constant 0 : index
    %122 = vector.load %arg4[%c15, %c0_137, %c0_138] : memref<25x16x32xbf16, #tpu.memory_space<vmem>>, vector<1x16x32xbf16>
    %123 = vector.shape_cast %122 : vector<1x16x32xbf16> to vector<16x32xbf16>
    %cst_139 = arith.constant dense<0.000000e+00> : vector<64x32xf32>
    %124 = tpu.matmul %121, %123, %cst_139 {dimension_numbers = #tpu.dot_dimension_numbers<[1], [0], [0], [1], [0, 0, 1, 1], [], []>} : vector<64x16xbf16>, vector<16x32xbf16>, vector<64x32xf32> -> vector<64x32xf32>
    %125 = arith.addf %119, %124 : vector<64x32xf32>
    %c0_140 = arith.constant 0 : index
    %c3_141 = arith.constant 3 : index
    %c1_142 = arith.constant 1 : index
    %c0_143 = arith.constant 0 : index
    %126 = vector.load %arg15[%c0_140, %c3_141, %c1_142, %c0_143] : memref<1x12x12x16xbf16, #tpu.memory_space<vmem>>, vector<1x8x8x16xbf16>
    %127 = vector.shape_cast %126 : vector<1x8x8x16xbf16> to vector<64x16xbf16>
    %c16 = arith.constant 16 : index
    %c0_144 = arith.constant 0 : index
    %c0_145 = arith.constant 0 : index
    %128 = vector.load %arg4[%c16, %c0_144, %c0_145] : memref<25x16x32xbf16, #tpu.memory_space<vmem>>, vector<1x16x32xbf16>
    %129 = vector.shape_cast %128 : vector<1x16x32xbf16> to vector<16x32xbf16>
    %cst_146 = arith.constant dense<0.000000e+00> : vector<64x32xf32>
    %130 = tpu.matmul %127, %129, %cst_146 {dimension_numbers = #tpu.dot_dimension_numbers<[1], [0], [0], [1], [0, 0, 1, 1], [], []>} : vector<64x16xbf16>, vector<16x32xbf16>, vector<64x32xf32> -> vector<64x32xf32>
    %131 = arith.addf %125, %130 : vector<64x32xf32>
    %c0_147 = arith.constant 0 : index
    %c3_148 = arith.constant 3 : index
    %c2_149 = arith.constant 2 : index
    %c0_150 = arith.constant 0 : index
    %132 = vector.load %arg15[%c0_147, %c3_148, %c2_149, %c0_150] : memref<1x12x12x16xbf16, #tpu.memory_space<vmem>>, vector<1x8x8x16xbf16>
    %133 = vector.shape_cast %132 : vector<1x8x8x16xbf16> to vector<64x16xbf16>
    %c17 = arith.constant 17 : index
    %c0_151 = arith.constant 0 : index
    %c0_152 = arith.constant 0 : index
    %134 = vector.load %arg4[%c17, %c0_151, %c0_152] : memref<25x16x32xbf16, #tpu.memory_space<vmem>>, vector<1x16x32xbf16>
    %135 = vector.shape_cast %134 : vector<1x16x32xbf16> to vector<16x32xbf16>
    %cst_153 = arith.constant dense<0.000000e+00> : vector<64x32xf32>
    %136 = tpu.matmul %133, %135, %cst_153 {dimension_numbers = #tpu.dot_dimension_numbers<[1], [0], [0], [1], [0, 0, 1, 1], [], []>} : vector<64x16xbf16>, vector<16x32xbf16>, vector<64x32xf32> -> vector<64x32xf32>
    %137 = arith.addf %131, %136 : vector<64x32xf32>
    %c0_154 = arith.constant 0 : index
    %c3_155 = arith.constant 3 : index
    %c3_156 = arith.constant 3 : index
    %c0_157 = arith.constant 0 : index
    %138 = vector.load %arg15[%c0_154, %c3_155, %c3_156, %c0_157] : memref<1x12x12x16xbf16, #tpu.memory_space<vmem>>, vector<1x8x8x16xbf16>
    %139 = vector.shape_cast %138 : vector<1x8x8x16xbf16> to vector<64x16xbf16>
    %c18 = arith.constant 18 : index
    %c0_158 = arith.constant 0 : index
    %c0_159 = arith.constant 0 : index
    %140 = vector.load %arg4[%c18, %c0_158, %c0_159] : memref<25x16x32xbf16, #tpu.memory_space<vmem>>, vector<1x16x32xbf16>
    %141 = vector.shape_cast %140 : vector<1x16x32xbf16> to vector<16x32xbf16>
    %cst_160 = arith.constant dense<0.000000e+00> : vector<64x32xf32>
    %142 = tpu.matmul %139, %141, %cst_160 {dimension_numbers = #tpu.dot_dimension_numbers<[1], [0], [0], [1], [0, 0, 1, 1], [], []>} : vector<64x16xbf16>, vector<16x32xbf16>, vector<64x32xf32> -> vector<64x32xf32>
    %143 = arith.addf %137, %142 : vector<64x32xf32>
    %c0_161 = arith.constant 0 : index
    %c3_162 = arith.constant 3 : index
    %c4_163 = arith.constant 4 : index
    %c0_164 = arith.constant 0 : index
    %144 = vector.load %arg15[%c0_161, %c3_162, %c4_163, %c0_164] : memref<1x12x12x16xbf16, #tpu.memory_space<vmem>>, vector<1x8x8x16xbf16>
    %145 = vector.shape_cast %144 : vector<1x8x8x16xbf16> to vector<64x16xbf16>
    %c19 = arith.constant 19 : index
    %c0_165 = arith.constant 0 : index
    %c0_166 = arith.constant 0 : index
    %146 = vector.load %arg4[%c19, %c0_165, %c0_166] : memref<25x16x32xbf16, #tpu.memory_space<vmem>>, vector<1x16x32xbf16>
    %147 = vector.shape_cast %146 : vector<1x16x32xbf16> to vector<16x32xbf16>
    %cst_167 = arith.constant dense<0.000000e+00> : vector<64x32xf32>
    %148 = tpu.matmul %145, %147, %cst_167 {dimension_numbers = #tpu.dot_dimension_numbers<[1], [0], [0], [1], [0, 0, 1, 1], [], []>} : vector<64x16xbf16>, vector<16x32xbf16>, vector<64x32xf32> -> vector<64x32xf32>
    %149 = arith.addf %143, %148 : vector<64x32xf32>
    %c0_168 = arith.constant 0 : index
    %c4_169 = arith.constant 4 : index
    %c0_170 = arith.constant 0 : index
    %c0_171 = arith.constant 0 : index
    %150 = vector.load %arg15[%c0_168, %c4_169, %c0_170, %c0_171] : memref<1x12x12x16xbf16, #tpu.memory_space<vmem>>, vector<1x8x8x16xbf16>
    %151 = vector.shape_cast %150 : vector<1x8x8x16xbf16> to vector<64x16xbf16>
    %c20 = arith.constant 20 : index
    %c0_172 = arith.constant 0 : index
    %c0_173 = arith.constant 0 : index
    %152 = vector.load %arg4[%c20, %c0_172, %c0_173] : memref<25x16x32xbf16, #tpu.memory_space<vmem>>, vector<1x16x32xbf16>
    %153 = vector.shape_cast %152 : vector<1x16x32xbf16> to vector<16x32xbf16>
    %cst_174 = arith.constant dense<0.000000e+00> : vector<64x32xf32>
    %154 = tpu.matmul %151, %153, %cst_174 {dimension_numbers = #tpu.dot_dimension_numbers<[1], [0], [0], [1], [0, 0, 1, 1], [], []>} : vector<64x16xbf16>, vector<16x32xbf16>, vector<64x32xf32> -> vector<64x32xf32>
    %155 = arith.addf %149, %154 : vector<64x32xf32>
    %c0_175 = arith.constant 0 : index
    %c4_176 = arith.constant 4 : index
    %c1_177 = arith.constant 1 : index
    %c0_178 = arith.constant 0 : index
    %156 = vector.load %arg15[%c0_175, %c4_176, %c1_177, %c0_178] : memref<1x12x12x16xbf16, #tpu.memory_space<vmem>>, vector<1x8x8x16xbf16>
    %157 = vector.shape_cast %156 : vector<1x8x8x16xbf16> to vector<64x16xbf16>
    %c21 = arith.constant 21 : index
    %c0_179 = arith.constant 0 : index
    %c0_180 = arith.constant 0 : index
    %158 = vector.load %arg4[%c21, %c0_179, %c0_180] : memref<25x16x32xbf16, #tpu.memory_space<vmem>>, vector<1x16x32xbf16>
    %159 = vector.shape_cast %158 : vector<1x16x32xbf16> to vector<16x32xbf16>
    %cst_181 = arith.constant dense<0.000000e+00> : vector<64x32xf32>
    %160 = tpu.matmul %157, %159, %cst_181 {dimension_numbers = #tpu.dot_dimension_numbers<[1], [0], [0], [1], [0, 0, 1, 1], [], []>} : vector<64x16xbf16>, vector<16x32xbf16>, vector<64x32xf32> -> vector<64x32xf32>
    %161 = arith.addf %155, %160 : vector<64x32xf32>
    %c0_182 = arith.constant 0 : index
    %c4_183 = arith.constant 4 : index
    %c2_184 = arith.constant 2 : index
    %c0_185 = arith.constant 0 : index
    %162 = vector.load %arg15[%c0_182, %c4_183, %c2_184, %c0_185] : memref<1x12x12x16xbf16, #tpu.memory_space<vmem>>, vector<1x8x8x16xbf16>
    %163 = vector.shape_cast %162 : vector<1x8x8x16xbf16> to vector<64x16xbf16>
    %c22 = arith.constant 22 : index
    %c0_186 = arith.constant 0 : index
    %c0_187 = arith.constant 0 : index
    %164 = vector.load %arg4[%c22, %c0_186, %c0_187] : memref<25x16x32xbf16, #tpu.memory_space<vmem>>, vector<1x16x32xbf16>
    %165 = vector.shape_cast %164 : vector<1x16x32xbf16> to vector<16x32xbf16>
    %cst_188 = arith.constant dense<0.000000e+00> : vector<64x32xf32>
    %166 = tpu.matmul %163, %165, %cst_188 {dimension_numbers = #tpu.dot_dimension_numbers<[1], [0], [0], [1], [0, 0, 1, 1], [], []>} : vector<64x16xbf16>, vector<16x32xbf16>, vector<64x32xf32> -> vector<64x32xf32>
    %167 = arith.addf %161, %166 : vector<64x32xf32>
    %c0_189 = arith.constant 0 : index
    %c4_190 = arith.constant 4 : index
    %c3_191 = arith.constant 3 : index
    %c0_192 = arith.constant 0 : index
    %168 = vector.load %arg15[%c0_189, %c4_190, %c3_191, %c0_192] : memref<1x12x12x16xbf16, #tpu.memory_space<vmem>>, vector<1x8x8x16xbf16>
    %169 = vector.shape_cast %168 : vector<1x8x8x16xbf16> to vector<64x16xbf16>
    %c23 = arith.constant 23 : index
    %c0_193 = arith.constant 0 : index
    %c0_194 = arith.constant 0 : index
    %170 = vector.load %arg4[%c23, %c0_193, %c0_194] : memref<25x16x32xbf16, #tpu.memory_space<vmem>>, vector<1x16x32xbf16>
    %171 = vector.shape_cast %170 : vector<1x16x32xbf16> to vector<16x32xbf16>
    %cst_195 = arith.constant dense<0.000000e+00> : vector<64x32xf32>
    %172 = tpu.matmul %169, %171, %cst_195 {dimension_numbers = #tpu.dot_dimension_numbers<[1], [0], [0], [1], [0, 0, 1, 1], [], []>} : vector<64x16xbf16>, vector<16x32xbf16>, vector<64x32xf32> -> vector<64x32xf32>
    %173 = arith.addf %167, %172 : vector<64x32xf32>
    %c0_196 = arith.constant 0 : index
    %c4_197 = arith.constant 4 : index
    %c4_198 = arith.constant 4 : index
    %c0_199 = arith.constant 0 : index
    %174 = vector.load %arg15[%c0_196, %c4_197, %c4_198, %c0_199] : memref<1x12x12x16xbf16, #tpu.memory_space<vmem>>, vector<1x8x8x16xbf16>
    %175 = vector.shape_cast %174 : vector<1x8x8x16xbf16> to vector<64x16xbf16>
    %c24 = arith.constant 24 : index
    %c0_200 = arith.constant 0 : index
    %c0_201 = arith.constant 0 : index
    %176 = vector.load %arg4[%c24, %c0_200, %c0_201] : memref<25x16x32xbf16, #tpu.memory_space<vmem>>, vector<1x16x32xbf16>
    %177 = vector.shape_cast %176 : vector<1x16x32xbf16> to vector<16x32xbf16>
    %cst_202 = arith.constant dense<0.000000e+00> : vector<64x32xf32>
    %178 = tpu.matmul %175, %177, %cst_202 {dimension_numbers = #tpu.dot_dimension_numbers<[1], [0], [0], [1], [0, 0, 1, 1], [], []>} : vector<64x16xbf16>, vector<16x32xbf16>, vector<64x32xf32> -> vector<64x32xf32>
    %179 = arith.addf %173, %178 : vector<64x32xf32>
    %c0_203 = arith.constant 0 : index
    %c0_204 = arith.constant 0 : index
    %180 = vector.load %arg5[%c0_203, %c0_204] : memref<1x32xf32, #tpu.memory_space<vmem>>, vector<1x32xf32>
    %181 = vector.broadcast %180 : vector<1x32xf32> to vector<64x32xf32>
    %182 = arith.addf %179, %181 : vector<64x32xf32>
    %cst_205 = arith.constant 0.000000e+00 : f32
    %183 = vector.broadcast %cst_205 : f32 to vector<64x32xf32>
    %184 = arith.maximumf %182, %183 : vector<64x32xf32>
    %185 = vector.shape_cast %184 : vector<64x32xf32> to vector<32x2x32xf32>
    %186 = vector.extract_strided_slice %185 {offsets = [0, 0, 0], sizes = [32, 1, 32], strides = [1, 1, 1]} : vector<32x2x32xf32> to vector<32x1x32xf32>
    %187 = vector.shape_cast %186 : vector<32x1x32xf32> to vector<32x32xf32>
    %188 = vector.extract_strided_slice %185 {offsets = [0, 1, 0], sizes = [32, 1, 32], strides = [1, 1, 1]} : vector<32x2x32xf32> to vector<32x1x32xf32>
    %189 = vector.shape_cast %188 : vector<32x1x32xf32> to vector<32x32xf32>
    %190 = arith.maximumf %187, %189 : vector<32x32xf32>
    %191 = vector.shape_cast %190 : vector<32x32xf32> to vector<1x4x2x4x32xf32>
    %192 = vector.extract_strided_slice %191 {offsets = [0, 0, 0, 0, 0], sizes = [1, 4, 1, 4, 32], strides = [1, 1, 1, 1, 1]} : vector<1x4x2x4x32xf32> to vector<1x4x1x4x32xf32>
    %193 = vector.shape_cast %192 : vector<1x4x1x4x32xf32> to vector<1x4x4x32xf32>
    %194 = vector.extract_strided_slice %191 {offsets = [0, 0, 1, 0, 0], sizes = [1, 4, 1, 4, 32], strides = [1, 1, 1, 1, 1]} : vector<1x4x2x4x32xf32> to vector<1x4x1x4x32xf32>
    %195 = vector.shape_cast %194 : vector<1x4x1x4x32xf32> to vector<1x4x4x32xf32>
    %196 = arith.maximumf %193, %195 : vector<1x4x4x32xf32>
    %197 = arith.truncf %196 : vector<1x4x4x32xf32> to vector<1x4x4x32xbf16>
    %c0_206 = arith.constant 0 : index
    %c2_207 = arith.constant 2 : index
    %c2_208 = arith.constant 2 : index
    %c0_209 = arith.constant 0 : index
    %198 = vector.load %arg16[%c0_206, %c2_207, %c2_208, %c0_209] : memref<1x8x8x32xbf16, #tpu.memory_space<vmem>>, vector<1x4x4x32xbf16>
    tpu.vector_store %arg16[%c0_206, %c2_207, %c2_208, %c0_209], %197 {strides = array<i32>} : memref<1x8x8x32xbf16, #tpu.memory_space<vmem>>, vector<1x4x4x32xbf16>,
    %cst_210 = arith.constant 0.000000e+00 : f32
    %199 = vector.broadcast %cst_210 : f32 to vector<16x64xf32>
    %c0_211 = arith.constant 0 : index
    %c0_212 = arith.constant 0 : index
    %c0_213 = arith.constant 0 : index
    %c0_214 = arith.constant 0 : index
    %200 = vector.load %arg16[%c0_211, %c0_212, %c0_213, %c0_214] : memref<1x8x8x32xbf16, #tpu.memory_space<vmem>>, vector<1x4x4x32xbf16>
    %201 = vector.shape_cast %200 : vector<1x4x4x32xbf16> to vector<16x32xbf16>
    %c0_215 = arith.constant 0 : index
    %c0_216 = arith.constant 0 : index
    %c0_217 = arith.constant 0 : index
    %202 = vector.load %arg6[%c0_215, %c0_216, %c0_217] : memref<25x32x64xbf16, #tpu.memory_space<vmem>>, vector<1x32x64xbf16>
    %203 = vector.shape_cast %202 : vector<1x32x64xbf16> to vector<32x64xbf16>
    %cst_218 = arith.constant dense<0.000000e+00> : vector<16x64xf32>
    %204 = tpu.matmul %201, %203, %cst_218 {dimension_numbers = #tpu.dot_dimension_numbers<[1], [0], [0], [1], [0, 0, 1, 1], [], []>} : vector<16x32xbf16>, vector<32x64xbf16>, vector<16x64xf32> -> vector<16x64xf32>
    %205 = arith.addf %199, %204 : vector<16x64xf32>
    %c0_219 = arith.constant 0 : index
    %c0_220 = arith.constant 0 : index
    %c1_221 = arith.constant 1 : index
    %c0_222 = arith.constant 0 : index
    %206 = vector.load %arg16[%c0_219, %c0_220, %c1_221, %c0_222] : memref<1x8x8x32xbf16, #tpu.memory_space<vmem>>, vector<1x4x4x32xbf16>
    %207 = vector.shape_cast %206 : vector<1x4x4x32xbf16> to vector<16x32xbf16>
    %c1_223 = arith.constant 1 : index
    %c0_224 = arith.constant 0 : index
    %c0_225 = arith.constant 0 : index
    %208 = vector.load %arg6[%c1_223, %c0_224, %c0_225] : memref<25x32x64xbf16, #tpu.memory_space<vmem>>, vector<1x32x64xbf16>
    %209 = vector.shape_cast %208 : vector<1x32x64xbf16> to vector<32x64xbf16>
    %cst_226 = arith.constant dense<0.000000e+00> : vector<16x64xf32>
    %210 = tpu.matmul %207, %209, %cst_226 {dimension_numbers = #tpu.dot_dimension_numbers<[1], [0], [0], [1], [0, 0, 1, 1], [], []>} : vector<16x32xbf16>, vector<32x64xbf16>, vector<16x64xf32> -> vector<16x64xf32>
    %211 = arith.addf %205, %210 : vector<16x64xf32>
    %c0_227 = arith.constant 0 : index
    %c0_228 = arith.constant 0 : index
    %c2_229 = arith.constant 2 : index
    %c0_230 = arith.constant 0 : index
    %212 = vector.load %arg16[%c0_227, %c0_228, %c2_229, %c0_230] : memref<1x8x8x32xbf16, #tpu.memory_space<vmem>>, vector<1x4x4x32xbf16>
    %213 = vector.shape_cast %212 : vector<1x4x4x32xbf16> to vector<16x32xbf16>
    %c2_231 = arith.constant 2 : index
    %c0_232 = arith.constant 0 : index
    %c0_233 = arith.constant 0 : index
    %214 = vector.load %arg6[%c2_231, %c0_232, %c0_233] : memref<25x32x64xbf16, #tpu.memory_space<vmem>>, vector<1x32x64xbf16>
    %215 = vector.shape_cast %214 : vector<1x32x64xbf16> to vector<32x64xbf16>
    %cst_234 = arith.constant dense<0.000000e+00> : vector<16x64xf32>
    %216 = tpu.matmul %213, %215, %cst_234 {dimension_numbers = #tpu.dot_dimension_numbers<[1], [0], [0], [1], [0, 0, 1, 1], [], []>} : vector<16x32xbf16>, vector<32x64xbf16>, vector<16x64xf32> -> vector<16x64xf32>
    %217 = arith.addf %211, %216 : vector<16x64xf32>
    %c0_235 = arith.constant 0 : index
    %c0_236 = arith.constant 0 : index
    %c3_237 = arith.constant 3 : index
    %c0_238 = arith.constant 0 : index
    %218 = vector.load %arg16[%c0_235, %c0_236, %c3_237, %c0_238] : memref<1x8x8x32xbf16, #tpu.memory_space<vmem>>, vector<1x4x4x32xbf16>
    %219 = vector.shape_cast %218 : vector<1x4x4x32xbf16> to vector<16x32xbf16>
    %c3_239 = arith.constant 3 : index
    %c0_240 = arith.constant 0 : index
    %c0_241 = arith.constant 0 : index
    %220 = vector.load %arg6[%c3_239, %c0_240, %c0_241] : memref<25x32x64xbf16, #tpu.memory_space<vmem>>, vector<1x32x64xbf16>
    %221 = vector.shape_cast %220 : vector<1x32x64xbf16> to vector<32x64xbf16>
    %cst_242 = arith.constant dense<0.000000e+00> : vector<16x64xf32>
    %222 = tpu.matmul %219, %221, %cst_242 {dimension_numbers = #tpu.dot_dimension_numbers<[1], [0], [0], [1], [0, 0, 1, 1], [], []>} : vector<16x32xbf16>, vector<32x64xbf16>, vector<16x64xf32> -> vector<16x64xf32>
    %223 = arith.addf %217, %222 : vector<16x64xf32>
    %c0_243 = arith.constant 0 : index
    %c0_244 = arith.constant 0 : index
    %c4_245 = arith.constant 4 : index
    %c0_246 = arith.constant 0 : index
    %224 = vector.load %arg16[%c0_243, %c0_244, %c4_245, %c0_246] : memref<1x8x8x32xbf16, #tpu.memory_space<vmem>>, vector<1x4x4x32xbf16>
    %225 = vector.shape_cast %224 : vector<1x4x4x32xbf16> to vector<16x32xbf16>
    %c4_247 = arith.constant 4 : index
    %c0_248 = arith.constant 0 : index
    %c0_249 = arith.constant 0 : index
    %226 = vector.load %arg6[%c4_247, %c0_248, %c0_249] : memref<25x32x64xbf16, #tpu.memory_space<vmem>>, vector<1x32x64xbf16>
    %227 = vector.shape_cast %226 : vector<1x32x64xbf16> to vector<32x64xbf16>
    %cst_250 = arith.constant dense<0.000000e+00> : vector<16x64xf32>
    %228 = tpu.matmul %225, %227, %cst_250 {dimension_numbers = #tpu.dot_dimension_numbers<[1], [0], [0], [1], [0, 0, 1, 1], [], []>} : vector<16x32xbf16>, vector<32x64xbf16>, vector<16x64xf32> -> vector<16x64xf32>
    %229 = arith.addf %223, %228 : vector<16x64xf32>
    %c0_251 = arith.constant 0 : index
    %c1_252 = arith.constant 1 : index
    %c0_253 = arith.constant 0 : index
    %c0_254 = arith.constant 0 : index
    %230 = vector.load %arg16[%c0_251, %c1_252, %c0_253, %c0_254] : memref<1x8x8x32xbf16, #tpu.memory_space<vmem>>, vector<1x4x4x32xbf16>
    %231 = vector.shape_cast %230 : vector<1x4x4x32xbf16> to vector<16x32xbf16>
    %c5_255 = arith.constant 5 : index
    %c0_256 = arith.constant 0 : index
    %c0_257 = arith.constant 0 : index
    %232 = vector.load %arg6[%c5_255, %c0_256, %c0_257] : memref<25x32x64xbf16, #tpu.memory_space<vmem>>, vector<1x32x64xbf16>
    %233 = vector.shape_cast %232 : vector<1x32x64xbf16> to vector<32x64xbf16>
    %cst_258 = arith.constant dense<0.000000e+00> : vector<16x64xf32>
    %234 = tpu.matmul %231, %233, %cst_258 {dimension_numbers = #tpu.dot_dimension_numbers<[1], [0], [0], [1], [0, 0, 1, 1], [], []>} : vector<16x32xbf16>, vector<32x64xbf16>, vector<16x64xf32> -> vector<16x64xf32>
    %235 = arith.addf %229, %234 : vector<16x64xf32>
    %c0_259 = arith.constant 0 : index
    %c1_260 = arith.constant 1 : index
    %c1_261 = arith.constant 1 : index
    %c0_262 = arith.constant 0 : index
    %236 = vector.load %arg16[%c0_259, %c1_260, %c1_261, %c0_262] : memref<1x8x8x32xbf16, #tpu.memory_space<vmem>>, vector<1x4x4x32xbf16>
    %237 = vector.shape_cast %236 : vector<1x4x4x32xbf16> to vector<16x32xbf16>
    %c6_263 = arith.constant 6 : index
    %c0_264 = arith.constant 0 : index
    %c0_265 = arith.constant 0 : index
    %238 = vector.load %arg6[%c6_263, %c0_264, %c0_265] : memref<25x32x64xbf16, #tpu.memory_space<vmem>>, vector<1x32x64xbf16>
    %239 = vector.shape_cast %238 : vector<1x32x64xbf16> to vector<32x64xbf16>
    %cst_266 = arith.constant dense<0.000000e+00> : vector<16x64xf32>
    %240 = tpu.matmul %237, %239, %cst_266 {dimension_numbers = #tpu.dot_dimension_numbers<[1], [0], [0], [1], [0, 0, 1, 1], [], []>} : vector<16x32xbf16>, vector<32x64xbf16>, vector<16x64xf32> -> vector<16x64xf32>
    %241 = arith.addf %235, %240 : vector<16x64xf32>
    %c0_267 = arith.constant 0 : index
    %c1_268 = arith.constant 1 : index
    %c2_269 = arith.constant 2 : index
    %c0_270 = arith.constant 0 : index
    %242 = vector.load %arg16[%c0_267, %c1_268, %c2_269, %c0_270] : memref<1x8x8x32xbf16, #tpu.memory_space<vmem>>, vector<1x4x4x32xbf16>
    %243 = vector.shape_cast %242 : vector<1x4x4x32xbf16> to vector<16x32xbf16>
    %c7_271 = arith.constant 7 : index
    %c0_272 = arith.constant 0 : index
    %c0_273 = arith.constant 0 : index
    %244 = vector.load %arg6[%c7_271, %c0_272, %c0_273] : memref<25x32x64xbf16, #tpu.memory_space<vmem>>, vector<1x32x64xbf16>
    %245 = vector.shape_cast %244 : vector<1x32x64xbf16> to vector<32x64xbf16>
    %cst_274 = arith.constant dense<0.000000e+00> : vector<16x64xf32>
    %246 = tpu.matmul %243, %245, %cst_274 {dimension_numbers = #tpu.dot_dimension_numbers<[1], [0], [0], [1], [0, 0, 1, 1], [], []>} : vector<16x32xbf16>, vector<32x64xbf16>, vector<16x64xf32> -> vector<16x64xf32>
    %247 = arith.addf %241, %246 : vector<16x64xf32>
    %c0_275 = arith.constant 0 : index
    %c1_276 = arith.constant 1 : index
    %c3_277 = arith.constant 3 : index
    %c0_278 = arith.constant 0 : index
    %248 = vector.load %arg16[%c0_275, %c1_276, %c3_277, %c0_278] : memref<1x8x8x32xbf16, #tpu.memory_space<vmem>>, vector<1x4x4x32xbf16>
    %249 = vector.shape_cast %248 : vector<1x4x4x32xbf16> to vector<16x32xbf16>
    %c8_279 = arith.constant 8 : index
    %c0_280 = arith.constant 0 : index
    %c0_281 = arith.constant 0 : index
    %250 = vector.load %arg6[%c8_279, %c0_280, %c0_281] : memref<25x32x64xbf16, #tpu.memory_space<vmem>>, vector<1x32x64xbf16>
    %251 = vector.shape_cast %250 : vector<1x32x64xbf16> to vector<32x64xbf16>
    %cst_282 = arith.constant dense<0.000000e+00> : vector<16x64xf32>
    %252 = tpu.matmul %249, %251, %cst_282 {dimension_numbers = #tpu.dot_dimension_numbers<[1], [0], [0], [1], [0, 0, 1, 1], [], []>} : vector<16x32xbf16>, vector<32x64xbf16>, vector<16x64xf32> -> vector<16x64xf32>
    %253 = arith.addf %247, %252 : vector<16x64xf32>
    %c0_283 = arith.constant 0 : index
    %c1_284 = arith.constant 1 : index
    %c4_285 = arith.constant 4 : index
    %c0_286 = arith.constant 0 : index
    %254 = vector.load %arg16[%c0_283, %c1_284, %c4_285, %c0_286] : memref<1x8x8x32xbf16, #tpu.memory_space<vmem>>, vector<1x4x4x32xbf16>
    %255 = vector.shape_cast %254 : vector<1x4x4x32xbf16> to vector<16x32xbf16>
    %c9_287 = arith.constant 9 : index
    %c0_288 = arith.constant 0 : index
    %c0_289 = arith.constant 0 : index
    %256 = vector.load %arg6[%c9_287, %c0_288, %c0_289] : memref<25x32x64xbf16, #tpu.memory_space<vmem>>, vector<1x32x64xbf16>
    %257 = vector.shape_cast %256 : vector<1x32x64xbf16> to vector<32x64xbf16>
    %cst_290 = arith.constant dense<0.000000e+00> : vector<16x64xf32>
    %258 = tpu.matmul %255, %257, %cst_290 {dimension_numbers = #tpu.dot_dimension_numbers<[1], [0], [0], [1], [0, 0, 1, 1], [], []>} : vector<16x32xbf16>, vector<32x64xbf16>, vector<16x64xf32> -> vector<16x64xf32>
    %259 = arith.addf %253, %258 : vector<16x64xf32>
    %c0_291 = arith.constant 0 : index
    %c2_292 = arith.constant 2 : index
    %c0_293 = arith.constant 0 : index
    %c0_294 = arith.constant 0 : index
    %260 = vector.load %arg16[%c0_291, %c2_292, %c0_293, %c0_294] : memref<1x8x8x32xbf16, #tpu.memory_space<vmem>>, vector<1x4x4x32xbf16>
    %261 = vector.shape_cast %260 : vector<1x4x4x32xbf16> to vector<16x32xbf16>
    %c10_295 = arith.constant 10 : index
    %c0_296 = arith.constant 0 : index
    %c0_297 = arith.constant 0 : index
    %262 = vector.load %arg6[%c10_295, %c0_296, %c0_297] : memref<25x32x64xbf16, #tpu.memory_space<vmem>>, vector<1x32x64xbf16>
    %263 = vector.shape_cast %262 : vector<1x32x64xbf16> to vector<32x64xbf16>
    %cst_298 = arith.constant dense<0.000000e+00> : vector<16x64xf32>
    %264 = tpu.matmul %261, %263, %cst_298 {dimension_numbers = #tpu.dot_dimension_numbers<[1], [0], [0], [1], [0, 0, 1, 1], [], []>} : vector<16x32xbf16>, vector<32x64xbf16>, vector<16x64xf32> -> vector<16x64xf32>
    %265 = arith.addf %259, %264 : vector<16x64xf32>
    %c0_299 = arith.constant 0 : index
    %c2_300 = arith.constant 2 : index
    %c1_301 = arith.constant 1 : index
    %c0_302 = arith.constant 0 : index
    %266 = vector.load %arg16[%c0_299, %c2_300, %c1_301, %c0_302] : memref<1x8x8x32xbf16, #tpu.memory_space<vmem>>, vector<1x4x4x32xbf16>
    %267 = vector.shape_cast %266 : vector<1x4x4x32xbf16> to vector<16x32xbf16>
    %c11_303 = arith.constant 11 : index
    %c0_304 = arith.constant 0 : index
    %c0_305 = arith.constant 0 : index
    %268 = vector.load %arg6[%c11_303, %c0_304, %c0_305] : memref<25x32x64xbf16, #tpu.memory_space<vmem>>, vector<1x32x64xbf16>
    %269 = vector.shape_cast %268 : vector<1x32x64xbf16> to vector<32x64xbf16>
    %cst_306 = arith.constant dense<0.000000e+00> : vector<16x64xf32>
    %270 = tpu.matmul %267, %269, %cst_306 {dimension_numbers = #tpu.dot_dimension_numbers<[1], [0], [0], [1], [0, 0, 1, 1], [], []>} : vector<16x32xbf16>, vector<32x64xbf16>, vector<16x64xf32> -> vector<16x64xf32>
    %271 = arith.addf %265, %270 : vector<16x64xf32>
    %c0_307 = arith.constant 0 : index
    %c2_308 = arith.constant 2 : index
    %c2_309 = arith.constant 2 : index
    %c0_310 = arith.constant 0 : index
    %272 = vector.load %arg16[%c0_307, %c2_308, %c2_309, %c0_310] : memref<1x8x8x32xbf16, #tpu.memory_space<vmem>>, vector<1x4x4x32xbf16>
    %273 = vector.shape_cast %272 : vector<1x4x4x32xbf16> to vector<16x32xbf16>
    %c12_311 = arith.constant 12 : index
    %c0_312 = arith.constant 0 : index
    %c0_313 = arith.constant 0 : index
    %274 = vector.load %arg6[%c12_311, %c0_312, %c0_313] : memref<25x32x64xbf16, #tpu.memory_space<vmem>>, vector<1x32x64xbf16>
    %275 = vector.shape_cast %274 : vector<1x32x64xbf16> to vector<32x64xbf16>
    %cst_314 = arith.constant dense<0.000000e+00> : vector<16x64xf32>
    %276 = tpu.matmul %273, %275, %cst_314 {dimension_numbers = #tpu.dot_dimension_numbers<[1], [0], [0], [1], [0, 0, 1, 1], [], []>} : vector<16x32xbf16>, vector<32x64xbf16>, vector<16x64xf32> -> vector<16x64xf32>
    %277 = arith.addf %271, %276 : vector<16x64xf32>
    %c0_315 = arith.constant 0 : index
    %c2_316 = arith.constant 2 : index
    %c3_317 = arith.constant 3 : index
    %c0_318 = arith.constant 0 : index
    %278 = vector.load %arg16[%c0_315, %c2_316, %c3_317, %c0_318] : memref<1x8x8x32xbf16, #tpu.memory_space<vmem>>, vector<1x4x4x32xbf16>
    %279 = vector.shape_cast %278 : vector<1x4x4x32xbf16> to vector<16x32xbf16>
    %c13_319 = arith.constant 13 : index
    %c0_320 = arith.constant 0 : index
    %c0_321 = arith.constant 0 : index
    %280 = vector.load %arg6[%c13_319, %c0_320, %c0_321] : memref<25x32x64xbf16, #tpu.memory_space<vmem>>, vector<1x32x64xbf16>
    %281 = vector.shape_cast %280 : vector<1x32x64xbf16> to vector<32x64xbf16>
    %cst_322 = arith.constant dense<0.000000e+00> : vector<16x64xf32>
    %282 = tpu.matmul %279, %281, %cst_322 {dimension_numbers = #tpu.dot_dimension_numbers<[1], [0], [0], [1], [0, 0, 1, 1], [], []>} : vector<16x32xbf16>, vector<32x64xbf16>, vector<16x64xf32> -> vector<16x64xf32>
    %283 = arith.addf %277, %282 : vector<16x64xf32>
    %c0_323 = arith.constant 0 : index
    %c2_324 = arith.constant 2 : index
    %c4_325 = arith.constant 4 : index
    %c0_326 = arith.constant 0 : index
    %284 = vector.load %arg16[%c0_323, %c2_324, %c4_325, %c0_326] : memref<1x8x8x32xbf16, #tpu.memory_space<vmem>>, vector<1x4x4x32xbf16>
    %285 = vector.shape_cast %284 : vector<1x4x4x32xbf16> to vector<16x32xbf16>
    %c14_327 = arith.constant 14 : index
    %c0_328 = arith.constant 0 : index
    %c0_329 = arith.constant 0 : index
    %286 = vector.load %arg6[%c14_327, %c0_328, %c0_329] : memref<25x32x64xbf16, #tpu.memory_space<vmem>>, vector<1x32x64xbf16>
    %287 = vector.shape_cast %286 : vector<1x32x64xbf16> to vector<32x64xbf16>
    %cst_330 = arith.constant dense<0.000000e+00> : vector<16x64xf32>
    %288 = tpu.matmul %285, %287, %cst_330 {dimension_numbers = #tpu.dot_dimension_numbers<[1], [0], [0], [1], [0, 0, 1, 1], [], []>} : vector<16x32xbf16>, vector<32x64xbf16>, vector<16x64xf32> -> vector<16x64xf32>
    %289 = arith.addf %283, %288 : vector<16x64xf32>
    %c0_331 = arith.constant 0 : index
    %c3_332 = arith.constant 3 : index
    %c0_333 = arith.constant 0 : index
    %c0_334 = arith.constant 0 : index
    %290 = vector.load %arg16[%c0_331, %c3_332, %c0_333, %c0_334] : memref<1x8x8x32xbf16, #tpu.memory_space<vmem>>, vector<1x4x4x32xbf16>
    %291 = vector.shape_cast %290 : vector<1x4x4x32xbf16> to vector<16x32xbf16>
    %c15_335 = arith.constant 15 : index
    %c0_336 = arith.constant 0 : index
    %c0_337 = arith.constant 0 : index
    %292 = vector.load %arg6[%c15_335, %c0_336, %c0_337] : memref<25x32x64xbf16, #tpu.memory_space<vmem>>, vector<1x32x64xbf16>
    %293 = vector.shape_cast %292 : vector<1x32x64xbf16> to vector<32x64xbf16>
    %cst_338 = arith.constant dense<0.000000e+00> : vector<16x64xf32>
    %294 = tpu.matmul %291, %293, %cst_338 {dimension_numbers = #tpu.dot_dimension_numbers<[1], [0], [0], [1], [0, 0, 1, 1], [], []>} : vector<16x32xbf16>, vector<32x64xbf16>, vector<16x64xf32> -> vector<16x64xf32>
    %295 = arith.addf %289, %294 : vector<16x64xf32>
    %c0_339 = arith.constant 0 : index
    %c3_340 = arith.constant 3 : index
    %c1_341 = arith.constant 1 : index
    %c0_342 = arith.constant 0 : index
    %296 = vector.load %arg16[%c0_339, %c3_340, %c1_341, %c0_342] : memref<1x8x8x32xbf16, #tpu.memory_space<vmem>>, vector<1x4x4x32xbf16>
    %297 = vector.shape_cast %296 : vector<1x4x4x32xbf16> to vector<16x32xbf16>
    %c16_343 = arith.constant 16 : index
    %c0_344 = arith.constant 0 : index
    %c0_345 = arith.constant 0 : index
    %298 = vector.load %arg6[%c16_343, %c0_344, %c0_345] : memref<25x32x64xbf16, #tpu.memory_space<vmem>>, vector<1x32x64xbf16>
    %299 = vector.shape_cast %298 : vector<1x32x64xbf16> to vector<32x64xbf16>
    %cst_346 = arith.constant dense<0.000000e+00> : vector<16x64xf32>
    %300 = tpu.matmul %297, %299, %cst_346 {dimension_numbers = #tpu.dot_dimension_numbers<[1], [0], [0], [1], [0, 0, 1, 1], [], []>} : vector<16x32xbf16>, vector<32x64xbf16>, vector<16x64xf32> -> vector<16x64xf32>
    %301 = arith.addf %295, %300 : vector<16x64xf32>
    %c0_347 = arith.constant 0 : index
    %c3_348 = arith.constant 3 : index
    %c2_349 = arith.constant 2 : index
    %c0_350 = arith.constant 0 : index
    %302 = vector.load %arg16[%c0_347, %c3_348, %c2_349, %c0_350] : memref<1x8x8x32xbf16, #tpu.memory_space<vmem>>, vector<1x4x4x32xbf16>
    %303 = vector.shape_cast %302 : vector<1x4x4x32xbf16> to vector<16x32xbf16>
    %c17_351 = arith.constant 17 : index
    %c0_352 = arith.constant 0 : index
    %c0_353 = arith.constant 0 : index
    %304 = vector.load %arg6[%c17_351, %c0_352, %c0_353] : memref<25x32x64xbf16, #tpu.memory_space<vmem>>, vector<1x32x64xbf16>
    %305 = vector.shape_cast %304 : vector<1x32x64xbf16> to vector<32x64xbf16>
    %cst_354 = arith.constant dense<0.000000e+00> : vector<16x64xf32>
    %306 = tpu.matmul %303, %305, %cst_354 {dimension_numbers = #tpu.dot_dimension_numbers<[1], [0], [0], [1], [0, 0, 1, 1], [], []>} : vector<16x32xbf16>, vector<32x64xbf16>, vector<16x64xf32> -> vector<16x64xf32>
    %307 = arith.addf %301, %306 : vector<16x64xf32>
    %c0_355 = arith.constant 0 : index
    %c3_356 = arith.constant 3 : index
    %c3_357 = arith.constant 3 : index
    %c0_358 = arith.constant 0 : index
    %308 = vector.load %arg16[%c0_355, %c3_356, %c3_357, %c0_358] : memref<1x8x8x32xbf16, #tpu.memory_space<vmem>>, vector<1x4x4x32xbf16>
    %309 = vector.shape_cast %308 : vector<1x4x4x32xbf16> to vector<16x32xbf16>
    %c18_359 = arith.constant 18 : index
    %c0_360 = arith.constant 0 : index
    %c0_361 = arith.constant 0 : index
    %310 = vector.load %arg6[%c18_359, %c0_360, %c0_361] : memref<25x32x64xbf16, #tpu.memory_space<vmem>>, vector<1x32x64xbf16>
    %311 = vector.shape_cast %310 : vector<1x32x64xbf16> to vector<32x64xbf16>
    %cst_362 = arith.constant dense<0.000000e+00> : vector<16x64xf32>
    %312 = tpu.matmul %309, %311, %cst_362 {dimension_numbers = #tpu.dot_dimension_numbers<[1], [0], [0], [1], [0, 0, 1, 1], [], []>} : vector<16x32xbf16>, vector<32x64xbf16>, vector<16x64xf32> -> vector<16x64xf32>
    %313 = arith.addf %307, %312 : vector<16x64xf32>
    %c0_363 = arith.constant 0 : index
    %c3_364 = arith.constant 3 : index
    %c4_365 = arith.constant 4 : index
    %c0_366 = arith.constant 0 : index
    %314 = vector.load %arg16[%c0_363, %c3_364, %c4_365, %c0_366] : memref<1x8x8x32xbf16, #tpu.memory_space<vmem>>, vector<1x4x4x32xbf16>
    %315 = vector.shape_cast %314 : vector<1x4x4x32xbf16> to vector<16x32xbf16>
    %c19_367 = arith.constant 19 : index
    %c0_368 = arith.constant 0 : index
    %c0_369 = arith.constant 0 : index
    %316 = vector.load %arg6[%c19_367, %c0_368, %c0_369] : memref<25x32x64xbf16, #tpu.memory_space<vmem>>, vector<1x32x64xbf16>
    %317 = vector.shape_cast %316 : vector<1x32x64xbf16> to vector<32x64xbf16>
    %cst_370 = arith.constant dense<0.000000e+00> : vector<16x64xf32>
    %318 = tpu.matmul %315, %317, %cst_370 {dimension_numbers = #tpu.dot_dimension_numbers<[1], [0], [0], [1], [0, 0, 1, 1], [], []>} : vector<16x32xbf16>, vector<32x64xbf16>, vector<16x64xf32> -> vector<16x64xf32>
    %319 = arith.addf %313, %318 : vector<16x64xf32>
    %c0_371 = arith.constant 0 : index
    %c4_372 = arith.constant 4 : index
    %c0_373 = arith.constant 0 : index
    %c0_374 = arith.constant 0 : index
    %320 = vector.load %arg16[%c0_371, %c4_372, %c0_373, %c0_374] : memref<1x8x8x32xbf16, #tpu.memory_space<vmem>>, vector<1x4x4x32xbf16>
    %321 = vector.shape_cast %320 : vector<1x4x4x32xbf16> to vector<16x32xbf16>
    %c20_375 = arith.constant 20 : index
    %c0_376 = arith.constant 0 : index
    %c0_377 = arith.constant 0 : index
    %322 = vector.load %arg6[%c20_375, %c0_376, %c0_377] : memref<25x32x64xbf16, #tpu.memory_space<vmem>>, vector<1x32x64xbf16>
    %323 = vector.shape_cast %322 : vector<1x32x64xbf16> to vector<32x64xbf16>
    %cst_378 = arith.constant dense<0.000000e+00> : vector<16x64xf32>
    %324 = tpu.matmul %321, %323, %cst_378 {dimension_numbers = #tpu.dot_dimension_numbers<[1], [0], [0], [1], [0, 0, 1, 1], [], []>} : vector<16x32xbf16>, vector<32x64xbf16>, vector<16x64xf32> -> vector<16x64xf32>
    %325 = arith.addf %319, %324 : vector<16x64xf32>
    %c0_379 = arith.constant 0 : index
    %c4_380 = arith.constant 4 : index
    %c1_381 = arith.constant 1 : index
    %c0_382 = arith.constant 0 : index
    %326 = vector.load %arg16[%c0_379, %c4_380, %c1_381, %c0_382] : memref<1x8x8x32xbf16, #tpu.memory_space<vmem>>, vector<1x4x4x32xbf16>
    %327 = vector.shape_cast %326 : vector<1x4x4x32xbf16> to vector<16x32xbf16>
    %c21_383 = arith.constant 21 : index
    %c0_384 = arith.constant 0 : index
    %c0_385 = arith.constant 0 : index
    %328 = vector.load %arg6[%c21_383, %c0_384, %c0_385] : memref<25x32x64xbf16, #tpu.memory_space<vmem>>, vector<1x32x64xbf16>
    %329 = vector.shape_cast %328 : vector<1x32x64xbf16> to vector<32x64xbf16>
    %cst_386 = arith.constant dense<0.000000e+00> : vector<16x64xf32>
    %330 = tpu.matmul %327, %329, %cst_386 {dimension_numbers = #tpu.dot_dimension_numbers<[1], [0], [0], [1], [0, 0, 1, 1], [], []>} : vector<16x32xbf16>, vector<32x64xbf16>, vector<16x64xf32> -> vector<16x64xf32>
    %331 = arith.addf %325, %330 : vector<16x64xf32>
    %c0_387 = arith.constant 0 : index
    %c4_388 = arith.constant 4 : index
    %c2_389 = arith.constant 2 : index
    %c0_390 = arith.constant 0 : index
    %332 = vector.load %arg16[%c0_387, %c4_388, %c2_389, %c0_390] : memref<1x8x8x32xbf16, #tpu.memory_space<vmem>>, vector<1x4x4x32xbf16>
    %333 = vector.shape_cast %332 : vector<1x4x4x32xbf16> to vector<16x32xbf16>
    %c22_391 = arith.constant 22 : index
    %c0_392 = arith.constant 0 : index
    %c0_393 = arith.constant 0 : index
    %334 = vector.load %arg6[%c22_391, %c0_392, %c0_393] : memref<25x32x64xbf16, #tpu.memory_space<vmem>>, vector<1x32x64xbf16>
    %335 = vector.shape_cast %334 : vector<1x32x64xbf16> to vector<32x64xbf16>
    %cst_394 = arith.constant dense<0.000000e+00> : vector<16x64xf32>
    %336 = tpu.matmul %333, %335, %cst_394 {dimension_numbers = #tpu.dot_dimension_numbers<[1], [0], [0], [1], [0, 0, 1, 1], [], []>} : vector<16x32xbf16>, vector<32x64xbf16>, vector<16x64xf32> -> vector<16x64xf32>
    %337 = arith.addf %331, %336 : vector<16x64xf32>
    %c0_395 = arith.constant 0 : index
    %c4_396 = arith.constant 4 : index
    %c3_397 = arith.constant 3 : index
    %c0_398 = arith.constant 0 : index
    %338 = vector.load %arg16[%c0_395, %c4_396, %c3_397, %c0_398] : memref<1x8x8x32xbf16, #tpu.memory_space<vmem>>, vector<1x4x4x32xbf16>
    %339 = vector.shape_cast %338 : vector<1x4x4x32xbf16> to vector<16x32xbf16>
    %c23_399 = arith.constant 23 : index
    %c0_400 = arith.constant 0 : index
    %c0_401 = arith.constant 0 : index
    %340 = vector.load %arg6[%c23_399, %c0_400, %c0_401] : memref<25x32x64xbf16, #tpu.memory_space<vmem>>, vector<1x32x64xbf16>
    %341 = vector.shape_cast %340 : vector<1x32x64xbf16> to vector<32x64xbf16>
    %cst_402 = arith.constant dense<0.000000e+00> : vector<16x64xf32>
    %342 = tpu.matmul %339, %341, %cst_402 {dimension_numbers = #tpu.dot_dimension_numbers<[1], [0], [0], [1], [0, 0, 1, 1], [], []>} : vector<16x32xbf16>, vector<32x64xbf16>, vector<16x64xf32> -> vector<16x64xf32>
    %343 = arith.addf %337, %342 : vector<16x64xf32>
    %c0_403 = arith.constant 0 : index
    %c4_404 = arith.constant 4 : index
    %c4_405 = arith.constant 4 : index
    %c0_406 = arith.constant 0 : index
    %344 = vector.load %arg16[%c0_403, %c4_404, %c4_405, %c0_406] : memref<1x8x8x32xbf16, #tpu.memory_space<vmem>>, vector<1x4x4x32xbf16>
    %345 = vector.shape_cast %344 : vector<1x4x4x32xbf16> to vector<16x32xbf16>
    %c24_407 = arith.constant 24 : index
    %c0_408 = arith.constant 0 : index
    %c0_409 = arith.constant 0 : index
    %346 = vector.load %arg6[%c24_407, %c0_408, %c0_409] : memref<25x32x64xbf16, #tpu.memory_space<vmem>>, vector<1x32x64xbf16>
    %347 = vector.shape_cast %346 : vector<1x32x64xbf16> to vector<32x64xbf16>
    %cst_410 = arith.constant dense<0.000000e+00> : vector<16x64xf32>
    %348 = tpu.matmul %345, %347, %cst_410 {dimension_numbers = #tpu.dot_dimension_numbers<[1], [0], [0], [1], [0, 0, 1, 1], [], []>} : vector<16x32xbf16>, vector<32x64xbf16>, vector<16x64xf32> -> vector<16x64xf32>
    %349 = arith.addf %343, %348 : vector<16x64xf32>
    %c0_411 = arith.constant 0 : index
    %c0_412 = arith.constant 0 : index
    %350 = vector.load %arg7[%c0_411, %c0_412] : memref<1x64xf32, #tpu.memory_space<vmem>>, vector<1x64xf32>
    %351 = vector.broadcast %350 : vector<1x64xf32> to vector<16x64xf32>
    %352 = arith.addf %349, %351 : vector<16x64xf32>
    %cst_413 = arith.constant 0.000000e+00 : f32
    %353 = vector.broadcast %cst_413 : f32 to vector<16x64xf32>
    %354 = arith.maximumf %352, %353 : vector<16x64xf32>
    %355 = vector.shape_cast %354 : vector<16x64xf32> to vector<8x2x64xf32>
    %356 = vector.extract_strided_slice %355 {offsets = [0, 0, 0], sizes = [8, 1, 64], strides = [1, 1, 1]} : vector<8x2x64xf32> to vector<8x1x64xf32>
    %357 = vector.shape_cast %356 : vector<8x1x64xf32> to vector<8x64xf32>
    %358 = vector.extract_strided_slice %355 {offsets = [0, 1, 0], sizes = [8, 1, 64], strides = [1, 1, 1]} : vector<8x2x64xf32> to vector<8x1x64xf32>
    %359 = vector.shape_cast %358 : vector<8x1x64xf32> to vector<8x64xf32>
    %360 = arith.maximumf %357, %359 : vector<8x64xf32>
    %361 = vector.shape_cast %360 : vector<8x64xf32> to vector<1x2x2x2x64xf32>
    %362 = vector.extract_strided_slice %361 {offsets = [0, 0, 0, 0, 0], sizes = [1, 2, 1, 2, 64], strides = [1, 1, 1, 1, 1]} : vector<1x2x2x2x64xf32> to vector<1x2x1x2x64xf32>
    %363 = vector.shape_cast %362 : vector<1x2x1x2x64xf32> to vector<1x2x2x64xf32>
    %364 = vector.extract_strided_slice %361 {offsets = [0, 0, 1, 0, 0], sizes = [1, 2, 1, 2, 64], strides = [1, 1, 1, 1, 1]} : vector<1x2x2x2x64xf32> to vector<1x2x1x2x64xf32>
    %365 = vector.shape_cast %364 : vector<1x2x1x2x64xf32> to vector<1x2x2x64xf32>
    %366 = arith.maximumf %363, %365 : vector<1x2x2x64xf32>
    %367 = arith.truncf %366 : vector<1x2x2x64xf32> to vector<1x2x2x64xbf16>
    %c0_414 = arith.constant 0 : index
    %c2_415 = arith.constant 2 : index
    %c2_416 = arith.constant 2 : index
    %c0_417 = arith.constant 0 : index
    %368 = vector.load %arg17[%c0_414, %c2_415, %c2_416, %c0_417] : memref<1x6x6x64xbf16, #tpu.memory_space<vmem>>, vector<1x2x2x64xbf16>
    tpu.vector_store %arg17[%c0_414, %c2_415, %c2_416, %c0_417], %367 {strides = array<i32>} : memref<1x6x6x64xbf16, #tpu.memory_space<vmem>>, vector<1x2x2x64xbf16>,
    %cst_418 = arith.constant 0.000000e+00 : f32
    %369 = vector.broadcast %cst_418 : f32 to vector<4x64xf32>
    %c0_419 = arith.constant 0 : index
    %c0_420 = arith.constant 0 : index
    %c0_421 = arith.constant 0 : index
    %c0_422 = arith.constant 0 : index
    %370 = vector.load %arg17[%c0_419, %c0_420, %c0_421, %c0_422] : memref<1x6x6x64xbf16, #tpu.memory_space<vmem>>, vector<1x2x2x64xbf16>
    %371 = vector.shape_cast %370 : vector<1x2x2x64xbf16> to vector<4x64xbf16>
    %c0_423 = arith.constant 0 : index
    %c0_424 = arith.constant 0 : index
    %c0_425 = arith.constant 0 : index
    %372 = vector.load %arg8[%c0_423, %c0_424, %c0_425] : memref<25x64x64xbf16, #tpu.memory_space<vmem>>, vector<1x64x64xbf16>
    %373 = vector.shape_cast %372 : vector<1x64x64xbf16> to vector<64x64xbf16>
    %cst_426 = arith.constant dense<0.000000e+00> : vector<4x64xf32>
    %374 = tpu.matmul %371, %373, %cst_426 {dimension_numbers = #tpu.dot_dimension_numbers<[1], [0], [0], [1], [0, 0, 1, 1], [], []>} : vector<4x64xbf16>, vector<64x64xbf16>, vector<4x64xf32> -> vector<4x64xf32>
    %375 = arith.addf %369, %374 : vector<4x64xf32>
    %c0_427 = arith.constant 0 : index
    %c0_428 = arith.constant 0 : index
    %c1_429 = arith.constant 1 : index
    %c0_430 = arith.constant 0 : index
    %376 = vector.load %arg17[%c0_427, %c0_428, %c1_429, %c0_430] : memref<1x6x6x64xbf16, #tpu.memory_space<vmem>>, vector<1x2x2x64xbf16>
    %377 = vector.shape_cast %376 : vector<1x2x2x64xbf16> to vector<4x64xbf16>
    %c1_431 = arith.constant 1 : index
    %c0_432 = arith.constant 0 : index
    %c0_433 = arith.constant 0 : index
    %378 = vector.load %arg8[%c1_431, %c0_432, %c0_433] : memref<25x64x64xbf16, #tpu.memory_space<vmem>>, vector<1x64x64xbf16>
    %379 = vector.shape_cast %378 : vector<1x64x64xbf16> to vector<64x64xbf16>
    %cst_434 = arith.constant dense<0.000000e+00> : vector<4x64xf32>
    %380 = tpu.matmul %377, %379, %cst_434 {dimension_numbers = #tpu.dot_dimension_numbers<[1], [0], [0], [1], [0, 0, 1, 1], [], []>} : vector<4x64xbf16>, vector<64x64xbf16>, vector<4x64xf32> -> vector<4x64xf32>
    %381 = arith.addf %375, %380 : vector<4x64xf32>
    %c0_435 = arith.constant 0 : index
    %c0_436 = arith.constant 0 : index
    %c2_437 = arith.constant 2 : index
    %c0_438 = arith.constant 0 : index
    %382 = vector.load %arg17[%c0_435, %c0_436, %c2_437, %c0_438] : memref<1x6x6x64xbf16, #tpu.memory_space<vmem>>, vector<1x2x2x64xbf16>
    %383 = vector.shape_cast %382 : vector<1x2x2x64xbf16> to vector<4x64xbf16>
    %c2_439 = arith.constant 2 : index
    %c0_440 = arith.constant 0 : index
    %c0_441 = arith.constant 0 : index
    %384 = vector.load %arg8[%c2_439, %c0_440, %c0_441] : memref<25x64x64xbf16, #tpu.memory_space<vmem>>, vector<1x64x64xbf16>
    %385 = vector.shape_cast %384 : vector<1x64x64xbf16> to vector<64x64xbf16>
    %cst_442 = arith.constant dense<0.000000e+00> : vector<4x64xf32>
    %386 = tpu.matmul %383, %385, %cst_442 {dimension_numbers = #tpu.dot_dimension_numbers<[1], [0], [0], [1], [0, 0, 1, 1], [], []>} : vector<4x64xbf16>, vector<64x64xbf16>, vector<4x64xf32> -> vector<4x64xf32>
    %387 = arith.addf %381, %386 : vector<4x64xf32>
    %c0_443 = arith.constant 0 : index
    %c0_444 = arith.constant 0 : index
    %c3_445 = arith.constant 3 : index
    %c0_446 = arith.constant 0 : index
    %388 = vector.load %arg17[%c0_443, %c0_444, %c3_445, %c0_446] : memref<1x6x6x64xbf16, #tpu.memory_space<vmem>>, vector<1x2x2x64xbf16>
    %389 = vector.shape_cast %388 : vector<1x2x2x64xbf16> to vector<4x64xbf16>
    %c3_447 = arith.constant 3 : index
    %c0_448 = arith.constant 0 : index
    %c0_449 = arith.constant 0 : index
    %390 = vector.load %arg8[%c3_447, %c0_448, %c0_449] : memref<25x64x64xbf16, #tpu.memory_space<vmem>>, vector<1x64x64xbf16>
    %391 = vector.shape_cast %390 : vector<1x64x64xbf16> to vector<64x64xbf16>
    %cst_450 = arith.constant dense<0.000000e+00> : vector<4x64xf32>
    %392 = tpu.matmul %389, %391, %cst_450 {dimension_numbers = #tpu.dot_dimension_numbers<[1], [0], [0], [1], [0, 0, 1, 1], [], []>} : vector<4x64xbf16>, vector<64x64xbf16>, vector<4x64xf32> -> vector<4x64xf32>
    %393 = arith.addf %387, %392 : vector<4x64xf32>
    %c0_451 = arith.constant 0 : index
    %c0_452 = arith.constant 0 : index
    %c4_453 = arith.constant 4 : index
    %c0_454 = arith.constant 0 : index
    %394 = vector.load %arg17[%c0_451, %c0_452, %c4_453, %c0_454] : memref<1x6x6x64xbf16, #tpu.memory_space<vmem>>, vector<1x2x2x64xbf16>
    %395 = vector.shape_cast %394 : vector<1x2x2x64xbf16> to vector<4x64xbf16>
    %c4_455 = arith.constant 4 : index
    %c0_456 = arith.constant 0 : index
    %c0_457 = arith.constant 0 : index
    %396 = vector.load %arg8[%c4_455, %c0_456, %c0_457] : memref<25x64x64xbf16, #tpu.memory_space<vmem>>, vector<1x64x64xbf16>
    %397 = vector.shape_cast %396 : vector<1x64x64xbf16> to vector<64x64xbf16>
    %cst_458 = arith.constant dense<0.000000e+00> : vector<4x64xf32>
    %398 = tpu.matmul %395, %397, %cst_458 {dimension_numbers = #tpu.dot_dimension_numbers<[1], [0], [0], [1], [0, 0, 1, 1], [], []>} : vector<4x64xbf16>, vector<64x64xbf16>, vector<4x64xf32> -> vector<4x64xf32>
    %399 = arith.addf %393, %398 : vector<4x64xf32>
    %c0_459 = arith.constant 0 : index
    %c1_460 = arith.constant 1 : index
    %c0_461 = arith.constant 0 : index
    %c0_462 = arith.constant 0 : index
    %400 = vector.load %arg17[%c0_459, %c1_460, %c0_461, %c0_462] : memref<1x6x6x64xbf16, #tpu.memory_space<vmem>>, vector<1x2x2x64xbf16>
    %401 = vector.shape_cast %400 : vector<1x2x2x64xbf16> to vector<4x64xbf16>
    %c5_463 = arith.constant 5 : index
    %c0_464 = arith.constant 0 : index
    %c0_465 = arith.constant 0 : index
    %402 = vector.load %arg8[%c5_463, %c0_464, %c0_465] : memref<25x64x64xbf16, #tpu.memory_space<vmem>>, vector<1x64x64xbf16>
    %403 = vector.shape_cast %402 : vector<1x64x64xbf16> to vector<64x64xbf16>
    %cst_466 = arith.constant dense<0.000000e+00> : vector<4x64xf32>
    %404 = tpu.matmul %401, %403, %cst_466 {dimension_numbers = #tpu.dot_dimension_numbers<[1], [0], [0], [1], [0, 0, 1, 1], [], []>} : vector<4x64xbf16>, vector<64x64xbf16>, vector<4x64xf32> -> vector<4x64xf32>
    %405 = arith.addf %399, %404 : vector<4x64xf32>
    %c0_467 = arith.constant 0 : index
    %c1_468 = arith.constant 1 : index
    %c1_469 = arith.constant 1 : index
    %c0_470 = arith.constant 0 : index
    %406 = vector.load %arg17[%c0_467, %c1_468, %c1_469, %c0_470] : memref<1x6x6x64xbf16, #tpu.memory_space<vmem>>, vector<1x2x2x64xbf16>
    %407 = vector.shape_cast %406 : vector<1x2x2x64xbf16> to vector<4x64xbf16>
    %c6_471 = arith.constant 6 : index
    %c0_472 = arith.constant 0 : index
    %c0_473 = arith.constant 0 : index
    %408 = vector.load %arg8[%c6_471, %c0_472, %c0_473] : memref<25x64x64xbf16, #tpu.memory_space<vmem>>, vector<1x64x64xbf16>
    %409 = vector.shape_cast %408 : vector<1x64x64xbf16> to vector<64x64xbf16>
    %cst_474 = arith.constant dense<0.000000e+00> : vector<4x64xf32>
    %410 = tpu.matmul %407, %409, %cst_474 {dimension_numbers = #tpu.dot_dimension_numbers<[1], [0], [0], [1], [0, 0, 1, 1], [], []>} : vector<4x64xbf16>, vector<64x64xbf16>, vector<4x64xf32> -> vector<4x64xf32>
    %411 = arith.addf %405, %410 : vector<4x64xf32>
    %c0_475 = arith.constant 0 : index
    %c1_476 = arith.constant 1 : index
    %c2_477 = arith.constant 2 : index
    %c0_478 = arith.constant 0 : index
    %412 = vector.load %arg17[%c0_475, %c1_476, %c2_477, %c0_478] : memref<1x6x6x64xbf16, #tpu.memory_space<vmem>>, vector<1x2x2x64xbf16>
    %413 = vector.shape_cast %412 : vector<1x2x2x64xbf16> to vector<4x64xbf16>
    %c7_479 = arith.constant 7 : index
    %c0_480 = arith.constant 0 : index
    %c0_481 = arith.constant 0 : index
    %414 = vector.load %arg8[%c7_479, %c0_480, %c0_481] : memref<25x64x64xbf16, #tpu.memory_space<vmem>>, vector<1x64x64xbf16>
    %415 = vector.shape_cast %414 : vector<1x64x64xbf16> to vector<64x64xbf16>
    %cst_482 = arith.constant dense<0.000000e+00> : vector<4x64xf32>
    %416 = tpu.matmul %413, %415, %cst_482 {dimension_numbers = #tpu.dot_dimension_numbers<[1], [0], [0], [1], [0, 0, 1, 1], [], []>} : vector<4x64xbf16>, vector<64x64xbf16>, vector<4x64xf32> -> vector<4x64xf32>
    %417 = arith.addf %411, %416 : vector<4x64xf32>
    %c0_483 = arith.constant 0 : index
    %c1_484 = arith.constant 1 : index
    %c3_485 = arith.constant 3 : index
    %c0_486 = arith.constant 0 : index
    %418 = vector.load %arg17[%c0_483, %c1_484, %c3_485, %c0_486] : memref<1x6x6x64xbf16, #tpu.memory_space<vmem>>, vector<1x2x2x64xbf16>
    %419 = vector.shape_cast %418 : vector<1x2x2x64xbf16> to vector<4x64xbf16>
    %c8_487 = arith.constant 8 : index
    %c0_488 = arith.constant 0 : index
    %c0_489 = arith.constant 0 : index
    %420 = vector.load %arg8[%c8_487, %c0_488, %c0_489] : memref<25x64x64xbf16, #tpu.memory_space<vmem>>, vector<1x64x64xbf16>
    %421 = vector.shape_cast %420 : vector<1x64x64xbf16> to vector<64x64xbf16>
    %cst_490 = arith.constant dense<0.000000e+00> : vector<4x64xf32>
    %422 = tpu.matmul %419, %421, %cst_490 {dimension_numbers = #tpu.dot_dimension_numbers<[1], [0], [0], [1], [0, 0, 1, 1], [], []>} : vector<4x64xbf16>, vector<64x64xbf16>, vector<4x64xf32> -> vector<4x64xf32>
    %423 = arith.addf %417, %422 : vector<4x64xf32>
    %c0_491 = arith.constant 0 : index
    %c1_492 = arith.constant 1 : index
    %c4_493 = arith.constant 4 : index
    %c0_494 = arith.constant 0 : index
    %424 = vector.load %arg17[%c0_491, %c1_492, %c4_493, %c0_494] : memref<1x6x6x64xbf16, #tpu.memory_space<vmem>>, vector<1x2x2x64xbf16>
    %425 = vector.shape_cast %424 : vector<1x2x2x64xbf16> to vector<4x64xbf16>
    %c9_495 = arith.constant 9 : index
    %c0_496 = arith.constant 0 : index
    %c0_497 = arith.constant 0 : index
    %426 = vector.load %arg8[%c9_495, %c0_496, %c0_497] : memref<25x64x64xbf16, #tpu.memory_space<vmem>>, vector<1x64x64xbf16>
    %427 = vector.shape_cast %426 : vector<1x64x64xbf16> to vector<64x64xbf16>
    %cst_498 = arith.constant dense<0.000000e+00> : vector<4x64xf32>
    %428 = tpu.matmul %425, %427, %cst_498 {dimension_numbers = #tpu.dot_dimension_numbers<[1], [0], [0], [1], [0, 0, 1, 1], [], []>} : vector<4x64xbf16>, vector<64x64xbf16>, vector<4x64xf32> -> vector<4x64xf32>
    %429 = arith.addf %423, %428 : vector<4x64xf32>
    %c0_499 = arith.constant 0 : index
    %c2_500 = arith.constant 2 : index
    %c0_501 = arith.constant 0 : index
    %c0_502 = arith.constant 0 : index
    %430 = vector.load %arg17[%c0_499, %c2_500, %c0_501, %c0_502] : memref<1x6x6x64xbf16, #tpu.memory_space<vmem>>, vector<1x2x2x64xbf16>
    %431 = vector.shape_cast %430 : vector<1x2x2x64xbf16> to vector<4x64xbf16>
    %c10_503 = arith.constant 10 : index
    %c0_504 = arith.constant 0 : index
    %c0_505 = arith.constant 0 : index
    %432 = vector.load %arg8[%c10_503, %c0_504, %c0_505] : memref<25x64x64xbf16, #tpu.memory_space<vmem>>, vector<1x64x64xbf16>
    %433 = vector.shape_cast %432 : vector<1x64x64xbf16> to vector<64x64xbf16>
    %cst_506 = arith.constant dense<0.000000e+00> : vector<4x64xf32>
    %434 = tpu.matmul %431, %433, %cst_506 {dimension_numbers = #tpu.dot_dimension_numbers<[1], [0], [0], [1], [0, 0, 1, 1], [], []>} : vector<4x64xbf16>, vector<64x64xbf16>, vector<4x64xf32> -> vector<4x64xf32>
    %435 = arith.addf %429, %434 : vector<4x64xf32>
    %c0_507 = arith.constant 0 : index
    %c2_508 = arith.constant 2 : index
    %c1_509 = arith.constant 1 : index
    %c0_510 = arith.constant 0 : index
    %436 = vector.load %arg17[%c0_507, %c2_508, %c1_509, %c0_510] : memref<1x6x6x64xbf16, #tpu.memory_space<vmem>>, vector<1x2x2x64xbf16>
    %437 = vector.shape_cast %436 : vector<1x2x2x64xbf16> to vector<4x64xbf16>
    %c11_511 = arith.constant 11 : index
    %c0_512 = arith.constant 0 : index
    %c0_513 = arith.constant 0 : index
    %438 = vector.load %arg8[%c11_511, %c0_512, %c0_513] : memref<25x64x64xbf16, #tpu.memory_space<vmem>>, vector<1x64x64xbf16>
    %439 = vector.shape_cast %438 : vector<1x64x64xbf16> to vector<64x64xbf16>
    %cst_514 = arith.constant dense<0.000000e+00> : vector<4x64xf32>
    %440 = tpu.matmul %437, %439, %cst_514 {dimension_numbers = #tpu.dot_dimension_numbers<[1], [0], [0], [1], [0, 0, 1, 1], [], []>} : vector<4x64xbf16>, vector<64x64xbf16>, vector<4x64xf32> -> vector<4x64xf32>
    %441 = arith.addf %435, %440 : vector<4x64xf32>
    %c0_515 = arith.constant 0 : index
    %c2_516 = arith.constant 2 : index
    %c2_517 = arith.constant 2 : index
    %c0_518 = arith.constant 0 : index
    %442 = vector.load %arg17[%c0_515, %c2_516, %c2_517, %c0_518] : memref<1x6x6x64xbf16, #tpu.memory_space<vmem>>, vector<1x2x2x64xbf16>
    %443 = vector.shape_cast %442 : vector<1x2x2x64xbf16> to vector<4x64xbf16>
    %c12_519 = arith.constant 12 : index
    %c0_520 = arith.constant 0 : index
    %c0_521 = arith.constant 0 : index
    %444 = vector.load %arg8[%c12_519, %c0_520, %c0_521] : memref<25x64x64xbf16, #tpu.memory_space<vmem>>, vector<1x64x64xbf16>
    %445 = vector.shape_cast %444 : vector<1x64x64xbf16> to vector<64x64xbf16>
    %cst_522 = arith.constant dense<0.000000e+00> : vector<4x64xf32>
    %446 = tpu.matmul %443, %445, %cst_522 {dimension_numbers = #tpu.dot_dimension_numbers<[1], [0], [0], [1], [0, 0, 1, 1], [], []>} : vector<4x64xbf16>, vector<64x64xbf16>, vector<4x64xf32> -> vector<4x64xf32>
    %447 = arith.addf %441, %446 : vector<4x64xf32>
    %c0_523 = arith.constant 0 : index
    %c2_524 = arith.constant 2 : index
    %c3_525 = arith.constant 3 : index
    %c0_526 = arith.constant 0 : index
    %448 = vector.load %arg17[%c0_523, %c2_524, %c3_525, %c0_526] : memref<1x6x6x64xbf16, #tpu.memory_space<vmem>>, vector<1x2x2x64xbf16>
    %449 = vector.shape_cast %448 : vector<1x2x2x64xbf16> to vector<4x64xbf16>
    %c13_527 = arith.constant 13 : index
    %c0_528 = arith.constant 0 : index
    %c0_529 = arith.constant 0 : index
    %450 = vector.load %arg8[%c13_527, %c0_528, %c0_529] : memref<25x64x64xbf16, #tpu.memory_space<vmem>>, vector<1x64x64xbf16>
    %451 = vector.shape_cast %450 : vector<1x64x64xbf16> to vector<64x64xbf16>
    %cst_530 = arith.constant dense<0.000000e+00> : vector<4x64xf32>
    %452 = tpu.matmul %449, %451, %cst_530 {dimension_numbers = #tpu.dot_dimension_numbers<[1], [0], [0], [1], [0, 0, 1, 1], [], []>} : vector<4x64xbf16>, vector<64x64xbf16>, vector<4x64xf32> -> vector<4x64xf32>
    %453 = arith.addf %447, %452 : vector<4x64xf32>
    %c0_531 = arith.constant 0 : index
    %c2_532 = arith.constant 2 : index
    %c4_533 = arith.constant 4 : index
    %c0_534 = arith.constant 0 : index
    %454 = vector.load %arg17[%c0_531, %c2_532, %c4_533, %c0_534] : memref<1x6x6x64xbf16, #tpu.memory_space<vmem>>, vector<1x2x2x64xbf16>
    %455 = vector.shape_cast %454 : vector<1x2x2x64xbf16> to vector<4x64xbf16>
    %c14_535 = arith.constant 14 : index
    %c0_536 = arith.constant 0 : index
    %c0_537 = arith.constant 0 : index
    %456 = vector.load %arg8[%c14_535, %c0_536, %c0_537] : memref<25x64x64xbf16, #tpu.memory_space<vmem>>, vector<1x64x64xbf16>
    %457 = vector.shape_cast %456 : vector<1x64x64xbf16> to vector<64x64xbf16>
    %cst_538 = arith.constant dense<0.000000e+00> : vector<4x64xf32>
    %458 = tpu.matmul %455, %457, %cst_538 {dimension_numbers = #tpu.dot_dimension_numbers<[1], [0], [0], [1], [0, 0, 1, 1], [], []>} : vector<4x64xbf16>, vector<64x64xbf16>, vector<4x64xf32> -> vector<4x64xf32>
    %459 = arith.addf %453, %458 : vector<4x64xf32>
    %c0_539 = arith.constant 0 : index
    %c3_540 = arith.constant 3 : index
    %c0_541 = arith.constant 0 : index
    %c0_542 = arith.constant 0 : index
    %460 = vector.load %arg17[%c0_539, %c3_540, %c0_541, %c0_542] : memref<1x6x6x64xbf16, #tpu.memory_space<vmem>>, vector<1x2x2x64xbf16>
    %461 = vector.shape_cast %460 : vector<1x2x2x64xbf16> to vector<4x64xbf16>
    %c15_543 = arith.constant 15 : index
    %c0_544 = arith.constant 0 : index
    %c0_545 = arith.constant 0 : index
    %462 = vector.load %arg8[%c15_543, %c0_544, %c0_545] : memref<25x64x64xbf16, #tpu.memory_space<vmem>>, vector<1x64x64xbf16>
    %463 = vector.shape_cast %462 : vector<1x64x64xbf16> to vector<64x64xbf16>
    %cst_546 = arith.constant dense<0.000000e+00> : vector<4x64xf32>
    %464 = tpu.matmul %461, %463, %cst_546 {dimension_numbers = #tpu.dot_dimension_numbers<[1], [0], [0], [1], [0, 0, 1, 1], [], []>} : vector<4x64xbf16>, vector<64x64xbf16>, vector<4x64xf32> -> vector<4x64xf32>
    %465 = arith.addf %459, %464 : vector<4x64xf32>
    %c0_547 = arith.constant 0 : index
    %c3_548 = arith.constant 3 : index
    %c1_549 = arith.constant 1 : index
    %c0_550 = arith.constant 0 : index
    %466 = vector.load %arg17[%c0_547, %c3_548, %c1_549, %c0_550] : memref<1x6x6x64xbf16, #tpu.memory_space<vmem>>, vector<1x2x2x64xbf16>
    %467 = vector.shape_cast %466 : vector<1x2x2x64xbf16> to vector<4x64xbf16>
    %c16_551 = arith.constant 16 : index
    %c0_552 = arith.constant 0 : index
    %c0_553 = arith.constant 0 : index
    %468 = vector.load %arg8[%c16_551, %c0_552, %c0_553] : memref<25x64x64xbf16, #tpu.memory_space<vmem>>, vector<1x64x64xbf16>
    %469 = vector.shape_cast %468 : vector<1x64x64xbf16> to vector<64x64xbf16>
    %cst_554 = arith.constant dense<0.000000e+00> : vector<4x64xf32>
    %470 = tpu.matmul %467, %469, %cst_554 {dimension_numbers = #tpu.dot_dimension_numbers<[1], [0], [0], [1], [0, 0, 1, 1], [], []>} : vector<4x64xbf16>, vector<64x64xbf16>, vector<4x64xf32> -> vector<4x64xf32>
    %471 = arith.addf %465, %470 : vector<4x64xf32>
    %c0_555 = arith.constant 0 : index
    %c3_556 = arith.constant 3 : index
    %c2_557 = arith.constant 2 : index
    %c0_558 = arith.constant 0 : index
    %472 = vector.load %arg17[%c0_555, %c3_556, %c2_557, %c0_558] : memref<1x6x6x64xbf16, #tpu.memory_space<vmem>>, vector<1x2x2x64xbf16>
    %473 = vector.shape_cast %472 : vector<1x2x2x64xbf16> to vector<4x64xbf16>
    %c17_559 = arith.constant 17 : index
    %c0_560 = arith.constant 0 : index
    %c0_561 = arith.constant 0 : index
    %474 = vector.load %arg8[%c17_559, %c0_560, %c0_561] : memref<25x64x64xbf16, #tpu.memory_space<vmem>>, vector<1x64x64xbf16>
    %475 = vector.shape_cast %474 : vector<1x64x64xbf16> to vector<64x64xbf16>
    %cst_562 = arith.constant dense<0.000000e+00> : vector<4x64xf32>
    %476 = tpu.matmul %473, %475, %cst_562 {dimension_numbers = #tpu.dot_dimension_numbers<[1], [0], [0], [1], [0, 0, 1, 1], [], []>} : vector<4x64xbf16>, vector<64x64xbf16>, vector<4x64xf32> -> vector<4x64xf32>
    %477 = arith.addf %471, %476 : vector<4x64xf32>
    %c0_563 = arith.constant 0 : index
    %c3_564 = arith.constant 3 : index
    %c3_565 = arith.constant 3 : index
    %c0_566 = arith.constant 0 : index
    %478 = vector.load %arg17[%c0_563, %c3_564, %c3_565, %c0_566] : memref<1x6x6x64xbf16, #tpu.memory_space<vmem>>, vector<1x2x2x64xbf16>
    %479 = vector.shape_cast %478 : vector<1x2x2x64xbf16> to vector<4x64xbf16>
    %c18_567 = arith.constant 18 : index
    %c0_568 = arith.constant 0 : index
    %c0_569 = arith.constant 0 : index
    %480 = vector.load %arg8[%c18_567, %c0_568, %c0_569] : memref<25x64x64xbf16, #tpu.memory_space<vmem>>, vector<1x64x64xbf16>
    %481 = vector.shape_cast %480 : vector<1x64x64xbf16> to vector<64x64xbf16>
    %cst_570 = arith.constant dense<0.000000e+00> : vector<4x64xf32>
    %482 = tpu.matmul %479, %481, %cst_570 {dimension_numbers = #tpu.dot_dimension_numbers<[1], [0], [0], [1], [0, 0, 1, 1], [], []>} : vector<4x64xbf16>, vector<64x64xbf16>, vector<4x64xf32> -> vector<4x64xf32>
    %483 = arith.addf %477, %482 : vector<4x64xf32>
    %c0_571 = arith.constant 0 : index
    %c3_572 = arith.constant 3 : index
    %c4_573 = arith.constant 4 : index
    %c0_574 = arith.constant 0 : index
    %484 = vector.load %arg17[%c0_571, %c3_572, %c4_573, %c0_574] : memref<1x6x6x64xbf16, #tpu.memory_space<vmem>>, vector<1x2x2x64xbf16>
    %485 = vector.shape_cast %484 : vector<1x2x2x64xbf16> to vector<4x64xbf16>
    %c19_575 = arith.constant 19 : index
    %c0_576 = arith.constant 0 : index
    %c0_577 = arith.constant 0 : index
    %486 = vector.load %arg8[%c19_575, %c0_576, %c0_577] : memref<25x64x64xbf16, #tpu.memory_space<vmem>>, vector<1x64x64xbf16>
    %487 = vector.shape_cast %486 : vector<1x64x64xbf16> to vector<64x64xbf16>
    %cst_578 = arith.constant dense<0.000000e+00> : vector<4x64xf32>
    %488 = tpu.matmul %485, %487, %cst_578 {dimension_numbers = #tpu.dot_dimension_numbers<[1], [0], [0], [1], [0, 0, 1, 1], [], []>} : vector<4x64xbf16>, vector<64x64xbf16>, vector<4x64xf32> -> vector<4x64xf32>
    %489 = arith.addf %483, %488 : vector<4x64xf32>
    %c0_579 = arith.constant 0 : index
    %c4_580 = arith.constant 4 : index
    %c0_581 = arith.constant 0 : index
    %c0_582 = arith.constant 0 : index
    %490 = vector.load %arg17[%c0_579, %c4_580, %c0_581, %c0_582] : memref<1x6x6x64xbf16, #tpu.memory_space<vmem>>, vector<1x2x2x64xbf16>
    %491 = vector.shape_cast %490 : vector<1x2x2x64xbf16> to vector<4x64xbf16>
    %c20_583 = arith.constant 20 : index
    %c0_584 = arith.constant 0 : index
    %c0_585 = arith.constant 0 : index
    %492 = vector.load %arg8[%c20_583, %c0_584, %c0_585] : memref<25x64x64xbf16, #tpu.memory_space<vmem>>, vector<1x64x64xbf16>
    %493 = vector.shape_cast %492 : vector<1x64x64xbf16> to vector<64x64xbf16>
    %cst_586 = arith.constant dense<0.000000e+00> : vector<4x64xf32>
    %494 = tpu.matmul %491, %493, %cst_586 {dimension_numbers = #tpu.dot_dimension_numbers<[1], [0], [0], [1], [0, 0, 1, 1], [], []>} : vector<4x64xbf16>, vector<64x64xbf16>, vector<4x64xf32> -> vector<4x64xf32>
    %495 = arith.addf %489, %494 : vector<4x64xf32>
    %c0_587 = arith.constant 0 : index
    %c4_588 = arith.constant 4 : index
    %c1_589 = arith.constant 1 : index
    %c0_590 = arith.constant 0 : index
    %496 = vector.load %arg17[%c0_587, %c4_588, %c1_589, %c0_590] : memref<1x6x6x64xbf16, #tpu.memory_space<vmem>>, vector<1x2x2x64xbf16>
    %497 = vector.shape_cast %496 : vector<1x2x2x64xbf16> to vector<4x64xbf16>
    %c21_591 = arith.constant 21 : index
    %c0_592 = arith.constant 0 : index
    %c0_593 = arith.constant 0 : index
    %498 = vector.load %arg8[%c21_591, %c0_592, %c0_593] : memref<25x64x64xbf16, #tpu.memory_space<vmem>>, vector<1x64x64xbf16>
    %499 = vector.shape_cast %498 : vector<1x64x64xbf16> to vector<64x64xbf16>
    %cst_594 = arith.constant dense<0.000000e+00> : vector<4x64xf32>
    %500 = tpu.matmul %497, %499, %cst_594 {dimension_numbers = #tpu.dot_dimension_numbers<[1], [0], [0], [1], [0, 0, 1, 1], [], []>} : vector<4x64xbf16>, vector<64x64xbf16>, vector<4x64xf32> -> vector<4x64xf32>
    %501 = arith.addf %495, %500 : vector<4x64xf32>
    %c0_595 = arith.constant 0 : index
    %c4_596 = arith.constant 4 : index
    %c2_597 = arith.constant 2 : index
    %c0_598 = arith.constant 0 : index
    %502 = vector.load %arg17[%c0_595, %c4_596, %c2_597, %c0_598] : memref<1x6x6x64xbf16, #tpu.memory_space<vmem>>, vector<1x2x2x64xbf16>
    %503 = vector.shape_cast %502 : vector<1x2x2x64xbf16> to vector<4x64xbf16>
    %c22_599 = arith.constant 22 : index
    %c0_600 = arith.constant 0 : index
    %c0_601 = arith.constant 0 : index
    %504 = vector.load %arg8[%c22_599, %c0_600, %c0_601] : memref<25x64x64xbf16, #tpu.memory_space<vmem>>, vector<1x64x64xbf16>
    %505 = vector.shape_cast %504 : vector<1x64x64xbf16> to vector<64x64xbf16>
    %cst_602 = arith.constant dense<0.000000e+00> : vector<4x64xf32>
    %506 = tpu.matmul %503, %505, %cst_602 {dimension_numbers = #tpu.dot_dimension_numbers<[1], [0], [0], [1], [0, 0, 1, 1], [], []>} : vector<4x64xbf16>, vector<64x64xbf16>, vector<4x64xf32> -> vector<4x64xf32>
    %507 = arith.addf %501, %506 : vector<4x64xf32>
    %c0_603 = arith.constant 0 : index
    %c4_604 = arith.constant 4 : index
    %c3_605 = arith.constant 3 : index
    %c0_606 = arith.constant 0 : index
    %508 = vector.load %arg17[%c0_603, %c4_604, %c3_605, %c0_606] : memref<1x6x6x64xbf16, #tpu.memory_space<vmem>>, vector<1x2x2x64xbf16>
    %509 = vector.shape_cast %508 : vector<1x2x2x64xbf16> to vector<4x64xbf16>
    %c23_607 = arith.constant 23 : index
    %c0_608 = arith.constant 0 : index
    %c0_609 = arith.constant 0 : index
    %510 = vector.load %arg8[%c23_607, %c0_608, %c0_609] : memref<25x64x64xbf16, #tpu.memory_space<vmem>>, vector<1x64x64xbf16>
    %511 = vector.shape_cast %510 : vector<1x64x64xbf16> to vector<64x64xbf16>
    %cst_610 = arith.constant dense<0.000000e+00> : vector<4x64xf32>
    %512 = tpu.matmul %509, %511, %cst_610 {dimension_numbers = #tpu.dot_dimension_numbers<[1], [0], [0], [1], [0, 0, 1, 1], [], []>} : vector<4x64xbf16>, vector<64x64xbf16>, vector<4x64xf32> -> vector<4x64xf32>
    %513 = arith.addf %507, %512 : vector<4x64xf32>
    %c0_611 = arith.constant 0 : index
    %c4_612 = arith.constant 4 : index
    %c4_613 = arith.constant 4 : index
    %c0_614 = arith.constant 0 : index
    %514 = vector.load %arg17[%c0_611, %c4_612, %c4_613, %c0_614] : memref<1x6x6x64xbf16, #tpu.memory_space<vmem>>, vector<1x2x2x64xbf16>
    %515 = vector.shape_cast %514 : vector<1x2x2x64xbf16> to vector<4x64xbf16>
    %c24_615 = arith.constant 24 : index
    %c0_616 = arith.constant 0 : index
    %c0_617 = arith.constant 0 : index
    %516 = vector.load %arg8[%c24_615, %c0_616, %c0_617] : memref<25x64x64xbf16, #tpu.memory_space<vmem>>, vector<1x64x64xbf16>
    %517 = vector.shape_cast %516 : vector<1x64x64xbf16> to vector<64x64xbf16>
    %cst_618 = arith.constant dense<0.000000e+00> : vector<4x64xf32>
    %518 = tpu.matmul %515, %517, %cst_618 {dimension_numbers = #tpu.dot_dimension_numbers<[1], [0], [0], [1], [0, 0, 1, 1], [], []>} : vector<4x64xbf16>, vector<64x64xbf16>, vector<4x64xf32> -> vector<4x64xf32>
    %519 = arith.addf %513, %518 : vector<4x64xf32>
    %c0_619 = arith.constant 0 : index
    %c0_620 = arith.constant 0 : index
    %520 = vector.load %arg9[%c0_619, %c0_620] : memref<1x64xf32, #tpu.memory_space<vmem>>, vector<1x64xf32>
    %521 = vector.broadcast %520 : vector<1x64xf32> to vector<4x64xf32>
    %522 = arith.addf %519, %521 : vector<4x64xf32>
    %cst_621 = arith.constant 0.000000e+00 : f32
    %523 = vector.broadcast %cst_621 : f32 to vector<4x64xf32>
    %524 = arith.maximumf %522, %523 : vector<4x64xf32>
    %525 = vector.shape_cast %524 : vector<4x64xf32> to vector<2x2x64xf32>
    %526 = vector.extract_strided_slice %525 {offsets = [0, 0, 0], sizes = [2, 1, 64], strides = [1, 1, 1]} : vector<2x2x64xf32> to vector<2x1x64xf32>
    %527 = vector.shape_cast %526 : vector<2x1x64xf32> to vector<2x64xf32>
    %528 = vector.extract_strided_slice %525 {offsets = [0, 1, 0], sizes = [2, 1, 64], strides = [1, 1, 1]} : vector<2x2x64xf32> to vector<2x1x64xf32>
    %529 = vector.shape_cast %528 : vector<2x1x64xf32> to vector<2x64xf32>
    %530 = arith.maximumf %527, %529 : vector<2x64xf32>
    %531 = vector.shape_cast %530 : vector<2x64xf32> to vector<1x1x2x1x64xf32>
    %532 = vector.extract_strided_slice %531 {offsets = [0, 0, 0, 0, 0], sizes = [1, 1, 1, 1, 64], strides = [1, 1, 1, 1, 1]} : vector<1x1x2x1x64xf32> to vector<1x1x1x1x64xf32>
    %533 = vector.shape_cast %532 : vector<1x1x1x1x64xf32> to vector<1x1x1x64xf32>
    %534 = vector.extract_strided_slice %531 {offsets = [0, 0, 1, 0, 0], sizes = [1, 1, 1, 1, 64], strides = [1, 1, 1, 1, 1]} : vector<1x1x2x1x64xf32> to vector<1x1x1x1x64xf32>
    %535 = vector.shape_cast %534 : vector<1x1x1x1x64xf32> to vector<1x1x1x64xf32>
    %536 = arith.maximumf %533, %535 : vector<1x1x1x64xf32>
    %537 = vector.shape_cast %536 : vector<1x1x1x64xf32> to vector<1x64xf32>
    %538 = arith.truncf %537 : vector<1x64xf32> to vector<1x64xbf16>
    %c0_622 = arith.constant 0 : index
    %c0_623 = arith.constant 0 : index
    %539 = vector.load %arg10[%c0_622, %c0_623] : memref<64x256xbf16, #tpu.memory_space<vmem>>, vector<64x256xbf16>
    %cst_624 = arith.constant dense<0.000000e+00> : vector<1x256xf32>
    %540 = tpu.matmul %538, %539, %cst_624 {dimension_numbers = #tpu.dot_dimension_numbers<[1], [0], [0], [1], [0, 0, 1, 1], [], []>} : vector<1x64xbf16>, vector<64x256xbf16>, vector<1x256xf32> -> vector<1x256xf32>
    %c0_625 = arith.constant 0 : index
    %c0_626 = arith.constant 0 : index
    %541 = vector.load %arg11[%c0_625, %c0_626] : memref<1x256xf32, #tpu.memory_space<vmem>>, vector<1x256xf32>
    %542 = arith.addf %540, %541 : vector<1x256xf32>
    %cst_627 = arith.constant 0.000000e+00 : f32
    %543 = vector.broadcast %cst_627 : f32 to vector<1x256xf32>
    %544 = arith.maximumf %542, %543 : vector<1x256xf32>
    %545 = arith.truncf %544 : vector<1x256xf32> to vector<1x256xbf16>
    %c0_628 = arith.constant 0 : index
    %c0_629 = arith.constant 0 : index
    %546 = vector.load %arg12[%c0_628, %c0_629] : memref<256x128xbf16, #tpu.memory_space<vmem>>, vector<256x128xbf16>
    %cst_630 = arith.constant dense<0.000000e+00> : vector<1x128xf32>
    %547 = tpu.matmul %545, %546, %cst_630 {dimension_numbers = #tpu.dot_dimension_numbers<[1], [0], [0], [1], [0, 0, 1, 1], [], []>} : vector<1x256xbf16>, vector<256x128xbf16>, vector<1x128xf32> -> vector<1x128xf32>
    %c0_631 = arith.constant 0 : index
    %c0_632 = arith.constant 0 : index
    %548 = vector.load %arg13[%c0_631, %c0_632] : memref<1x128xf32, #tpu.memory_space<vmem>>, vector<1x128xf32>
    %549 = arith.addf %547, %548 : vector<1x128xf32>
    %cst_633 = arith.constant 0.000000e+00 : f32
    %550 = vector.broadcast %cst_633 : f32 to vector<1x128xf32>
    %551 = arith.subf %550, %549 : vector<1x128xf32>
    %552 = math.exp %551 : vector<1x128xf32>
    %cst_634 = arith.constant 1.000000e+00 : f32
    %553 = vector.broadcast %cst_634 : f32 to vector<1x128xf32>
    %554 = arith.addf %553, %552 : vector<1x128xf32>
    %555 = tpu.reciprocal %554 {approx = true} : vector<1x128xf32> -> vector<1x128xf32>
    %cst_635 = arith.constant 0.000000e+00 : f32
    %556 = vector.broadcast %cst_635 : f32 to vector<1x128xf32>
    %557 = arith.maximumf %555, %556 : vector<1x128xf32>
    %cst_636 = arith.constant 1.000000e+00 : f32
    %558 = vector.broadcast %cst_636 : f32 to vector<1x128xf32>
    %559 = arith.minimumf %557, %558 : vector<1x128xf32>
    %c0_637 = arith.constant 0 : index
    %c0_638 = arith.constant 0 : index
    %c0_639 = arith.constant 0 : index
    %560 = vector.load %arg14[%c0_637, %c0_638, %c0_639] : memref<1x1x128xf32, #tpu.memory_space<vmem>>, vector<1x1x128xf32>
    %561 = vector.shape_cast %560 : vector<1x1x128xf32> to vector<1x128xf32>
    %562 = vector.shape_cast %559 : vector<1x128xf32> to vector<1x1x128xf32>
    tpu.vector_store %arg14[%c0_637, %c0_638, %c0_639], %562 {strides = array<i32>} : memref<1x1x128xf32, #tpu.memory_space<vmem>>, vector<1x1x128xf32>,
    return
  }
  func.func @transform_0(%arg0: i32) -> (i32, i32, i32) {
    %c0_i32 = arith.constant 0 : i32
    %c0_i32_0 = arith.constant 0 : i32
    %c0_i32_1 = arith.constant 0 : i32
    return %arg0, %c0_i32, %c0_i32_0 : i32, i32, i32
  }
  func.func @transform_1(%arg0: i32) -> (i32, i32) {
    %c0_i32 = arith.constant 0 : i32
    %c0_i32_0 = arith.constant 0 : i32
    %c0_i32_1 = arith.constant 0 : i32
    return %c0_i32, %c0_i32_0 : i32, i32
  }
  func.func @transform_2(%arg0: i32) -> (i32, i32) {
    %c0_i32 = arith.constant 0 : i32
    %c0_i32_0 = arith.constant 0 : i32
    %c0_i32_1 = arith.constant 0 : i32
    return %c0_i32, %c0_i32_0 : i32, i32
  }
  func.func @transform_3(%arg0: i32) -> (i32, i32, i32) {
    %c0_i32 = arith.constant 0 : i32
    %c0_i32_0 = arith.constant 0 : i32
    %c0_i32_1 = arith.constant 0 : i32
    %c0_i32_2 = arith.constant 0 : i32
    return %c0_i32, %c0_i32_0, %c0_i32_1 : i32, i32, i32
  }
  func.func @transform_4(%arg0: i32) -> (i32, i32) {
    %c0_i32 = arith.constant 0 : i32
    %c0_i32_0 = arith.constant 0 : i32
    %c0_i32_1 = arith.constant 0 : i32
    return %c0_i32, %c0_i32_0 : i32, i32
  }
  func.func @transform_5(%arg0: i32) -> (i32, i32, i32) {
    %c0_i32 = arith.constant 0 : i32
    %c0_i32_0 = arith.constant 0 : i32
    %c0_i32_1 = arith.constant 0 : i32
    %c0_i32_2 = arith.constant 0 : i32
    return %c0_i32, %c0_i32_0, %c0_i32_1 : i32, i32, i32
  }
  func.func @transform_6(%arg0: i32) -> (i32, i32) {
    %c0_i32 = arith.constant 0 : i32
    %c0_i32_0 = arith.constant 0 : i32
    %c0_i32_1 = arith.constant 0 : i32
    return %c0_i32, %c0_i32_0 : i32, i32
  }
  func.func @transform_7(%arg0: i32) -> (i32, i32, i32) {
    %c0_i32 = arith.constant 0 : i32
    %c0_i32_0 = arith.constant 0 : i32
    %c0_i32_1 = arith.constant 0 : i32
    %c0_i32_2 = arith.constant 0 : i32
    return %c0_i32, %c0_i32_0, %c0_i32_1 : i32, i32, i32
  }
  func.func @transform_8(%arg0: i32) -> (i32, i32) {
    %c0_i32 = arith.constant 0 : i32
    %c0_i32_0 = arith.constant 0 : i32
    %c0_i32_1 = arith.constant 0 : i32
    return %c0_i32, %c0_i32_0 : i32, i32
  }
  func.func @transform_9(%arg0: i32) -> (i32, i32) {
    %c0_i32 = arith.constant 0 : i32
    %c0_i32_0 = arith.constant 0 : i32
    %c0_i32_1 = arith.constant 0 : i32
    return %c0_i32, %c0_i32_0 : i32, i32
  }
  func.func @transform_10(%arg0: i32) -> (i32, i32) {
    %c0_i32 = arith.constant 0 : i32
    %c0_i32_0 = arith.constant 0 : i32
    %c0_i32_1 = arith.constant 0 : i32
    return %c0_i32, %c0_i32_0 : i32, i32
  }
  func.func @transform_11(%arg0: i32) -> (i32, i32) {
    %c0_i32 = arith.constant 0 : i32
    %c0_i32_0 = arith.constant 0 : i32
    %c0_i32_1 = arith.constant 0 : i32
    return %c0_i32, %c0_i32_0 : i32, i32
  }
  func.func @transform_12(%arg0: i32) -> (i32, i32) {
    %c0_i32 = arith.constant 0 : i32
    %c0_i32_0 = arith.constant 0 : i32
    %c0_i32_1 = arith.constant 0 : i32
    return %c0_i32, %c0_i32_0 : i32, i32
  }
  func.func @transform_13(%arg0: i32) -> (i32, i32, i32) {
    %c0_i32 = arith.constant 0 : i32
    %c0_i32_0 = arith.constant 0 : i32
    %c0_i32_1 = arith.constant 0 : i32
    return %arg0, %c0_i32, %c0_i32_0 : i32, i32, i32
  }
}

</mosaic_0001>

<bundles_post_ra>
// kernel: conv_lassonet_forward.1
= control target key start
LH: loop header
LB: loop body
LE: loop exit
PB: predicated region body
PF: predicated region fallthrough
CT: control target
= control target key end

     0   :  { %18 = vsyncpa [#allocation6], 0  ;;  %s21496_s0 = inlined_call_operand.vmem [shape: bf16[2,256,128], index: 0, kind: input, shape index: {}]   ;;  %s21497_s1 = inlined_call_operand.vmem [shape: bf16[128,16], index: 1, kind: input, shape index: {}]   ;;  %s21498_s2 = inlined_call_operand.vmem [shape: f32[1,16], index: 2, kind: input, shape index: {}]   ;;  %s21499_s3 = inlined_call_operand.vmem [shape: bf16[25,16,32], index: 3, kind: input, shape index: {}]   ;;  %s21500_s4 = inlined_call_operand.vmem [shape: f32[1,32], index: 4, kind: input, shape index: {}]   ;;  %s21501_s5 = inlined_call_operand.vmem [shape: bf16[25,32,64], index: 5, kind: input, shape index: {}]   ;;  %s21502_s6 = inlined_call_operand.vmem [shape: f32[1,64], index: 6, kind: input, shape index: {}]   ;;  %s21503_s7 = inlined_call_operand.vmem [shape: bf16[25,64,64], index: 7, kind: input, shape index: {}]   ;;  %s21504_s8 = inlined_call_operand.vmem [shape: f32[1,64], index: 8, kind: input, shape index: {}]   ;;  %s21505_s9 = inlined_call_operand.vmem [shape: bf16[64,256], index: 9, kind: input, shape index: {}]   ;;  %s21506_s10 = inlined_call_operand.vmem [shape: f32[1,256], index: 10, kind: input, shape index: {}]   ;;  %s21507_s11 = inlined_call_operand.vmem [shape: bf16[256,128], index: 11, kind: input, shape index: {}]   ;;  %s21508_s12 = inlined_call_operand.vmem [shape: f32[1,128], index: 12, kind: input, shape index: {}]   ;;  %s21509_s13 = inlined_call_operand.hbm [shape: f32[2,1,128], index: 13, kind: output, shape index: {}]  }
   0x1   :  { %20 = vsyncpa [#allocation6 + $0x1], 0  ;;  %s18375_s25 = smov 0   ;;  %s18377_s26 = smov 0  }
   0x2   :  { %s18379_s27 = smov 0   ;;  %s18381_s28 = smov 0  }
   0x3 LB: > { %21513 = sst [smem:[#allocation8_spill]] %s18293_s27  ;;  %s18396_s29 = sadd.s32 4294967295, %s18297_s28   ;;  %s18297_s28 = sphi %s18381_s28, %s21538_s28   ;;  %s18293_s27 = sphi %s18379_s27, %s21540_s27   ;;  %s18289_s26 = sphi %s18377_s26, %s21542_s26   ;;  %s18285_s25 = sphi %s18375_s25, %s21541_s25  }
   0x4   : > { %s15110_s30 = sadd.s32 4294967294, %s18297_s28   ;;  %s18400_s14 = sadd.s32 1, %s18297_s28  }
   0x5   : > { %21514 = sst [smem:[#allocation9_spill]] %s18400_s14  ;;  %s311_s15 = sadd.s32 1, %s18293_s27 }
   0x6   : > { %s308_s16 = ssub.s32 %s18297_s28, %s18400_s14  ;;  %p321_p0 = scmp.ne.s32.totalorder %s18293_s27, %s18289_s26 }
   0x7   : > { %p309_p1 = scmp.eq.s32.totalorder %s308_s16, 0  ;;  %p322_p2 = scmp.eq.s32.totalorder %s18396_s29, 1 }
   0x8   : > { %p327_p3 = scmp.ne.s32.totalorder %s18289_s26, %s18285_s25  ;;  %p328_p4 = scmp.eq.s32.totalorder %s15110_s30, 1 }
   0x9   : > { %s18411_s17 = scalar_select %p309_p1, %s18293_s27, %s311_s15  }
   0xa   : > { %p18413_p5 = por %p322_p2, %p321_p0  ;;  %p18417_p6 = por %p328_p4, %p327_p3 }
   0xb   : > { %21515 = sst [smem:[#allocation10_spill]] %s18411_s17  ;;  %p15113_p7 = scmp.ge.s32.totalorder %s18297_s28, 1 }
   0xc   : > { %p390_p8 = scmp.lt.s32.totalorder %s18297_s28, 3 }
   0xe   : > { %p391_p9 = pnand %p15113_p7, %p390_p8 }
   0xf   : > { %v17952_v0 = vld [vmem:[%s21497_s1] sm:$0xff] (!%p391_p9)   ;;  %p433_p10 = scmp.lt.s32.totalorder (!%p391_p9), %s18396_s29, 1  ;;  %v17953_v1 = vld [vmem:[%s21497_s1 + $0x8] sm:$0xff] (!%p391_p9)   ;;  %v17954_v2 = vld [vmem:[%s21497_s1 + $0x10] sm:$0xff] (!%p391_p9)   ;;  %vm439_vm0 = vcmask (!%p391_p9), 125952   ;;  %vm441_vm1 = vcmask (!%p391_p9), 123904   ;;  %v909_v27 = vlaneseq (!%p391_p9) }
  0x10   : > { %394 = sbr.rel (%p391_p9) target bundleno = 2438 (0x986), region = 72  ;;  %16918 = vmatprep.subr.bf16.mxu0 (!%p391_p9), %v17952_v0  ;;  %v17955_v3 = vld [vmem:[%s21497_s1 + $0x18] sm:$0xff] (!%p391_p9)   ;;  %v17956_v5 = vld [vmem:[%s21497_s1 + $0x20] sm:$0xff] (!%p391_p9)   ;;  %v17957_v6 = vld [vmem:[%s21497_s1 + $0x28] sm:$0xff] (!%p391_p9)   ;;  %v18299_v24 = vmov (!%p391_p9), 0   ;;  %vm2475_vm2 = vcmask (!%p391_p9), 1043459  }
  0x11   : > { %16919 = vmatpush3.bf16.msra.mxu0 (!%p391_p9), %v17952_v0  ;;  %v17958_v7 = vld [vmem:[%s21497_s1 + $0x30] sm:$0xff] (!%p391_p9)   ;;  %v17959_v8 = vld [vmem:[%s21497_s1 + $0x38] sm:$0xff] (!%p391_p9)   ;;  %445 = vst.msk [vmem:[#allocation2 + $0x10] sm:$0xf] (!%p391_p9), %vm439_vm0, %v18299_v24  ;;  %440 = vst.msk [vmem:[#allocation2] sm:$0xf] (!%p391_p9), %vm439_vm0, %v18299_v24 }
  0x12   : > { %16920 = vmatprep.subr.bf16.mxu0 (!%p391_p9), %v17953_v1  ;;  %446 = vst.msk [vmem:[#allocation2 + $0x14] sm:$0x3] (!%p391_p9), %vm441_vm1, %v18299_v24  ;;  %442 = vst.msk [vmem:[#allocation2 + $0x4] sm:$0x3] (!%p391_p9), %vm441_vm1, %v18299_v24  ;;  %v18300_v25 = vmov (!%p391_p9), 1983009808  }
  0x13   : > { %443 = vst.msk [vmem:[#allocation2 + $0x8] sm:$0xf] (!%p391_p9), %vm439_vm0, %v18299_v24  ;;  %447 = vst.msk [vmem:[#allocation2 + $0x18] sm:$0xf] (!%p391_p9), %vm439_vm0, %v18299_v24  ;;  %v907_v26 = vunpack.c.l.s4 (!%p391_p9), %v18300_v25  ;;  %v18518_v29 = vshrl.u32 (!%p391_p9), %v909_v27, 7  ;;  %vm2478_vm3 = vcmask (!%p391_p9), 1044484  }
  0x14   : > { %444 = vst.msk [vmem:[#allocation2 + $0xc] sm:$0x3] (!%p391_p9), %vm441_vm1, %v18299_v24  ;;  %448 = vst.msk [vmem:[#allocation2 + $0x1c] sm:$0x3] (!%p391_p9), %vm441_vm1, %v18299_v24  ;;  %v18523_v30 = vld [vmem:[%s21498_s2] ss:$0 sm:$0xff] (!%p391_p9) }
  0x15   : > { %16921 = vmatpush3.bf16.msra.mxu0 (!%p391_p9), %v17953_v1  ;;  %449 = vst.msk [vmem:[#allocation2 + $0x20] sm:$0xf] (!%p391_p9), %vm439_vm0, %v18299_v24  ;;  %451 = vst.msk [vmem:[#allocation2 + $0x28] sm:$0xf] (!%p391_p9), %vm439_vm0, %v18299_v24  ;;  %v908_v28 = vunpack.c.0.s8 (!%p391_p9), %v907_v26  ;;  %vm2481_vm4 = vcmask (!%p391_p9), 1045509   ;;  %vm2484_vm5 = vcmask (!%p391_p9), 1046534  }
  0x16   : > { %16922 = vmatprep.subr.bf16.mxu0 (!%p391_p9), %v17954_v2  ;;  %450 = vst.msk [vmem:[#allocation2 + $0x24] sm:$0x3] (!%p391_p9), %vm441_vm1, %v18299_v24  ;;  %452 = vst.msk [vmem:[#allocation2 + $0x2c] sm:$0x3] (!%p391_p9), %vm441_vm1, %v18299_v24  ;;  %vm2487_vm6 = vcmask (!%p391_p9), 1047559   ;;  %vm2490_vm7 = vcmask (!%p391_p9), 1041409  }
  0x17   : > { %s434_s24 = scalar_select %p433_p10, %s18396_s29, 1  ;;  %453 = vst.msk [vmem:[#allocation2 + $0x30] sm:$0xf] %vm439_vm0, %v18299_v24  ;;  %455 = vst.msk [vmem:[#allocation2 + $0x38] sm:$0xf] %vm439_vm0, %v18299_v24  ;;  %v18527_v33 = vsub.s32 %v908_v28, %v18518_v29  ;;  %vm2616_vm8 = vcmask 125953  }
  0x18   : > { %454 = vst.msk [vmem:[#allocation2 + $0x34] sm:$0x3] %vm441_vm1, %v18299_v24  ;;  %456 = vst.msk [vmem:[#allocation2 + $0x3c] sm:$0x3] %vm441_vm1, %v18299_v24  ;;  %vm2618_vm9 = vcmask 122880   ;;  %vm2788_vm13 = vcmask 130048  }
  0x19   : > { %s16462_s16 = sshll.u32 %s434_s24, 7  ;;  %16923 = vmatpush3.bf16.msra.mxu0 %v17954_v2  ;;  %457 = vst.msk [vmem:[#allocation2 + $0x40] sm:$0xf] %vm439_vm0, %v18299_v24  ;;  %459 = vst.msk [vmem:[#allocation2 + $0x48] sm:$0xf] %vm439_vm0, %v18299_v24  ;;  %vm2993_vm14 = vcmask 1042432  }
  0x1a   : > { %s18437_s20 = scalar_lea.vmem %s21496_s0, %s16462_s16  ;;  %16924 = vmatprep.subr.bf16.mxu0 %v17955_v3  ;;  %458 = vst.msk [vmem:[#allocation2 + $0x44] sm:$0x3] %vm441_vm1, %v18299_v24  ;;  %460 = vst.msk [vmem:[#allocation2 + $0x4c] sm:$0x3] %vm441_vm1, %v18299_v24  ;;  %vm2652_vm10 = vsmask.f32 3328 }
  0x1b   : > { %v17960_v4 = vld [vmem:[%s18437_s20] sm:$0xff]   ;;  %v17961_v9 = vld [vmem:[%s18437_s20 + $0x8] sm:$0xff]   ;;  %v17962_v10 = vld [vmem:[%s18437_s20 + $0x10] sm:$0xff]   ;;  %461 = vst.msk [vmem:[#allocation2 + $0x50] sm:$0xf] %vm439_vm0, %v18299_v24  ;;  %vm2994_vm15 = vcmask 1046532  }
  0x1c   : > { %16934 = vmatprep.mubr.bf16.mxu0 %v17960_v4  ;;  %v17963_v11 = vld [vmem:[%s18437_s20 + $0x18] sm:$0xff]   ;;  %v17964_v12 = vld [vmem:[%s18437_s20 + $0x20] sm:$0xff]   ;;  %v17965_v13 = vld [vmem:[%s18437_s20 + $0x28] sm:$0xff]   ;;  %462 = vst.msk [vmem:[#allocation2 + $0x54] sm:$0x3] %vm441_vm1, %v18299_v24  ;;  %s431_s14 = sand.u32 1, %s18289_s26  }
  0x1d   : > { %16925 = vmatpush3.bf16.msra.mxu0 %v17955_v3  ;;  %v17966_v14 = vld [vmem:[%s18437_s20 + $0x30] sm:$0xff]   ;;  %v17967_v15 = vld [vmem:[%s18437_s20 + $0x38] sm:$0xff]   ;;  %v17968_v16 = vld [vmem:[%s18437_s20 + $0x40] sm:$0xff]   ;;  %463 = vst.msk [vmem:[#allocation2 + $0x58] sm:$0xf] %vm439_vm0, %v18299_v24  ;;  %s16459_s24 = sshll.u32 %s18396_s29, 4 }
  0x1e   : > { %16926 = vmatprep.subr.bf16.mxu0 %v17956_v5  ;;  %v17969_v17 = vld [vmem:[%s18437_s20 + $0x48] sm:$0xff]   ;;  %v17970_v18 = vld [vmem:[%s18437_s20 + $0x50] sm:$0xff]   ;;  %v17971_v19 = vld [vmem:[%s18437_s20 + $0x58] sm:$0xff]   ;;  %464 = vst.msk [vmem:[#allocation2 + $0x5c] sm:$0x3] %vm441_vm1, %v18299_v24  ;;  %s432_s30 = scalar_lea.vmem [#allocation5], %s431_s14  ;;  %s21454_s21 = scalar_lea.hbm %s21509_s13, %s16459_s24 }
  0x1f   : > { %v17972_v20 = vld [vmem:[%s18437_s20 + $0x60] sm:$0xff]   ;;  %v17973_v21 = vld [vmem:[%s18437_s20 + $0x68] sm:$0xff]   ;;  %v17974_v22 = vld [vmem:[%s18437_s20 + $0x70] sm:$0xff]   ;;  %vm2653_vm11 = vsmask.f32 7440  ;;  %s15055_s15 = sshll.u32 %s432_s30, 4  ;;  %s21456_s15 = int_to_ptr.vmem [resolvable:$true] %s15055_s15 }
  0x20   : > { %v17975_v23 = vld [vmem:[%s18437_s20 + $0x78] sm:$0xff]   ;;  %vm18782_vm12 = vmor %vm2652_vm10, %vm2653_vm11  ;;  %vm3142_vm1 = vsmask.f32 2304  ;;  %vm3143_vm10 = vsmask.f32 6416  ;;  %s15043_s22 = scalar_lea.sflag [#allocation6], %s431_s14 }
  0x21   : > { %16927 = vmatpush3.bf16.msra.mxu0 %v17956_v5  ;;  %vm18883_vm0 = vmor %vm2993_vm14, %vm2994_vm15  ;;  %vm8230_vm14 = vsmask.f32 256  ;;  %vm8231_vm15 = vsmask.f32 2312  ;;  %s18235_s23 = scalar_lea.vmem %s21456_s15, 16  ;;  %s18304_s29 = smov [#allocation5]  }
  0x22   : > { %16928 = vmatprep.subr.bf16.mxu0 %v17957_v6  ;;  %vm19022_vm11 = vmor %vm3142_vm1, %vm3143_vm10  ;;  %vm7775_vm10 = vcmask 256001   ;;  %p18236_p11 = scmp.ne.s32.totalorder %s21456_s15, %s18235_s23  ;;  %s18239_s27 = sshll.u32 %s18304_s29, 4  ;;  %s18240_s27 = int_to_ptr.vmem [resolvable:$false] %s18239_s27 }
  0x23   : > { %s18241_s17 = scalar_lea.vmem %s18240_s27, 32  ;;  %p18242_p0 = scmp.lt.s32.totalorder %s21456_s15, %s18240_s27 }
  0x24   : > { %p18237_p12 = pnand %p18236_p11, %p18413_p5  ;;  %p18243_p1 = scmp.lt.s32.totalorder %s18241_s17, %s18235_s23 }
  0x25   : > { %16929 = vmatpush3.bf16.msra.mxu0 %v17957_v6 }
  0x26   : > { %16930 = vmatprep.subr.bf16.mxu0 %v17958_v7  ;;  %p18238_p13 = pneg %p18237_p12  ;;  %p18244_p2 = por %p18243_p1, %p18242_p0 }
  0x28   : > { %p18245_p3 = pnand %p18244_p2, %p18238_p13 }
  0x29   : > { %16931 = vmatpush3.bf16.msra.mxu0 %v17958_v7 }
  0x2a   : > { %16932 = vmatprep.subr.bf16.mxu0 %v17959_v8 }
  0x2d   : > { %16933 = vmatpush3.bf16.msra.mxu0 %v17959_v8 }
  0x30   : > { %16935 = vmatmul.mubr.bf16.vlgmr.msra.gmra.mrb[0].mxu0 %v17961_v9 }
  0x31   : > { %16938 = vmatprep.mubr.bf16.mxu0 %v17962_v10 }
  0x38   : > { %16939 = vmatmul.mubr.bf16.gmra.mrb[4].mxu0 %v17963_v11 }
  0x39   : > { %16942 = vmatprep.mubr.bf16.mxu0 %v17964_v12 }
  0x40   : > { %16943 = vmatmul.mubr.bf16.gmra.mrb[8].mxu0 %v17965_v13 }
  0x41   : > { %16946 = vmatprep.mubr.bf16.mxu0 %v17966_v14 }
  0x48   : > { %16947 = vmatmul.mubr.bf16.gmra.mrb[12].mxu0 %v17967_v15 }
  0x49   : > { %16950 = vmatprep.mubr.bf16.mxu0 %v17968_v16 }
  0x50   : > { %16951 = vmatmul.mubr.bf16.gmra.mrb[16].mxu0 %v17969_v17 }
  0x51   : > { %16954 = vmatprep.mubr.bf16.mxu0 %v17970_v18 }
  0x58   : > { %16955 = vmatmul.mubr.bf16.gmra.mrb[20].mxu0 %v17971_v19 }
  0x59   : > { %16958 = vmatprep.mubr.bf16.mxu0 %v17972_v20 }
  0x60   : > { %16959 = vmatmul.mubr.bf16.gmra.mrb[24].mxu0 %v17973_v21 }
  0x61   : > { %16962 = vmatprep.mubr.bf16.mxu0 %v17974_v22 }
  0x68   : > { %16963 = vmatmul.mubr.bf16.gmra.mrb[28].mxu0 %v17975_v23 }
 0x103   : > { %v16936_v31 = vpop.f32.mrb[0].mxu0 }
 0x104   : > { %v723_v32 = vadd.f32 %v16936_v31, %v18523_v30  ;;  %v714_v34 = vpop.f32.mrb[1].mxu0 }
 0x105   : > { %v715_v35 = vadd.f32 %v18523_v30, %v714_v34  ;;  %v16937_v36 = vpop.f32.mrb[2].mxu0 }
 0x106   : > { %v843_v37 = vmax.f32 %v723_v32, 0.0  ;;  %v726_v38 = vadd.f32 %v16937_v36, %v18523_v30  ;;  %v717_v39 = vpop.f32.mrb[3].mxu0 }
 0x107   : > { %v841_v40 = vmax.f32 %v715_v35, 0.0  ;;  %v718_v41 = vadd.f32 %v18523_v30, %v717_v39 }
 0x108   : > { %v939_v42 = vcombine.high %v843_v37, %v843_v37  ;;  %v946_v43 = vrot.slane %v843_v37, %v18527_v33  ;;  %v844_v44 = vmax.f32 %v726_v38, 0.0 }
 0x109   : > { %v905_v45 = vcombine.high %v841_v40, %v841_v40  ;;  %v912_v46 = vrot.slane %v841_v40, %v18527_v33  ;;  %v842_v47 = vmax.f32 %v718_v41, 0.0 }
 0x10a   : > { %v953_v48 = vrot.slane %v939_v42, %v18527_v33  ;;  %v954_v49 = vcombine.high %v946_v43, %v946_v43  ;;  %v15149_v50 = vrot.slane %v946_v43, 9  ;;  %v956_v51 = vcombine.high %v844_v44, %v844_v44 }
 0x10b   : > { %v919_v52 = vrot.slane %v905_v45, %v18527_v33  ;;  %v920_v53 = vcombine.high %v912_v46, %v912_v46  ;;  %v15141_v54 = vrot.slane %v912_v46, 9  ;;  %v963_v55 = vrot.slane %v844_v44, %v18527_v33  ;;  %v16940_v56 = vpop.f32.mrb[4].mxu0 }
 0x10c   : > { %v955_v57 = vcombine.high %v953_v48, %v953_v48  ;;  %v15150_v58 = vrot.slane %v954_v49, 9  ;;  %v15151_v59 = vrot.slane %v953_v48, 9  ;;  %v1969_v60 = vmax.f32 %v946_v43, %v15149_v50  ;;  %v730_v61 = vpop.f32.mrb[5].mxu0 }
 0x10d   : > { %v921_v62 = vcombine.high %v919_v52, %v919_v52  ;;  %v15142_v63 = vrot.slane %v920_v53, 9  ;;  %v15143_v0 = vrot.slane %v919_v52, 9  ;;  %v1961_v1 = vmax.f32 %v912_v46, %v15141_v54  ;;  %v16941_v2 = vpop.f32.mrb[6].mxu0 }
 0x10e   : > { %v15152_v3 = vrot.slane %v955_v57, 9  ;;  %v1970_v4 = vmax.f32 %v954_v49, %v15150_v58  ;;  %v1971_v5 = vmax.f32 %v953_v48, %v15151_v59  ;;  %v970_v6 = vrot.slane %v956_v51, %v18527_v33  ;;  %v18538_v7 = vpop.f32.mrb[7].mxu0 }
 0x10f   : > { %v15144_v8 = vrot.slane %v921_v62, 9  ;;  %v1962_v9 = vmax.f32 %v920_v53, %v15142_v63  ;;  %v1963_v10 = vmax.f32 %v919_v52, %v15143_v0  ;;  %v2089_v11 = vmax.f32 %v1961_v1, %v1969_v60 }
 0x110   : > { %v1972_v12 = vmax.f32 %v955_v57, %v15152_v3  ;;  %v971_v13 = vcombine.high %v963_v55, %v963_v55  ;;  %v972_v14 = vcombine.high %v970_v6, %v970_v6  ;;  %v15153_v15 = vrot.slane %v963_v55, 9 }
 0x111   : > { %v1964_v16 = vmax.f32 %v921_v62, %v15144_v8  ;;  %v2090_v17 = vmax.f32 %v1962_v9, %v1970_v4  ;;  %v2091_v18 = vmax.f32 %v1963_v10, %v1971_v5  ;;  %v16463_v19 = vpack.c.bf16 %v2089_v11, %v2089_v11 }
 0x112   : > { %v15154_v20 = vrot.slane %v971_v13, 9  ;;  %v15155_v21 = vrot.slane %v970_v6, 9  ;;  %v15156_v22 = vrot.slane %v972_v14, 9  ;;  %v1973_v23 = vmax.f32 %v963_v55, %v15153_v15 }
 0x113   : > { %v2092_v25 = vmax.f32 %v1964_v16, %v1972_v12  ;;  %v16464_v26 = vpack.c.bf16 %v2090_v17, %v2090_v17  ;;  %v16465_v27 = vpack.c.bf16 %v2091_v18, %v2091_v18  ;;  %v2409_v28 = vunpack.c.l.b16 %v16463_v19  ;;  %v18540_v31 = vpop.f32.mrb[8].mxu0 }
 0x114   : > { %v1974_v32 = vmax.f32 %v971_v13, %v15154_v20  ;;  %v1975_v34 = vmax.f32 %v970_v6, %v15155_v21  ;;  %v1976_v35 = vmax.f32 %v972_v14, %v15156_v22  ;;  %v922_v36 = vcombine.high %v842_v47, %v842_v47  ;;  %v18542_v37 = vpop.f32.mrb[9].mxu0 }
 0x115   : > { %v16466_v38 = vpack.c.bf16 %v2092_v25, %v2092_v25  ;;  %v2410_v39 = vunpack.c.l.b16 %v16464_v26  ;;  %v2411_v40 = vunpack.c.l.b16 %v16465_v27  ;;  %v2473_v41 = vrot.slane %v2409_v28, 6  ;;  %v18544_v42 = vpop.f32.mrb[10].mxu0 }
 0x116   : > { %v929_v43 = vrot.slane %v842_v47, %v18527_v33  ;;  %v936_v44 = vrot.slane %v922_v36, %v18527_v33  ;;  %v739_v45 = vadd.f32 %v16940_v56, %v18523_v30  ;;  %v731_v46 = vadd.f32 %v18523_v30, %v730_v61  ;;  %v18550_v48 = vpop.f32.mrb[11].mxu0 }
 0x117   : > { %v2412_v49 = vunpack.c.l.b16 %v16466_v38  ;;  %v2474_v50 = vrot.slane %v2410_v39, 5  ;;  %v2477_v51 = vrot.slane %v2411_v40, 4  ;;  %v742_v52 = vadd.f32 %v16941_v2, %v18523_v30 }
 0x118   : > { %v937_v53 = vcombine.high %v929_v43, %v929_v43  ;;  %v938_v54 = vcombine.high %v936_v44, %v936_v44  ;;  %v15145_v55 = vrot.slane %v929_v43, 9  ;;  %v15147_v57 = vrot.slane %v936_v44, 9 }
 0x119   : > { %v2476_v58 = vsel %vm2475_vm2, %v2474_v50, %v2473_v41  ;;  %v2480_v47 = vrot.slane %v2412_v49, 3  ;;  %v847_v59 = vmax.f32 %v739_v45, 0.0  ;;  %v845_v60 = vmax.f32 %v731_v46, 0.0 }
 0x11a   : > { %v2479_v56 = vsel %vm2478_vm3, %v2477_v51, %v2476_v58  ;;  %v15146_v61 = vrot.slane %v937_v53, 9  ;;  %v15148_v62 = vrot.slane %v938_v54, 9  ;;  %v1965_v63 = vmax.f32 %v929_v43, %v15145_v55  ;;  %v17976_v51 = vld [vmem:[%s21499_s3 + $0x8] sm:$0xff]  }
 0x11b   : > { %v1967_v0 = vmax.f32 %v936_v44, %v15147_v57  ;;  %v2482_v1 = vsel %vm2481_vm4, %v2480_v47, %v2479_v56  ;;  %v1007_v2 = vcombine.high %v847_v59, %v847_v59  ;;  %v1014_v3 = vrot.slane %v847_v59, %v18527_v33  ;;  %v18557_v4 = vpop.f32.mrb[12].mxu0  ;;  %16966 = vmatprep.subr.bf16.mxu1 %v17976_v51 }
 0x11c   : > { %v1966_v5 = vmax.f32 %v937_v53, %v15146_v61  ;;  %v1968_v6 = vmax.f32 %v938_v54, %v15148_v62  ;;  %v2093_v8 = vmax.f32 %v1965_v63, %v1973_v23  ;;  %v973_v9 = vcombine.high %v845_v60, %v845_v60  ;;  %v18559_v10 = vpop.f32.mrb[13].mxu0  ;;  %16967 = vmatpush3.bf16.msra.mxu1 %v17976_v51 }
 0x11d   : > { %v2095_v11 = vmax.f32 %v1967_v0, %v1975_v34  ;;  %v1021_v12 = vrot.slane %v1007_v2, %v18527_v33  ;;  %v1022_v13 = vcombine.high %v1014_v3, %v1014_v3  ;;  %v15165_v14 = vrot.slane %v1014_v3, 9  ;;  %v18562_v15 = vpop.f32.mrb[14].mxu0 }
 0x11e   : > { %v2094_v16 = vmax.f32 %v1966_v5, %v1974_v32  ;;  %v2096_v17 = vmax.f32 %v1968_v6, %v1976_v35  ;;  %v16467_v18 = vpack.c.bf16 %v2093_v8, %v2093_v8  ;;  %v980_v19 = vrot.slane %v845_v60, %v18527_v33  ;;  %v18565_v20 = vpop.f32.mrb[15].mxu0 }
 0x11f   : > { %v16469_v21 = vpack.c.bf16 %v2095_v11, %v2095_v11  ;;  %v1023_v22 = vcombine.high %v1021_v12, %v1021_v12  ;;  %v15166_v23 = vrot.slane %v1022_v13, 9  ;;  %v15167_v25 = vrot.slane %v1021_v12, 9 }
 0x120   : > { %v16468_v26 = vpack.c.bf16 %v2094_v16, %v2094_v16  ;;  %v16470_v27 = vpack.c.bf16 %v2096_v17, %v2096_v17  ;;  %v2413_v28 = vunpack.c.l.b16 %v16467_v18  ;;  %v1985_v34 = vmax.f32 %v1014_v3, %v15165_v14 }
 0x121   : > { %v2415_v36 = vunpack.c.l.b16 %v16469_v21  ;;  %v15168_v38 = vrot.slane %v1023_v22, 9  ;;  %v1986_v39 = vmax.f32 %v1022_v13, %v15166_v23  ;;  %v1987_v32 = vmax.f32 %v1021_v12, %v15167_v25 }
 0x122   : > { %v2414_v35 = vunpack.c.l.b16 %v16468_v26  ;;  %v2416_v40 = vunpack.c.l.b16 %v16470_v27  ;;  %v2483_v41 = vrot.slane %v2413_v28, 2  ;;  %v987_v43 = vrot.slane %v973_v9, %v18527_v33 }
 0x123   : > { %v1988_v44 = vmax.f32 %v1023_v22, %v15168_v38  ;;  %v988_v45 = vcombine.high %v980_v19, %v980_v19  ;;  %v15157_v46 = vrot.slane %v980_v19, 9  ;;  %v848_v49 = vmax.f32 %v742_v52, 0.0  ;;  %v18568_v50 = vpop.f32.mrb[16].mxu0 }
 0x124   : > { %v2485_v53 = vsel %vm2484_vm5, %v2483_v41, %v2482_v1  ;;  %v2486_v54 = vrot.slane %v2414_v35, 1  ;;  %v2489_v55 = vrot.slane %v2416_v40, 7  ;;  %v989_v57 = vcombine.high %v987_v43, %v987_v43  ;;  %v18574_v58 = vpop.f32.mrb[17].mxu0 }
 0x125   : > { %v15158_v47 = vrot.slane %v988_v45, 9  ;;  %v15159_v59 = vrot.slane %v987_v43, 9  ;;  %v1977_v60 = vmax.f32 %v980_v19, %v15157_v46  ;;  %v1024_v56 = vcombine.high %v848_v49, %v848_v49  ;;  %v18576_v61 = vpop.f32.mrb[18].mxu0 }
 0x126   : > { %v2488_v52 = vsel %vm2487_vm6, %v2486_v54, %v2485_v53  ;;  %v2491_v62 = vsel %vm2490_vm7, %v2489_v55, %v2415_v36  ;;  %v15160_v63 = vrot.slane %v989_v57, 9  ;;  %v1031_v0 = vrot.slane %v848_v49, %v18527_v33  ;;  %v18581_v1 = vpop.f32.mrb[19].mxu0 }
 0x127   : > { %v2583_v2 = vpack.c.b16 %v2488_v52, %v2488_v52  ;;  %v2584_v3 = vpack.c.b16 %v2491_v62, %v2491_v62  ;;  %v1978_v5 = vmax.f32 %v988_v45, %v15158_v47  ;;  %v1979_v6 = vmax.f32 %v987_v43, %v15159_v59 }
 0x128   : > { %v1980_v8 = vmax.f32 %v989_v57, %v15160_v63  ;;  %v2097_v9 = vmax.f32 %v1977_v60, %v1985_v34  ;;  %v1038_v11 = vrot.slane %v1024_v56, %v18527_v33  ;;  %v1039_v12 = vcombine.high %v1031_v0, %v1031_v0 }
 0x129   : > { %2617 = vst.msk [vmem:[#allocation2 + $0x10] sm:$0xe] %vm2616_vm8, %v2583_v2  ;;  %v2098_v13 = vmax.f32 %v1978_v5, %v1986_v39  ;;  %v2099_v14 = vmax.f32 %v1979_v6, %v1987_v32  ;;  %v15169_v16 = vrot.slane %v1031_v0, 9  ;;  %v734_v17 = vadd.f32 %v18523_v30, %v18538_v7 }
 0x12a   : > { %2619 = vst.msk [vmem:[#allocation2 + $0x14] sm:$0x1] %vm2618_vm9, %v2584_v3  ;;  %v2100_v18 = vmax.f32 %v1980_v8, %v1988_v44  ;;  %v16471_v19 = vpack.c.bf16 %v2097_v9, %v2097_v9  ;;  %v1040_v21 = vcombine.high %v1038_v11, %v1038_v11  ;;  %v15170_v22 = vrot.slane %v1039_v12, 9 }
 0x12b   : > { %v16472_v23 = vpack.c.bf16 %v2098_v13, %v2098_v13  ;;  %v16473_v25 = vpack.c.bf16 %v2099_v14, %v2099_v14  ;;  %v15171_v26 = vrot.slane %v1038_v11, 9  ;;  %v1989_v27 = vmax.f32 %v1031_v0, %v15169_v16  ;;  %v18588_v28 = vpop.f32.mrb[20].mxu0 }
 0x12c   : > { %v16474_v34 = vpack.c.bf16 %v2100_v18, %v2100_v18  ;;  %v2417_v36 = vunpack.c.l.b16 %v16471_v19  ;;  %v15172_v38 = vrot.slane %v1040_v21, 9  ;;  %v1990_v35 = vmax.f32 %v1039_v12, %v15170_v22  ;;  %v18590_v39 = vpop.f32.mrb[21].mxu0 }
 0x12d   : > { %v2418_v32 = vunpack.c.l.b16 %v16472_v23  ;;  %v2419_v40 = vunpack.c.l.b16 %v16473_v25  ;;  %v1991_v41 = vmax.f32 %v1038_v11, %v15171_v26  ;;  %v846_v7 = vmax.f32 %v734_v17, 0.0  ;;  %v18592_v43 = vpop.f32.mrb[22].mxu0 }
 0x12e   : > { %v2420_v44 = vunpack.c.l.b16 %v16474_v34  ;;  %v2492_v45 = vrot.slane %v2417_v36, 6  ;;  %v1992_v46 = vmax.f32 %v1040_v21, %v15172_v38  ;;  %v755_v49 = vadd.f32 %v18540_v31, %v18523_v30  ;;  %v18596_v51 = vpop.f32.mrb[23].mxu0 }
 0x12f   : > { %v2493_v53 = vrot.slane %v2418_v32, 5  ;;  %v2495_v54 = vrot.slane %v2419_v40, 4  ;;  %v990_v55 = vcombine.high %v846_v7, %v846_v7  ;;  %v997_v57 = vrot.slane %v846_v7, %v18527_v33 }
 0x130   : > { %v2497_v47 = vrot.slane %v2420_v44, 3  ;;  %v851_v59 = vmax.f32 %v755_v49, 0.0  ;;  %v747_v60 = vadd.f32 %v18523_v30, %v18542_v37  ;;  %v758_v56 = vadd.f32 %v18544_v42, %v18523_v30 }
 0x131   : > { %v2494_v52 = vsel %vm2475_vm2, %v2493_v53, %v2492_v45  ;;  %v1004_v62 = vrot.slane %v990_v55, %v18527_v33  ;;  %v1005_v31 = vcombine.high %v997_v57, %v997_v57  ;;  %v15161_v63 = vrot.slane %v997_v57, 9 }
 0x132   : > { %v2496_v0 = vsel %vm2478_vm3, %v2495_v54, %v2494_v52  ;;  %v1075_v2 = vcombine.high %v851_v59, %v851_v59  ;;  %v1082_v3 = vrot.slane %v851_v59, %v18527_v33  ;;  %v849_v5 = vmax.f32 %v747_v60, 0.0 }
 0x133   : > { %v1006_v6 = vcombine.high %v1004_v62, %v1004_v62  ;;  %v15162_v8 = vrot.slane %v1005_v31, 9  ;;  %v15163_v9 = vrot.slane %v1004_v62, 9  ;;  %v1981_v11 = vmax.f32 %v997_v57, %v15161_v63  ;;  %v18607_v37 = vpop.f32.mrb[24].mxu0 }
 0x134   : > { %v2498_v42 = vsel %vm2481_vm4, %v2497_v47, %v2496_v0  ;;  %v1089_v12 = vrot.slane %v1075_v2, %v18527_v33  ;;  %v1090_v13 = vcombine.high %v1082_v3, %v1082_v3  ;;  %v15181_v14 = vrot.slane %v1082_v3, 9  ;;  %v18611_v16 = vpop.f32.mrb[25].mxu0 }
 0x135   : > { %v15164_v17 = vrot.slane %v1006_v6, 9  ;;  %v1982_v18 = vmax.f32 %v1005_v31, %v15162_v8  ;;  %v1983_v19 = vmax.f32 %v1004_v62, %v15163_v9  ;;  %v2101_v21 = vmax.f32 %v1981_v11, %v1989_v27  ;;  %v18613_v22 = vpop.f32.mrb[26].mxu0 }
 0x136   : > { %v1091_v23 = vcombine.high %v1089_v12, %v1089_v12  ;;  %v15182_v25 = vrot.slane %v1090_v13, 9  ;;  %v15183_v26 = vrot.slane %v1089_v12, 9  ;;  %v2001_v34 = vmax.f32 %v1082_v3, %v15181_v14  ;;  %v18615_v36 = vpop.f32.mrb[27].mxu0 }
 0x137   : > { %v1984_v38 = vmax.f32 %v1006_v6, %v15164_v17  ;;  %v2102_v32 = vmax.f32 %v1982_v18, %v1990_v35  ;;  %v2103_v40 = vmax.f32 %v1983_v19, %v1991_v41  ;;  %v16475_v7 = vpack.c.bf16 %v2101_v21, %v2101_v21 }
 0x138   : > { %v15184_v44 = vrot.slane %v1091_v23, 9  ;;  %v2002_v45 = vmax.f32 %v1090_v13, %v15182_v25  ;;  %v2003_v49 = vmax.f32 %v1089_v12, %v15183_v26  ;;  %v1041_v53 = vcombine.high %v849_v5, %v849_v5 }
 0x139   : > { %v2104_v54 = vmax.f32 %v1984_v38, %v1992_v46  ;;  %v16476_v55 = vpack.c.bf16 %v2102_v32, %v2102_v32  ;;  %v16477_v57 = vpack.c.bf16 %v2103_v40, %v2103_v40  ;;  %v2421_v27 = vunpack.c.l.b16 %v16475_v7 }
 0x13a   : > { %v2004_v47 = vmax.f32 %v1091_v23, %v15184_v44  ;;  %v1048_v59 = vrot.slane %v849_v5, %v18527_v33  ;;  %v1055_v60 = vrot.slane %v1041_v53, %v18527_v33  ;;  %v852_v52 = vmax.f32 %v758_v56, 0.0 }
 0x13b   : > { %v16478_v62 = vpack.c.bf16 %v2104_v54, %v2104_v54  ;;  %v2422_v31 = vunpack.c.l.b16 %v16476_v55  ;;  %v2423_v63 = vunpack.c.l.b16 %v16477_v57  ;;  %v2499_v35 = vrot.slane %v2421_v27, 2 }
 0x13c   : > { %v1056_v41 = vcombine.high %v1048_v59, %v1048_v59  ;;  %v1057_v0 = vcombine.high %v1055_v60, %v1055_v60  ;;  %v15173_v2 = vrot.slane %v1048_v59, 9  ;;  %v15175_v3 = vrot.slane %v1055_v60, 9 }
 0x13d   : > { %v2424_v6 = vunpack.c.l.b16 %v16478_v62  ;;  %v2500_v46 = vsel %vm2484_vm5, %v2499_v35, %v2498_v42  ;;  %v2501_v8 = vrot.slane %v2422_v31, 1  ;;  %v1092_v9 = vcombine.high %v852_v52, %v852_v52 }
 0x13e   : > { %v15174_v11 = vrot.slane %v1056_v41, 9  ;;  %v15176_v12 = vrot.slane %v1057_v0, 9  ;;  %v1993_v13 = vmax.f32 %v1048_v59, %v15173_v2  ;;  %v1995_v5 = vmax.f32 %v1055_v60, %v15175_v3 }
 0x13f   : > { %v2502_v14 = vsel %vm2487_vm6, %v2501_v8, %v2500_v46  ;;  %v2503_v56 = vrot.slane %v2424_v6, 7  ;;  %v1099_v17 = vrot.slane %v852_v52, %v18527_v33  ;;  %v1106_v18 = vrot.slane %v1092_v9, %v18527_v33 }
 0x140   : > { %v2585_v19 = vpack.c.b16 %v2502_v14, %v2502_v14  ;;  %v1994_v21 = vmax.f32 %v1056_v41, %v15174_v11  ;;  %v1996_v23 = vmax.f32 %v1057_v0, %v15176_v12  ;;  %v2105_v25 = vmax.f32 %v1993_v13, %v2001_v34 }
 0x141   : > { %v2504_v26 = vsel %vm2490_vm7, %v2503_v56, %v2423_v63  ;;  %v2107_v42 = vmax.f32 %v1995_v5, %v2003_v49  ;;  %v1107_v38 = vcombine.high %v1099_v17, %v1099_v17  ;;  %v1108_v32 = vcombine.high %v1106_v18, %v1106_v18 }
 0x142   : > { %v2586_v40 = vpack.c.b16 %v2504_v26, %v2504_v26  ;;  %2620 = vst.msk [vmem:[#allocation2 + $0x18] sm:$0xe] %vm2616_vm8, %v2585_v19  ;;  %v2106_v7 = vmax.f32 %v1994_v21, %v2002_v45  ;;  %v2108_v44 = vmax.f32 %v1996_v23, %v2004_v47  ;;  %v16479_v53 = vpack.c.bf16 %v2105_v25, %v2105_v25 }
 0x143   : > { %v16481_v54 = vpack.c.bf16 %v2107_v42, %v2107_v42  ;;  %v15185_v55 = vrot.slane %v1099_v17, 9  ;;  %v15186_v57 = vrot.slane %v1107_v38, 9  ;;  %v15187_v27 = vrot.slane %v1106_v18, 9 }
 0x144   : > { %2621 = vst.msk [vmem:[#allocation2 + $0x1c] sm:$0x1] %vm2618_vm9, %v2586_v40  ;;  %v16480_v59 = vpack.c.bf16 %v2106_v7, %v2106_v7  ;;  %v16482_v60 = vpack.c.bf16 %v2108_v44, %v2108_v44  ;;  %v2425_v34 = vunpack.c.l.b16 %v16479_v53  ;;  %v15188_v52 = vrot.slane %v1108_v32, 9 }
 0x145   : > { %v2427_v62 = vunpack.c.l.b16 %v16481_v54  ;;  %v2005_v49 = vmax.f32 %v1099_v17, %v15185_v55  ;;  %v2006_v31 = vmax.f32 %v1107_v38, %v15186_v57  ;;  %v2007_v63 = vmax.f32 %v1106_v18, %v15187_v27 }
 0x146   : > { %v2426_v35 = vunpack.c.l.b16 %v16480_v59  ;;  %v2428_v41 = vunpack.c.l.b16 %v16482_v60  ;;  %v2505_v0 = vrot.slane %v2425_v34, 6  ;;  %v2008_v45 = vmax.f32 %v1108_v32, %v15188_v52 }
 0x147   : > { %v2508_v47 = vrot.slane %v2427_v62, 4  ;;  %v750_v2 = vadd.f32 %v18523_v30, %v18550_v48  ;;  %v771_v3 = vadd.f32 %v18557_v4, %v18523_v30  ;;  %v763_v6 = vadd.f32 %v18523_v30, %v18559_v10 }
 0x148   : > { %v2506_v46 = vrot.slane %v2426_v35, 5  ;;  %v2510_v8 = vrot.slane %v2428_v41, 3  ;;  %v774_v9 = vadd.f32 %v18562_v15, %v18523_v30  ;;  %v766_v11 = vadd.f32 %v18523_v30, %v18565_v20  ;;  %v17977_v15 = vld [vmem:[%s21499_s3] sm:$0xff]  }
 0x149   : > { %v850_v12 = vmax.f32 %v750_v2, 0.0  ;;  %v855_v13 = vmax.f32 %v771_v3, 0.0  ;;  %v853_v5 = vmax.f32 %v763_v6, 0.0  ;;  %v18638_v48 = vadd.f32 %v18568_v50, %v18523_v30  ;;  %16976 = vmatprep.subr.bf16.mxu1 %v17977_v15 }
 0x14a   : > { %v2507_v4 = vsel %vm2475_vm2, %v2506_v46, %v2505_v0  ;;  %v18641_v14 = vmax.f32 %v774_v9, 0.0  ;;  %v18643_v10 = vmax.f32 %v766_v11, 0.0  ;;  %v18647_v56 = vadd.f32 %v18523_v30, %v18574_v58 }
 0x14b   : > { %v2509_v20 = vsel %vm2478_vm3, %v2508_v47, %v2507_v4  ;;  %v1058_v17 = vcombine.high %v850_v12, %v850_v12  ;;  %v1065_v50 = vrot.slane %v850_v12, %v18527_v33  ;;  %v1143_v18 = vcombine.high %v855_v13, %v855_v13 }
 0x14c   : > { %v2511_v19 = vsel %vm2481_vm4, %v2510_v8, %v2509_v20  ;;  %v1150_v21 = vrot.slane %v855_v13, %v18527_v33  ;;  %v1109_v23 = vcombine.high %v853_v5, %v853_v5  ;;  %v1116_v25 = vrot.slane %v853_v5, %v18527_v33 }
 0x14d   : > { %v1072_v58 = vrot.slane %v1058_v17, %v18527_v33  ;;  %v1073_v26 = vcombine.high %v1065_v50, %v1065_v50  ;;  %v15177_v42 = vrot.slane %v1065_v50, 9  ;;  %v1157_v38 = vrot.slane %v1143_v18, %v18527_v33 }
 0x14e   : > { %v1158_v32 = vcombine.high %v1150_v21, %v1150_v21  ;;  %v15197_v40 = vrot.slane %v1150_v21, 9  ;;  %v1123_v7 = vrot.slane %v1109_v23, %v18527_v33  ;;  %v1124_v44 = vcombine.high %v1116_v25, %v1116_v25 }
 0x14f   : > { %v1074_v53 = vcombine.high %v1072_v58, %v1072_v58  ;;  %v15178_v54 = vrot.slane %v1073_v26, 9  ;;  %v15179_v55 = vrot.slane %v1072_v58, 9  ;;  %v1997_v57 = vmax.f32 %v1065_v50, %v15177_v42 }
 0x150   : > { %v1159_v27 = vcombine.high %v1157_v38, %v1157_v38  ;;  %v15198_v59 = vrot.slane %v1158_v32, 9  ;;  %v15199_v60 = vrot.slane %v1157_v38, 9  ;;  %v2017_v34 = vmax.f32 %v1150_v21, %v15197_v40 }
 0x151   : > { %v15180_v52 = vrot.slane %v1074_v53, 9  ;;  %v1998_v62 = vmax.f32 %v1073_v26, %v15178_v54  ;;  %v1999_v35 = vmax.f32 %v1072_v58, %v15179_v55  ;;  %v2109_v41 = vmax.f32 %v1997_v57, %v2005_v49 }
 0x152   : > { %v15200_v0 = vrot.slane %v1159_v27, 9  ;;  %v2018_v47 = vmax.f32 %v1158_v32, %v15198_v59  ;;  %v2019_v2 = vmax.f32 %v1157_v38, %v15199_v60  ;;  %v1125_v3 = vcombine.high %v1123_v7, %v1123_v7 }
 0x153   : > { %v2000_v6 = vmax.f32 %v1074_v53, %v15180_v52  ;;  %v2110_v46 = vmax.f32 %v1998_v62, %v2006_v31  ;;  %v2111_v8 = vmax.f32 %v1999_v35, %v2007_v63  ;;  %v16483_v9 = vpack.c.bf16 %v2109_v41, %v2109_v41 }
 0x154   : > { %v2020_v11 = vmax.f32 %v1159_v27, %v15200_v0  ;;  %v15189_v12 = vrot.slane %v1116_v25, 9  ;;  %v15190_v13 = vrot.slane %v1124_v44, 9  ;;  %v15191_v5 = vrot.slane %v1123_v7, 9 }
 0x155   : > { %v2112_v4 = vmax.f32 %v2000_v6, %v2008_v45  ;;  %v16484_v15 = vpack.c.bf16 %v2110_v46, %v2110_v46  ;;  %v16485_v20 = vpack.c.bf16 %v2111_v8, %v2111_v8  ;;  %v2429_v17 = vunpack.c.l.b16 %v16483_v9 }
 0x156   : > { %v15192_v50 = vrot.slane %v1125_v3, 9  ;;  %v2009_v18 = vmax.f32 %v1116_v25, %v15189_v12  ;;  %v2010_v21 = vmax.f32 %v1124_v44, %v15190_v13  ;;  %v2011_v49 = vmax.f32 %v1123_v7, %v15191_v5 }
 0x157   : > { %v16486_v23 = vpack.c.bf16 %v2112_v4, %v2112_v4  ;;  %v2430_v58 = vunpack.c.l.b16 %v16484_v15  ;;  %v2431_v26 = vunpack.c.l.b16 %v16485_v20  ;;  %v2512_v42 = vrot.slane %v2429_v17, 2 }
 0x158   : > { %v2012_v38 = vmax.f32 %v1125_v3, %v15192_v50  ;;  %v2113_v31 = vmax.f32 %v2009_v18, %v2017_v34  ;;  %v2114_v63 = vmax.f32 %v2010_v21, %v2018_v47  ;;  %v2115_v32 = vmax.f32 %v2011_v49, %v2019_v2 }
 0x159   : > { %v2432_v40 = vunpack.c.l.b16 %v16486_v23  ;;  %v2513_v53 = vsel %vm2484_vm5, %v2512_v42, %v2511_v19  ;;  %v2514_v54 = vrot.slane %v2430_v58, 1  ;;  %v1160_v45 = vcombine.high %v18641_v14, %v18641_v14 }
 0x15a   : > { %v2116_v55 = vmax.f32 %v2012_v38, %v2020_v11  ;;  %v16487_v57 = vpack.c.bf16 %v2113_v31, %v2113_v31  ;;  %v16488_v25 = vpack.c.bf16 %v2114_v63, %v2114_v63  ;;  %v16489_v44 = vpack.c.bf16 %v2115_v32, %v2115_v32 }
 0x15b   : > { %v2515_v7 = vsel %vm2487_vm6, %v2514_v54, %v2513_v53  ;;  %v2516_v27 = vrot.slane %v2432_v40, 7  ;;  %v1167_v59 = vrot.slane %v18641_v14, %v18527_v33  ;;  %v1174_v60 = vrot.slane %v1160_v45, %v18527_v33 }
 0x15c   : > { %v2587_v34 = vpack.c.b16 %v2515_v7, %v2515_v7  ;;  %v16490_v52 = vpack.c.bf16 %v2116_v55, %v2116_v55  ;;  %v2433_v62 = vunpack.c.l.b16 %v16487_v57  ;;  %v2434_v19 = vunpack.c.l.b16 %v16488_v25 }
 0x15d   : > { %v2517_v35 = vsel %vm2490_vm7, %v2516_v27, %v2431_v26  ;;  %v2435_v41 = vunpack.c.l.b16 %v16489_v44  ;;  %v1175_v0 = vcombine.high %v1167_v59, %v1167_v59  ;;  %v1176_v47 = vcombine.high %v1174_v60, %v1174_v60 }
 0x15e   : > { %v2588_v2 = vpack.c.b16 %v2517_v35, %v2517_v35  ;;  %2622 = vst.msk [vmem:[#allocation2 + $0x20] sm:$0xe] %vm2616_vm8, %v2587_v34  ;;  %v2436_v3 = vunpack.c.l.b16 %v16490_v52  ;;  %v2518_v6 = vrot.slane %v2433_v62, 6  ;;  %v2519_v46 = vrot.slane %v2434_v19, 5  ;;  %v18690_v19 = vpop.f32.mrb[28].mxu0 }
 0x15f   : > { %v2521_v8 = vrot.slane %v2435_v41, 4  ;;  %v15201_v9 = vrot.slane %v1167_v59, 9  ;;  %v15202_v14 = vrot.slane %v1175_v0, 9  ;;  %v15203_v11 = vrot.slane %v1174_v60, 9 }
 0x160   : > { %2623 = vst.msk [vmem:[#allocation2 + $0x24] sm:$0x1] %vm2618_vm9, %v2588_v2  ;;  %v2520_v12 = vsel %vm2475_vm2, %v2519_v46, %v2518_v6  ;;  %v2523_v13 = vrot.slane %v2436_v3, 3  ;;  %v15204_v5 = vrot.slane %v1176_v47, 9  ;;  %v1126_v4 = vcombine.high %v18643_v10, %v18643_v10  ;;  %v18692_v2 = vpop.f32.mrb[29].mxu0 }
 0x161   : > { %v2522_v15 = vsel %vm2478_vm3, %v2521_v8, %v2520_v12  ;;  %v2021_v20 = vmax.f32 %v1167_v59, %v15201_v9  ;;  %v2022_v17 = vmax.f32 %v1175_v0, %v15202_v14  ;;  %v2023_v50 = vmax.f32 %v1174_v60, %v15203_v11  ;;  %v18694_v9 = vpop.f32.mrb[30].mxu0 }
 0x162   : > { %v2024_v18 = vmax.f32 %v1176_v47, %v15204_v5  ;;  %v1133_v21 = vrot.slane %v18643_v10, %v18527_v33  ;;  %v1140_v49 = vrot.slane %v1126_v4, %v18527_v33  ;;  %v2524_v23 = vsel %vm2481_vm4, %v2523_v13, %v2522_v15 }
 0x163   : > { %v859_v58 = vmax.f32 %v18638_v48, 0.0  ;;  %v857_v26 = vmax.f32 %v18647_v56, 0.0  ;;  %v790_v42 = vadd.f32 %v18576_v61, %v18523_v30  ;;  %v18684_v38 = vadd.f32 %v18523_v30, %v18581_v1 }
 0x164   : > { %v1141_v31 = vcombine.high %v1133_v21, %v1133_v21  ;;  %v1142_v63 = vcombine.high %v1140_v49, %v1140_v49  ;;  %v15193_v32 = vrot.slane %v1133_v21, 9  ;;  %v15195_v40 = vrot.slane %v1140_v49, 9 }
 0x165   : > { %v1211_v10 = vcombine.high %v859_v58, %v859_v58  ;;  %v1218_v53 = vrot.slane %v859_v58, %v18527_v33  ;;  %v1177_v54 = vcombine.high %v857_v26, %v857_v26  ;;  %v1184_v45 = vrot.slane %v857_v26, %v18527_v33 }
 0x166   : > { %v15194_v48 = vrot.slane %v1141_v31, 9  ;;  %v15196_v55 = vrot.slane %v1142_v63, 9  ;;  %v2013_v56 = vmax.f32 %v1133_v21, %v15193_v32  ;;  %v2015_v57 = vmax.f32 %v1140_v49, %v15195_v40 }
 0x167   : > { %v1225_v61 = vrot.slane %v1211_v10, %v18527_v33  ;;  %v1226_v25 = vcombine.high %v1218_v53, %v1218_v53  ;;  %v15213_v44 = vrot.slane %v1218_v53, 9  ;;  %v1191_v30 = vrot.slane %v1177_v54, %v18527_v33 }
 0x168   : > { %v2014_v1 = vmax.f32 %v1141_v31, %v15194_v48  ;;  %v2016_v7 = vmax.f32 %v1142_v63, %v15196_v55  ;;  %v2117_v27 = vmax.f32 %v2013_v56, %v2021_v20  ;;  %v2119_v59 = vmax.f32 %v2015_v57, %v2023_v50 }
 0x169   : > { %v1227_v60 = vcombine.high %v1225_v61, %v1225_v61  ;;  %v15214_v34 = vrot.slane %v1226_v25, 9  ;;  %v15215_v52 = vrot.slane %v1225_v61, 9  ;;  %v2033_v62 = vmax.f32 %v1218_v53, %v15213_v44  ;;  %v18697_v53 = vpop.f32.mrb[31].mxu0 }
 0x16a   : > { %v2118_v35 = vmax.f32 %v2014_v1, %v2022_v17  ;;  %v2120_v41 = vmax.f32 %v2016_v7, %v2024_v18  ;;  %v16491_v0 = vpack.c.bf16 %v2117_v27, %v2117_v27  ;;  %v16493_v47 = vpack.c.bf16 %v2119_v59, %v2119_v59 }
 0x16b   : > { %v15216_v3 = vrot.slane %v1227_v60, 9  ;;  %v2034_v6 = vmax.f32 %v1226_v25, %v15214_v34  ;;  %v2035_v46 = vmax.f32 %v1225_v61, %v15215_v52  ;;  %v1192_v8 = vcombine.high %v1184_v45, %v1184_v45 }
 0x16c   : > { %v16492_v14 = vpack.c.bf16 %v2118_v35, %v2118_v35  ;;  %v16494_v11 = vpack.c.bf16 %v2120_v41, %v2120_v41  ;;  %v2437_v12 = vunpack.c.l.b16 %v16491_v0  ;;  %v2439_v13 = vunpack.c.l.b16 %v16493_v47 }
 0x16d   : > { %v2036_v5 = vmax.f32 %v1227_v60, %v15216_v3  ;;  %v1193_v4 = vcombine.high %v1191_v30, %v1191_v30  ;;  %v15205_v15 = vrot.slane %v1184_v45, 9  ;;  %v15206_v20 = vrot.slane %v1192_v8, 9 }
 0x16e   : > { %v2438_v17 = vunpack.c.l.b16 %v16492_v14  ;;  %v2440_v50 = vunpack.c.l.b16 %v16494_v11  ;;  %v2525_v18 = vrot.slane %v2437_v12, 2  ;;  %v15207_v21 = vrot.slane %v1191_v30, 9 }
 0x16f   : > { %v15208_v49 = vrot.slane %v1193_v4, 9  ;;  %v2025_v58 = vmax.f32 %v1184_v45, %v15205_v15  ;;  %v2026_v26 = vmax.f32 %v1192_v8, %v15206_v20  ;;  %v860_v31 = vmax.f32 %v790_v42, 0.0 }
 0x170   : > { %v2526_v63 = vsel %vm2484_vm5, %v2525_v18, %v2524_v23  ;;  %v2527_v32 = vrot.slane %v2438_v17, 1  ;;  %v2529_v40 = vrot.slane %v2440_v50, 7  ;;  %v2027_v10 = vmax.f32 %v1191_v30, %v15207_v21  ;;  %v18711_v50 = vld [vmem:[%s21498_s2] ss:$0 sm:$0xff] }
 0x171   : > { %v2028_v54 = vmax.f32 %v1193_v4, %v15208_v49  ;;  %v2121_v48 = vmax.f32 %v2025_v58, %v2033_v62  ;;  %v2122_v55 = vmax.f32 %v2026_v26, %v2034_v6  ;;  %v1228_v56 = vcombine.high %v860_v31, %v860_v31 }
 0x172   : > { %v2528_v57 = vsel %vm2487_vm6, %v2527_v32, %v2526_v63  ;;  %v2530_v61 = vsel %vm2490_vm7, %v2529_v40, %v2439_v13  ;;  %v2123_v25 = vmax.f32 %v2027_v10, %v2035_v46  ;;  %v1235_v45 = vrot.slane %v860_v31, %v18527_v33 }
 0x173   : > { %v2589_v44 = vpack.c.b16 %v2528_v57, %v2528_v57  ;;  %v2590_v42 = vpack.c.b16 %v2530_v61, %v2530_v61  ;;  %v2124_v1 = vmax.f32 %v2028_v54, %v2036_v5  ;;  %v16495_v23 = vpack.c.bf16 %v2121_v48, %v2121_v48 }
 0x174   : > { %v16496_v7 = vpack.c.bf16 %v2122_v55, %v2122_v55  ;;  %v16497_v27 = vpack.c.bf16 %v2123_v25, %v2123_v25  ;;  %v1242_v30 = vrot.slane %v1228_v56, %v18527_v33  ;;  %v1243_v59 = vcombine.high %v1235_v45, %v1235_v45 }
 0x175   : > { %2624 = vst.msk [vmem:[#allocation2 + $0x28] sm:$0xe] %vm2616_vm8, %v2589_v44  ;;  %v16498_v60 = vpack.c.bf16 %v2124_v1, %v2124_v1  ;;  %v2441_v34 = vunpack.c.l.b16 %v16495_v23  ;;  %v15217_v52 = vrot.slane %v1235_v45, 9  ;;  %v858_v62 = vmax.f32 %v18684_v38, 0.0 }
 0x176   : > { %2625 = vst.msk [vmem:[#allocation2 + $0x2c] sm:$0x1] %vm2618_vm9, %v2590_v42  ;;  %v2442_v35 = vunpack.c.l.b16 %v16496_v7  ;;  %v2443_v41 = vunpack.c.l.b16 %v16497_v27  ;;  %v1244_v0 = vcombine.high %v1242_v30, %v1242_v30  ;;  %v15218_v47 = vrot.slane %v1243_v59, 9 }
 0x177   : > { %v2444_v3 = vunpack.c.l.b16 %v16498_v60  ;;  %v2531_v6 = vrot.slane %v2441_v34, 6  ;;  %v15219_v46 = vrot.slane %v1242_v30, 9  ;;  %v2037_v8 = vmax.f32 %v1235_v45, %v15217_v52 }
 0x178   : > { %v2532_v14 = vrot.slane %v2442_v35, 5  ;;  %v2534_v11 = vrot.slane %v2443_v41, 4  ;;  %v15220_v12 = vrot.slane %v1244_v0, 9  ;;  %v2038_v13 = vmax.f32 %v1243_v59, %v15218_v47 }
 0x179   : > { %v2536_v5 = vrot.slane %v2444_v3, 3  ;;  %v2039_v4 = vmax.f32 %v1242_v30, %v15219_v46  ;;  %v1194_v15 = vcombine.high %v858_v62, %v858_v62  ;;  %v1201_v20 = vrot.slane %v858_v62, %v18527_v33 }
 0x17a   : > { %v2533_v17 = vsel %vm2475_vm2, %v2532_v14, %v2531_v6  ;;  %v2040_v38 = vmax.f32 %v1244_v0, %v15220_v12  ;;  %v803_v18 = vadd.f32 %v18711_v50, %v18588_v28  ;;  %v795_v21 = vadd.f32 %v18711_v50, %v18590_v39 }
 0x17b   : > { %v2535_v49 = vsel %vm2478_vm3, %v2534_v11, %v2533_v17  ;;  %v1208_v58 = vrot.slane %v1194_v15, %v18527_v33  ;;  %v1209_v26 = vcombine.high %v1201_v20, %v1201_v20  ;;  %v15209_v31 = vrot.slane %v1201_v20, 9 }
 0x17c   : > { %v2537_v63 = vsel %vm2481_vm4, %v2536_v5, %v2535_v49  ;;  %v863_v32 = vmax.f32 %v803_v18, 0.0  ;;  %v861_v40 = vmax.f32 %v795_v21, 0.0  ;;  %v806_v10 = vadd.f32 %v18711_v50, %v18592_v43 }
 0x17d   : > { %v1210_v54 = vcombine.high %v1208_v58, %v1208_v58  ;;  %v15210_v48 = vrot.slane %v1209_v26, 9  ;;  %v15211_v55 = vrot.slane %v1208_v58, 9  ;;  %v2029_v28 = vmax.f32 %v1201_v20, %v15209_v31 }
 0x17e   : > { %v1279_v56 = vcombine.high %v863_v32, %v863_v32  ;;  %v1286_v39 = vrot.slane %v863_v32, %v18527_v33  ;;  %v1245_v57 = vcombine.high %v861_v40, %v861_v40  ;;  %v1252_v61 = vrot.slane %v861_v40, %v18527_v33 }
 0x17f   : > { %v15212_v25 = vrot.slane %v1210_v54, 9  ;;  %v2030_v45 = vmax.f32 %v1209_v26, %v15210_v48  ;;  %v2031_v44 = vmax.f32 %v1208_v58, %v15211_v55  ;;  %v2125_v42 = vmax.f32 %v2029_v28, %v2037_v8 }
 0x180   : > { %v1293_v1 = vrot.slane %v1279_v56, %v18527_v33  ;;  %v1294_v23 = vcombine.high %v1286_v39, %v1286_v39  ;;  %v15229_v7 = vrot.slane %v1286_v39, 9  ;;  %v1259_v43 = vrot.slane %v1245_v57, %v18527_v33 }
 0x181   : > { %v2032_v27 = vmax.f32 %v1210_v54, %v15212_v25  ;;  %v2126_v30 = vmax.f32 %v2030_v45, %v2038_v13  ;;  %v2127_v59 = vmax.f32 %v2031_v44, %v2039_v4  ;;  %v16499_v60 = vpack.c.bf16 %v2125_v42, %v2125_v42 }
 0x182   : > { %v1295_v34 = vcombine.high %v1293_v1, %v1293_v1  ;;  %v15230_v52 = vrot.slane %v1294_v23, 9  ;;  %v15231_v62 = vrot.slane %v1293_v1, 9  ;;  %v2049_v35 = vmax.f32 %v1286_v39, %v15229_v7 }
 0x183   : > { %v2128_v41 = vmax.f32 %v2032_v27, %v2040_v38  ;;  %v16500_v0 = vpack.c.bf16 %v2126_v30, %v2126_v30  ;;  %v16501_v47 = vpack.c.bf16 %v2127_v59, %v2127_v59  ;;  %v2445_v3 = vunpack.c.l.b16 %v16499_v60 }
 0x184   : > { %v15232_v6 = vrot.slane %v1295_v34, 9  ;;  %v2050_v46 = vmax.f32 %v1294_v23, %v15230_v52  ;;  %v2051_v8 = vmax.f32 %v1293_v1, %v15231_v62  ;;  %v1260_v14 = vcombine.high %v1252_v61, %v1252_v61 }
 0x185   : > { %v16502_v11 = vpack.c.bf16 %v2128_v41, %v2128_v41  ;;  %v2446_v12 = vunpack.c.l.b16 %v16500_v0  ;;  %v2447_v5 = vunpack.c.l.b16 %v16501_v47  ;;  %v2538_v15 = vrot.slane %v2445_v3, 2 }
 0x186   : > { %v2052_v20 = vmax.f32 %v1295_v34, %v15232_v6  ;;  %v1261_v13 = vcombine.high %v1259_v43, %v1259_v43  ;;  %v15221_v4 = vrot.slane %v1252_v61, 9  ;;  %v15222_v17 = vrot.slane %v1260_v14, 9 }
 0x187   : > { %v2448_v18 = vunpack.c.l.b16 %v16502_v11  ;;  %v2539_v21 = vsel %vm2484_vm5, %v2538_v15, %v2537_v63  ;;  %v2540_v49 = vrot.slane %v2446_v12, 1  ;;  %v15223_v38 = vrot.slane %v1259_v43, 9 }
 0x188   : > { %v15224_v58 = vrot.slane %v1261_v13, 9  ;;  %v2041_v26 = vmax.f32 %v1252_v61, %v15221_v4  ;;  %v2042_v31 = vmax.f32 %v1260_v14, %v15222_v17  ;;  %v864_v32 = vmax.f32 %v806_v10, 0.0 }
 0x189   : > { %v2541_v40 = vsel %vm2487_vm6, %v2540_v49, %v2539_v21  ;;  %v2542_v54 = vrot.slane %v2448_v18, 7  ;;  %v2043_v48 = vmax.f32 %v1259_v43, %v15223_v38  ;;  %v798_v55 = vadd.f32 %v18711_v50, %v18596_v51 }
 0x18a   : > { %v2591_v28 = vpack.c.b16 %v2541_v40, %v2541_v40  ;;  %v2044_v56 = vmax.f32 %v1261_v13, %v15224_v58  ;;  %v2129_v39 = vmax.f32 %v2041_v26, %v2049_v35  ;;  %v2130_v57 = vmax.f32 %v2042_v31, %v2050_v46 }
 0x18b   : > { %v2543_v25 = vsel %vm2490_vm7, %v2542_v54, %v2447_v5  ;;  %v2131_v63 = vmax.f32 %v2043_v48, %v2051_v8  ;;  %v1296_v45 = vcombine.high %v864_v32, %v864_v32  ;;  %v1303_v44 = vrot.slane %v864_v32, %v18527_v33 }
 0x18c   : > { %v2592_v61 = vpack.c.b16 %v2543_v25, %v2543_v25  ;;  %2626 = vst.msk [vmem:[#allocation2 + $0x30] sm:$0xe] %vm2616_vm8, %v2591_v28  ;;  %v2132_v10 = vmax.f32 %v2044_v56, %v2052_v20  ;;  %v16503_v42 = vpack.c.bf16 %v2129_v39, %v2129_v39  ;;  %v16504_v1 = vpack.c.bf16 %v2130_v57, %v2130_v57 }
 0x18d   : > { %v16505_v23 = vpack.c.bf16 %v2131_v63, %v2131_v63  ;;  %v1310_v7 = vrot.slane %v1296_v45, %v18527_v33  ;;  %v1311_v51 = vcombine.high %v1303_v44, %v1303_v44  ;;  %v15233_v43 = vrot.slane %v1303_v44, 9 }
 0x18e   : > { %2627 = vst.msk [vmem:[#allocation2 + $0x34] sm:$0x1] %vm2618_vm9, %v2592_v61  ;;  %v16506_v27 = vpack.c.bf16 %v2132_v10, %v2132_v10  ;;  %v2449_v30 = vunpack.c.l.b16 %v16503_v42  ;;  %v2450_v59 = vunpack.c.l.b16 %v16504_v1  ;;  %v862_v60 = vmax.f32 %v798_v55, 0.0 }
 0x18f   : > { %v2451_v34 = vunpack.c.l.b16 %v16505_v23  ;;  %v1312_v52 = vcombine.high %v1310_v7, %v1310_v7  ;;  %v15234_v62 = vrot.slane %v1311_v51, 9  ;;  %v15235_v35 = vrot.slane %v1310_v7, 9 }
 0x190   : > { %v2452_v41 = vunpack.c.l.b16 %v16506_v27  ;;  %v2544_v0 = vrot.slane %v2449_v30, 6  ;;  %v2545_v47 = vrot.slane %v2450_v59, 5  ;;  %v2053_v3 = vmax.f32 %v1303_v44, %v15233_v43 }
 0x191   : > { %v2547_v6 = vrot.slane %v2451_v34, 4  ;;  %v15236_v46 = vrot.slane %v1312_v52, 9  ;;  %v2054_v8 = vmax.f32 %v1311_v51, %v15234_v62  ;;  %v2055_v14 = vmax.f32 %v1310_v7, %v15235_v35 }
 0x192   : > { %v2546_v11 = vsel %vm2475_vm2, %v2545_v47, %v2544_v0  ;;  %v2549_v12 = vrot.slane %v2452_v41, 3  ;;  %v1262_v5 = vcombine.high %v862_v60, %v862_v60  ;;  %v1269_v15 = vrot.slane %v862_v60, %v18527_v33 }
 0x193   : > { %v2548_v20 = vsel %vm2478_vm3, %v2547_v6, %v2546_v11  ;;  %v2056_v13 = vmax.f32 %v1312_v52, %v15236_v46  ;;  %v819_v4 = vadd.f32 %v18711_v50, %v18607_v37  ;;  %v811_v17 = vadd.f32 %v18711_v50, %v18611_v16 }
 0x194   : > { %v1276_v18 = vrot.slane %v1262_v5, %v18527_v33  ;;  %v1277_v21 = vcombine.high %v1269_v15, %v1269_v15  ;;  %v15225_v49 = vrot.slane %v1269_v15, 9  ;;  %v2550_v38 = vsel %vm2481_vm4, %v2549_v12, %v2548_v20 }
 0x195   : > { %v867_v58 = vmax.f32 %v819_v4, 0.0  ;;  %v865_v26 = vmax.f32 %v811_v17, 0.0  ;;  %v822_v31 = vadd.f32 %v18711_v50, %v18613_v22  ;;  %v814_v32 = vadd.f32 %v18711_v50, %v18615_v36 }
 0x196   : > { %v1278_v40 = vcombine.high %v1276_v18, %v1276_v18  ;;  %v15226_v54 = vrot.slane %v1277_v21, 9  ;;  %v15227_v37 = vrot.slane %v1276_v18, 9  ;;  %v2045_v48 = vmax.f32 %v1269_v15, %v15225_v49 }
 0x197   : > { %v1347_v55 = vcombine.high %v867_v58, %v867_v58  ;;  %v1354_v16 = vrot.slane %v867_v58, %v18527_v33  ;;  %v1313_v28 = vcombine.high %v865_v26, %v865_v26  ;;  %v1320_v56 = vrot.slane %v865_v26, %v18527_v33 }
 0x198   : > { %v15228_v39 = vrot.slane %v1278_v40, 9  ;;  %v2046_v57 = vmax.f32 %v1277_v21, %v15226_v54  ;;  %v2047_v25 = vmax.f32 %v1276_v18, %v15227_v37  ;;  %v2133_v63 = vmax.f32 %v2045_v48, %v2053_v3 }
 0x199   : > { %v1361_v45 = vrot.slane %v1347_v55, %v18527_v33  ;;  %v1362_v22 = vcombine.high %v1354_v16, %v1354_v16  ;;  %v15245_v44 = vrot.slane %v1354_v16, 9  ;;  %v1327_v36 = vrot.slane %v1313_v28, %v18527_v33 }
 0x19a   : > { %v2048_v61 = vmax.f32 %v1278_v40, %v15228_v39  ;;  %v2134_v10 = vmax.f32 %v2046_v57, %v2054_v8  ;;  %v2135_v42 = vmax.f32 %v2047_v25, %v2055_v14  ;;  %v16507_v1 = vpack.c.bf16 %v2133_v63, %v2133_v63 }
 0x19b   : > { %v1363_v23 = vcombine.high %v1361_v45, %v1361_v45  ;;  %v15246_v7 = vrot.slane %v1362_v22, 9  ;;  %v15247_v51 = vrot.slane %v1361_v45, 9  ;;  %v2065_v43 = vmax.f32 %v1354_v16, %v15245_v44 }
 0x19c   : > { %v2136_v27 = vmax.f32 %v2048_v61, %v2056_v13  ;;  %v16508_v30 = vpack.c.bf16 %v2134_v10, %v2134_v10  ;;  %v16509_v59 = vpack.c.bf16 %v2135_v42, %v2135_v42  ;;  %v2453_v60 = vunpack.c.l.b16 %v16507_v1 }
 0x19d   : > { %v15248_v34 = vrot.slane %v1363_v23, 9  ;;  %v2066_v52 = vmax.f32 %v1362_v22, %v15246_v7  ;;  %v2067_v62 = vmax.f32 %v1361_v45, %v15247_v51  ;;  %v1328_v35 = vcombine.high %v1320_v56, %v1320_v56 }
 0x19e   : > { %v16510_v41 = vpack.c.bf16 %v2136_v27, %v2136_v27  ;;  %v2454_v0 = vunpack.c.l.b16 %v16508_v30  ;;  %v2455_v47 = vunpack.c.l.b16 %v16509_v59  ;;  %v2551_v3 = vrot.slane %v2453_v60, 2 }
 0x19f   : > { %v2068_v6 = vmax.f32 %v1363_v23, %v15248_v34  ;;  %v1329_v46 = vcombine.high %v1327_v36, %v1327_v36  ;;  %v15237_v8 = vrot.slane %v1320_v56, 9  ;;  %v15238_v14 = vrot.slane %v1328_v35, 9 }
 0x1a0   : > { %v2456_v11 = vunpack.c.l.b16 %v16510_v41  ;;  %v2552_v12 = vsel %vm2484_vm5, %v2551_v3, %v2550_v38  ;;  %v2553_v5 = vrot.slane %v2454_v0, 1  ;;  %v15239_v15 = vrot.slane %v1327_v36, 9  ;;  %v18762_v41 = vld [vmem:[#allocation2] sm:$0xf]  ;;  %v18764_v0 = vld [vmem:[#allocation2 + $0x4] sm:$0x1] }
 0x1a1   : > { %v15240_v20 = vrot.slane %v1329_v46, 9  ;;  %v2057_v13 = vmax.f32 %v1320_v56, %v15237_v8  ;;  %v2058_v4 = vmax.f32 %v1328_v35, %v15238_v14  ;;  %v868_v17 = vmax.f32 %v822_v31, 0.0 }
 0x1a2   : > { %v2554_v18 = vsel %vm2487_vm6, %v2553_v5, %v2552_v12  ;;  %v2555_v21 = vrot.slane %v2456_v11, 7  ;;  %v2059_v49 = vmax.f32 %v1327_v36, %v15239_v15  ;;  %v866_v58 = vmax.f32 %v814_v32, 0.0  ;;  %v18767_v11 = vld [vmem:[#allocation2 + $0x8] sm:$0xf] }
 0x1a3   : > { %v2593_v26 = vpack.c.b16 %v2554_v18, %v2554_v18  ;;  %v2060_v40 = vmax.f32 %v1329_v46, %v15240_v20  ;;  %v2137_v54 = vmax.f32 %v2057_v13, %v2065_v43  ;;  %v2138_v37 = vmax.f32 %v2058_v4, %v2066_v52 }
 0x1a4   : > { %v2556_v48 = vsel %vm2490_vm7, %v2555_v21, %v2455_v47  ;;  %v2139_v55 = vmax.f32 %v2059_v49, %v2067_v62  ;;  %v1364_v16 = vcombine.high %v868_v17, %v868_v17  ;;  %v1371_v38 = vrot.slane %v868_v17, %v18527_v33  ;;  %v18773_v21 = vld [vmem:[#allocation2 + $0xc] sm:$0x1] }
 0x1a5   : > { %v2594_v28 = vpack.c.b16 %v2556_v48, %v2556_v48  ;;  %2628 = vst.msk [vmem:[#allocation2 + $0x38] sm:$0xe] %vm2616_vm8, %v2593_v26  ;;  %v2140_v56 = vmax.f32 %v2060_v40, %v2068_v6  ;;  %v16511_v31 = vpack.c.bf16 %v2137_v54, %v2137_v54  ;;  %v16512_v39 = vpack.c.bf16 %v2138_v37, %v2138_v37 }
 0x1a6   : > { %v16513_v57 = vpack.c.bf16 %v2139_v55, %v2139_v55  ;;  %v1378_v25 = vrot.slane %v1364_v16, %v18527_v33  ;;  %v1379_v32 = vcombine.high %v1371_v38, %v1371_v38  ;;  %v15249_v63 = vrot.slane %v1371_v38, 9 }
 0x1a7   : > { %2629 = vst.msk [vmem:[#allocation2 + $0x3c] sm:$0x1] %vm2618_vm9, %v2594_v28  ;;  %v16514_v45 = vpack.c.bf16 %v2140_v56, %v2140_v56  ;;  %v2457_v22 = vunpack.c.l.b16 %v16511_v31  ;;  %v2458_v44 = vunpack.c.l.b16 %v16512_v39  ;;  %v1330_v36 = vcombine.high %v866_v58, %v866_v58 }
 0x1a8   : > { %v2459_v61 = vunpack.c.l.b16 %v16513_v57  ;;  %v1380_v10 = vcombine.high %v1378_v25, %v1378_v25  ;;  %v15250_v42 = vrot.slane %v1379_v32, 9  ;;  %v15251_v1 = vrot.slane %v1378_v25, 9 }
 0x1a9   : > { %v2460_v23 = vunpack.c.l.b16 %v16514_v45  ;;  %v2557_v7 = vrot.slane %v2457_v22, 6  ;;  %v2558_v51 = vrot.slane %v2458_v44, 5  ;;  %v2069_v43 = vmax.f32 %v1371_v38, %v15249_v63  ;;  %v18778_v22 = vld [vmem:[#allocation2 + $0x10] sm:$0xf] }
 0x1aa   : > { %v2560_v27 = vrot.slane %v2459_v61, 4  ;;  %v15252_v30 = vrot.slane %v1380_v10, 9  ;;  %v2070_v59 = vmax.f32 %v1379_v32, %v15250_v42  ;;  %v2071_v60 = vmax.f32 %v1378_v25, %v15251_v1  ;;  %v18786_v42 = vld [vmem:[#allocation2 + $0x18] sm:$0xf]  ;;  %v18788_v1 = vld [vmem:[#allocation2 + $0x14] sm:$0x1] }
 0x1ab   : > { %v2559_v34 = vsel %vm2475_vm2, %v2558_v51, %v2557_v7  ;;  %v2562_v52 = vrot.slane %v2460_v23, 3  ;;  %v1337_v62 = vrot.slane %v866_v58, %v18527_v33  ;;  %v1344_v35 = vrot.slane %v1330_v36, %v18527_v33 }
 0x1ac   : > { %v2561_v47 = vsel %vm2478_vm3, %v2560_v27, %v2559_v34  ;;  %v2072_v3 = vmax.f32 %v1380_v10, %v15252_v30  ;;  %v2656_v5 = vshrl.u32 %v18762_v41, 16  ;;  %v2659_v15 = vshll.u32 %v18762_v41, 16 }
 0x1ad   : > { %v1345_v6 = vcombine.high %v1337_v62, %v1337_v62  ;;  %v1346_v46 = vcombine.high %v1344_v35, %v1344_v35  ;;  %v15241_v8 = vrot.slane %v1337_v62, 9  ;;  %v15243_v14 = vrot.slane %v1344_v35, 9 }
 0x1ae   : > { %v2563_v12 = vsel %vm2481_vm4, %v2562_v52, %v2561_v47  ;;  %v2665_v20 = vshll.u32 %v18764_v0, 16  ;;  %v2658_v49 = vrot.slane %v2656_v5, 4  ;;  %v2661_v58 = vrot.slane %v2659_v15, 5 }
 0x1af   : > { %v15242_v13 = vrot.slane %v1345_v6, 9  ;;  %v15244_v4 = vrot.slane %v1346_v46, 9  ;;  %v2061_v17 = vmax.f32 %v1337_v62, %v15241_v8  ;;  %v2063_v18 = vmax.f32 %v1344_v35, %v15243_v14 }
 0x1b0   : > { %v2667_v26 = vrot.slane %v2665_v20, 5  ;;  %v2670_v40 = vshrl.u32 %v18767_v11, 16  ;;  %v2662_v16 = vor.u32 %v2661_v58, %v2658_v49  ;;  %v2673_v28 = vshll.u32 %v18767_v11, 16  ;;  %v18808_v49 = vld [vmem:[#allocation2 + $0x24] sm:$0x1] }
 0x1b1   : > { %v2062_v54 = vmax.f32 %v1345_v6, %v15242_v13  ;;  %v2064_v37 = vmax.f32 %v1346_v46, %v15244_v4  ;;  %v2141_v48 = vmax.f32 %v2061_v17, %v2069_v43  ;;  %v2143_v55 = vmax.f32 %v2063_v18, %v2071_v60  ;;  %v18798_v46 = vld [vmem:[#allocation2 + $0x1c] sm:$0x1]  ;;  %v18803_v13 = vld [vmem:[#allocation2 + $0x20] sm:$0xf] }
 0x1b2   : > { %v2672_v38 = vrot.slane %v2670_v40, 4  ;;  %v2679_v56 = vshll.u32 %v18773_v21, 16  ;;  %v2663_v32 = vrot.slane %v2662_v16, 4  ;;  %v2675_v63 = vrot.slane %v2673_v28, 5 }
 0x1b3   : > { %v2142_v31 = vmax.f32 %v2062_v54, %v2070_v59  ;;  %v2144_v39 = vmax.f32 %v2064_v37, %v2072_v3  ;;  %v16515_v57 = vpack.c.bf16 %v2141_v48, %v2141_v48  ;;  %v16517_v25 = vpack.c.bf16 %v2143_v55, %v2143_v55  ;;  %v18811_v37 = vld [vmem:[#allocation2 + $0x28] sm:$0xf] }
 0x1b4   : > { %v2681_v45 = vrot.slane %v2679_v56, 5  ;;  %v2668_v7 = vsel %vm18782_vm12, %v2663_v32, %v2667_v26  ;;  %v2676_v51 = vor.u32 %v2675_v63, %v2672_v38  ;;  %v2998_v43 = vrot.slane %v18764_v0, 5  ;;  %v18815_v38 = vld [vmem:[#allocation2 + $0x2c] sm:$0x1] }
 0x1b5   : > { %v16516_v44 = vpack.c.bf16 %v2142_v31, %v2142_v31  ;;  %v16518_v36 = vpack.c.bf16 %v2144_v39, %v2144_v39  ;;  %v2461_v61 = vunpack.c.l.b16 %v16515_v57  ;;  %v2463_v23 = vunpack.c.l.b16 %v16517_v25  ;;  %v18823_v25 = vld [vmem:[#allocation2 + $0x30] sm:$0xf] }
 0x1b6   : > { %v2684_v60 = vshrl.u32 %v18778_v22, 16  ;;  %v2677_v34 = vrot.slane %v2676_v51, 4  ;;  %v2687_v52 = vshll.u32 %v18778_v22, 16  ;;  %v2693_v62 = vshll.u32 %v18788_v1, 16 }
 0x1b7   : > { %v2462_v27 = vunpack.c.l.b16 %v16516_v44  ;;  %v2464_v30 = vunpack.c.l.b16 %v16518_v36  ;;  %v2564_v59 = vrot.slane %v2461_v61, 2  ;;  %v2698_v35 = vshrl.u32 %v18786_v42, 16  ;;  %v18827_v36 = vld [vmem:[#allocation2 + $0x34] sm:$0x1] }
 0x1b8   : > { %v2686_v8 = vrot.slane %v2684_v60, 4  ;;  %v2682_v14 = vsel %vm18782_vm12, %v2677_v34, %v2681_v45  ;;  %v3002_v5 = vrot.slane %v18773_v21, 5  ;;  %v2689_v15 = vrot.slane %v2687_v52, 5 }
 0x1b9   : > { %v2565_v47 = vsel %vm2484_vm5, %v2564_v59, %v2563_v12  ;;  %v2566_v3 = vrot.slane %v2462_v27, 1  ;;  %v2568_v6 = vrot.slane %v2464_v30, 7  ;;  %v2700_v20 = vrot.slane %v2698_v35, 4  ;;  %v18832_v27 = vld [vmem:[#allocation2 + $0x38] sm:$0xf] }
 0x1ba   : > { %v15335_v18 = vcombine.low %v2668_v7, %v2682_v14  ;;  %v2701_v12 = vshll.u32 %v18786_v42, 16  ;;  %v2690_v40 = vor.u32 %v2689_v15, %v2686_v8  ;;  %v2707_v54 = vshll.u32 %v18798_v46, 16  ;;  %v18835_v35 = vld [vmem:[#allocation2 + $0x3c] sm:$0x1] }
 0x1bb   : > { %v2567_v4 = vsel %vm2487_vm6, %v2566_v3, %v2565_v47  ;;  %v2569_v17 = vsel %vm2490_vm7, %v2568_v6, %v2463_v23  ;;  %v2695_v48 = vrot.slane %v2693_v62, 5  ;;  %v3006_v16 = vrot.slane %v18788_v1, 5 }
 0x1bc   : > { %v2595_v58 = vpack.c.b16 %v2567_v4, %v2567_v4  ;;  %v2596_v26 = vpack.c.b16 %v2569_v17, %v2569_v17  ;;  %16968 = vmatprep.mubr.msk.bf16.mxu1 %vm2788_vm13, %v15335_v18  ;;  %v2703_v55 = vrot.slane %v2701_v12, 5  ;;  %v2712_v28 = vshrl.u32 %v18803_v13, 16  ;;  %v18845_v12 = vld [vmem:[%s21499_s3 + $0x10] sm:$0xff]  }
 0x1bd   : > { %v2691_v56 = vrot.slane %v2690_v40, 4  ;;  %v3010_v31 = vrot.slane %v18798_v46, 5  ;;  %v2715_v39 = vshll.u32 %v18803_v13, 16  ;;  %v2721_v57 = vshll.u32 %v18808_v49, 16 }
 0x1be   : > { %2630 = vst.msk [vmem:[#allocation2 + $0x40] sm:$0xe] %vm2616_vm8, %v2595_v58  ;;  %v2704_v32 = vor.u32 %v2703_v55, %v2700_v20  ;;  %v2714_v63 = vrot.slane %v2712_v28, 4  ;;  %v2726_v45 = vshrl.u32 %v18811_v37, 16  ;;  %v2729_v44 = vshll.u32 %v18811_v37, 16 }
 0x1bf   : > { %2631 = vst.msk [vmem:[#allocation2 + $0x44] sm:$0x1] %vm2618_vm9, %v2596_v26  ;;  %v2696_v61 = vsel %vm18782_vm12, %v2691_v56, %v2695_v48  ;;  %v2709_v23 = vrot.slane %v2707_v54, 5  ;;  %v2717_v7 = vrot.slane %v2715_v39, 5  ;;  %v2735_v51 = vshll.u32 %v18815_v38, 16 }
 0x1c0   : > { %v2705_v30 = vrot.slane %v2704_v32, 4  ;;  %v2728_v59 = vrot.slane %v2726_v45, 4  ;;  %v2731_v60 = vrot.slane %v2729_v44, 5  ;;  %v2740_v34 = vshrl.u32 %v18823_v25, 16  ;;  %v18854_v39 = vld [vmem:[#allocation2] sm:$0xe] }
 0x1c1   : > { %v2718_v52 = vor.u32 %v2717_v7, %v2714_v63  ;;  %v2723_v62 = vrot.slane %v2721_v57, 5  ;;  %v2743_v47 = vshll.u32 %v18823_v25, 16  ;;  %v2749_v3 = vshll.u32 %v18827_v36, 16  ;;  %v18856_v57 = vld [vmem:[#allocation2 + $0x8] sm:$0xe]  ;;  %v18219_v63 = vld [vmem:[%s21499_s3] sm:$0xff]  }
 0x1c2   : > { %v2710_v6 = vsel %vm18782_vm12, %v2705_v30, %v2709_v23  ;;  %v2732_v8 = vor.u32 %v2731_v60, %v2728_v59  ;;  %v2742_v14 = vrot.slane %v2740_v34, 4  ;;  %v2754_v15 = vshrl.u32 %v18832_v27, 16  ;;  %v18865_v23 = vld [vmem:[#allocation2 + $0x10] sm:$0xe]  ;;  %v18872_v30 = vld [vmem:[#allocation2 + $0x20] sm:$0xe] }
 0x1c3   : > { %v15336_v20 = vcombine.low %v2696_v61, %v2710_v6  ;;  %v2719_v4 = vrot.slane %v2718_v52, 4  ;;  %v2737_v17 = vrot.slane %v2735_v51, 5  ;;  %v2745_v18 = vrot.slane %v2743_v47, 5  ;;  %v18876_v52 = vld [vmem:[#allocation2 + $0x28] sm:$0xe] }
 0x1c4   : > { %v2733_v58 = vrot.slane %v2732_v8, 4  ;;  %v2756_v26 = vrot.slane %v2754_v15, 4  ;;  %v2757_v40 = vshll.u32 %v18832_v27, 16  ;;  %v2763_v54 = vshll.u32 %v18835_v35, 16 }
 0x1c5   : > { %16969 = vmatmul.mubr.msk.bf16.vlgmr.msra.gmra.mrb[0].mxu1 %vm2788_vm13, %v15336_v20  ;;  %v2724_v48 = vsel %vm18782_vm12, %v2719_v4, %v2723_v62  ;;  %v2746_v55 = vor.u32 %v2745_v18, %v2742_v14  ;;  %v2751_v28 = vrot.slane %v2749_v3, 5  ;;  %v15344_v56 = vcombine.low %v18762_v41, %v18767_v11  ;;  %v18867_v41 = vld [vmem:[#allocation2 + $0x18] sm:$0xe] }
 0x1c6   : > { %v2738_v32 = vsel %vm18782_vm12, %v2733_v58, %v2737_v17  ;;  %16977 = vmatpush3.bf16.msra.mxu1 %v18219_v63  ;;  %v2759_v45 = vrot.slane %v2757_v40, 5  ;;  %v2765_v44 = vrot.slane %v2763_v54, 5  ;;  %v15345_v61 = vcombine.low %v18778_v22, %v18786_v42  ;;  %v18902_v17 = vld [vmem:[#allocation2 + $0x30] sm:$0xe] }
 0x1c7   : > { %v15337_v11 = vcombine.low %v2724_v48, %v2738_v32  ;;  %v2747_v7 = vrot.slane %v2746_v55, 4  ;;  %16986 = vmatprep.subr.bf16.mxu1 %v18845_v12  ;;  %v15346_v51 = vcombine.low %v18803_v13, %v18811_v37  ;;  %v15353_v60 = vrot.slane %v18854_v39, 9 }
 0x1c8   : > { %v2760_v59 = vor.u32 %v2759_v45, %v2756_v26  ;;  %v15354_v34 = vrot.slane %v18856_v57, 9  ;;  %v15347_v47 = vcombine.low %v18823_v25, %v18832_v27  ;;  %v15355_v6 = vrot.slane %v18865_v23, 9 }
 0x1c9   : > { %16972 = vmatprep.mubr.msk.bf16.mxu1 %vm2788_vm13, %v15337_v11  ;;  %v2752_v62 = vsel %vm18782_vm12, %v2747_v7, %v2751_v28  ;;  %v15356_v8 = vrot.slane %v18867_v41, 9  ;;  %v18893_v15 = vsel %vm18883_vm0, %v15353_v60, %v2998_v43  ;;  %v15357_v4 = vrot.slane %v18872_v30, 9 }
 0x1ca   : > { %v2761_v14 = vrot.slane %v2760_v59, 4  ;;  %v18899_v20 = vsel %vm18883_vm0, %v15354_v34, %v3002_v5  ;;  %v18908_v18 = vsel %vm18883_vm0, %v15355_v6, %v3006_v16  ;;  %v3014_v21 = vrot.slane %v18808_v49, 5  ;;  %v18918_v5 = vld [vmem:[#allocation2 + $0x38] sm:$0xe] }
 0x1cb   : > { %v18914_v0 = vsel %vm18883_vm0, %v15356_v8, %v3010_v31  ;;  %v15358_v43 = vrot.slane %v18876_v52, 9  ;;  %v15363_v1 = vcombine.low %v18893_v15, %v18899_v20  ;;  %v3018_v46 = vrot.slane %v18815_v38, 5 }
 0x1cc   : > { %v2766_v58 = vsel %vm18782_vm12, %v2761_v14, %v2765_v44  ;;  %v15364_v16 = vcombine.low %v18908_v18, %v18914_v0  ;;  %v835_v31 = vadd.f32 %v18711_v50, %v18690_v19  ;;  %v827_v49 = vadd.f32 %v18711_v50, %v18692_v2 }
 0x1cd   : > { %v15338_v26 = vcombine.low %v2752_v62, %v2766_v58  ;;  %v838_v40 = vadd.f32 %v18711_v50, %v18694_v9  ;;  %v18935_v54 = vsel %vm18883_vm0, %v15358_v43, %v3018_v46  ;;  %v15359_v48 = vrot.slane %v18902_v17, 9  ;;  %v18968_v43 = vld [vmem:[%s21499_s3 + $0x18] sm:$0xff]  }
 0x1ce   : > { %v3022_v55 = vrot.slane %v18827_v36, 5  ;;  %v15360_v38 = vrot.slane %v18918_v5, 9  ;;  %v18943_v19 = vsel %vm18883_vm0, %v15357_v4, %v3014_v21  ;;  %v871_v2 = vmax.f32 %v835_v31, 0.0 }
 0x1cf   : > { %16973 = vmatmul.mubr.msk.bf16.gmra.mrb[4].mxu1 %vm2788_vm13, %v15338_v26  ;;  %v869_v28 = vmax.f32 %v827_v49, 0.0  ;;  %v872_v32 = vmax.f32 %v838_v40, 0.0  ;;  %v15365_v9 = vcombine.low %v18943_v19, %v18935_v54  ;;  %v3026_v36 = vrot.slane %v18835_v35, 5 }
 0x1d0   : > { %16978 = vmatprep.mubr.msk.bf16.mxu1 %vm2788_vm13, %v15344_v56  ;;  %v18950_v63 = vsel %vm18883_vm0, %v15359_v48, %v3022_v55  ;;  %v830_v45 = vadd.f32 %v18711_v50, %v18697_v53  ;;  %v1415_v44 = vcombine.high %v871_v2, %v871_v2  ;;  %v1422_v11 = vrot.slane %v871_v2, %v18527_v33 }
 0x1d1   : > { %v1381_v7 = vcombine.high %v869_v28, %v869_v28  ;;  %v1388_v59 = vrot.slane %v869_v28, %v18527_v33  ;;  %v1432_v60 = vcombine.high %v872_v32, %v872_v32  ;;  %v1439_v56 = vrot.slane %v872_v32, %v18527_v33 }
 0x1d2   : > { %v18960_v34 = vsel %vm18883_vm0, %v15360_v38, %v3026_v36  ;;  %v870_v62 = vmax.f32 %v830_v45, 0.0  ;;  %v1429_v6 = vrot.slane %v1415_v44, %v18527_v33  ;;  %v1430_v35 = vcombine.high %v1422_v11, %v1422_v11 }
 0x1d3   : > { %v15261_v8 = vrot.slane %v1422_v11, 9  ;;  %v1395_v53 = vrot.slane %v1381_v7, %v18527_v33  ;;  %v1396_v50 = vcombine.high %v1388_v59, %v1388_v59  ;;  %v15253_v14 = vrot.slane %v1388_v59, 9 }
 0x1d4   : > { %v1446_v4 = vrot.slane %v1432_v60, %v18527_v33  ;;  %v1447_v21 = vcombine.high %v1439_v56, %v1439_v56  ;;  %v1431_v58 = vcombine.high %v1429_v6, %v1429_v6  ;;  %v15262_v46 = vrot.slane %v1430_v35, 9 }
 0x1d5   : > { %v15263_v26 = vrot.slane %v1429_v6, 9  ;;  %v2081_v31 = vmax.f32 %v1422_v11, %v15261_v8  ;;  %v1397_v49 = vcombine.high %v1395_v53, %v1395_v53  ;;  %v15254_v40 = vrot.slane %v1396_v50, 9 }
 0x1d6   : > { %v15255_v48 = vrot.slane %v1395_v53, 9  ;;  %v2073_v55 = vmax.f32 %v1388_v59, %v15253_v14  ;;  %v15264_v38 = vrot.slane %v1431_v58, 9  ;;  %v2082_v2 = vmax.f32 %v1430_v35, %v15262_v46 }
 0x1d7   : > { %16979 = vmatmul.mubr.msk.bf16.vlgmr.msra.gmra.mrb[0].mxu1 %vm2788_vm13, %v15345_v61  ;;  %v2083_v28 = vmax.f32 %v1429_v6, %v15263_v26  ;;  %v1448_v32 = vcombine.high %v1446_v4, %v1446_v4  ;;  %v15256_v36 = vrot.slane %v1397_v49, 9  ;;  %v2074_v45 = vmax.f32 %v1396_v50, %v15254_v40 }
 0x1d8   : > { %16987 = vmatpush3.bf16.msra.mxu1 %v18845_v12  ;;  %16982 = vmatprep.mubr.msk.bf16.mxu1 %vm2788_vm13, %v15346_v51  ;;  %v2075_v44 = vmax.f32 %v1395_v53, %v15255_v48  ;;  %v2145_v11 = vmax.f32 %v2073_v55, %v2081_v31  ;;  %v2084_v22 = vmax.f32 %v1431_v58, %v15264_v38  ;;  %v15265_v42 = vrot.slane %v1439_v56, 9 }
 0x1d9   : > { %16996 = vmatprep.subr.bf16.mxu1 %v18968_v43  ;;  %v15266_v61 = vrot.slane %v1447_v21, 9  ;;  %v15267_v7 = vrot.slane %v1446_v4, 9  ;;  %v2076_v59 = vmax.f32 %v1397_v49, %v15256_v36  ;;  %v2146_v60 = vmax.f32 %v2074_v45, %v2082_v2  ;;  %v18993_v36 = vld [vmem:[#allocation2 + $0x4] sm:$0x3] }
 0x1da   : > { %v2147_v6 = vmax.f32 %v2075_v44, %v2083_v28  ;;  %v16519_v35 = vpack.c.bf16 %v2145_v11, %v2145_v11  ;;  %v15268_v12 = vrot.slane %v1448_v32, 9  ;;  %v2085_v8 = vmax.f32 %v1439_v56, %v15265_v42 }
 0x1db   : > { %v2086_v14 = vmax.f32 %v1447_v21, %v15266_v61  ;;  %v2087_v13 = vmax.f32 %v1446_v4, %v15267_v7  ;;  %v2148_v37 = vmax.f32 %v2076_v59, %v2084_v22  ;;  %v16520_v51 = vpack.c.bf16 %v2146_v60, %v2146_v60 }
 0x1dc   : > { %v16521_v46 = vpack.c.bf16 %v2147_v6, %v2147_v6  ;;  %v2465_v50 = vunpack.c.l.b16 %v16519_v35  ;;  %v2088_v53 = vmax.f32 %v1448_v32, %v15268_v12  ;;  %v15366_v26 = vcombine.low %v18950_v63, %v18960_v34  ;;  %v19050_v34 = vld [vmem:[#allocation2 + $0x24] sm:$0x3] }
 0x1dd   : > { %v1398_v58 = vcombine.high %v870_v62, %v870_v62  ;;  %v1405_v31 = vrot.slane %v870_v62, %v18527_v33  ;;  %v16522_v40 = vpack.c.bf16 %v2148_v37, %v2148_v37  ;;  %v2466_v49 = vunpack.c.l.b16 %v16520_v51 }
 0x1de   : > { %v2467_v48 = vunpack.c.l.b16 %v16521_v46  ;;  %v2570_v55 = vrot.slane %v2465_v50, 6  ;;  %v3146_v28 = vshrl.u32 %v18854_v39, 16  ;;  %v3149_v22 = vshll.u32 %v18854_v39, 16  ;;  %v19004_v39 = vld [vmem:[%s21499_s3 + $0x20] sm:$0xff]  }
 0x1df   : > { %16983 = vmatmul.mubr.msk.bf16.gmra.mrb[4].mxu1 %vm2788_vm13, %v15347_v47  ;;  %v1412_v56 = vrot.slane %v1398_v58, %v18527_v33  ;;  %v1413_v4 = vcombine.high %v1405_v31, %v1405_v31  ;;  %v15257_v21 = vrot.slane %v1405_v31, 9  ;;  %v2468_v62 = vunpack.c.l.b16 %v16522_v40 }
 0x1e0   : > { %16988 = vmatprep.mubr.msk.bf16.mxu1 %vm2788_vm13, %v15363_v1  ;;  %v2571_v38 = vrot.slane %v2466_v49, 5  ;;  %v2573_v2 = vrot.slane %v2467_v48, 4  ;;  %v3148_v11 = vrot.slane %v3146_v28, 5  ;;  %v3151_v59 = vrot.slane %v3149_v22, 6 }
 0x1e1   : > { %v1414_v32 = vcombine.high %v1412_v56, %v1412_v56  ;;  %v15258_v25 = vrot.slane %v1413_v4, 9  ;;  %v15259_v27 = vrot.slane %v1412_v56, 9  ;;  %v2077_v47 = vmax.f32 %v1405_v31, %v15257_v21  ;;  %v19011_v31 = vld [vmem:[#allocation2 + $0xc] sm:$0x3] }
 0x1e2   : > { %v2572_v45 = vsel %vm2475_vm2, %v2571_v38, %v2570_v55  ;;  %v2575_v44 = vrot.slane %v2468_v62, 3  ;;  %v3155_v60 = vshrl.u32 %v18993_v36, 16  ;;  %v3158_v37 = vshll.u32 %v18993_v36, 16  ;;  %v19030_v38 = vld [vmem:[#allocation2 + $0x14] sm:$0x3] }
 0x1e3   : > { %v2574_v15 = vsel %vm2478_vm3, %v2573_v2, %v2572_v45  ;;  %v15260_v20 = vrot.slane %v1414_v32, 9  ;;  %v2078_v1 = vmax.f32 %v1413_v4, %v15258_v25  ;;  %v2079_v42 = vmax.f32 %v1412_v56, %v15259_v27 }
 0x1e4   : > { %v2149_v61 = vmax.f32 %v2077_v47, %v2085_v8  ;;  %v2576_v7 = vsel %vm2481_vm4, %v2575_v44, %v2574_v15  ;;  %v3152_v46 = vor.u32 %v3151_v59, %v3148_v11  ;;  %v3157_v50 = vrot.slane %v3155_v60, 5 }
 0x1e5   : > { %v2080_v6 = vmax.f32 %v1414_v32, %v15260_v20  ;;  %v2150_v35 = vmax.f32 %v2078_v1, %v2086_v14  ;;  %v2151_v12 = vmax.f32 %v2079_v42, %v2087_v13  ;;  %v3164_v8 = vshrl.u32 %v18856_v57, 16 }
 0x1e6   : > { %v16523_v51 = vpack.c.bf16 %v2149_v61, %v2149_v61  ;;  %v3160_v40 = vrot.slane %v3158_v37, 6  ;;  %v3153_v48 = vrot.slane %v3152_v46, 4  ;;  %v3167_v18 = vshll.u32 %v18856_v57, 16  ;;  %v19042_v61 = vld [vmem:[#allocation2 + $0x1c] sm:$0x3] }
 0x1e7   : > { %16989 = vmatmul.mubr.msk.bf16.vlgmr.msra.gmra.mrb[0].mxu1 %vm2788_vm13, %v15364_v16  ;;  %v2152_v58 = vmax.f32 %v2080_v6, %v2088_v53  ;;  %v16524_v14 = vpack.c.bf16 %v2150_v35, %v2150_v35  ;;  %v16525_v13 = vpack.c.bf16 %v2151_v12, %v2151_v12  ;;  %v3166_v55 = vrot.slane %v3164_v8, 5 }
 0x1e8   : > { %16997 = vmatpush3.bf16.msra.mxu1 %v18968_v43  ;;  %16992 = vmatprep.mubr.msk.bf16.mxu1 %vm2788_vm13, %v15365_v9  ;;  %v2469_v49 = vunpack.c.l.b16 %v16523_v51  ;;  %v3161_v56 = vor.u32 %v3160_v40, %v3157_v50  ;;  %v3169_v54 = vrot.slane %v3167_v18, 6  ;;  %v3173_v19 = vshrl.u32 %v19011_v31, 16  ;;  %v19059_v18 = vld [vmem:[#allocation2 + $0x2c] sm:$0x3] }
 0x1e9   : > { %v16526_v0 = vpack.c.bf16 %v2152_v58, %v2152_v58  ;;  %v2470_v16 = vunpack.c.l.b16 %v16524_v14  ;;  %v2471_v53 = vunpack.c.l.b16 %v16525_v13  ;;  %17006 = vmatprep.subr.bf16.mxu1 %v19004_v39  ;;  %v3176_v9 = vshll.u32 %v19011_v31, 16 }
 0x1ea   : > { %v2577_v4 = vrot.slane %v2469_v49, 2  ;;  %v3162_v62 = vsel %vm19022_vm11, %v3153_v48, %v3161_v56  ;;  %v3182_v2 = vshrl.u32 %v18865_v23, 16  ;;  %v3170_v32 = vor.u32 %v3169_v54, %v3166_v55 }
 0x1eb   : > { %v2472_v21 = vunpack.c.l.b16 %v16526_v0  ;;  %v2579_v57 = vrot.slane %v2470_v16, 1  ;;  %v3175_v25 = vrot.slane %v3173_v19, 5  ;;  %v3178_v27 = vrot.slane %v3176_v9, 6 }
 0x1ec   : > { %v2578_v28 = vsel %vm2484_vm5, %v2577_v4, %v2576_v7  ;;  %v3184_v44 = vrot.slane %v3182_v2, 5  ;;  %v3185_v11 = vshll.u32 %v18865_v23, 16  ;;  %v3171_v15 = vrot.slane %v3170_v32, 4 }
 0x1ed   : > { %v2580_v47 = vsel %vm2487_vm6, %v2579_v57, %v2578_v28  ;;  %v2581_v45 = vrot.slane %v2472_v21, 7  ;;  %v3179_v20 = vor.u32 %v3178_v27, %v3175_v25  ;;  %v3191_v1 = vshrl.u32 %v19030_v38, 16  ;;  %v19070_v27 = vld [vmem:[#allocation2 + $0x34] sm:$0x3] }
 0x1ee   : > { %v2597_v22 = vpack.c.b16 %v2580_v47, %v2580_v47  ;;  %v3187_v7 = vrot.slane %v3185_v11, 6  ;;  %v3194_v59 = vshll.u32 %v19030_v38, 16  ;;  %v3200_v60 = vshrl.u32 %v18867_v41, 16 }
 0x1ef   : > { %16993 = vmatmul.mubr.msk.bf16.gmra.mrb[4].mxu1 %vm2788_vm13, %v15366_v26  ;;  %v2582_v42 = vsel %vm2490_vm7, %v2581_v45, %v2471_v53  ;;  %v3180_v6 = vsel %vm19022_vm11, %v3171_v15, %v3179_v20  ;;  %v3193_v35 = vrot.slane %v3191_v1, 5  ;;  %v3203_v63 = vshll.u32 %v18867_v41, 16  ;;  %v19076_v45 = vld [vmem:[%s21499_s3 + $0x28] sm:$0xff]   ;;  %v19078_v1 = vld [vmem:[#allocation2 + $0x3c] sm:$0x3] }
 0x1f0   : > { %v2598_v23 = vpack.c.b16 %v2582_v42, %v2582_v42  ;;  %2632 = vst.msk [vmem:[#allocation2 + $0x48] sm:$0xe] %vm2616_vm8, %v2597_v22  ;;  %v15374_v26 = vcombine.low %v3162_v62, %v3180_v6  ;;  %v3188_v12 = vor.u32 %v3187_v7, %v3184_v44  ;;  %v3196_v37 = vrot.slane %v3194_v59, 6 }
 0x1f1   : > { %v3202_v51 = vrot.slane %v3200_v60, 5  ;;  %v3205_v46 = vrot.slane %v3203_v63, 6  ;;  %v3209_v50 = vshrl.u32 %v19042_v61, 16  ;;  %v3212_v8 = vshll.u32 %v19042_v61, 16 }
 0x1f2   : > { %2633 = vst.msk [vmem:[#allocation2 + $0x4c] sm:$0x1] %vm2618_vm9, %v2598_v23  ;;  %v3218_v58 = vshrl.u32 %v18872_v30, 16  ;;  %16998 = vmatprep.mubr.msk.bf16.mxu1 %vm2788_vm13, %v15374_v26  ;;  %v3189_v14 = vrot.slane %v3188_v12, 4  ;;  %v3197_v13 = vor.u32 %v3196_v37, %v3193_v35  ;;  %v3221_v41 = vshll.u32 %v18872_v30, 16 }
 0x1f3   : > { %v3227_v40 = vshrl.u32 %v19050_v34, 16  ;;  %v3206_v49 = vor.u32 %v3205_v46, %v3202_v51  ;;  %v3211_v48 = vrot.slane %v3209_v50, 5  ;;  %v3214_v55 = vrot.slane %v3212_v8, 6 }
 0x1f4   : > { %v3220_v0 = vrot.slane %v3218_v58, 5  ;;  %v3198_v16 = vsel %vm19022_vm11, %v3189_v14, %v3197_v13  ;;  %v3223_v53 = vrot.slane %v3221_v41, 6  ;;  %v3230_v4 = vshll.u32 %v19050_v34, 16  ;;  %v3396_v13 = vld [vmem:[#allocation2 + $0x8] sm:$0xc] }
 0x1f5   : > { %v3229_v56 = vrot.slane %v3227_v40, 5  ;;  %v3207_v54 = vrot.slane %v3206_v49, 4  ;;  %v3215_v19 = vor.u32 %v3214_v55, %v3211_v48  ;;  %v3236_v9 = vshrl.u32 %v18876_v52, 16 }
 0x1f6   : > { %v3239_v30 = vshll.u32 %v18876_v52, 16  ;;  %v3224_v21 = vor.u32 %v3223_v53, %v3220_v0  ;;  %v3232_v57 = vrot.slane %v3230_v4, 6  ;;  %v3245_v62 = vshrl.u32 %v19059_v18, 16 }
 0x1f7   : > { %v3248_v2 = vshll.u32 %v19059_v18, 16  ;;  %v3216_v28 = vsel %vm19022_vm11, %v3207_v54, %v3215_v19  ;;  %v3238_v32 = vrot.slane %v3236_v9, 5  ;;  %v3254_v47 = vshrl.u32 %v18902_v17, 16  ;;  %v18022_v19 = vld [vmem:[%s21501_s5 + $0x18] sm:$0xff]  }
 0x1f8   : > { %v3241_v25 = vrot.slane %v3239_v30, 6  ;;  %v15375_v52 = vcombine.low %v3198_v16, %v3216_v28  ;;  %v3225_v44 = vrot.slane %v3224_v21, 4  ;;  %v3233_v11 = vor.u32 %v3232_v57, %v3229_v56  ;;  %v3398_v21 = vld [vmem:[#allocation2 + $0x18] sm:$0xc]  ;;  %v3397_v28 = vld [vmem:[#allocation2 + $0x10] sm:$0xc] }
 0x1f9   : > { %v3247_v22 = vrot.slane %v3245_v62, 5  ;;  %v3250_v20 = vrot.slane %v3248_v2, 6  ;;  %v3256_v42 = vrot.slane %v3254_v47, 5  ;;  %v3257_v7 = vshll.u32 %v18902_v17, 16  ;;  %v3400_v62 = vld [vmem:[#allocation2 + $0x28] sm:$0xc] }
 0x1fa   : > { %v3242_v15 = vor.u32 %v3241_v25, %v3238_v32  ;;  %16999 = vmatmul.mubr.msk.bf16.vlgmr.msra.gmra.mrb[0].mxu1 %vm2788_vm13, %v15375_v52  ;;  %v3234_v59 = vsel %vm19022_vm11, %v3225_v44, %v3233_v11  ;;  %v3263_v60 = vshrl.u32 %v19070_v27, 16  ;;  %v3266_v23 = vshll.u32 %v19070_v27, 16  ;;  %v3399_v47 = vld [vmem:[#allocation2 + $0x20] sm:$0xc] }
 0x1fb   : > { %v3272_v6 = vshrl.u32 %v18918_v5, 16  ;;  %17007 = vmatpush3.bf16.msra.mxu1 %v19004_v39  ;;  %v3251_v63 = vor.u32 %v3250_v20, %v3247_v22  ;;  %v3259_v26 = vrot.slane %v3257_v7, 6  ;;  %v3275_v12 = vshll.u32 %v18918_v5, 16  ;;  %v3395_v39 = vld [vmem:[#allocation2] sm:$0xc] }
 0x1fc   : > { %v3243_v35 = vrot.slane %v3242_v15, 4  ;;  %v3265_v37 = vrot.slane %v3263_v60, 5  ;;  %v3268_v17 = vrot.slane %v3266_v23, 6  ;;  %v3281_v46 = vshrl.u32 %v19078_v1, 16  ;;  %17016 = vmatprep.subr.bf16.mxu1 %v19076_v45  ;;  %v3402_v7 = vld [vmem:[#allocation2 + $0x38] sm:$0xc] }
 0x1fd   : > { %v3274_v51 = vrot.slane %v3272_v6, 5  ;;  %v3260_v8 = vor.u32 %v3259_v26, %v3256_v42  ;;  %v3277_v58 = vrot.slane %v3275_v12, 6  ;;  %v3284_v14 = vshll.u32 %v19078_v1, 16  ;;  %v3401_v23 = vld [vmem:[#allocation2 + $0x30] sm:$0xc] }
 0x1fe   : > { %v3252_v50 = vsel %vm19022_vm11, %v3243_v35, %v3251_v63  ;;  %v3283_v40 = vrot.slane %v3281_v46, 5  ;;  %vm3419_vm6 = vcmask 1041408   ;;  %vm3420_vm7 = vcmask 1045508   ;;  %v3683_v12 = vld [vmem:[#allocation2 + $0x8] sm:$0xf] }
 0x1ff   : > { %v15376_v41 = vcombine.low %v3234_v59, %v3252_v50  ;;  %v3261_v5 = vrot.slane %v3260_v8, 4  ;;  %v3278_v49 = vor.u32 %v3277_v58, %v3274_v51  ;;  %v3286_v48 = vrot.slane %v3284_v14, 6  ;;  %vm19097_vm8 = vmor %vm3419_vm6, %vm3420_vm7  ;;  %v3689_v14 = vld [vmem:[#allocation2 + $0x20] sm:$0xf] }
 0x200   : > { %v15383_v55 = vrot.slane %v3395_v39, 10  ;;  %v3424_v0 = vrot.slane %v18993_v36, 6  ;;  %v15384_v16 = vrot.slane %v3396_v13, 10  ;;  %v3428_v53 = vrot.slane %v19011_v31, 6 }
 0x201   : > { %17002 = vmatprep.mubr.msk.bf16.mxu1 %vm2788_vm13, %v15376_v41  ;;  %v3269_v56 = vor.u32 %v3268_v17, %v3265_v37  ;;  %v3279_v4 = vrot.slane %v3278_v49, 4  ;;  %v3287_v54 = vor.u32 %v3286_v48, %v3283_v40  ;;  %v15386_v32 = vrot.slane %v3398_v21, 10  ;;  %v3685_v37 = vld [vmem:[#allocation2 + $0x10] sm:$0xf]  ;;  %v19137_v49 = vld [vmem:[#allocation2 + $0xc] sm:$0x1] }
 0x202   : > { %v3425_v9 = vsel %vm19097_vm8, %v15383_v55, %v3424_v0  ;;  %v3429_v30 = vsel %vm19097_vm8, %v15384_v16, %v3428_v53  ;;  %v3436_v25 = vrot.slane %v19042_v61, 6  ;;  %v15388_v52 = vrot.slane %v3400_v62, 10  ;;  %v3693_v40 = vld [vmem:[#allocation2 + $0x30] sm:$0xf]  ;;  %v3691_v0 = vld [vmem:[#allocation2 + $0x28] sm:$0xf] }
 0x203   : > { %v3270_v36 = vsel %vm19022_vm11, %v3261_v5, %v3269_v56  ;;  %v3288_v31 = vsel %vm19022_vm11, %v3279_v4, %v3287_v54  ;;  %v15393_v57 = vcombine.low %v3425_v9, %v3429_v30  ;;  %v3444_v44 = vrot.slane %v19059_v18, 6  ;;  %v3687_v5 = vld [vmem:[#allocation2 + $0x18] sm:$0xf]  ;;  %v19139_v16 = vld [vmem:[#allocation2 + $0x14] sm:$0x1] }
 0x204   : > { %v15377_v2 = vcombine.low %v3270_v36, %v3288_v31  ;;  %v15385_v11 = vrot.slane %v3397_v28, 10  ;;  %v3432_v22 = vrot.slane %v19030_v38, 6  ;;  %v15387_v15 = vrot.slane %v3399_v47, 10  ;;  %v17987_v38 = vld [vmem:[%s21499_s3 + $0x30] sm:$0xff]   ;;  %v17988_v36 = vld [vmem:[#allocation2 + $0x18] ss:$8 sps:$4 sm:$0xff]  }
 0x205   : > { %v3440_v20 = vrot.slane %v19050_v34, 6  ;;  %v3437_v42 = vsel %vm19097_vm8, %v15386_v32, %v3436_v25  ;;  %v3445_v61 = vsel %vm19097_vm8, %v15388_v52, %v3444_v44  ;;  %v15390_v6 = vrot.slane %v3402_v7, 10  ;;  %v19148_v28 = vld [vmem:[#allocation2 + $0x1c] sm:$0x1]  ;;  %v3695_v47 = vld [vmem:[#allocation2 + $0x38] sm:$0xf] }
 0x206   : > { %17003 = vmatmul.mubr.msk.bf16.gmra.mrb[4].mxu1 %vm2788_vm13, %v15377_v2  ;;  %v3433_v59 = vsel %vm19097_vm8, %v15385_v11, %v3432_v22  ;;  %v3452_v35 = vrot.slane %v19078_v1, 6  ;;  %v15389_v63 = vrot.slane %v3401_v23, 10  ;;  %v3448_v26 = vrot.slane %v19070_v27, 6  ;;  %v19146_v2 = vld [vmem:[%s21499_s3 + $0x38] sm:$0xff]   ;;  %v17989_v52 = vld [vmem:[#allocation2 + $0x28] ss:$8 sps:$4 sm:$0xff]  }
 0x207   : > { %17008 = vmatprep.mubr.msk.bf16.mxu1 %vm2788_vm13, %v15393_v57  ;;  %v15394_v60 = vcombine.low %v3433_v59, %v3437_v42  ;;  %v3441_v18 = vsel %vm19097_vm8, %v15387_v15, %v3440_v20  ;;  %v3700_v51 = vshrl.u32 %v3683_v12, 16  ;;  %v3703_v46 = vshll.u32 %v3683_v12, 16  ;;  %v3697_v7 = vld [vmem:[#allocation2 + $0x40] sm:$0xf]  ;;  %v19152_v59 = vld [vmem:[#allocation2 + $0x24] sm:$0x1] }
 0x208   : > { %v15395_v34 = vcombine.low %v3441_v18, %v3445_v61  ;;  %v3453_v17 = vsel %vm19097_vm8, %v15390_v6, %v3452_v35  ;;  %v3714_v50 = vshrl.u32 %v3685_v37, 16  ;;  %v3717_v8 = vshll.u32 %v3685_v37, 16  ;;  %v19158_v12 = vld [vmem:[#allocation2 + $0x2c] sm:$0x1] }
 0x209   : > { %v3449_v1 = vsel %vm19097_vm8, %v15389_v63, %v3448_v26  ;;  %v3702_v39 = vrot.slane %v3700_v51, 4  ;;  %v3705_v27 = vrot.slane %v3703_v46, 5  ;;  %v3742_v48 = vshrl.u32 %v3689_v14, 16  ;;  %v19155_v63 = vld [vmem:[#allocation2 + $0x34] sm:$0x1] }
 0x20a   : > { %v15396_v58 = vcombine.low %v3449_v1, %v3453_v17  ;;  %v3716_v13 = vrot.slane %v3714_v50, 4  ;;  %v3719_v41 = vrot.slane %v3717_v8, 5  ;;  %v3745_v55 = vshll.u32 %v3689_v14, 16 }
 0x20b   : > { %v3709_v53 = vshll.u32 %v19137_v49, 16  ;;  %v3770_v56 = vshrl.u32 %v3693_v40, 16  ;;  %v3773_v4 = vshll.u32 %v3693_v40, 16  ;;  %v3706_v54 = vor.u32 %v3705_v27, %v3702_v39  ;;  %v17990_v39 = vld [vmem:[#allocation2 + $0x38] ss:$8 sps:$4 sm:$0xff]  }
 0x20c   : > { %v3720_v9 = vor.u32 %v3719_v41, %v3716_v13  ;;  %v3728_v30 = vshrl.u32 %v3687_v5, 16  ;;  %v3731_v21 = vshll.u32 %v3687_v5, 16  ;;  %v3756_v31 = vshrl.u32 %v3691_v0, 16  ;;  %v19167_v41 = vld [vmem:[#allocation2 + $0x8] sm:$0xe] }
 0x20d   : > { %v3759_v57 = vshll.u32 %v3691_v0, 16  ;;  %v3723_v62 = vshll.u32 %v19139_v16, 16  ;;  %v3744_v32 = vrot.slane %v3742_v48, 4  ;;  %v3747_v25 = vrot.slane %v3745_v55, 5  ;;  %v19169_v0 = vld [vmem:[#allocation2 + $0x10] sm:$0xe] }
 0x20e   : > { %17009 = vmatmul.mubr.msk.bf16.vlgmr.msra.gmra.mrb[0].mxu1 %vm2788_vm13, %v15394_v60  ;;  %v3711_v44 = vrot.slane %v3709_v53, 5  ;;  %v3772_v11 = vrot.slane %v3770_v56, 4  ;;  %v3775_v22 = vrot.slane %v3773_v4, 5  ;;  %v3707_v15 = vrot.slane %v3706_v54, 4  ;;  %v19172_v54 = vld [vmem:[#allocation2 + $0x44] sm:$0x1] }
 0x20f   : > { %17017 = vmatpush3.bf16.msra.mxu1 %v19076_v45  ;;  %17012 = vmatprep.mubr.msk.bf16.mxu1 %vm2788_vm13, %v15395_v34  ;;  %v17986_v45 = vld [vmem:[#allocation2 + $0x8] ss:$8 sps:$4 sm:$0xff]   ;;  %v3721_v20 = vrot.slane %v3720_v9, 4  ;;  %v3730_v42 = vrot.slane %v3728_v30, 4  ;;  %v3733_v61 = vrot.slane %v3731_v21, 5  ;;  %v3758_v60 = vrot.slane %v3756_v31, 4 }
 0x210   : > { %17026 = vmatprep.subr.bf16.mxu1 %v17987_v38  ;;  %v3761_v18 = vrot.slane %v3759_v57, 5  ;;  %v3784_v23 = vshrl.u32 %v3695_v47, 16  ;;  %v3787_v34 = vshll.u32 %v3695_v47, 16  ;;  %v3725_v6 = vrot.slane %v3723_v62, 5  ;;  %v19175_v21 = vld [vmem:[#allocation2 + $0x3c] sm:$0x1] }
 0x211   : > { %v3748_v35 = vor.u32 %v3747_v25, %v3744_v32  ;;  %v3737_v26 = vshll.u32 %v19148_v28, 16  ;;  %v3776_v37 = vor.u32 %v3775_v22, %v3772_v11  ;;  %v3801_v17 = vshll.u32 %v3697_v7, 16  ;;  %v19186_v22 = vld [vmem:[#allocation2 + $0x18] sm:$0xe] }
 0x212   : > { %v3712_v51 = vsel %vm18782_vm12, %v3707_v15, %v3711_v44  ;;  %v3726_v46 = vsel %vm18782_vm12, %v3721_v20, %v3725_v6  ;;  %v3734_v50 = vor.u32 %v3733_v61, %v3730_v42  ;;  %v3751_v8 = vshll.u32 %v19152_v59, 16  ;;  %v19191_v42 = vld [vmem:[#allocation2 + $0x20] sm:$0xe] }
 0x213   : > { %v3762_v1 = vor.u32 %v3761_v18, %v3758_v60  ;;  %v3789_v14 = vrot.slane %v3787_v34, 5  ;;  %v3749_v27 = vrot.slane %v3748_v35, 4  ;;  %v3765_v13 = vshll.u32 %v19158_v12, 16 }
 0x214   : > { %v15415_v40 = vcombine.low %v3712_v51, %v3726_v46  ;;  %v3777_v5 = vrot.slane %v3776_v37, 4  ;;  %v3803_v55 = vrot.slane %v3801_v17, 5  ;;  %v3735_v53 = vrot.slane %v3734_v50, 4  ;;  %v19208_v17 = vld [vmem:[#allocation2 + $0x28] sm:$0xe] }
 0x215   : > { %v3739_v56 = vrot.slane %v3737_v26, 5  ;;  %v3753_v4 = vrot.slane %v3751_v8, 5  ;;  %v3763_v9 = vrot.slane %v3762_v1, 4  ;;  %v3807_v31 = vshll.u32 %v19172_v54, 16  ;;  %v19211_v46 = vld [vmem:[#allocation2 + $0x30] sm:$0xe] }
 0x216   : > { %17013 = vmatmul.mubr.msk.bf16.gmra.mrb[4].mxu1 %vm2788_vm13, %v15396_v58  ;;  %v3779_v58 = vshll.u32 %v19155_v63, 16  ;;  %v3767_v62 = vrot.slane %v3765_v13, 5  ;;  %v15424_v32 = vrot.slane %v19167_v41, 9  ;;  %v3943_v25 = vrot.slane %v19137_v49, 5 }
 0x217   : > { %17018 = vmatprep.mubr.msk.bf16.mxu1 %vm2788_vm13, %v17986_v45  ;;  %v3786_v45 = vrot.slane %v3784_v23, 4  ;;  %v3754_v57 = vsel %vm18782_vm12, %v3749_v27, %v3753_v4  ;;  %v15425_v44 = vrot.slane %v19169_v0, 9  ;;  %v3947_v11 = vrot.slane %v19139_v16, 5  ;;  %v19200_v16 = vld [vmem:[%s21499_s3 + $0x40] sm:$0xff]  }
 0x218   : > { %v3781_v30 = vrot.slane %v3779_v58, 5  ;;  %v3740_v15 = vsel %vm18782_vm12, %v3735_v53, %v3739_v56  ;;  %v3793_v20 = vshll.u32 %v19175_v21, 16  ;;  %v3768_v49 = vsel %vm18782_vm12, %v3763_v9, %v3767_v62  ;;  %v19241_v56 = vld [vmem:[#allocation2 + $0x14] sm:$0x3] }
 0x219   : > { %v15416_v61 = vcombine.low %v3740_v15, %v3754_v57  ;;  %v3809_v60 = vrot.slane %v3807_v31, 5  ;;  %v3944_v23 = vsel %vm18883_vm0, %v15424_v32, %v3943_v25  ;;  %v15426_v34 = vrot.slane %v19186_v22, 9  ;;  %v19250_v15 = vld [vmem:[#allocation2 + $0x1c] sm:$0x3] }
 0x21a   : > { %v3782_v47 = vsel %vm18782_vm12, %v3777_v5, %v3781_v30  ;;  %v3951_v6 = vrot.slane %v19148_v28, 5  ;;  %v3948_v26 = vsel %vm18883_vm0, %v15425_v44, %v3947_v11  ;;  %v15427_v37 = vrot.slane %v19191_v42, 9  ;;  %v19215_v28 = vld [vmem:[#allocation2 + $0x38] sm:$0xe] }
 0x21b   : > { %v15417_v18 = vcombine.low %v3768_v49, %v3782_v47  ;;  %v3795_v51 = vrot.slane %v3793_v20, 5  ;;  %v4088_v50 = vshrl.u32 %v19167_v41, 16  ;;  %v4091_v8 = vshll.u32 %v19167_v41, 16  ;;  %v19233_v41 = vld [vmem:[#allocation2 + $0x40] sm:$0xe] }
 0x21c   : > { %v4106_v1 = vshrl.u32 %v19169_v0, 16  ;;  %v15430_v53 = vrot.slane %v19215_v28, 9  ;;  %v3967_v57 = vrot.slane %v19175_v21, 5  ;;  %v15431_v62 = vrot.slane %v19233_v41, 9 }
 0x21d   : > { %v4090_v4 = vrot.slane %v4088_v50, 5  ;;  %v4093_v9 = vrot.slane %v4091_v8, 6  ;;  %v3971_v32 = vrot.slane %v19172_v54, 5  ;;  %v4115_v47 = vshrl.u32 %v19241_v56, 16 }
 0x21e   : > { %17019 = vmatmul.mubr.msk.bf16.vlgmr.msra.gmra.mrb[0].mxu1 %vm2788_vm13, %v17988_v36  ;;  %v3790_v36 = vor.u32 %v3789_v14, %v3786_v45  ;;  %v15434_v45 = vcombine.low %v3944_v23, %v3948_v26  ;;  %v15428_v14 = vrot.slane %v19208_v17, 9  ;;  %v4108_v30 = vrot.slane %v4106_v1, 5 }
 0x21f   : > { %17027 = vmatpush3.bf16.msra.mxu1 %v17987_v38  ;;  %17022 = vmatprep.mubr.msk.bf16.mxu1 %vm2788_vm13, %v17989_v52  ;;  %v3798_v38 = vshrl.u32 %v3697_v7, 16  ;;  %v4094_v44 = vor.u32 %v4093_v9, %v4090_v4  ;;  %v4142_v21 = vshrl.u32 %v19191_v42, 16  ;;  %v4145_v20 = vshll.u32 %v19191_v42, 16  ;;  %v19267_v42 = vld [vmem:[#allocation2 + $0x24] sm:$0x3] }
 0x220   : > { %17036 = vmatprep.subr.bf16.mxu1 %v19146_v2  ;;  %v3791_v7 = vrot.slane %v3790_v36, 4  ;;  %v19260_v49 = vsel %vm18883_vm0, %v15430_v53, %v3967_v57  ;;  %v4178_v26 = vshrl.u32 %v19211_v46, 16  ;;  %v19294_v9 = vld [vmem:[#allocation2 + $0x2c] sm:$0x3]  ;;  %vm465_vm9 = vcmask 257024  }
 0x221   : > { %v3800_v48 = vrot.slane %v3798_v38, 4  ;;  %v3955_v38 = vrot.slane %v19152_v59, 5  ;;  %v4109_v59 = vshll.u32 %v19169_v0, 16  ;;  %v3963_v0 = vrot.slane %v19155_v63, 5  ;;  %469 = vst.msk [vmem:[#allocation3 + $0xc] sm:$0xf] %vm465_vm9, %v18299_v24 }
 0x222   : > { %v3796_v58 = vsel %vm18782_vm12, %v3791_v7, %v3795_v51  ;;  %v4118_v63 = vshll.u32 %v19241_v56, 16  ;;  %v19264_v7 = vsel %vm18883_vm0, %v15431_v62, %v3971_v32  ;;  %v4144_v50 = vrot.slane %v4142_v21, 5  ;;  %466 = vst.msk [vmem:[#allocation3] sm:$0xf] %vm465_vm9, %v18299_v24  ;;  %467 = vst.msk [vmem:[#allocation3 + $0x4] sm:$0xf] %vm465_vm9, %v18299_v24 }
 0x223   : > { %v3804_v52 = vor.u32 %v3803_v55, %v3800_v48  ;;  %v3956_v13 = vsel %vm18883_vm0, %v15427_v37, %v3955_v38  ;;  %v3959_v48 = vrot.slane %v19158_v12, 5  ;;  %v15429_v55 = vrot.slane %v19211_v46, 9  ;;  %468 = vst.msk [vmem:[#allocation3 + $0x8] sm:$0xf] %vm465_vm9, %v18299_v24  ;;  %470 = vst.msk [vmem:[#allocation3 + $0x10] sm:$0xf] %vm465_vm9, %v18299_v24 }
 0x224   : > { %v4111_v36 = vrot.slane %v4109_v59, 6  ;;  %v4120_v23 = vrot.slane %v4118_v63, 6  ;;  %v4181_v37 = vshll.u32 %v19211_v46, 16  ;;  %v4095_v38 = vrot.slane %v4094_v44, 4  ;;  %471 = vst.msk [vmem:[#allocation3 + $0x14] sm:$0xf] %vm465_vm9, %v18299_v24 }
 0x225   : > { %v3805_v35 = vrot.slane %v3804_v52, 4  ;;  %v3960_v54 = vsel %vm18883_vm0, %v15428_v14, %v3959_v48  ;;  %v4147_v8 = vrot.slane %v4145_v20, 6  ;;  %v15437_v59 = vcombine.low %v19260_v49, %v19264_v7  ;;  %472 = vst.msk [vmem:[#allocation3 + $0x18] sm:$0xf] %vm465_vm9, %v18299_v24  ;;  %473 = vst.msk [vmem:[#allocation3 + $0x1c] sm:$0xf] %vm465_vm9, %v18299_v24 }
 0x226   : > { %17023 = vmatmul.mubr.msk.bf16.gmra.mrb[4].mxu1 %vm2788_vm13, %v17990_v39  ;;  %v19227_v39 = vld [vmem:[#allocation2 + $0xc] sm:$0x3]  ;;  %v4112_v11 = vor.u32 %v4111_v36, %v4108_v30  ;;  %v4136_v46 = vshll.u32 %v19250_v15, 16  ;;  %v4180_v48 = vrot.slane %v4178_v26, 5  ;;  %v4214_v32 = vshrl.u32 %v19233_v41, 16 }
 0x227   : > { %17028 = vmatprep.mubr.msk.bf16.mxu1 %vm2788_vm13, %v15415_v40  ;;  %v3810_v27 = vsel %vm18782_vm12, %v3805_v35, %v3809_v60  ;;  %v4097_v40 = vshrl.u32 %v19227_v39, 16  ;;  %v4100_v5 = vshll.u32 %v19227_v39, 16  ;;  %v4133_v35 = vshrl.u32 %v19250_v15, 16 }
 0x228   : > { %v15418_v31 = vcombine.low %v3796_v58, %v3810_v27  ;;  %v4113_v51 = vrot.slane %v4112_v11, 4  ;;  %v19278_v58 = vld [vmem:[%s21499_s3 + $0x48] sm:$0xff]   ;;  %v4151_v27 = vshrl.u32 %v19267_v42, 16  ;;  %v4148_v4 = vor.u32 %v4147_v8, %v4144_v50 }
 0x229   : > { %v4099_v12 = vrot.slane %v4097_v40, 5  ;;  %v4102_v25 = vrot.slane %v4100_v5, 6  ;;  %v4154_v5 = vshll.u32 %v19267_v42, 16  ;;  %v4135_v53 = vrot.slane %v4133_v35, 5 }
 0x22a   : > { %v4138_v57 = vrot.slane %v4136_v46, 6  ;;  %v4153_v62 = vrot.slane %v4151_v27, 5  ;;  %v4172_v63 = vshll.u32 %v19294_v9, 16  ;;  %v4196_v21 = vshrl.u32 %v19215_v28, 16 }
 0x22b   : > { %v4103_v60 = vor.u32 %v4102_v25, %v4099_v12  ;;  %v4217_v12 = vshll.u32 %v19233_v41, 16  ;;  %v4156_v25 = vrot.slane %v4154_v5, 6  ;;  %v4199_v20 = vshll.u32 %v19215_v28, 16 }
 0x22c   : > { %v4216_v41 = vrot.slane %v4214_v32, 5  ;;  %v4198_v50 = vrot.slane %v4196_v21, 5  ;;  %vm7829_vm6 = vsmask.f32 3336  ;;  %vm7831_vm7 = vsmask.f32 5392 }
 0x22d   : > { %v4157_v35 = vor.u32 %v4156_v25, %v4153_v62  ;;  %v4201_v8 = vrot.slane %v4199_v20, 6  ;;  %v4342_v20 = vld [vmem:[#allocation2 + $0x30] sm:$0xc] }
 0x22e   : > { %17029 = vmatmul.mubr.msk.bf16.vlgmr.msra.gmra.mrb[0].mxu1 %vm2788_vm13, %v15416_v61  ;;  %v3964_v61 = vsel %vm18883_vm0, %v15429_v55, %v3963_v0  ;;  %v4183_v55 = vrot.slane %v4181_v37, 6  ;;  %v4174_v37 = vrot.slane %v4172_v63, 6 }
 0x22f   : > { %17037 = vmatpush3.bf16.msra.mxu1 %v19146_v2  ;;  %17032 = vmatprep.mubr.msk.bf16.mxu1 %vm2788_vm13, %v15417_v18  ;;  %v3952_v2 = vsel %vm18883_vm0, %v15426_v34, %v3951_v6  ;;  %v4117_v18 = vrot.slane %v4115_v47, 5  ;;  %v4124_v34 = vshrl.u32 %v19186_v22, 16  ;;  %v4127_v6 = vshll.u32 %v19186_v22, 16 }
 0x230   : > { %17046 = vmatprep.subr.bf16.mxu1 %v19200_v16  ;;  %v15435_v52 = vcombine.low %v3952_v2, %v3956_v13  ;;  %v15436_v1 = vcombine.low %v3960_v54, %v3964_v61  ;;  %v4160_v22 = vshrl.u32 %v19208_v17, 16  ;;  %v19284_v13 = vld [vmem:[#allocation2 + $0x34] sm:$0x3]  ;;  %v4169_v47 = vshrl.u32 %v19294_v9, 16 }
 0x231   : > { %v4121_v2 = vor.u32 %v4120_v23, %v4117_v18  ;;  %v4126_v14 = vrot.slane %v4124_v34, 5  ;;  %v4129_v40 = vrot.slane %v4127_v6, 6  ;;  %v4149_v54 = vrot.slane %v4148_v4, 4  ;;  %v19307_v18 = vld [vmem:[#allocation2 + $0x3c] sm:$0x3] }
 0x232   : > { %v4162_v30 = vrot.slane %v4160_v22, 5  ;;  %v4219_v23 = vrot.slane %v4217_v12, 6  ;;  %v4171_v26 = vrot.slane %v4169_v47, 5  ;;  %v4363_v12 = vrot.slane %v19227_v39, 6  ;;  %v4340_v39 = vld [vmem:[#allocation2 + $0x20] sm:$0xc] }
 0x233   : > { %v4122_v0 = vsel %vm19022_vm11, %v4113_v51, %v4121_v2  ;;  %v4130_v11 = vor.u32 %v4129_v40, %v4126_v14  ;;  %v4139_v51 = vor.u32 %v4138_v57, %v4135_v53  ;;  %v4205_v2 = vshrl.u32 %v19307_v18, 16 }
 0x234   : > { %v4208_v14 = vshll.u32 %v19307_v18, 16  ;;  %v4175_v40 = vor.u32 %v4174_v37, %v4171_v26  ;;  %v4367_v47 = vrot.slane %v19241_v56, 6  ;;  %v4379_v37 = vrot.slane %v19294_v9, 6 }
 0x236   : > { %17033 = vmatmul.mubr.msk.bf16.gmra.mrb[4].mxu1 %vm2788_vm13, %v15418_v31  ;;  %v4187_v31 = vshrl.u32 %v19284_v13, 16 }
 0x237   : > { %17038 = vmatprep.mubr.msk.bf16.mxu1 %vm2788_vm13, %v15434_v45  ;;  %v4163_v45 = vshll.u32 %v19208_v17, 16  ;;  %v4104_v17 = vsel %vm19022_vm11, %v4095_v38, %v4103_v60  ;;  %v19305_v60 = vld [vmem:[#allocation2 + $0x44] sm:$0x3]  ;;  %v4131_v38 = vrot.slane %v4130_v11, 4 }
 0x238   : > { %v15445_v44 = vcombine.low %v4104_v17, %v4122_v0  ;;  %v4189_v49 = vrot.slane %v4187_v31, 5  ;;  %v4223_v34 = vshrl.u32 %v19305_v60, 16  ;;  %v4226_v6 = vshll.u32 %v19305_v60, 16  ;;  %v4337_v17 = vld [vmem:[#allocation2 + $0x8] sm:$0xc] }
 0x239   : > { %v4165_v36 = vrot.slane %v4163_v45, 6  ;;  %v4338_v0 = vld [vmem:[#allocation2 + $0x10] sm:$0xc]  ;;  %v15454_v32 = vrot.slane %v4337_v17, 10 }
 0x23a   : > { %v4225_v46 = vrot.slane %v4223_v34, 5  ;;  %v4228_v27 = vrot.slane %v4226_v6, 6  ;;  %v15455_v25 = vrot.slane %v4338_v0, 10  ;;  %v4383_v34 = vrot.slane %v19284_v13, 6  ;;  %v17995_v0 = vld [vmem:[#allocation2 + $0x10] ss:$8 sps:$4 sm:$0xff]  }
 0x23b   : > { %v4166_v61 = vor.u32 %v4165_v36, %v4162_v30  ;;  %v4207_v30 = vrot.slane %v4205_v2, 5  ;;  %v17994_v36 = vld [vmem:[%s21499_s3 + $0x50] sm:$0xff]   ;;  %v4364_v11 = vsel %vm19097_vm8, %v15454_v32, %v4363_v12  ;;  %v19366_v32 = vld [vmem:[#allocation2 + $0x1c] sm:$0x1] }
 0x23c   : > { %v4229_v62 = vor.u32 %v4228_v27, %v4225_v46  ;;  %v4368_v21 = vsel %vm19097_vm8, %v15455_v25, %v4367_v47  ;;  %v4621_v46 = vld [vmem:[#allocation2 + $0x10] sm:$0xf] }
 0x23d   : > { %v4167_v22 = vrot.slane %v4166_v61, 4  ;;  %v15464_v61 = vcombine.low %v4364_v11, %v4368_v21  ;;  %v4641_v17 = vshll.u32 %v4621_v46, 16 }
 0x23e   : > { %17039 = vmatmul.mubr.msk.bf16.vlgmr.msra.gmra.mrb[0].mxu1 %vm2788_vm13, %v15435_v52  ;;  %v4184_v52 = vor.u32 %v4183_v55, %v4180_v48  ;;  %v4140_v48 = vsel %vm19022_vm11, %v4131_v38, %v4139_v51  ;;  %v4202_v55 = vor.u32 %v4201_v8, %v4198_v50  ;;  %v4344_v38 = vld [vmem:[#allocation2 + $0x40] sm:$0xc]  ;;  %v4343_v8 = vld [vmem:[#allocation2 + $0x38] sm:$0xc] }
 0x23f   : > { %17047 = vmatpush3.bf16.msra.mxu1 %v19200_v16  ;;  %17042 = vmatprep.mubr.msk.bf16.mxu1 %vm2788_vm13, %v15436_v1  ;;  %v4190_v16 = vshll.u32 %v19284_v13, 16  ;;  %v4158_v1 = vsel %vm19022_vm11, %v4149_v54, %v4157_v35  ;;  %v4176_v4 = vsel %vm19022_vm11, %v4167_v22, %v4175_v40  ;;  %v4339_v54 = vld [vmem:[#allocation2 + $0x18] sm:$0xc]  ;;  %v4371_v35 = vrot.slane %v19250_v15, 6 }
 0x240   : > { %17056 = vmatprep.subr.bf16.mxu1 %v19278_v58  ;;  %v4185_v28 = vrot.slane %v4184_v52, 4  ;;  %v15446_v53 = vcombine.low %v4140_v48, %v4158_v1  ;;  %v4203_v63 = vrot.slane %v4202_v55, 4  ;;  %v15456_v6 = vrot.slane %v4339_v54, 10  ;;  %v17996_v15 = vld [vmem:[%s21499_s3 + $0x58] sm:$0xff]  }
 0x241   : > { %v4192_v7 = vrot.slane %v4190_v16, 6  ;;  %v4210_v16 = vrot.slane %v4208_v14, 6  ;;  %v15461_v1 = vrot.slane %v4344_v38, 10  ;;  %v4391_v22 = vrot.slane %v19305_v60, 6  ;;  %v4627_v60 = vld [vmem:[#allocation2 + $0x28] sm:$0xf] }
 0x242   : > { %v4372_v51 = vsel %vm19097_vm8, %v15456_v6, %v4371_v35  ;;  %v15460_v2 = vrot.slane %v4343_v8, 10  ;;  %v4387_v14 = vrot.slane %v19307_v18, 6  ;;  %v4638_v55 = vshrl.u32 %v4621_v46, 16  ;;  %v4625_v18 = vld [vmem:[#allocation2 + $0x20] sm:$0xf] }
 0x243   : > { %v4193_v45 = vor.u32 %v4192_v7, %v4189_v49  ;;  %v4211_v52 = vor.u32 %v4210_v16, %v4207_v30  ;;  %v15457_v49 = vrot.slane %v4340_v39, 10  ;;  %v4375_v7 = vrot.slane %v19267_v42, 6  ;;  %v17997_v39 = vld [vmem:[#allocation2 + $0x20] ss:$8 sps:$4 sm:$0xff]   ;;  %v19381_v38 = vld [vmem:[#allocation2 + $0x24] sm:$0x1] }
 0x244   : > { %v4680_v30 = vshrl.u32 %v4627_v60, 16  ;;  %v4640_v16 = vrot.slane %v4638_v55, 4  ;;  %v4666_v25 = vshrl.u32 %v4625_v18, 16  ;;  %v4669_v47 = vshll.u32 %v4625_v18, 16 }
 0x245   : > { %v4194_v5 = vsel %vm19022_vm11, %v4185_v28, %v4193_v45  ;;  %v4212_v56 = vsel %vm19022_vm11, %v4203_v63, %v4211_v52  ;;  %v4376_v28 = vsel %vm19097_vm8, %v15457_v49, %v4375_v7  ;;  %v4623_v45 = vld [vmem:[#allocation2 + $0x18] sm:$0xf]  ;;  %v19368_v63 = vld [vmem:[#allocation2 + $0x14] sm:$0x1]  ;;  %v4661_v54 = vshll.u32 %v19366_v32, 16 }
 0x246   : > { %17043 = vmatmul.mubr.msk.bf16.gmra.mrb[4].mxu1 %vm2788_vm13, %v15437_v59  ;;  %v4220_v59 = vor.u32 %v4219_v23, %v4216_v41  ;;  %v15447_v31 = vcombine.low %v4176_v4, %v4194_v5  ;;  %v4341_v41 = vld [vmem:[#allocation2 + $0x28] sm:$0xc]  ;;  %v15459_v23 = vrot.slane %v4342_v20, 10  ;;  %v15465_v50 = vcombine.low %v4372_v51, %v4376_v28  ;;  %v19376_v49 = vld [vmem:[#allocation2 + $0x2c] sm:$0x1] }
 0x247   : > { %17048 = vmatprep.mubr.msk.bf16.mxu1 %vm2788_vm13, %v15445_v44  ;;  %v15458_v26 = vrot.slane %v4341_v41, 10  ;;  %v4652_v27 = vshrl.u32 %v4623_v45, 16  ;;  %v4655_v40 = vshll.u32 %v4623_v45, 16  ;;  %v4388_v5 = vsel %vm19097_vm8, %v15460_v2, %v4387_v14  ;;  %v4633_v7 = vld [vmem:[#allocation2 + $0x40] sm:$0xf] }
 0x248   : > { %v4221_v57 = vrot.slane %v4220_v59, 4  ;;  %v4384_v42 = vsel %vm19097_vm8, %v15459_v23, %v4383_v34  ;;  %v4392_v59 = vsel %vm19097_vm8, %v15461_v1, %v4391_v22  ;;  %v4682_v52 = vrot.slane %v4680_v30, 4  ;;  %v17998_v41 = vld [vmem:[#allocation2 + $0x30] ss:$8 sps:$4 sm:$0xff]   ;;  %v19385_v2 = vld [vmem:[#allocation2 + $0x3c] sm:$0x1] }
 0x249   : > { %v4380_v13 = vsel %vm19097_vm8, %v15458_v26, %v4379_v37  ;;  %v15467_v48 = vcombine.low %v4388_v5, %v4392_v59  ;;  %v4657_v4 = vrot.slane %v4655_v40, 5  ;;  %v4647_v23 = vshll.u32 %v19368_v63, 16  ;;  %v19390_v40 = vld [vmem:[#allocation2 + $0x34] sm:$0x1] }
 0x24a   : > { %v4230_v44 = vsel %vm19022_vm11, %v4221_v57, %v4229_v62  ;;  %v15466_v9 = vcombine.low %v4380_v13, %v4384_v42  ;;  %v4643_v57 = vrot.slane %v4641_v17, 5  ;;  %v4629_v62 = vld [vmem:[#allocation2 + $0x30] sm:$0xf]  ;;  %v4668_v34 = vrot.slane %v4666_v25, 4  ;;  %v4635_v42 = vld [vmem:[#allocation2 + $0x48] sm:$0xf] }
 0x24b   : > { %v4697_v20 = vshll.u32 %v4629_v62, 16  ;;  %v4671_v6 = vrot.slane %v4669_v47, 5  ;;  %v4722_v13 = vshrl.u32 %v4633_v7, 16  ;;  %v4725_v8 = vshll.u32 %v4633_v7, 16 }
 0x24c   : > { %v4663_v1 = vrot.slane %v4661_v54, 5  ;;  %v4689_v22 = vshll.u32 %v19376_v49, 16  ;;  %v4649_v45 = vrot.slane %v4647_v23, 5  ;;  %v4736_v14 = vshrl.u32 %v4635_v42, 16 }
 0x24d   : > { %v4739_v59 = vshll.u32 %v4635_v42, 16  ;;  %v4672_v46 = vor.u32 %v4671_v6, %v4668_v34  ;;  %v4724_v55 = vrot.slane %v4722_v13, 4  ;;  %v4727_v17 = vrot.slane %v4725_v8, 5  ;;  %v19410_v34 = vld [vmem:[#allocation2 + $0x28] sm:$0xe] }
 0x24e   : > { %17049 = vmatmul.mubr.msk.bf16.vlgmr.msra.gmra.mrb[0].mxu1 %vm2788_vm13, %v15446_v53  ;;  %v4654_v53 = vrot.slane %v4652_v27, 4  ;;  %v4675_v27 = vshll.u32 %v19381_v38, 16  ;;  %v4691_v18 = vrot.slane %v4689_v22, 5  ;;  %v4717_v30 = vshll.u32 %v19385_v2, 16 }
 0x24f   : > { %17057 = vmatpush3.bf16.msra.mxu1 %v19278_v58  ;;  %17052 = vmatprep.mubr.msk.bf16.mxu1 %vm2788_vm13, %v15447_v31  ;;  %v15448_v58 = vcombine.low %v4212_v56, %v4230_v44  ;;  %v4631_v31 = vld [vmem:[#allocation2 + $0x38] sm:$0xf]  ;;  %v4694_v56 = vshrl.u32 %v4629_v62, 16  ;;  %v4738_v62 = vrot.slane %v4736_v14, 4  ;;  %v4673_v25 = vrot.slane %v4672_v46, 4 }
 0x250   : > { %17066 = vmatprep.subr.bf16.mxu1 %v17994_v36  ;;  %v4658_v12 = vor.u32 %v4657_v4, %v4654_v53  ;;  %v4708_v11 = vshrl.u32 %v4631_v31, 16  ;;  %v4711_v21 = vshll.u32 %v4631_v31, 16  ;;  %v17999_v53 = vld [vmem:[#allocation2 + $0x40] ss:$8 sps:$4 sm:$0xff]   ;;  %v4677_v47 = vrot.slane %v4675_v27, 5 }
 0x251   : > { %v4696_v51 = vrot.slane %v4694_v56, 4  ;;  %v4855_v56 = vld [vmem:[#allocation2 + $0x10] sm:$0xe]  ;;  %v4885_v7 = vrot.slane %v19366_v32, 5  ;;  %v19419_v32 = vld [vmem:[#allocation2 + $0x38] sm:$0xe] }
 0x252   : > { %v4659_v35 = vrot.slane %v4658_v12, 4  ;;  %v4710_v37 = vrot.slane %v4708_v11, 4  ;;  %v4713_v28 = vrot.slane %v4711_v21, 5  ;;  %v4741_v12 = vrot.slane %v4739_v59, 5  ;;  %v19432_v59 = vld [vmem:[#allocation2 + $0x30] sm:$0xe] }
 0x253   : > { %v4728_v21 = vor.u32 %v4727_v17, %v4724_v55  ;;  %v4678_v6 = vsel %vm18782_vm12, %v4673_v25, %v4677_v47  ;;  %v4893_v22 = vrot.slane %v19376_v49, 5  ;;  %v4889_v17 = vrot.slane %v19381_v38, 5 }
 0x254   : > { %v4714_v5 = vor.u32 %v4713_v28, %v4710_v37  ;;  %v4742_v23 = vor.u32 %v4741_v12, %v4738_v62  ;;  %v4881_v37 = vrot.slane %v19368_v63, 5  ;;  %v15498_v63 = vrot.slane %v19410_v34, 9 }
 0x255   : > { %v4897_v38 = vrot.slane %v19390_v40, 5 }
 0x256   : > { %17053 = vmatmul.mubr.msk.bf16.gmra.mrb[4].mxu1 %vm2788_vm13, %v15448_v58  ;;  %v4644_v58 = vor.u32 %v4643_v57, %v4640_v16  ;;  %v4703_v16 = vshll.u32 %v19390_v40, 16  ;;  %v19400_v57 = vld [vmem:[#allocation2 + $0x4c] sm:$0x1]  ;;  %v4743_v14 = vrot.slane %v4742_v23, 4 }
 0x257   : > { %17058 = vmatprep.mubr.msk.bf16.mxu1 %vm2788_vm13, %v15464_v61  ;;  %v19374_v61 = vld [vmem:[%s21499_s3 + $0x60] sm:$0xff]  }
 0x25e   : > { %17059 = vmatmul.mubr.msk.bf16.vlgmr.msra.gmra.mrb[0].mxu1 %vm2788_vm13, %v15465_v50  ;;  %v4699_v50 = vrot.slane %v4697_v20, 5  ;;  %v4719_v20 = vrot.slane %v4717_v30, 5  ;;  %v5029_v30 = vshll.u32 %v4855_v56, 16 }
 0x25f   : > { %17067 = vmatpush3.bf16.msra.mxu1 %v17994_v36  ;;  %17062 = vmatprep.mubr.msk.bf16.mxu1 %vm2788_vm13, %v15466_v9  ;;  %v4683_v36 = vshll.u32 %v4627_v60, 16  ;;  %v4645_v9 = vrot.slane %v4644_v58, 4  ;;  %v4745_v58 = vshll.u32 %v19400_v57, 16 }
 0x260   : > { %17076 = vmatprep.subr.bf16.mxu1 %v17996_v15 }
 0x261   : > { %v4685_v44 = vrot.slane %v4683_v36, 5  ;;  %v4650_v4 = vsel %vm18782_vm12, %v4645_v9, %v4649_v45  ;;  %v19397_v36 = vld [vmem:[#allocation2 + $0x44] sm:$0x1]  ;;  %v4747_v13 = vrot.slane %v4745_v58, 5  ;;  %v19426_v9 = vld [vmem:[%s21499_s3 + $0x68] sm:$0xff]   ;;  %v5031_v58 = vrot.slane %v5029_v30, 6 }
 0x263   : > { %v4686_v26 = vor.u32 %v4685_v44, %v4682_v52  ;;  %v4715_v52 = vrot.slane %v4714_v5, 4  ;;  %v15500_v5 = vrot.slane %v19419_v32, 9 }
 0x265   : > { %v4687_v60 = vrot.slane %v4686_v26, 4  ;;  %v15495_v26 = vrot.slane %v4855_v56, 9 }
 0x266   : > { %17063 = vmatmul.mubr.msk.bf16.gmra.mrb[4].mxu1 %vm2788_vm13, %v15467_v48  ;;  %v4700_v48 = vor.u32 %v4699_v50, %v4696_v51  ;;  %v4729_v51 = vrot.slane %v4728_v21, 4 }
 0x267   : > { %17068 = vmatprep.mubr.msk.bf16.mxu1 %vm2788_vm13, %v17995_v0  ;;  %v19392_v0 = vld [vmem:[#allocation2 + $0x18] sm:$0xe]  ;;  %v4692_v44 = vsel %vm18782_vm12, %v4687_v60, %v4691_v18  ;;  %v4882_v27 = vsel %vm18883_vm0, %v15495_v26, %v4881_v37  ;;  %v4901_v60 = vrot.slane %v19385_v2, 5  ;;  %v19454_v2 = vsel %vm18883_vm0, %v15498_v63, %v4893_v22  ;;  %v19485_v26 = vld [vmem:[#allocation2 + $0x24] sm:$0x3] }
 0x268   : > { %v4701_v11 = vrot.slane %v4700_v48, 4  ;;  %v15496_v54 = vrot.slane %v19392_v0, 9  ;;  %v15487_v28 = vcombine.low %v4678_v6, %v4692_v44  ;;  %v5047_v46 = vshll.u32 %v19392_v0, 16  ;;  %v19487_v37 = vld [vmem:[#allocation2 + $0x2c] sm:$0x3] }
 0x269   : > { %v5026_v18 = vshrl.u32 %v4855_v56, 16  ;;  %v4902_v25 = vsel %vm18883_vm0, %v15500_v5, %v4901_v60  ;;  %v5092_v5 = vshll.u32 %v19487_v37, 16  ;;  %v5116_v60 = vshrl.u32 %v19419_v32, 16 }
 0x26a   : > { %v4886_v8 = vsel %vm18883_vm0, %v15496_v54, %v4885_v7  ;;  %v5049_v12 = vrot.slane %v5047_v46, 6 }
 0x26b   : > { %v15505_v48 = vcombine.low %v4882_v27, %v4886_v8 }
 0x26e   : > { %17069 = vmatmul.mubr.msk.bf16.vlgmr.msra.gmra.mrb[0].mxu1 %vm2788_vm13, %v17997_v39  ;;  %v4731_v39 = vshll.u32 %v19397_v36, 16 }
 0x26f   : > { %17077 = vmatpush3.bf16.msra.mxu1 %v17996_v15  ;;  %17072 = vmatprep.mubr.msk.bf16.mxu1 %vm2788_vm13, %v17998_v41  ;;  %v4664_v15 = vsel %vm18782_vm12, %v4659_v35, %v4663_v1  ;;  %v4705_v41 = vrot.slane %v4703_v16, 5  ;;  %v4720_v35 = vsel %vm18782_vm12, %v4715_v52, %v4719_v20  ;;  %v19428_v1 = vld [vmem:[#allocation2 + $0x20] sm:$0xe]  ;;  %v19462_v16 = vld [vmem:[#allocation2 + $0x48] sm:$0xe]  ;;  %v4905_v52 = vrot.slane %v19397_v36, 5 }
 0x270   : > { %17086 = vmatprep.subr.bf16.mxu1 %v19374_v61  ;;  %v15486_v31 = vcombine.low %v4650_v4, %v4664_v15  ;;  %v4733_v50 = vrot.slane %v4731_v39, 5  ;;  %v5044_v15 = vshrl.u32 %v19392_v0, 16  ;;  %v15497_v55 = vrot.slane %v19428_v1, 9  ;;  %v19447_v0 = vld [vmem:[#allocation2 + $0x14] sm:$0x3] }
 0x271   : > { %v4706_v42 = vsel %vm18782_vm12, %v4701_v11, %v4705_v41  ;;  %v19457_v4 = vld [vmem:[#allocation2 + $0x40] sm:$0xe]  ;;  %v15502_v44 = vrot.slane %v19462_v16, 9  ;;  %v4909_v11 = vrot.slane %v19400_v57, 5  ;;  %v5035_v21 = vshrl.u32 %v19447_v0, 16 }
 0x272   : > { %v15488_v45 = vcombine.low %v4706_v42, %v4720_v35  ;;  %v4734_v49 = vsel %vm18782_vm12, %v4729_v51, %v4733_v50  ;;  %v5046_v62 = vrot.slane %v5044_v15, 5  ;;  %v15501_v47 = vrot.slane %v19457_v4, 9 }
 0x273   : > { %v5028_v20 = vrot.slane %v5026_v18, 5  ;;  %v5038_v54 = vshll.u32 %v19447_v0, 16  ;;  %v4890_v7 = vsel %vm18883_vm0, %v15497_v55, %v4889_v17  ;;  %v5080_v57 = vshrl.u32 %v19410_v34, 16  ;;  %v19509_v18 = vld [vmem:[%s21499_s3 + $0x70] sm:$0xff]  }
 0x274   : > { %v5050_v41 = vor.u32 %v5049_v12, %v5046_v62  ;;  %v15506_v23 = vcombine.low %v4890_v7, %v19454_v2  ;;  %v19483_v35 = vsel %vm18883_vm0, %v15501_v47, %v4905_v52  ;;  %v19493_v42 = vsel %vm18883_vm0, %v15502_v44, %v4909_v11  ;;  %v19519_v11 = vld [vmem:[#allocation2 + $0x34] sm:$0x3] }
 0x275   : > { %v5037_v51 = vrot.slane %v5035_v21, 5  ;;  %v5032_v8 = vor.u32 %v5031_v58, %v5028_v20  ;;  %v5040_v63 = vrot.slane %v5038_v54, 6  ;;  %v5062_v22 = vshrl.u32 %v19428_v1, 16 }
 0x276   : > { %17073 = vmatmul.mubr.msk.bf16.gmra.mrb[4].mxu1 %vm2788_vm13, %v17999_v53  ;;  %v19449_v53 = vld [vmem:[#allocation2 + $0x1c] sm:$0x3]  ;;  %v5071_v15 = vshrl.u32 %v19485_v26, 16  ;;  %v5082_v46 = vrot.slane %v5080_v57, 5  ;;  %v5098_v17 = vshrl.u32 %v19432_v59, 16  ;;  %v5094_v47 = vrot.slane %v5092_v5, 6 }
 0x277   : > { %17078 = vmatprep.mubr.msk.bf16.mxu1 %vm2788_vm13, %v15486_v31  ;;  %v4748_v31 = vsel %vm18782_vm12, %v4743_v14, %v4747_v13  ;;  %v5053_v39 = vshrl.u32 %v19449_v53, 16  ;;  %v5056_v40 = vshll.u32 %v19449_v53, 16  ;;  %v5051_v14 = vrot.slane %v5050_v41, 4  ;;  %v19528_v41 = vld [vmem:[#allocation2 + $0x44] sm:$0x3] }
 0x278   : > { %v15489_v56 = vcombine.low %v4734_v49, %v4748_v31  ;;  %v5119_v49 = vshll.u32 %v19419_v32, 16  ;;  %v5033_v2 = vrot.slane %v5032_v8, 4  ;;  %v5064_v30 = vrot.slane %v5062_v22, 5 }
 0x279   : > { %v5055_v50 = vrot.slane %v5053_v39, 5  ;;  %v5058_v13 = vrot.slane %v5056_v40, 6  ;;  %v5074_v31 = vshll.u32 %v19485_v26, 16  ;;  %v5073_v12 = vrot.slane %v5071_v15, 5 }
 0x27a   : > { %v5118_v52 = vrot.slane %v5116_v60, 5  ;;  %v5121_v44 = vrot.slane %v5119_v49, 6  ;;  %v5100_v21 = vrot.slane %v5098_v17, 5  ;;  %v5134_v54 = vshrl.u32 %v19457_v4, 16 }
 0x27b   : > { %v5059_v55 = vor.u32 %v5058_v13, %v5055_v50  ;;  %v5076_v58 = vrot.slane %v5074_v31, 6  ;;  %v5152_v57 = vshrl.u32 %v19462_v16, 16 }
 0x27d   : > { %v5060_v32 = vsel %vm19022_vm11, %v5051_v14, %v5059_v55  ;;  %v5146_v14 = vshll.u32 %v19528_v41, 16  ;;  %v5154_v15 = vrot.slane %v5152_v57, 5  ;;  %v5077_v55 = vor.u32 %v5076_v58, %v5073_v12 }
 0x27e   : > { %17079 = vmatmul.mubr.msk.bf16.vlgmr.msra.gmra.mrb[0].mxu1 %vm2788_vm13, %v15487_v28  ;;  %v5083_v28 = vshll.u32 %v19410_v34, 16  ;;  %v5089_v34 = vshrl.u32 %v19487_v37, 16  ;;  %v5301_v57 = vrot.slane %v19447_v0, 6  ;;  %v5313_v0 = vrot.slane %v19487_v37, 6 }
 0x27f   : > { %17087 = vmatpush3.bf16.msra.mxu1 %v19374_v61  ;;  %17082 = vmatprep.mubr.msk.bf16.mxu1 %vm2788_vm13, %v15488_v45  ;;  %v15499_v61 = vrot.slane %v19432_v59, 9  ;;  %v5065_v45 = vshll.u32 %v19428_v1, 16  ;;  %v5101_v1 = vshll.u32 %v19432_v59, 16 }
 0x280   : > { %17096 = vmatprep.subr.bf16.mxu1 %v19426_v9  ;;  %v5085_v27 = vrot.slane %v5083_v28, 6  ;;  %v5110_v28 = vshll.u32 %v19519_v11, 16 }
 0x281   : > { %v4898_v36 = vsel %vm18883_vm0, %v15499_v61, %v4897_v38  ;;  %v5041_v61 = vor.u32 %v5040_v63, %v5037_v51  ;;  %v19512_v38 = vld [vmem:[#allocation2 + $0x3c] sm:$0x3]  ;;  %v5067_v62 = vrot.slane %v5065_v45, 6  ;;  %v5103_v39 = vrot.slane %v5101_v1, 6  ;;  %v19534_v51 = vld [vmem:[#allocation2 + $0x4c] sm:$0x3] }
 0x282   : > { %v15507_v6 = vcombine.low %v4898_v36, %v4902_v25  ;;  %v5091_v25 = vrot.slane %v5089_v34, 5  ;;  %v5086_v59 = vor.u32 %v5085_v27, %v5082_v46  ;;  %v5125_v40 = vshrl.u32 %v19512_v38, 16 }
 0x283   : > { %v5042_v20 = vsel %vm19022_vm11, %v5033_v2, %v5041_v61  ;;  %v5068_v36 = vor.u32 %v5067_v62, %v5064_v30  ;;  %v5104_v13 = vor.u32 %v5103_v39, %v5100_v21  ;;  %v5136_v63 = vrot.slane %v5134_v54, 5  ;;  %v18003_v39 = vld [vmem:[%s21499_s3 + $0x78] sm:$0xff]   ;;  %v5275_v54 = vld [vmem:[#allocation2 + $0x10] sm:$0xc] }
 0x284   : > { %v15516_v7 = vcombine.low %v5042_v20, %v5060_v32  ;;  %v5087_v50 = vrot.slane %v5086_v59, 4  ;;  %v5127_v8 = vrot.slane %v5125_v40, 5  ;;  %v5143_v45 = vshrl.u32 %v19528_v41, 16 }
 0x285   : > { %v5161_v46 = vshrl.u32 %v19534_v51, 16  ;;  %v5164_v34 = vshll.u32 %v19534_v51, 16  ;;  %v5112_v5 = vrot.slane %v5110_v28, 6  ;;  %v5069_v49 = vrot.slane %v5068_v36, 4  ;;  %v5278_v28 = vld [vmem:[#allocation2 + $0x28] sm:$0xc] }
 0x286   : > { %17083 = vmatmul.mubr.msk.bf16.gmra.mrb[4].mxu1 %vm2788_vm13, %v15489_v56  ;;  %v5128_v56 = vshll.u32 %v19512_v38, 16  ;;  %v5105_v1 = vrot.slane %v5104_v13, 4  ;;  %v5145_v61 = vrot.slane %v5143_v45, 5  ;;  %v5148_v30 = vrot.slane %v5146_v14, 6 }
 0x287   : > { %17088 = vmatprep.mubr.msk.bf16.mxu1 %vm2788_vm13, %v15505_v48  ;;  %v15508_v48 = vcombine.low %v19483_v35, %v19493_v42  ;;  %v5107_v35 = vshrl.u32 %v19519_v11, 16  ;;  %v5122_v42 = vor.u32 %v5121_v44, %v5118_v52  ;;  %v5163_v62 = vrot.slane %v5161_v46, 5  ;;  %v5276_v52 = vld [vmem:[#allocation2 + $0x18] sm:$0xc] }
 0x288   : > { %v5149_v21 = vor.u32 %v5148_v30, %v5145_v61  ;;  %v15525_v36 = vrot.slane %v5275_v54, 10  ;;  %v5309_v14 = vrot.slane %v19485_v26, 6  ;;  %v18005_v26 = vld [vmem:[%s21499_s3 + $0x80] sm:$0xff]   ;;  %v5560_v61 = vld [vmem:[#allocation2 + $0x18] sm:$0xf] }
 0x289   : > { %v5109_v27 = vrot.slane %v5107_v35, 5  ;;  %v5123_v60 = vrot.slane %v5122_v42, 4  ;;  %v5280_v42 = vld [vmem:[#allocation2 + $0x38] sm:$0xc] }
 0x28b   : > { %v5113_v59 = vor.u32 %v5112_v5, %v5109_v27  ;;  %v5282_v27 = vld [vmem:[#allocation2 + $0x48] sm:$0xc] }
 0x28d   : > { %v5114_v44 = vsel %vm19022_vm11, %v5105_v1, %v5113_v59  ;;  %v5329_v1 = vrot.slane %v19534_v51, 6  ;;  %v18004_v59 = vld [vmem:[#allocation2 + $0x18] ss:$8 sps:$4 sm:$0xff]   ;;  %v5580_v51 = vshll.u32 %v5560_v61, 16 }
 0x28e   : > { %17089 = vmatmul.mubr.msk.bf16.vlgmr.msra.gmra.mrb[0].mxu1 %vm2788_vm13, %v15506_v23  ;;  %v5155_v23 = vshll.u32 %v19462_v16, 16 }
 0x28f   : > { %17097 = vmatpush3.bf16.msra.mxu1 %v19426_v9  ;;  %17092 = vmatprep.mubr.msk.bf16.mxu1 %vm2788_vm13, %v15507_v6  ;;  %v5137_v9 = vshll.u32 %v19457_v4, 16  ;;  %v5095_v6 = vor.u32 %v5094_v47, %v5091_v25  ;;  %v5130_v4 = vrot.slane %v5128_v56, 6  ;;  %v5166_v25 = vrot.slane %v5164_v34, 6  ;;  %v5281_v34 = vld [vmem:[#allocation2 + $0x40] sm:$0xc] }
 0x290   : > { %17106 = vmatprep.subr.bf16.mxu1 %v19509_v18  ;;  %v5157_v16 = vrot.slane %v5155_v23, 6  ;;  %v5078_v47 = vsel %vm19022_vm11, %v5069_v49, %v5077_v55  ;;  %v15531_v49 = vrot.slane %v5281_v34, 10  ;;  %v5325_v55 = vrot.slane %v19528_v41, 6 }
 0x291   : > { %v5139_v22 = vrot.slane %v5137_v9, 6  ;;  %v5096_v17 = vsel %vm19022_vm11, %v5087_v50, %v5095_v6  ;;  %v5131_v2 = vor.u32 %v5130_v4, %v5127_v8  ;;  %v5167_v58 = vor.u32 %v5166_v25, %v5163_v62  ;;  %v5277_v50 = vld [vmem:[#allocation2 + $0x20] sm:$0xc]  ;;  %v5279_v4 = vld [vmem:[#allocation2 + $0x30] sm:$0xc] }
 0x292   : > { %v5158_v32 = vor.u32 %v5157_v16, %v5154_v15  ;;  %v15517_v12 = vcombine.low %v5078_v47, %v5096_v17  ;;  %v15526_v9 = vrot.slane %v5276_v52, 10  ;;  %v15528_v8 = vrot.slane %v5278_v28, 10  ;;  %v5564_v52 = vld [vmem:[#allocation2 + $0x28] sm:$0xf] }
 0x293   : > { %v5140_v31 = vor.u32 %v5139_v22, %v5136_v63  ;;  %v15530_v63 = vrot.slane %v5280_v42, 10  ;;  %v5321_v22 = vrot.slane %v19512_v38, 6  ;;  %v15527_v45 = vrot.slane %v5277_v50, 10  ;;  %v5574_v50 = vld [vmem:[#allocation2 + $0x50] sm:$0xf] }
 0x294   : > { %v5159_v20 = vrot.slane %v5158_v32, 4  ;;  %v15529_v15 = vrot.slane %v5279_v4, 10  ;;  %v5317_v16 = vrot.slane %v19519_v11, 6  ;;  %v5314_v46 = vsel %vm19097_vm8, %v15528_v8, %v5313_v0  ;;  %v19602_v8 = vld [vmem:[%s21499_s3 + $0x88] sm:$0xff]   ;;  %v19604_v0 = vld [vmem:[#allocation2 + $0x34] sm:$0x1] }
 0x295   : > { %v5141_v56 = vrot.slane %v5140_v31, 4  ;;  %v5322_v37 = vsel %vm19097_vm8, %v15530_v63, %v5321_v22  ;;  %v5310_v5 = vsel %vm19097_vm8, %v15527_v45, %v5309_v14  ;;  %v15532_v17 = vrot.slane %v5282_v27, 10  ;;  %v18007_v45 = vld [vmem:[#allocation2 + $0x38] ss:$8 sps:$4 sm:$0xff]  }
 0x296   : > { %17093 = vmatmul.mubr.msk.bf16.gmra.mrb[4].mxu1 %vm2788_vm13, %v15508_v48  ;;  %v5132_v48 = vsel %vm19022_vm11, %v5123_v60, %v5131_v2  ;;  %v5168_v6 = vsel %vm19022_vm11, %v5159_v20, %v5167_v58  ;;  %v15536_v38 = vcombine.low %v5310_v5, %v5314_v46  ;;  %v5318_v60 = vsel %vm19097_vm8, %v15529_v15, %v5317_v16  ;;  %v5562_v2 = vld [vmem:[#allocation2 + $0x20] sm:$0xf] }
 0x297   : > { %17098 = vmatprep.mubr.msk.bf16.mxu1 %vm2788_vm13, %v15516_v7  ;;  %v15518_v40 = vcombine.low %v5114_v44, %v5132_v48  ;;  %v5305_v7 = vrot.slane %v19449_v53, 6  ;;  %v5150_v23 = vsel %vm19022_vm11, %v5141_v56, %v5149_v21  ;;  %v15537_v11 = vcombine.low %v5318_v60, %v5322_v37  ;;  %v5570_v44 = vld [vmem:[#allocation2 + $0x40] sm:$0xf]  ;;  %v19593_v21 = vld [vmem:[#allocation2 + $0x1c] sm:$0x1] }
 0x298   : > { %v15519_v53 = vcombine.low %v5150_v23, %v5168_v6  ;;  %v5326_v30 = vsel %vm19097_vm8, %v15531_v49, %v5325_v55  ;;  %v5330_v31 = vsel %vm19097_vm8, %v15532_v17, %v5329_v1  ;;  %v5591_v32 = vshrl.u32 %v5562_v2, 16  ;;  %v18006_v6 = vld [vmem:[#allocation2 + $0x28] ss:$8 sps:$4 sm:$0xff]   ;;  %v19608_v60 = vld [vmem:[#allocation2 + $0x2c] sm:$0x1] }
 0x299   : > { %v5306_v35 = vsel %vm19097_vm8, %v15526_v9, %v5305_v7  ;;  %v5594_v62 = vshll.u32 %v5562_v2, 16  ;;  %v5577_v41 = vshrl.u32 %v5560_v61, 16  ;;  %v15538_v25 = vcombine.low %v5326_v30, %v5330_v31  ;;  %v5568_v9 = vld [vmem:[#allocation2 + $0x38] sm:$0xf]  ;;  %v19612_v61 = vld [vmem:[#allocation2 + $0x44] sm:$0x1] }
 0x29a   : > { %v5593_v48 = vrot.slane %v5591_v32, 4  ;;  %v5582_v56 = vrot.slane %v5580_v51, 5  ;;  %v5605_v20 = vshrl.u32 %v5564_v52, 16  ;;  %v5650_v23 = vshll.u32 %v5570_v44, 16  ;;  %v19616_v31 = vld [vmem:[#allocation2 + $0x3c] sm:$0x1] }
 0x29b   : > { %v5596_v47 = vrot.slane %v5594_v62, 5  ;;  %v5586_v28 = vshll.u32 %v19593_v21, 16  ;;  %v5675_v27 = vshrl.u32 %v5574_v50, 16  ;;  %v5678_v5 = vshll.u32 %v5574_v50, 16 }
 0x29c   : > { %v5607_v4 = vrot.slane %v5605_v20, 4  ;;  %v5652_v46 = vrot.slane %v5650_v23, 5  ;;  %v5628_v2 = vshll.u32 %v19604_v0, 16  ;;  %v5656_v62 = vshll.u32 %v19612_v61, 16 }
 0x29d   : > { %v5597_v7 = vor.u32 %v5596_v47, %v5593_v48  ;;  %v5588_v17 = vrot.slane %v5586_v28, 5  ;;  %v5680_v51 = vrot.slane %v5678_v5, 5  ;;  %v5614_v48 = vshll.u32 %v19608_v60, 16  ;;  %v19630_v28 = vld [vmem:[#allocation2 + $0x18] sm:$0xe] }
 0x29e   : > { %17099 = vmatmul.mubr.msk.bf16.vlgmr.msra.gmra.mrb[0].mxu1 %vm2788_vm13, %v15517_v12  ;;  %v5566_v12 = vld [vmem:[#allocation2 + $0x30] sm:$0xf]  ;;  %v5630_v20 = vrot.slane %v5628_v2, 5  ;;  %v5828_v2 = vrot.slane %v19608_v60, 5 }
 0x29f   : > { %17107 = vmatpush3.bf16.msra.mxu1 %v19509_v18  ;;  %17102 = vmatprep.mubr.msk.bf16.mxu1 %vm2788_vm13, %v15518_v40  ;;  %v5302_v18 = vsel %vm19097_vm8, %v15525_v36, %v5301_v57  ;;  %v5579_v40 = vrot.slane %v5577_v41, 4  ;;  %v5619_v58 = vshrl.u32 %v5566_v12, 16  ;;  %v5622_v54 = vshll.u32 %v5566_v12, 16  ;;  %v19622_v12 = vld [vmem:[#allocation2 + $0x54] sm:$0x1] }
 0x2a0   : > { %17116 = vmatprep.subr.bf16.mxu1 %v18003_v39  ;;  %v15535_v13 = vcombine.low %v5302_v18, %v5306_v35  ;;  %v5608_v36 = vshll.u32 %v5564_v52, 16  ;;  %v5647_v57 = vshrl.u32 %v5570_v44, 16  ;;  %v5572_v35 = vld [vmem:[#allocation2 + $0x48] sm:$0xf]  ;;  %v5636_v18 = vshll.u32 %v5568_v9, 16 }
 0x2a1   : > { %v5621_v63 = vrot.slane %v5619_v58, 4  ;;  %v5624_v22 = vrot.slane %v5622_v54, 5  ;;  %v5598_v14 = vrot.slane %v5597_v7, 4  ;;  %v5661_v34 = vshrl.u32 %v5572_v35, 16  ;;  %v19620_v52 = vld [vmem:[#allocation2 + $0x4c] sm:$0x1] }
 0x2a2   : > { %v5610_v15 = vrot.slane %v5608_v36, 5  ;;  %v5649_v16 = vrot.slane %v5647_v57, 4  ;;  %v5664_v37 = vshll.u32 %v5572_v35, 16  ;;  %v18008_v44 = vld [vmem:[#allocation2 + $0x48] ss:$8 sps:$4 sm:$0xff]   ;;  %v5642_v58 = vshll.u32 %v19616_v31, 16 }
 0x2a3   : > { %v5625_v1 = vor.u32 %v5624_v22, %v5621_v63  ;;  %v5663_v41 = vrot.slane %v5661_v34, 4  ;;  %v5658_v36 = vrot.slane %v5656_v62, 5  ;;  %v5670_v23 = vshll.u32 %v19620_v52, 16  ;;  %v5795_v63 = vld [vmem:[#allocation2 + $0x20] sm:$0xe] }
 0x2a4   : > { %v5653_v32 = vor.u32 %v5652_v46, %v5649_v16  ;;  %v5684_v35 = vshll.u32 %v19622_v12, 16  ;;  %v5644_v50 = vrot.slane %v5642_v58, 5  ;;  %v15566_v22 = vrot.slane %v19630_v28, 9  ;;  %v19672_v60 = vld [vmem:[#allocation2 + $0x50] sm:$0xe] }
 0x2a5   : > { %v5672_v16 = vrot.slane %v5670_v23, 5 }
 0x2a6   : > { %17103 = vmatmul.mubr.msk.bf16.gmra.mrb[4].mxu1 %vm2788_vm13, %v15519_v53  ;;  %v5633_v53 = vshrl.u32 %v5568_v9, 16  ;;  %v5654_v7 = vrot.slane %v5653_v32, 4  ;;  %v5686_v34 = vrot.slane %v5684_v35, 5  ;;  %v19661_v32 = vld [vmem:[#allocation2 + $0x38] sm:$0xe] }
 0x2a7   : > { %17108 = vmatprep.mubr.msk.bf16.mxu1 %vm2788_vm13, %v15535_v13  ;;  %v5583_v13 = vor.u32 %v5582_v56, %v5579_v40  ;;  %v5626_v56 = vrot.slane %v5625_v1, 4 }
 0x2a8   : > { %v5635_v49 = vrot.slane %v5633_v53, 4 }
 0x2a9   : > { %v5584_v55 = vrot.slane %v5583_v13, 4 }
 0x2ab   : > { %v5589_v40 = vsel %vm18782_vm12, %v5584_v55, %v5588_v17 }
 0x2ae   : > { %17109 = vmatmul.mubr.msk.bf16.vlgmr.msra.gmra.mrb[0].mxu1 %vm2788_vm13, %v15536_v38 }
 0x2af   : > { %17117 = vmatpush3.bf16.msra.mxu1 %v18003_v39  ;;  %17112 = vmatprep.mubr.msk.bf16.mxu1 %vm2788_vm13, %v15537_v11  ;;  %v19595_v39 = vld [vmem:[#allocation2 + $0x24] sm:$0x1]  ;;  %v5638_v11 = vrot.slane %v5636_v18, 5  ;;  %v5631_v18 = vsel %vm18782_vm12, %v5626_v56, %v5630_v20  ;;  %v5983_v56 = vshrl.u32 %v5795_v63, 16  ;;  %v5986_v20 = vshll.u32 %v5795_v63, 16 }
 0x2b0   : > { %17126 = vmatprep.subr.bf16.mxu1 %v18005_v26  ;;  %v5600_v42 = vshll.u32 %v19595_v39, 16  ;;  %v5824_v55 = vrot.slane %v19595_v39, 5 }
 0x2b1   : > { %v5639_v47 = vor.u32 %v5638_v11, %v5635_v49  ;;  %v15567_v11 = vrot.slane %v5795_v63, 9  ;;  %v19709_v63 = vld [vmem:[#allocation2 + $0x2c] sm:$0x3] }
 0x2b2   : > { %v5602_v38 = vrot.slane %v5600_v42, 5  ;;  %v5616_v42 = vrot.slane %v5614_v48, 5  ;;  %v15573_v48 = vrot.slane %v19672_v60, 9 }
 0x2b3   : > { %v5640_v53 = vrot.slane %v5639_v47, 4  ;;  %v5848_v47 = vrot.slane %v19622_v12, 5  ;;  %v5825_v58 = vsel %vm18883_vm0, %v15567_v11, %v5824_v55 }
 0x2b4   : > { %v5603_v30 = vsel %vm18782_vm12, %v5598_v14, %v5602_v38  ;;  %v19641_v14 = vld [vmem:[#allocation2 + $0x28] sm:$0xe]  ;;  %v19647_v38 = vld [vmem:[#allocation2 + $0x40] sm:$0xe] }
 0x2b5   : > { %v15557_v54 = vcombine.low %v5589_v40, %v5603_v30  ;;  %v5645_v5 = vsel %vm18782_vm12, %v5640_v53, %v5644_v50  ;;  %v15568_v17 = vrot.slane %v19641_v14, 9  ;;  %v5965_v40 = vshrl.u32 %v19630_v28, 16 }
 0x2b6   : > { %17113 = vmatmul.mubr.msk.bf16.gmra.mrb[4].mxu1 %vm2788_vm13, %v15538_v25  ;;  %v5666_v25 = vrot.slane %v5664_v37, 5  ;;  %v19643_v37 = vld [vmem:[#allocation2 + $0x30] sm:$0xe]  ;;  %v19705_v35 = vsel %vm18883_vm0, %v15573_v48, %v5848_v47  ;;  %v6037_v48 = vshrl.u32 %v19661_v32, 16 }
 0x2b7   : > { %17118 = vmatprep.mubr.msk.bf16.mxu1 %vm2788_vm13, %v18004_v59  ;;  %v5677_v59 = vrot.slane %v5675_v27, 4  ;;  %v15569_v30 = vrot.slane %v19643_v37, 9 }
 0x2b8   : > { %v5667_v57 = vor.u32 %v5666_v25, %v5663_v41  ;;  %v15571_v41 = vrot.slane %v19647_v38, 9  ;;  %v5840_v25 = vrot.slane %v19612_v61, 5  ;;  %v19683_v61 = vld [vmem:[#allocation2 + $0x24] sm:$0x3] }
 0x2ba   : > { %v5841_v23 = vsel %vm18883_vm0, %v15571_v41, %v5840_v25  ;;  %v6055_v25 = vshrl.u32 %v19647_v38, 16 }
 0x2be   : > { %17119 = vmatmul.mubr.msk.bf16.vlgmr.msra.gmra.mrb[0].mxu1 %vm2788_vm13, %v18006_v6  ;;  %v5681_v6 = vor.u32 %v5680_v51, %v5677_v59  ;;  %v19670_v59 = vld [vmem:[#allocation2 + $0x48] sm:$0xe]  ;;  %v5844_v51 = vrot.slane %v19620_v52, 5  ;;  %v5829_v52 = vsel %vm18883_vm0, %v15568_v17, %v5828_v2  ;;  %v6001_v17 = vshrl.u32 %v19641_v14, 16 }
 0x2bf   : > { %17127 = vmatpush3.bf16.msra.mxu1 %v18005_v26  ;;  %17122 = vmatprep.mubr.msk.bf16.mxu1 %vm2788_vm13, %v18007_v45  ;;  %v5611_v26 = vor.u32 %v5610_v15, %v5607_v4  ;;  %v5659_v4 = vsel %vm18782_vm12, %v5654_v7, %v5658_v36  ;;  %v5820_v45 = vrot.slane %v19593_v21, 5  ;;  %v5668_v15 = vrot.slane %v5667_v57, 4  ;;  %v19653_v21 = vld [vmem:[%s21499_s3 + $0x90] sm:$0xff]  }
 0x2c0   : > { %17136 = vmatprep.subr.bf16.mxu1 %v19602_v8  ;;  %v5682_v46 = vrot.slane %v5681_v6, 4  ;;  %v15559_v49 = vcombine.low %v5645_v5, %v5659_v4  ;;  %v5836_v7 = vrot.slane %v19616_v31, 5  ;;  %v5985_v31 = vrot.slane %v5983_v56, 5 }
 0x2c1   : > { %v5612_v9 = vrot.slane %v5611_v26, 4  ;;  %v5821_v1 = vsel %vm18883_vm0, %v15566_v22, %v5820_v45  ;;  %v5832_v26 = vrot.slane %v19604_v0, 5  ;;  %v5673_v39 = vsel %vm18782_vm12, %v5668_v15, %v5672_v16  ;;  %v19714_v16 = vld [vmem:[#allocation2 + $0x34] sm:$0x3] }
 0x2c2   : > { %v5687_v62 = vsel %vm18782_vm12, %v5682_v46, %v5686_v34  ;;  %v15572_v0 = vrot.slane %v19670_v59, 9  ;;  %v15576_v50 = vcombine.low %v5821_v1, %v5825_v58  ;;  %v5995_v4 = vshll.u32 %v19683_v61, 16 }
 0x2c3   : > { %v5617_v13 = vsel %vm18782_vm12, %v5612_v9, %v5616_v42  ;;  %v5833_v12 = vsel %vm18883_vm0, %v15569_v30, %v5832_v26  ;;  %v15560_v9 = vcombine.low %v5673_v39, %v5687_v62  ;;  %v5967_v42 = vrot.slane %v5965_v40, 5 }
 0x2c4   : > { %v15558_v27 = vcombine.low %v5617_v13, %v5631_v18  ;;  %v19701_v6 = vsel %vm18883_vm0, %v15572_v0, %v5844_v51  ;;  %v5988_v18 = vrot.slane %v5986_v20, 6  ;;  %v15577_v13 = vcombine.low %v5829_v52, %v5833_v12 }
 0x2c5   : > { %v6019_v46 = vshrl.u32 %v19643_v37, 16  ;;  %v6004_v1 = vshll.u32 %v19641_v14, 16  ;;  %v5997_v2 = vrot.slane %v5995_v4, 6  ;;  %v6010_v30 = vshrl.u32 %v19709_v63, 16 }
 0x2c6   : > { %17123 = vmatmul.mubr.msk.bf16.gmra.mrb[4].mxu1 %vm2788_vm13, %v18008_v44  ;;  %v19680_v44 = vld [vmem:[#allocation2 + $0x1c] sm:$0x3]  ;;  %v5989_v55 = vor.u32 %v5988_v18, %v5985_v31  ;;  %v6013_v26 = vshll.u32 %v19709_v63, 16  ;;  %v6028_v39 = vshrl.u32 %v19714_v16, 16  ;;  %v6058_v0 = vshll.u32 %v19647_v38, 16 }
 0x2c7   : > { %17128 = vmatprep.mubr.msk.bf16.mxu1 %vm2788_vm13, %v15557_v54  ;;  %v15570_v54 = vrot.slane %v19661_v32, 9  ;;  %v5974_v36 = vshrl.u32 %v19680_v44, 16  ;;  %v5977_v57 = vshll.u32 %v19680_v44, 16  ;;  %v6021_v41 = vrot.slane %v6019_v46, 5 }
 0x2c8   : > { %v6031_v51 = vshll.u32 %v19714_v16, 16  ;;  %v6040_v14 = vshll.u32 %v19661_v32, 16  ;;  %v5990_v40 = vrot.slane %v5989_v55, 4  ;;  %v6003_v56 = vrot.slane %v6001_v17, 5 }
 0x2c9   : > { %v5837_v22 = vsel %vm18883_vm0, %v15570_v54, %v5836_v7  ;;  %v5976_v45 = vrot.slane %v5974_v36, 5  ;;  %v5979_v15 = vrot.slane %v5977_v57, 6  ;;  %v6006_v20 = vrot.slane %v6004_v1, 6  ;;  %v19738_v54 = vld [vmem:[#allocation2 + $0x44] sm:$0x3] }
 0x2ca   : > { %v15578_v34 = vcombine.low %v5837_v22, %v5841_v23  ;;  %v19736_v52 = vrot.slane %v6010_v30, 5  ;;  %v6015_v38 = vrot.slane %v6013_v26, 6  ;;  %v6030_v12 = vrot.slane %v6028_v39, 5  ;;  %v19755_v22 = vld [vmem:[#allocation2 + $0x4c] sm:$0x3] }
 0x2cb   : > { %v5980_v62 = vor.u32 %v5979_v15, %v5976_v45  ;;  %v6057_v32 = vrot.slane %v6055_v25, 5  ;;  %v6060_v7 = vrot.slane %v6058_v0, 6  ;;  %v6064_v36 = vshrl.u32 %v19738_v54, 16 }
 0x2cc   : > { %v6067_v57 = vshll.u32 %v19738_v54, 16  ;;  %v6007_v4 = vor.u32 %v6006_v20, %v6003_v56  ;;  %v6091_v45 = vshrl.u32 %v19672_v60, 16  ;;  %v6094_v15 = vshll.u32 %v19672_v60, 16 }
 0x2cd   : > { %v6082_v26 = vshrl.u32 %v19755_v22, 16  ;;  %v6085_v39 = vshll.u32 %v19755_v22, 16 }
 0x2ce   : > { %17129 = vmatmul.mubr.msk.bf16.vlgmr.msra.gmra.mrb[0].mxu1 %vm2788_vm13, %v15558_v27  ;;  %v15579_v27 = vcombine.low %v19701_v6, %v19705_v35 }
 0x2cf   : > { %17137 = vmatpush3.bf16.msra.mxu1 %v19602_v8  ;;  %17132 = vmatprep.mubr.msk.bf16.mxu1 %vm2788_vm13, %v15559_v49  ;;  %v5968_v8 = vshll.u32 %v19630_v28, 16  ;;  %v5992_v28 = vshrl.u32 %v19683_v61, 16  ;;  %v6022_v49 = vshll.u32 %v19643_v37, 16  ;;  %v6084_v20 = vrot.slane %v6082_v26, 5 }
 0x2d0   : > { %17146 = vmatprep.subr.bf16.mxu1 %v19653_v21 }
 0x2d1   : > { %v5970_v53 = vrot.slane %v5968_v8, 6  ;;  %v5994_v5 = vrot.slane %v5992_v28, 5  ;;  %v6024_v37 = vrot.slane %v6022_v49, 6  ;;  %v19734_v8 = vld [vmem:[%s21499_s3 + $0x98] sm:$0xff]   ;;  %v6033_v28 = vrot.slane %v6031_v51, 6 }
 0x2d2   : > { %v6069_v49 = vrot.slane %v6067_v57, 6  ;;  %v6215_v57 = vld [vmem:[#allocation2 + $0x20] sm:$0xc] }
 0x2d3   : > { %v5971_v11 = vor.u32 %v5970_v53, %v5967_v42  ;;  %v5998_v58 = vor.u32 %v5997_v2, %v5994_v5  ;;  %v6025_v23 = vor.u32 %v6024_v37, %v6021_v41  ;;  %v6039_v42 = vrot.slane %v6037_v48, 5 }
 0x2d4   : > { %v6042_v53 = vrot.slane %v6040_v14, 6  ;;  %v6066_v5 = vrot.slane %v6064_v36, 5  ;;  %v6034_v1 = vor.u32 %v6033_v28, %v6030_v12  ;;  %v6096_v41 = vrot.slane %v6094_v15, 6  ;;  %v18012_v28 = vld [vmem:[%s21499_s3 + $0xa0] sm:$0xff]  }
 0x2d5   : > { %v5972_v47 = vrot.slane %v5971_v11, 4  ;;  %v5999_v18 = vsel %vm19022_vm11, %v5990_v40, %v5998_v58  ;;  %v19760_v11 = vld [vmem:[#allocation2 + $0x54] sm:$0x3]  ;;  %v6026_v17 = vrot.slane %v6025_v23, 4  ;;  %v6008_v14 = vrot.slane %v6007_v4, 4 }
 0x2d6   : > { %17133 = vmatmul.mubr.msk.bf16.gmra.mrb[4].mxu1 %vm2788_vm13, %v15560_v9  ;;  %v19741_v9 = vld [vmem:[#allocation2 + $0x3c] sm:$0x3]  ;;  %v6100_v60 = vshrl.u32 %v19760_v11, 16  ;;  %v6103_v25 = vshll.u32 %v19760_v11, 16  ;;  %v6070_v48 = vor.u32 %v6069_v49, %v6066_v5  ;;  %v6087_v58 = vrot.slane %v6085_v39, 6 }
 0x2d7   : > { %17138 = vmatprep.mubr.msk.bf16.mxu1 %vm2788_vm13, %v15576_v50  ;;  %v5981_v31 = vsel %vm19022_vm11, %v5972_v47, %v5980_v62  ;;  %v6073_v50 = vshrl.u32 %v19670_v59, 16  ;;  %v6049_v46 = vshll.u32 %v19741_v9, 16  ;;  %v6093_v62 = vrot.slane %v6091_v45, 5  ;;  %v6219_v49 = vld [vmem:[#allocation2 + $0x40] sm:$0xc] }
 0x2d8   : > { %v15587_v55 = vcombine.low %v5981_v31, %v5999_v18  ;;  %v6016_v47 = vor.u32 %v6015_v38, %v19736_v52  ;;  %v6035_v40 = vsel %vm19022_vm11, %v6026_v17, %v6034_v1  ;;  %v6102_v6 = vrot.slane %v6100_v60, 5  ;;  %v6216_v17 = vld [vmem:[#allocation2 + $0x28] sm:$0xc] }
 0x2d9   : > { %v6075_v2 = vrot.slane %v6073_v50, 5  ;;  %v6051_v37 = vrot.slane %v6049_v46, 6  ;;  %v6105_v35 = vrot.slane %v6103_v25, 6  ;;  %v6088_v38 = vor.u32 %v6087_v58, %v6084_v20  ;;  %v6214_v50 = vld [vmem:[#allocation2 + $0x18] sm:$0xc] }
 0x2da   : > { %v6017_v36 = vsel %vm19022_vm11, %v6008_v14, %v6016_v47  ;;  %v15597_v4 = vrot.slane %v6215_v57, 10  ;;  %v15596_v45 = vrot.slane %v6214_v50, 10  ;;  %v6240_v15 = vrot.slane %v19680_v44, 6  ;;  %v6501_v58 = vld [vmem:[#allocation2 + $0x28] sm:$0xf] }
 0x2db   : > { %v15588_v23 = vcombine.low %v6017_v36, %v6035_v40  ;;  %v6106_v18 = vor.u32 %v6105_v35, %v6102_v6  ;;  %v18301_v46 = vmov 0.0   ;;  %v15601_v26 = vrot.slane %v6219_v49, 10  ;;  %v6511_v49 = vld [vmem:[#allocation2 + $0x50] sm:$0xf] }
 0x2dc   : > { %17216 = vmatprep.subr.bf16.mxu0 %v18301_v46  ;;  %v6241_v44 = vsel %vm19097_vm8, %v15596_v45, %v6240_v15  ;;  %v6260_v39 = vrot.slane %v19738_v54, 6  ;;  %v6256_v25 = vrot.slane %v19741_v9, 6  ;;  %v6264_v40 = vrot.slane %v19755_v22, 6 }
 0x2dd   : > { %v6268_v20 = vrot.slane %v19760_v11, 6  ;;  %v6533_v6 = vshll.u32 %v6501_v58, 16  ;;  %v6505_v11 = vld [vmem:[#allocation2 + $0x38] sm:$0xf] }
 0x2de   : > { %17139 = vmatmul.mubr.msk.bf16.vlgmr.msra.gmra.mrb[0].mxu1 %vm2788_vm13, %v15577_v13  ;;  %v6076_v13 = vshll.u32 %v19670_v59, 16  ;;  %v6043_v59 = vor.u32 %v6042_v53, %v6039_v42 }
 0x2df   : > { %17147 = vmatpush3.bf16.msra.mxu1 %v19653_v21  ;;  %17142 = vmatprep.mubr.msk.bf16.mxu1 %vm2788_vm13, %v15578_v34  ;;  %v6046_v21 = vshrl.u32 %v19741_v9, 16  ;;  %v6061_v34 = vor.u32 %v6060_v7, %v6057_v32  ;;  %v6097_v32 = vor.u32 %v6096_v41, %v6093_v62  ;;  %v15598_v62 = vrot.slane %v6216_v17, 10 }
 0x2e0   : > { %17156 = vmatprep.subr.bf16.mxu1 %v19734_v8  ;;  %v6078_v30 = vrot.slane %v6076_v13, 6  ;;  %v6044_v56 = vrot.slane %v6043_v59, 4  ;;  %v18021_v13 = vld [vmem:[%s21501_s5 + $0x10] sm:$0xff]   ;;  %v6248_v41 = vrot.slane %v19709_v63, 6  ;;  %v19818_v63 = vld [vmem:[%s21499_s3 + $0xa8] sm:$0xff]  }
 0x2e1   : > { %v6048_v0 = vrot.slane %v6046_v21, 5  ;;  %v6062_v51 = vrot.slane %v6061_v34, 4  ;;  %v6098_v31 = vrot.slane %v6097_v32, 4  ;;  %v6244_v21 = vrot.slane %v19683_v61, 6  ;;  %17217 = vmatpush3.bf16.msra.mxu0 %v18021_v13 }
 0x2e2   : > { %v6079_v12 = vor.u32 %v6078_v30, %v6075_v2  ;;  %17218 = vmatprep.subr.bf16.mxu0 %v18301_v46  ;;  %v6252_v2 = vrot.slane %v19714_v16, 6  ;;  %v6218_v30 = vld [vmem:[#allocation2 + $0x38] sm:$0xc]  ;;  %v6261_v16 = vsel %vm19097_vm8, %v15601_v26, %v6260_v39  ;;  %v6530_v32 = vshrl.u32 %v6501_v58, 16 }
 0x2e3   : > { %v6071_v7 = vsel %vm19022_vm11, %v6062_v51, %v6070_v48  ;;  %v6107_v5 = vsel %vm19022_vm11, %v6098_v31, %v6106_v18  ;;  %v6245_v61 = vsel %vm19097_vm8, %v15597_v4, %v6244_v21  ;;  %v15600_v60 = vrot.slane %v6218_v30, 10  ;;  %v6221_v51 = vld [vmem:[#allocation2 + $0x50] sm:$0xc]  ;;  %v6509_v31 = vld [vmem:[#allocation2 + $0x48] sm:$0xf] }
 0x2e4   : > { %v6080_v53 = vrot.slane %v6079_v12, 4  ;;  %v15606_v1 = vcombine.low %v6241_v44, %v6245_v61  ;;  %v6249_v48 = vsel %vm19097_vm8, %v15598_v62, %v6248_v41  ;;  %v6499_v12 = vld [vmem:[#allocation2 + $0x20] sm:$0xf]  ;;  %v6532_v57 = vrot.slane %v6530_v32, 4  ;;  %v19831_v4 = vld [vmem:[#allocation2 + $0x24] sm:$0x1] }
 0x2e5   : > { %v6257_v14 = vsel %vm19097_vm8, %v15600_v60, %v6256_v25  ;;  %v19833_v21 = vld [vmem:[#allocation2 + $0x2c] sm:$0x1]  ;;  %v6586_v61 = vshrl.u32 %v6509_v31, 16  ;;  %v19835_v44 = vld [vmem:[#allocation2 + $0x3c] sm:$0x1]  ;;  %v6525_v30 = vshll.u32 %v19831_v4, 16  ;;  %17219 = vmatpush3.bf16.msra.mxu0 %v18022_v19 }
 0x2e6   : > { %17143 = vmatmul.mubr.msk.bf16.gmra.mrb[4].mxu1 %vm2788_vm13, %v15579_v27  ;;  %v6052_v27 = vor.u32 %v6051_v37, %v6048_v0  ;;  %v6089_v34 = vsel %vm19022_vm11, %v6080_v53, %v6088_v38  ;;  %v6220_v37 = vld [vmem:[#allocation2 + $0x48] sm:$0xc]  ;;  %v15608_v9 = vcombine.low %v6257_v14, %v6261_v16  ;;  %v6507_v53 = vld [vmem:[#allocation2 + $0x40] sm:$0xf]  ;;  %v6539_v26 = vshll.u32 %v19833_v21, 16  ;;  %v19842_v60 = vld [vmem:[%s21499_s3 + $0xb0] sm:$0xff]   ;;  %17224 = vmatprep.subr.bf16.mxu0 %v18301_v46 }
 0x2e7   : > { %17148 = vmatprep.mubr.msk.bf16.mxu1 %vm2788_vm13, %v15587_v55  ;;  %v15590_v55 = vcombine.low %v6089_v34, %v6107_v5  ;;  %v15602_v47 = vrot.slane %v6220_v37, 10  ;;  %v18013_v38 = vld [vmem:[#allocation2 + $0x20] ss:$8 sps:$4 sm:$0xff]   ;;  %v6572_v34 = vshrl.u32 %v6507_v53, 16  ;;  %v6575_v5 = vshll.u32 %v6507_v53, 16 }
 0x2e8   : > { %v6053_v52 = vsel %vm19022_vm11, %v6044_v56, %v6052_v27  ;;  %v15603_v56 = vrot.slane %v6221_v51, 10  ;;  %v6516_v27 = vshrl.u32 %v6499_v12, 16  ;;  %v6513_v62 = vld [vmem:[#allocation2 + $0x58] sm:$0xf]  ;;  %v6603_v37 = vshll.u32 %v6511_v49, 16 }
 0x2e9   : > { %v15589_v42 = vcombine.low %v6053_v52, %v6071_v7  ;;  %v6265_v35 = vsel %vm19097_vm8, %v15602_v47, %v6264_v40  ;;  %v6519_v7 = vshll.u32 %v6499_v12, 16  ;;  %v6503_v52 = vld [vmem:[#allocation2 + $0x30] sm:$0xf]  ;;  %v19844_v16 = vld [vmem:[#allocation2 + $0x44] sm:$0x1]  ;;  %v6574_v51 = vrot.slane %v6572_v34, 4 }
 0x2ea   : > { %v6269_v22 = vsel %vm19097_vm8, %v15603_v56, %v6268_v20  ;;  %v6518_v18 = vrot.slane %v6516_v27, 4  ;;  %v6544_v13 = vshrl.u32 %v6503_v52, 16  ;;  %v6547_v15 = vshll.u32 %v6503_v52, 16  ;;  %v19851_v32 = vld [vmem:[#allocation2 + $0x34] sm:$0x1] }
 0x2eb   : > { %v15609_v36 = vcombine.low %v6265_v35, %v6269_v22  ;;  %v6521_v50 = vrot.slane %v6519_v7, 5  ;;  %v6614_v40 = vshrl.u32 %v6513_v62, 16  ;;  %v6617_v56 = vshll.u32 %v6513_v62, 16  ;;  %v18017_v52 = vld [vmem:[#allocation2 + $0x50] ss:$8 sps:$4 sm:$0xff]  }
 0x2ec   : > { %v6546_v39 = vrot.slane %v6544_v13, 4  ;;  %v6549_v25 = vrot.slane %v6547_v15, 5  ;;  %v6527_v58 = vrot.slane %v6525_v30, 5  ;;  %v6541_v12 = vrot.slane %v6539_v26, 5  ;;  %v6734_v62 = vld [vmem:[#allocation2 + $0x28] sm:$0xe] }
 0x2ed   : > { %v6581_v22 = vshll.u32 %v19844_v16, 16  ;;  %v6605_v7 = vrot.slane %v6603_v37, 5  ;;  %v6619_v53 = vrot.slane %v6617_v56, 5  ;;  %v19878_v37 = vld [vmem:[#allocation2 + $0x30] sm:$0xe]  ;;  %v15638_v56 = vrot.slane %v6734_v62, 9 }
 0x2ee   : > { %17149 = vmatmul.mubr.msk.bf16.vlgmr.msra.gmra.mrb[0].mxu1 %vm2788_vm13, %v15588_v23  ;;  %v6535_v23 = vrot.slane %v6533_v6, 5  ;;  %v6567_v6 = vshll.u32 %v19835_v44, 16  ;;  %v6550_v35 = vor.u32 %v6549_v25, %v6546_v39 }
 0x2ef   : > { %17157 = vmatpush3.bf16.msra.mxu1 %v19734_v8  ;;  %17152 = vmatprep.mubr.msk.bf16.mxu1 %vm2788_vm13, %v15589_v42  ;;  %v6217_v8 = vld [vmem:[#allocation2 + $0x30] sm:$0xc]  ;;  %v6561_v42 = vshll.u32 %v6505_v11, 16 }
 0x2f0   : > { %17166 = vmatprep.subr.bf16.mxu1 %v18012_v28  ;;  %v15599_v59 = vrot.slane %v6217_v8, 10  ;;  %v6536_v45 = vor.u32 %v6535_v23, %v6532_v57  ;;  %v6589_v8 = vshll.u32 %v6509_v31, 16  ;;  %v19859_v23 = vld [vmem:[#allocation2 + $0x54] sm:$0x1] }
 0x2f1   : > { %v6609_v34 = vshll.u32 %v19859_v23, 16 }
 0x2f2   : > { %v6253_v0 = vsel %vm19097_vm8, %v15599_v59, %v6252_v2  ;;  %v18016_v59 = vld [vmem:[#allocation2 + $0x40] ss:$8 sps:$4 sm:$0xff]   ;;  %v6522_v2 = vor.u32 %v6521_v50, %v6518_v18  ;;  %v6537_v41 = vrot.slane %v6536_v45, 4  ;;  %v6591_v14 = vrot.slane %v6589_v8, 5  ;;  %v19864_v50 = vld [vmem:[#allocation2 + $0x5c] sm:$0x1] }
 0x2f3   : > { %v15607_v54 = vcombine.low %v6249_v48, %v6253_v0  ;;  %v6600_v0 = vshrl.u32 %v6511_v49, 16  ;;  %v6577_v48 = vrot.slane %v6575_v5, 5  ;;  %v6569_v18 = vrot.slane %v6567_v6, 5 }
 0x2f4   : > { %v6523_v20 = vrot.slane %v6522_v2, 4  ;;  %v6551_v45 = vrot.slane %v6550_v35, 4  ;;  %v6733_v2 = vld [vmem:[#allocation2 + $0x20] sm:$0xe]  ;;  %v6611_v39 = vrot.slane %v6609_v34, 5 }
 0x2f5   : > { %v6602_v27 = vrot.slane %v6600_v0, 4  ;;  %v6904_v6 = vshrl.u32 %v6733_v2, 16  ;;  %v6907_v35 = vshll.u32 %v6733_v2, 16 }
 0x2f6   : > { %17153 = vmatmul.mubr.msk.bf16.gmra.mrb[4].mxu1 %vm2788_vm13, %v15590_v55  ;;  %v18015_v55 = vld [vmem:[#allocation2 + $0x30] ss:$8 sps:$4 sm:$0xff]   ;;  %v6528_v31 = vsel %vm18782_vm12, %v6523_v20, %v6527_v58  ;;  %v6763_v20 = vrot.slane %v19833_v21, 5  ;;  %v19889_v58 = vld [vmem:[#allocation2 + $0x40] sm:$0xe]  ;;  %v6771_v21 = vrot.slane %v19835_v44, 5 }
 0x2f7   : > { %17158 = vmatprep.mubr.msk.bf16.mxu1 %vm2788_vm13, %v15606_v1  ;;  %v6563_v1 = vrot.slane %v6561_v42, 5  ;;  %v6616_v42 = vrot.slane %v6614_v40, 4  ;;  %v6606_v15 = vor.u32 %v6605_v7, %v6602_v27  ;;  %v19886_v40 = vld [vmem:[%s21499_s3 + $0xb8] sm:$0xff]  }
 0x2f9   : > { %v6607_v26 = vrot.slane %v6606_v15, 4 }
 0x2fb   : > { %v6612_v27 = vsel %vm18782_vm12, %v6607_v26, %v6611_v39 }
 0x2fe   : > { %17159 = vmatmul.mubr.msk.bf16.vlgmr.msra.gmra.mrb[0].mxu1 %vm2788_vm13, %v15607_v54  ;;  %v6588_v54 = vrot.slane %v6586_v61, 4  ;;  %v6583_v61 = vrot.slane %v6581_v22, 5 }
 0x2ff   : > { %17167 = vmatpush3.bf16.msra.mxu1 %v18012_v28  ;;  %17162 = vmatprep.mubr.msk.bf16.mxu1 %vm2788_vm13, %v15608_v9  ;;  %v6558_v28 = vshrl.u32 %v6505_v11, 16  ;;  %v19847_v9 = vld [vmem:[#allocation2 + $0x4c] sm:$0x1]  ;;  %v6542_v11 = vsel %vm18782_vm12, %v6537_v41, %v6541_v12  ;;  %v19891_v12 = vld [vmem:[#allocation2 + $0x24] sm:$0x3] }
 0x300   : > { %17176 = vmatprep.subr.bf16.mxu1 %v19818_v63  ;;  %v6595_v57 = vshll.u32 %v19847_v9, 16  ;;  %v15628_v13 = vcombine.low %v6528_v31, %v6542_v11  ;;  %v19897_v11 = vld [vmem:[#allocation2 + $0x48] sm:$0xe]  ;;  %v6925_v31 = vshll.u32 %v6734_v62, 16  ;;  %v6913_v15 = vshrl.u32 %v19891_v12, 16 }
 0x301   : > { %v6560_v17 = vrot.slane %v6558_v28, 4 }
 0x302   : > { %v6597_v49 = vrot.slane %v6595_v57, 5  ;;  %v6775_v57 = vrot.slane %v19844_v16, 5  ;;  %v6783_v16 = vrot.slane %v19859_v23, 5  ;;  %v6764_v23 = vsel %vm18883_vm0, %v15638_v56, %v6763_v20 }
 0x303   : > { %v6564_v47 = vor.u32 %v6563_v1, %v6560_v17  ;;  %v6620_v1 = vor.u32 %v6619_v53, %v6616_v42  ;;  %v6779_v42 = vrot.slane %v19847_v9, 5  ;;  %v6922_v53 = vshrl.u32 %v6734_v62, 16 }
 0x304   : > { %v6787_v9 = vrot.slane %v19864_v50, 5  ;;  %v6915_v26 = vrot.slane %v6913_v15, 5 }
 0x305   : > { %v6565_v28 = vrot.slane %v6564_v47, 4  ;;  %v6759_v47 = vrot.slane %v19831_v4, 5  ;;  %v15639_v4 = vrot.slane %v19878_v37, 9 }
 0x306   : > { %17163 = vmatmul.mubr.msk.bf16.gmra.mrb[4].mxu1 %vm2788_vm13, %v15609_v36  ;;  %v6592_v36 = vor.u32 %v6591_v14, %v6588_v54  ;;  %v15637_v14 = vrot.slane %v6733_v2, 9 }
 0x307   : > { %17168 = vmatprep.mubr.msk.bf16.mxu1 %vm2788_vm13, %v18013_v38  ;;  %v6553_v38 = vshll.u32 %v19851_v32, 16  ;;  %v6570_v17 = vsel %vm18782_vm12, %v6565_v28, %v6569_v18  ;;  %v19915_v18 = vld [vmem:[#allocation2 + $0x2c] sm:$0x3] }
 0x308   : > { %v6593_v8 = vrot.slane %v6592_v36, 4  ;;  %v15641_v36 = vrot.slane %v19889_v58, 9 }
 0x30a   : > { %v6598_v0 = vsel %vm18782_vm12, %v6593_v8, %v6597_v49  ;;  %v6924_v8 = vrot.slane %v6922_v53, 5  ;;  %v6927_v49 = vrot.slane %v6925_v31, 6  ;;  %v19963_v31 = vld [vmem:[#allocation2 + $0x4c] sm:$0x3] }
 0x30e   : > { %17169 = vmatmul.mubr.msk.bf16.vlgmr.msra.gmra.mrb[0].mxu1 %vm2788_vm13, %v18015_v55  ;;  %v6555_v55 = vrot.slane %v6553_v38, 5  ;;  %v19905_v38 = vld [vmem:[#allocation2 + $0x58] sm:$0xe] }
 0x30f   : > { %17177 = vmatpush3.bf16.msra.mxu1 %v19818_v63  ;;  %17172 = vmatprep.mubr.msk.bf16.mxu1 %vm2788_vm13, %v18016_v59  ;;  %v6578_v63 = vor.u32 %v6577_v48, %v6574_v51  ;;  %v6623_v59 = vshll.u32 %v19864_v50, 16  ;;  %v19880_v51 = vld [vmem:[#allocation2 + $0x38] sm:$0xe]  ;;  %v6621_v48 = vrot.slane %v6620_v1, 4  ;;  %v15644_v10 = vrot.slane %v19905_v38, 9 }
 0x310   : > { %17186 = vmatprep.subr.bf16.mxu1 %v19842_v60  ;;  %v6556_v30 = vsel %vm18782_vm12, %v6551_v45, %v6555_v55  ;;  %v15640_v7 = vrot.slane %v19880_v51, 9  ;;  %v6909_v45 = vrot.slane %v6907_v35, 6  ;;  %v6931_v55 = vshrl.u32 %v19915_v18, 16 }
 0x311   : > { %v6579_v5 = vrot.slane %v6578_v63, 4  ;;  %v15629_v41 = vcombine.low %v6556_v30, %v6570_v17  ;;  %v6625_v54 = vrot.slane %v6623_v59, 5  ;;  %v19899_v63 = vld [vmem:[#allocation2 + $0x50] sm:$0xe]  ;;  %v6934_v17 = vshll.u32 %v19915_v18, 16 }
 0x312   : > { %v15643_v44 = vrot.slane %v19899_v63, 9  ;;  %v6772_v50 = vsel %vm18883_vm0, %v15640_v7, %v6771_v21  ;;  %v6776_v1 = vsel %vm18883_vm0, %v15641_v36, %v6775_v57  ;;  %v6958_v35 = vshrl.u32 %v19880_v51, 16 }
 0x313   : > { %v6584_v25 = vsel %vm18782_vm12, %v6579_v5, %v6583_v61  ;;  %v6626_v28 = vsel %vm18782_vm12, %v6621_v48, %v6625_v54  ;;  %v6760_v5 = vsel %vm18883_vm0, %v15637_v14, %v6759_v47  ;;  %v6767_v61 = vrot.slane %v19851_v32, 5 }
 0x314   : > { %v15630_v22 = vcombine.low %v6584_v25, %v6598_v0  ;;  %v15631_v34 = vcombine.low %v6612_v27, %v6626_v28  ;;  %v19937_v30 = vsel %vm18883_vm0, %v15643_v44, %v6783_v16  ;;  %v19941_v32 = vsel %vm18883_vm0, %v15644_v10, %v6787_v9  ;;  %v19945_v25 = vld [vmem:[#allocation2 + $0x34] sm:$0x3]  ;;  %v19954_v27 = vld [vmem:[#allocation2 + $0x3c] sm:$0x3] }
 0x315   : > { %v15647_v62 = vcombine.low %v6760_v5, %v6764_v23  ;;  %v6940_v0 = vshrl.u32 %v19878_v37, 16  ;;  %v6943_v48 = vshll.u32 %v19878_v37, 16  ;;  %v6928_v14 = vor.u32 %v6927_v49, %v6924_v8 }
 0x316   : > { %17173 = vmatmul.mubr.msk.bf16.gmra.mrb[4].mxu1 %vm2788_vm13, %v18017_v52  ;;  %v15642_v52 = vrot.slane %v19897_v11, 9  ;;  %v6933_v47 = vrot.slane %v6931_v55, 5  ;;  %v6936_v56 = vrot.slane %v6934_v17, 6  ;;  %v6949_v37 = vshrl.u32 %v19945_v25, 16 }
 0x317   : > { %17178 = vmatprep.mubr.msk.bf16.mxu1 %vm2788_vm13, %v15628_v13  ;;  %v6906_v13 = vrot.slane %v6904_v6, 5  ;;  %v15650_v6 = vcombine.low %v19937_v30, %v19941_v32  ;;  %v6976_v7 = vshrl.u32 %v19889_v58, 16  ;;  %v6942_v21 = vrot.slane %v6940_v0, 5  ;;  %v19992_v0 = vld [vmem:[#allocation2 + $0x5c] sm:$0x3] }
 0x318   : > { %v6780_v59 = vsel %vm18883_vm0, %v15642_v52, %v6779_v42  ;;  %v6945_v36 = vrot.slane %v6943_v48, 6  ;;  %v6952_v57 = vshll.u32 %v19945_v25, 16  ;;  %v19960_v52 = vld [vmem:[#allocation2 + $0x44] sm:$0x3]  ;;  %v6979_v28 = vshll.u32 %v19889_v58, 16 }
 0x319   : > { %v6910_v2 = vor.u32 %v6909_v45, %v6906_v13  ;;  %v15649_v20 = vcombine.low %v6776_v1, %v6780_v59  ;;  %v6929_v42 = vrot.slane %v6928_v14, 4  ;;  %v6937_v53 = vor.u32 %v6936_v56, %v6933_v47  ;;  %v19974_v58 = vld [vmem:[%s21499_s3 + $0xc0] sm:$0xff]   ;;  %v19987_v59 = vld [vmem:[#allocation2 + $0x54] sm:$0x3] }
 0x31a   : > { %v6994_v44 = vshrl.u32 %v19897_v11, 16  ;;  %v6997_v16 = vshll.u32 %v19897_v11, 16  ;;  %v6960_v13 = vrot.slane %v6958_v35, 5  ;;  %v6967_v45 = vshrl.u32 %v19954_v27, 16 }
 0x31b   : > { %v6911_v3 = vrot.slane %v6910_v2, 4  ;;  %v6970_v10 = vshll.u32 %v19954_v27, 16  ;;  %v6978_v15 = vrot.slane %v6976_v7, 5  ;;  %v6981_v11 = vrot.slane %v6979_v28, 6 }
 0x31c   : > { %v7003_v5 = vshrl.u32 %v19963_v31, 16  ;;  %v7006_v23 = vshll.u32 %v19963_v31, 16  ;;  %v6946_v8 = vor.u32 %v6945_v36, %v6942_v21  ;;  %v6996_v49 = vrot.slane %v6994_v44, 5 }
 0x31d   : > { %v6999_v55 = vrot.slane %v6997_v16, 6  ;;  %v7015_v17 = vshll.u32 %v19899_v63, 16  ;;  %v6969_v1 = vrot.slane %v6967_v45, 5  ;;  %v7030_v2 = vshrl.u32 %v19905_v38, 16 }
 0x31e   : > { %17179 = vmatmul.mubr.msk.bf16.vlgmr.msra.gmra.mrb[0].mxu1 %vm2788_vm13, %v15629_v41  ;;  %v6768_v41 = vsel %vm18883_vm0, %v15639_v4, %v6767_v61  ;;  %v6961_v4 = vshll.u32 %v19880_v51, 16  ;;  %v7012_v61 = vshrl.u32 %v19899_v63, 16  ;;  %v7005_v48 = vrot.slane %v7003_v5, 5 }
 0x31f   : > { %17187 = vmatpush3.bf16.msra.mxu1 %v19842_v60  ;;  %17182 = vmatprep.mubr.msk.bf16.mxu1 %vm2788_vm13, %v15630_v22  ;;  %v6916_v60 = vshll.u32 %v19891_v12, 16  ;;  %v15648_v54 = vcombine.low %v6768_v41, %v6772_v50  ;;  %v6938_v50 = vsel %vm19022_vm11, %v6929_v42, %v6937_v53  ;;  %v7000_v47 = vor.u32 %v6999_v55, %v6996_v49 }
 0x320   : > { %17196 = vmatprep.subr.bf16.mxu1 %v19886_v40  ;;  %v6963_v9 = vrot.slane %v6961_v4, 6  ;;  %v7014_v14 = vrot.slane %v7012_v61, 5  ;;  %v7017_v56 = vrot.slane %v7015_v17, 6  ;;  %v7032_v35 = vrot.slane %v7030_v2, 5  ;;  %v7153_v17 = vld [vmem:[#allocation2 + $0x20] sm:$0xc] }
 0x321   : > { %v6918_v39 = vrot.slane %v6916_v60, 6  ;;  %v6985_v60 = vshrl.u32 %v19960_v52, 16  ;;  %v7042_v4 = vshll.u32 %v19992_v0, 16  ;;  %v6947_v21 = vrot.slane %v6946_v8, 4  ;;  %v7154_v8 = vld [vmem:[#allocation2 + $0x28] sm:$0xc] }
 0x322   : > { %v6951_v36 = vrot.slane %v6949_v37, 5  ;;  %v6954_v28 = vrot.slane %v6952_v57, 6  ;;  %v7187_v43 = vrot.slane %v19945_v25, 6  ;;  %vm18302_vm12 = vmmov 0  }
 0x323   : > { %v6919_v22 = vor.u32 %v6918_v39, %v6915_v26  ;;  %v7033_v26 = vshll.u32 %v19905_v38, 16  ;;  %v6964_v39 = vor.u32 %v6963_v9, %v6960_v13  ;;  %v6987_v41 = vrot.slane %v6985_v60, 5  ;;  %17220 = vmatprep.mubr.msk.bf16.mxu0 %vm18302_vm12, %v18301_v46 }
 0x324   : > { %v7001_v13 = vrot.slane %v7000_v47, 4  ;;  %v7044_v37 = vrot.slane %v7042_v4, 6  ;;  %v6955_v57 = vor.u32 %v6954_v28, %v6951_v36  ;;  %v7160_v4 = vld [vmem:[#allocation2 + $0x58] sm:$0xc]  ;;  %v7203_v36 = vrot.slane %v19987_v59, 6 }
 0x325   : > { %v6920_v51 = vsel %vm19022_vm11, %v6911_v3, %v6919_v22  ;;  %v7024_v3 = vshll.u32 %v19987_v59, 16  ;;  %v7035_v38 = vrot.slane %v7033_v26, 6  ;;  %v7039_v22 = vshrl.u32 %v19992_v0, 16 }
 0x326   : > { %17183 = vmatmul.mubr.msk.bf16.gmra.mrb[4].mxu1 %vm2788_vm13, %v15631_v34  ;;  %v6988_v34 = vshll.u32 %v19960_v52, 16  ;;  %v15658_v7 = vcombine.low %v6920_v51, %v6938_v50  ;;  %v6965_v42 = vrot.slane %v6964_v39, 4  ;;  %v15668_v50 = vrot.slane %v7154_v8, 10 }
 0x327   : > { %17188 = vmatprep.mubr.msk.bf16.mxu1 %vm2788_vm13, %v15647_v62  ;;  %v6972_v62 = vrot.slane %v6970_v10, 6  ;;  %v7026_v9 = vrot.slane %v7024_v3, 6  ;;  %v7036_v51 = vor.u32 %v7035_v38, %v7032_v35  ;;  %v7041_v60 = vrot.slane %v7039_v22, 5  ;;  %v7159_v22 = vld [vmem:[#allocation2 + $0x50] sm:$0xc] }
 0x328   : > { %v6990_v63 = vrot.slane %v6988_v34, 6  ;;  %v15667_v39 = vrot.slane %v7153_v17, 10  ;;  %v7195_v3 = vrot.slane %v19960_v52, 6  ;;  %v7199_v38 = vrot.slane %v19963_v31, 6 }
 0x329   : > { %v6973_v53 = vor.u32 %v6972_v62, %v6969_v1  ;;  %v7045_v61 = vor.u32 %v7044_v37, %v7041_v60  ;;  %v7183_v1 = vrot.slane %v19915_v18, 6  ;;  %v7179_v62 = vrot.slane %v19891_v12, 6 }
 0x32a   : > { %v6991_v16 = vor.u32 %v6990_v63, %v6987_v41  ;;  %v7155_v41 = vld [vmem:[#allocation2 + $0x30] sm:$0xc]  ;;  %v7191_v12 = vrot.slane %v19954_v27, 6  ;;  %v15673_v52 = vrot.slane %v7159_v22, 10  ;;  %v15674_v31 = vrot.slane %v7160_v4, 10 }
 0x32b   : > { %v6974_v34 = vsel %vm19022_vm11, %v6965_v42, %v6973_v53  ;;  %v7184_v18 = vsel %vm19097_vm8, %v15668_v50, %v7183_v1  ;;  %v7207_v28 = vrot.slane %v19992_v0, 6  ;;  %v15735_v0 = vld.sshfl [vmem:[#allocation3] sm:$0x13 pattern:$0x76325410] }
 0x32c   : > { %v7836_v60 = vshrl.u32 %v15735_v0, 16  ;;  %v7839_v37 = vshll.u32 %v15735_v0, 16 }
 0x32e   : > { %17189 = vmatmul.mubr.msk.bf16.vlgmr.msra.gmra.mrb[0].mxu1 %vm2788_vm13, %v15648_v54  ;;  %v7008_v54 = vrot.slane %v7006_v23, 6  ;;  %v7037_v23 = vrot.slane %v7036_v51, 4  ;;  %v20083_v50 = vrot.slane %v7836_v60, 6  ;;  %v20085_v1 = vrot.slane %v7839_v37, 7 }
 0x32f   : > { %17197 = vmatpush3.bf16.msra.mxu1 %v19886_v40  ;;  %17192 = vmatprep.mubr.msk.bf16.mxu1 %vm2788_vm13, %v15649_v20  ;;  %v6982_v40 = vor.u32 %v6981_v11, %v6978_v15  ;;  %v7021_v20 = vshrl.u32 %v19987_v59, 16  ;;  %v7018_v15 = vor.u32 %v7017_v56, %v7014_v14  ;;  %v6956_v11 = vsel %vm19022_vm11, %v6947_v21, %v6955_v57 }
 0x330   : > { %17206 = vmatprep.subr.bf16.mxu1 %v19974_v58  ;;  %v7009_v45 = vor.u32 %v7008_v54, %v7005_v48  ;;  %v15659_v49 = vcombine.low %v6956_v11, %v6974_v34  ;;  %v7046_v26 = vsel %vm19022_vm11, %v7037_v23, %v7045_v61  ;;  %v7158_v48 = vld [vmem:[#allocation2 + $0x48] sm:$0xc]  ;;  %v7180_v54 = vsel %vm19097_vm8, %v15667_v39, %v7179_v62 }
 0x331   : > { %v6983_v44 = vrot.slane %v6982_v40, 4  ;;  %v7023_v10 = vrot.slane %v7021_v20, 5  ;;  %v7156_v40 = vld [vmem:[#allocation2 + $0x38] sm:$0xc]  ;;  %v15669_v14 = vrot.slane %v7155_v41, 10  ;;  %v15677_v47 = vcombine.low %v7180_v54, %v7184_v18 }
 0x332   : > { %v7010_v32 = vsel %vm19022_vm11, %v7001_v13, %v7009_v45  ;;  %v15670_v56 = vrot.slane %v7156_v40, 10  ;;  %v15672_v35 = vrot.slane %v7158_v48, 10  ;;  %v20073_v45 = vld [vmem:[%s21500_s4] ss:$0 sm:$0xff] }
 0x333   : > { %v6992_v30 = vsel %vm19022_vm11, %v6983_v44, %v6991_v16  ;;  %v7027_v5 = vor.u32 %v7026_v9, %v7023_v10  ;;  %v7188_v25 = vsel %vm19097_vm8, %v15669_v14, %v7187_v43  ;;  %v7204_v44 = vsel %vm19097_vm8, %v15673_v52, %v7203_v36  ;;  %v15736_v10 = vld.sshfl [vmem:[#allocation3 + $0x4] sm:$0x13 pattern:$0x76325410] }
 0x334   : > { %v15660_v55 = vcombine.low %v6992_v30, %v7010_v32  ;;  %v7200_v21 = vsel %vm19097_vm8, %v15672_v35, %v7199_v38  ;;  %v7208_v16 = vsel %vm19097_vm8, %v15674_v31, %v7207_v28  ;;  %v7803_v9 = vcombine.high %v15735_v0, %v15735_v0 }
 0x335   : > { %v15680_v13 = vcombine.low %v7204_v44, %v7208_v16  ;;  %v7850_v11 = vshrl.u32 %v15736_v10, 16 }
 0x336   : > { %17193 = vmatmul.mubr.msk.bf16.gmra.mrb[4].mxu1 %vm2788_vm13, %v15650_v6  ;;  %v7019_v6 = vrot.slane %v7018_v15, 4  ;;  %v7811_v15 = vcombine.high %v15736_v10, %v15736_v10  ;;  %v20078_v8 = vshll.u32 %v7803_v9, 16 }
 0x337   : > { %17198 = vmatprep.mubr.msk.bf16.mxu1 %vm2788_vm13, %v15658_v7  ;;  %v7192_v7 = vsel %vm19097_vm8, %v15670_v56, %v7191_v12  ;;  %v20088_v62 = vrot.slane %v7850_v11, 6 }
 0x338   : > { %v7028_v2 = vsel %vm19022_vm11, %v7019_v6, %v7027_v5  ;;  %v15678_v42 = vcombine.low %v7188_v25, %v7192_v7  ;;  %v7853_v6 = vshll.u32 %v15736_v10, 16  ;;  %vm7828_vm11 = vsmask.f32 1280 }
 0x339   : > { %v15661_v63 = vcombine.low %v7028_v2, %v7046_v26  ;;  %vm7830_vm9 = vmor %vm7828_vm11, %vm7829_vm6  ;;  %vm8087_vm11 = vcmask 1040384   ;;  %vm8088_vm6 = vcmask 1042434  }
 0x33a   : > { %v20091_v40 = vrot.slane %v7853_v6, 7 }
 0x33e   : > { %17199 = vmatmul.mubr.msk.bf16.vlgmr.msra.gmra.mrb[0].mxu1 %vm2788_vm13, %v15659_v49  ;;  %v20080_v49 = vshll.u32 %v7811_v15, 16 }
 0x33f   : > { %17207 = vmatpush3.bf16.msra.mxu1 %v19974_v58  ;;  %17202 = vmatprep.mubr.msk.bf16.mxu1 %vm2788_vm13, %v15660_v55  ;;  %v7157_v58 = vld [vmem:[#allocation2 + $0x40] sm:$0xc] }
 0x340   : > { %17416 = vmatprep.subr.bf16.mxu1 %v18301_v46  ;;  %v15671_v20 = vrot.slane %v7157_v58, 10 }
 0x342   : > { %v7196_v27 = vsel %vm19097_vm8, %v15671_v20, %v7195_v3  ;;  %vm7833_vm8 = vsmask.f32 7448 }
 0x343   : > { %v15679_v53 = vcombine.low %v7196_v27, %v7200_v21 }
 0x346   : > { %17203 = vmatmul.mubr.msk.bf16.gmra.mrb[4].mxu1 %vm2788_vm13, %v15661_v63 }
 0x347   : > { %17208 = vmatprep.mubr.msk.bf16.mxu1 %vm2788_vm13, %v15677_v47 }
 0x34e   : > { %17209 = vmatmul.mubr.msk.bf16.vlgmr.msra.gmra.mrb[0].mxu1 %vm2788_vm13, %v15678_v42 }
 0x34f   : > { %17212 = vmatprep.mubr.msk.bf16.mxu1 %vm2788_vm13, %v15679_v53 }
 0x356   : > { %17213 = vmatmul.mubr.msk.bf16.gmra.mrb[4].mxu1 %vm2788_vm13, %v15680_v13  ;;  %vm11443_vm13 = vsmask.f32 1284 }
 0x357   : > { %17424 = vmatprep.mubr.msk.bf16.mxu1 %vm18302_vm12, %v18301_v46  ;;  %vm11444_vm0 = vmor %vm8230_vm14, %vm11443_vm13 }
 0x358   : > { %vm20066_vm1 = vmor %vm11444_vm0, %vm8231_vm15 }
 0x359   : > { %vm7832_vm13 = vmor %vm7830_vm9, %vm7831_vm7  ;;  %vm7925_vm7 = vcmask 261120   ;;  %vm8235_vm9 = vsmask.f32 6424 }
 0x35a   : > { %vm20142_vm0 = vmor %vm7832_vm13, %vm7833_vm8  ;;  %vm474_vm13 = vcmask 518144  }
 0x35b   : > { %vm8232_vm8 = vmor %vm8230_vm14, %vm8231_vm15  ;;  %475 = vst.msk [vmem:[#allocation4] sm:$0x7] %vm474_vm13, %v18299_v24 }
 0x35c   : > { %476 = vst.msk [vmem:[#allocation4 + $0x4] sm:$0x7] %vm474_vm13, %v18299_v24  ;;  %477 = vst.msk [vmem:[#allocation4 + $0x8] sm:$0x7] %vm474_vm13, %v18299_v24 }
 0x35d   : > { %478 = vst.msk [vmem:[#allocation4 + $0xc] sm:$0x7] %vm474_vm13, %v18299_v24  ;;  %479 = vst.msk [vmem:[#allocation4 + $0x10] sm:$0x7] %vm474_vm13, %v18299_v24 }
 0x35e   : > { %480 = vst.msk [vmem:[#allocation4 + $0x14] sm:$0x7] %vm474_vm13, %v18299_v24 }
 0x421   : > { %v17210_v51 = vpop.f32.mrb[0].mxu1 }
 0x422   : > { %v7324_v57 = vadd.f32 %v17210_v51, %v20073_v45  ;;  %v7276_v34 = vpop.f32.mrb[1].mxu1 }
 0x423   : > { %v7322_v30 = vadd.f32 %v20073_v45, %v7276_v34  ;;  %v17211_v32 = vpop.f32.mrb[2].mxu1 }
 0x424   : > { %v7332_v5 = vmax.f32 %v7324_v57, 0.0  ;;  %v7325_v23 = vadd.f32 %v17211_v32, %v20073_v45  ;;  %v7279_v61 = vpop.f32.mrb[3].mxu1 }
 0x425   : > { %v7330_v55 = vmax.f32 %v7322_v30, 0.0  ;;  %v7323_v17 = vadd.f32 %v20073_v45, %v7279_v61 }
 0x426   : > { %v7380_v2 = vcombine.high %v7332_v5, %v7332_v5  ;;  %v7387_v26 = vrot.slane %v7332_v5, %v18527_v33  ;;  %v7333_v39 = vmax.f32 %v7325_v23, 0.0 }
 0x427   : > { %v7346_v41 = vcombine.high %v7330_v55, %v7330_v55  ;;  %v7353_v63 = vrot.slane %v7330_v55, %v18527_v33  ;;  %v7331_v18 = vmax.f32 %v7323_v17, 0.0 }
 0x428   : > { %v7394_v58 = vrot.slane %v7380_v2, %v18527_v33  ;;  %v7395_v48 = vcombine.high %v7387_v26, %v7387_v26  ;;  %v15695_v54 = vrot.slane %v7387_v26, 9  ;;  %v7397_v14 = vcombine.high %v7333_v39, %v7333_v39 }
 0x429   : > { %v7360_v47 = vrot.slane %v7346_v41, %v18527_v33  ;;  %v7361_v43 = vcombine.high %v7353_v63, %v7353_v63  ;;  %v15687_v56 = vrot.slane %v7353_v63, 9  ;;  %v7404_v12 = vrot.slane %v7333_v39, %v18527_v33  ;;  %v17214_v20 = vpop.f32.mrb[4].mxu1 }
 0x42a   : > { %v7396_v3 = vcombine.high %v7394_v58, %v7394_v58  ;;  %v15696_v35 = vrot.slane %v7395_v48, 9  ;;  %v15697_v38 = vrot.slane %v7394_v58, 9  ;;  %v7618_v22 = vmax.f32 %v7387_v26, %v15695_v54  ;;  %v20096_v4 = vpop.f32.mrb[5].mxu1 }
 0x42b   : > { %v7362_v7 = vcombine.high %v7360_v47, %v7360_v47  ;;  %v15688_v25 = vrot.slane %v7361_v43, 9  ;;  %v15689_v27 = vrot.slane %v7360_v47, 9  ;;  %v7610_v21 = vmax.f32 %v7353_v63, %v15687_v56  ;;  %v20098_v52 = vpop.f32.mrb[6].mxu1 }
 0x42c   : > { %v15698_v36 = vrot.slane %v7396_v3, 9  ;;  %v7619_v31 = vmax.f32 %v7395_v48, %v15696_v35  ;;  %v7620_v28 = vmax.f32 %v7394_v58, %v15697_v38  ;;  %v7411_v42 = vrot.slane %v7397_v14, %v18527_v33  ;;  %v20101_v53 = vpop.f32.mrb[7].mxu1 }
 0x42d   : > { %v15690_v44 = vrot.slane %v7362_v7, 9  ;;  %v7611_v16 = vmax.f32 %v7361_v43, %v15688_v25  ;;  %v7612_v13 = vmax.f32 %v7360_v47, %v15689_v27  ;;  %v7412_v19 = vcombine.high %v7404_v12, %v7404_v12 }
 0x42e   : > { %v7621_v0 = vmax.f32 %v7396_v3, %v15698_v36  ;;  %v7413_v10 = vcombine.high %v7411_v42, %v7411_v42  ;;  %v15699_v9 = vrot.slane %v7404_v12, 9  ;;  %v15701_v15 = vrot.slane %v7411_v42, 9 }
 0x42f   : > { %v7613_v51 = vmax.f32 %v7362_v7, %v15690_v44  ;;  %v15700_v60 = vrot.slane %v7412_v19, 9  ;;  %v7363_v37 = vcombine.high %v7331_v18, %v7331_v18  ;;  %v7370_v57 = vrot.slane %v7331_v18, %v18527_v33 }
 0x430   : > { %v15702_v34 = vrot.slane %v7413_v10, 9  ;;  %v7622_v11 = vmax.f32 %v7404_v12, %v15699_v9  ;;  %v7624_v30 = vmax.f32 %v7411_v42, %v15701_v15  ;;  %v7328_v32 = vadd.f32 %v17214_v20, %v20073_v45 }
 0x431   : > { %v7623_v6 = vmax.f32 %v7412_v19, %v15700_v60  ;;  %v7377_v5 = vrot.slane %v7363_v37, %v18527_v33  ;;  %v7378_v23 = vcombine.high %v7370_v57, %v7370_v57  ;;  %v15691_v61 = vrot.slane %v7370_v57, 9 }
 0x432   : > { %v7625_v55 = vmax.f32 %v7413_v10, %v15702_v34  ;;  %v7646_v17 = vmax.f32 %v7618_v22, %v7622_v11  ;;  %v7648_v2 = vmax.f32 %v7620_v28, %v7624_v30  ;;  %v7336_v26 = vmax.f32 %v7328_v32, 0.0 }
 0x433   : > { %v7647_v39 = vmax.f32 %v7619_v31, %v7623_v6  ;;  %v7379_v41 = vcombine.high %v7377_v5, %v7377_v5  ;;  %v15692_v63 = vrot.slane %v7378_v23, 9  ;;  %v15693_v58 = vrot.slane %v7377_v5, 9 }
 0x434   : > { %v7649_v48 = vmax.f32 %v7621_v0, %v7625_v55  ;;  %v16531_v18 = vpack.c.bf16 %v7646_v17, %v7646_v17  ;;  %v16533_v54 = vpack.c.bf16 %v7648_v2, %v7648_v2  ;;  %v7614_v14 = vmax.f32 %v7370_v57, %v15691_v61 }
 0x435   : > { %v16532_v47 = vpack.c.bf16 %v7647_v39, %v7647_v39  ;;  %v15694_v43 = vrot.slane %v7379_v41, 9  ;;  %v7615_v56 = vmax.f32 %v7378_v23, %v15692_v63  ;;  %v7616_v12 = vmax.f32 %v7377_v5, %v15693_v58 }
 0x436   : > { %v16534_v20 = vpack.c.bf16 %v7649_v48, %v7649_v48  ;;  %v7726_v3 = vunpack.c.l.b16 %v16531_v18  ;;  %v7728_v35 = vunpack.c.l.b16 %v16533_v54  ;;  %v7642_v38 = vmax.f32 %v7610_v21, %v7614_v14 }
 0x437   : > { %v7727_v22 = vunpack.c.l.b16 %v16532_v47  ;;  %v7617_v7 = vmax.f32 %v7379_v41, %v15694_v43  ;;  %v7643_v25 = vmax.f32 %v7611_v16, %v7615_v56  ;;  %v7644_v27 = vmax.f32 %v7612_v13, %v7616_v12 }
 0x438   : > { %v7729_v36 = vunpack.c.l.b16 %v16534_v20  ;;  %v7745_v31 = vrot.slane %v7726_v3, 6  ;;  %v7748_v28 = vrot.slane %v7728_v35, 4  ;;  %v16527_v42 = vpack.c.bf16 %v7642_v38, %v7642_v38 }
 0x439   : > { %v7746_v44 = vrot.slane %v7727_v22, 5  ;;  %v7645_v19 = vmax.f32 %v7613_v51, %v7617_v7  ;;  %v16528_v0 = vpack.c.bf16 %v7643_v25, %v7643_v25  ;;  %v16529_v10 = vpack.c.bf16 %v7644_v27, %v7644_v27 }
 0x43a   : > { %v7750_v9 = vrot.slane %v7729_v36, 3  ;;  %v7722_v15 = vunpack.c.l.b16 %v16527_v42  ;;  %v7448_v60 = vcombine.high %v7336_v26, %v7336_v26  ;;  %v7455_v37 = vrot.slane %v7336_v26, %v18527_v33 }
 0x43b   : > { %v7747_v57 = vsel %vm2475_vm2, %v7746_v44, %v7745_v31  ;;  %v16530_v21 = vpack.c.bf16 %v7645_v19, %v7645_v19  ;;  %v7723_v34 = vunpack.c.l.b16 %v16528_v0  ;;  %v7724_v11 = vunpack.c.l.b16 %v16529_v10 }
 0x43c   : > { %v7749_v16 = vsel %vm2478_vm3, %v7748_v28, %v7747_v57  ;;  %v7738_v13 = vrot.slane %v7722_v15, 6  ;;  %v7462_v30 = vrot.slane %v7448_v60, %v18527_v33  ;;  %v7463_v32 = vcombine.high %v7455_v37, %v7455_v37 }
 0x43d   : > { %v7751_v51 = vsel %vm2481_vm4, %v7750_v9, %v7749_v16  ;;  %v7725_v6 = vunpack.c.l.b16 %v16530_v21  ;;  %v7739_v5 = vrot.slane %v7723_v34, 5  ;;  %v7741_v23 = vrot.slane %v7724_v11, 4 }
 0x43e   : > { %v7767_v61 = vpack.c.b16 %v7751_v51, %v7751_v51  ;;  %v7464_v55 = vcombine.high %v7462_v30, %v7462_v30  ;;  %v7842_v17 = vor.u32 %v20085_v1, %v20083_v50  ;;  %v7847_v2 = vrot.slane %v20078_v8, 7 }
 0x43f   : > { %v7740_v26 = vsel %vm2475_vm2, %v7739_v5, %v7738_v13  ;;  %v7743_v39 = vrot.slane %v7725_v6, 3  ;;  %v7326_v41 = vadd.f32 %v20073_v45, %v20096_v4  ;;  %v7856_v63 = vor.u32 %v20091_v40, %v20088_v62 }
 0x440   : > { %7777 = vst.msk [vmem:[#allocation3 + $0xc] sm:$0x6] %vm7775_vm10, %v7767_v61  ;;  %v7742_v58 = vsel %vm2478_vm3, %v7741_v23, %v7740_v26  ;;  %v15711_v48 = vrot.slane %v7455_v37, 9  ;;  %v15712_v18 = vrot.slane %v7463_v32, 9  ;;  %v15713_v54 = vrot.slane %v7462_v30, 9 }
 0x441   : > { %v7744_v50 = vsel %vm2481_vm4, %v7743_v39, %v7742_v58  ;;  %v7334_v1 = vmax.f32 %v7326_v41, 0.0  ;;  %v7329_v14 = vadd.f32 %v20098_v52, %v20073_v45  ;;  %v7861_v47 = vrot.slane %v20080_v49, 7 }
 0x442   : > { %v7766_v43 = vpack.c.b16 %v7744_v50, %v7744_v50  ;;  %v15714_v4 = vrot.slane %v7464_v55, 9  ;;  %v7327_v62 = vadd.f32 %v20073_v45, %v20101_v53  ;;  %v20127_v40 = vrot.slane %v7842_v17, 2 }
 0x443   : > { %v7414_v56 = vcombine.high %v7334_v1, %v7334_v1  ;;  %v7421_v12 = vrot.slane %v7334_v1, %v18527_v33  ;;  %v7337_v20 = vmax.f32 %v7329_v14, 0.0  ;;  %v20130_v3 = vrot.slane %v7856_v63, 2 }
 0x444   : > { %7776 = vst.msk [vmem:[#allocation3 + $0x8] sm:$0x6] %vm7775_vm10, %v7766_v43  ;;  %v7634_v35 = vmax.f32 %v7455_v37, %v15711_v48  ;;  %v7635_v38 = vmax.f32 %v7463_v32, %v15712_v18  ;;  %v7636_v52 = vmax.f32 %v7462_v30, %v15713_v54  ;;  %v7335_v22 = vmax.f32 %v7327_v62, 0.0 }
 0x445   : > { %v7428_v7 = vrot.slane %v7414_v56, %v18527_v33  ;;  %v7429_v25 = vcombine.high %v7421_v12, %v7421_v12  ;;  %v15703_v45 = vrot.slane %v7421_v12, 9  ;;  %v7465_v53 = vcombine.high %v7337_v20, %v7337_v20 }
 0x446   : > { %v7637_v27 = vmax.f32 %v7464_v55, %v15714_v4  ;;  %v7472_v36 = vrot.slane %v7337_v20, %v18527_v33  ;;  %v7431_v31 = vcombine.high %v7335_v22, %v7335_v22  ;;  %v7438_v28 = vrot.slane %v7335_v22, %v18527_v33 }
 0x447   : > { %v7430_v42 = vcombine.high %v7428_v7, %v7428_v7  ;;  %v15704_v44 = vrot.slane %v7429_v25, 9  ;;  %v15705_v19 = vrot.slane %v7428_v7, 9  ;;  %v7626_v0 = vmax.f32 %v7421_v12, %v15703_v45 }
 0x448   : > { %v7479_v10 = vrot.slane %v7465_v53, %v18527_v33  ;;  %v7480_v9 = vcombine.high %v7472_v36, %v7472_v36  ;;  %v15715_v15 = vrot.slane %v7472_v36, 9  ;;  %v7445_v60 = vrot.slane %v7431_v31, %v18527_v33 }
 0x449   : > { %v15706_v37 = vrot.slane %v7430_v42, 9  ;;  %v7627_v57 = vmax.f32 %v7429_v25, %v15704_v44  ;;  %v7628_v21 = vmax.f32 %v7428_v7, %v15705_v19  ;;  %v7446_v34 = vcombine.high %v7438_v28, %v7438_v28  ;;  %v15738_v44 = vld.sshfl [vmem:[#allocation3 + $0xc] sm:$0x13 pattern:$0x76325410] }
 0x44a   : > { %v7481_v11 = vcombine.high %v7479_v10, %v7479_v10  ;;  %v15716_v16 = vrot.slane %v7480_v9, 9  ;;  %v15717_v13 = vrot.slane %v7479_v10, 9  ;;  %v7638_v30 = vmax.f32 %v7472_v36, %v15715_v15 }
 0x44b   : > { %v7629_v32 = vmax.f32 %v7430_v42, %v15706_v37  ;;  %v7447_v51 = vcombine.high %v7445_v60, %v7445_v60  ;;  %v15707_v6 = vrot.slane %v7438_v28, 9  ;;  %v15708_v5 = vrot.slane %v7446_v34, 9  ;;  %v15737_v25 = vld.sshfl [vmem:[#allocation3 + $0x8] sm:$0x13 pattern:$0x76325410] }
 0x44c   : > { %v15718_v23 = vrot.slane %v7481_v11, 9  ;;  %v7639_v61 = vmax.f32 %v7480_v9, %v15716_v16  ;;  %v7640_v55 = vmax.f32 %v7479_v10, %v15717_v13  ;;  %v7654_v17 = vmax.f32 %v7634_v35, %v7638_v30 }
 0x44d   : > { %v15709_v26 = vrot.slane %v7445_v60, 9  ;;  %v15710_v39 = vrot.slane %v7447_v51, 9  ;;  %v7630_v41 = vmax.f32 %v7438_v28, %v15707_v6  ;;  %v7631_v63 = vmax.f32 %v7446_v34, %v15708_v5 }
 0x44e   : > { %v7641_v58 = vmax.f32 %v7481_v11, %v15718_v23  ;;  %v7655_v48 = vmax.f32 %v7635_v38, %v7639_v61  ;;  %v7656_v18 = vmax.f32 %v7636_v52, %v7640_v55  ;;  %v16539_v54 = vpack.c.bf16 %v7654_v17, %v7654_v17 }
 0x44f   : > { %v7632_v50 = vmax.f32 %v7445_v60, %v15709_v26  ;;  %v7633_v1 = vmax.f32 %v7447_v51, %v15710_v39  ;;  %v7650_v14 = vmax.f32 %v7626_v0, %v7630_v41  ;;  %v7651_v43 = vmax.f32 %v7627_v57, %v7631_v63 }
 0x450   : > { %v7657_v4 = vmax.f32 %v7637_v27, %v7641_v58  ;;  %v16540_v62 = vpack.c.bf16 %v7655_v48, %v7655_v48  ;;  %v16541_v56 = vpack.c.bf16 %v7656_v18, %v7656_v18  ;;  %v7734_v12 = vunpack.c.l.b16 %v16539_v54  ;;  %v15749_v54 = vld.sshfl [vmem:[#allocation3] sm:$0x12 pattern:$0x76325410] }
 0x451   : > { %v7652_v20 = vmax.f32 %v7628_v21, %v7632_v50  ;;  %v7653_v35 = vmax.f32 %v7629_v32, %v7633_v1  ;;  %v16535_v22 = vpack.c.bf16 %v7650_v14, %v7650_v14  ;;  %v16536_v7 = vpack.c.bf16 %v7651_v43, %v7651_v43  ;;  %v15750_v1 = vld.sshfl [vmem:[#allocation3 + $0x4] sm:$0x12 pattern:$0x76325410] }
 0x452   : > { %v16542_v45 = vpack.c.bf16 %v7657_v4, %v7657_v4  ;;  %v7735_v38 = vunpack.c.l.b16 %v16540_v62  ;;  %v7736_v52 = vunpack.c.l.b16 %v16541_v56  ;;  %v7759_v53 = vrot.slane %v7734_v12, 6  ;;  %v15752_v62 = vld.sshfl [vmem:[#allocation3 + $0xc] sm:$0x12 pattern:$0x76325410] }
 0x453   : > { %v16537_v36 = vpack.c.bf16 %v7652_v20, %v7652_v20  ;;  %v16538_v31 = vpack.c.bf16 %v7653_v35, %v7653_v35  ;;  %v7730_v28 = vunpack.c.l.b16 %v16535_v22  ;;  %v7731_v42 = vunpack.c.l.b16 %v16536_v7  ;;  %v20171_v56 = vld.sshfl [vmem:[#allocation3 + $0xc] sm:$0x32 pattern:$0x76325410] }
 0x454   : > { %v7737_v27 = vunpack.c.l.b16 %v16542_v45  ;;  %v7760_v19 = vrot.slane %v7735_v38, 5  ;;  %v7762_v0 = vrot.slane %v7736_v52, 4  ;;  %v7819_v10 = vcombine.high %v15737_v25, %v15737_v25  ;;  %v15751_v35 = vld.sshfl [vmem:[#allocation3 + $0x8] sm:$0x12 pattern:$0x76325410] }
 0x455   : > { %v7732_v9 = vunpack.c.l.b16 %v16537_v36  ;;  %v7733_v15 = vunpack.c.l.b16 %v16538_v31  ;;  %v7752_v60 = vrot.slane %v7730_v28, 6  ;;  %v7753_v37 = vrot.slane %v7731_v42, 5  ;;  %v20177_v45 = vld.sshfl [vmem:[#allocation3 + $0x8] sm:$0x32 pattern:$0x76325410] }
 0x456   : > { %v7761_v21 = vsel %vm2475_vm2, %v7760_v19, %v7759_v53  ;;  %v7764_v34 = vrot.slane %v7737_v27, 3  ;;  %v7827_v11 = vcombine.high %v15738_v44, %v15738_v44  ;;  %v7864_v16 = vshrl.u32 %v15737_v25, 16  ;;  %v20187_v36 = vld.sshfl [vmem:[#allocation3] sm:$0xf pattern:$0x76325410] }
 0x457   : > { %v7763_v13 = vsel %vm2478_vm3, %v7762_v0, %v7761_v21  ;;  %v7754_v30 = vsel %vm2475_vm2, %v7753_v37, %v7752_v60  ;;  %v7755_v32 = vrot.slane %v7732_v9, 4  ;;  %v7757_v51 = vrot.slane %v7733_v15, 3  ;;  %v18023_v21 = vld [vmem:[%s21501_s5] sm:$0xff]  }
 0x458   : > { %v7765_v6 = vsel %vm2481_vm4, %v7764_v34, %v7763_v13  ;;  %v7848_v5 = vsel %vm20142_vm0, %v20127_v40, %v7847_v2  ;;  %v7866_v23 = vrot.slane %v7864_v16, 6  ;;  %v7867_v61 = vshll.u32 %v15737_v25, 16 }
 0x459   : > { %v7769_v55 = vpack.c.b16 %v7765_v6, %v7765_v6  ;;  %v7756_v17 = vsel %vm2478_vm3, %v7755_v32, %v7754_v30  ;;  %v7878_v26 = vshrl.u32 %v15738_v44, 16  ;;  %v7881_v39 = vshll.u32 %v15738_v44, 16 }
 0x45a   : > { %v7758_v41 = vsel %vm2481_vm4, %v7757_v51, %v7756_v17  ;;  %v20162_v63 = vsel %vm20142_vm0, %v20130_v3, %v7861_v47  ;;  %v7869_v8 = vrot.slane %v7867_v61, 7  ;;  %v7873_v58 = vshll.u32 %v7819_v10, 16  ;;  %v20167_v47 = vld.sshfl [vmem:[#allocation3] sm:$0x32 pattern:$0x76325410]  ;;  %vm8089_vm4 = vmor %vm8087_vm11, %vm8088_vm6 }
 0x45b   : > { %7779 = vst.msk [vmem:[#allocation3 + $0x14] sm:$0x6] %vm7775_vm10, %v7769_v55  ;;  %v7768_v2 = vpack.c.b16 %v7758_v41, %v7758_v41  ;;  %v7880_v40 = vrot.slane %v7878_v26, 6  ;;  %v7883_v48 = vrot.slane %v7881_v39, 7  ;;  %v7887_v18 = vshll.u32 %v7827_v11, 16 }
 0x45c   : > { %v7870_v50 = vor.u32 %v7869_v8, %v7866_v23  ;;  %v7896_v14 = vcombine.low %v7848_v5, %v20162_v63  ;;  %v20169_v3 = vld.sshfl [vmem:[#allocation3 + $0x4] sm:$0x32 pattern:$0x76325410]  ;;  %v7875_v4 = vrot.slane %v7873_v58, 7  ;;  %v8062_v7 = vcombine.high %v15749_v54, %v15749_v54  ;;  %v18024_v5 = vld [vmem:[%s21501_s5 + $0x8] sm:$0xff]  }
 0x45d   : > { %7778 = vst.msk [vmem:[#allocation3 + $0x10] sm:$0x6] %vm7775_vm10, %v7768_v2  ;;  %v7884_v49 = vor.u32 %v7883_v48, %v7880_v40  ;;  %v7889_v20 = vrot.slane %v7887_v18, 7  ;;  %v8070_v25 = vcombine.high %v15750_v1, %v15750_v1  ;;  %vm8091_vm10 = vmor %vm8089_vm4, %vm2478_vm3  ;;  %v15753_v31 = vrot.slane %v15749_v54, 9 }
 0x45e   : > { %v7871_v43 = vrot.slane %v7870_v50, 2  ;;  %v7904_v52 = vrot.slane %v7896_v14, %v18527_v33  ;;  %v8205_v28 = vcombine.high %v20167_v47, %v20167_v47  ;;  %v8213_v42 = vcombine.high %v20169_v3, %v20169_v3  ;;  %vm20201_vm3 = vmor %vm8091_vm10, %vm2484_vm5  ;;  %v18221_v11 = vld.sshfl [vmem:[#allocation3 + $0x8] sm:$0xf pattern:$0x76325410] }
 0x45f   : > { %v7885_v12 = vrot.slane %v7884_v49, 2  ;;  %v8078_v44 = vcombine.high %v15751_v35, %v15751_v35  ;;  %v8086_v27 = vcombine.high %v15752_v62, %v15752_v62  ;;  %v8221_v19 = vcombine.high %v20177_v45, %v20177_v45 }
 0x460   : > { %v20175_v22 = vsel %vm20142_vm0, %v7871_v43, %v7875_v4  ;;  %v8229_v0 = vcombine.high %v20171_v56, %v20171_v56  ;;  %v8096_v9 = vrot.slane %v8062_v7, 7  ;;  %v15754_v15 = vrot.slane %v15750_v1, 9  ;;  %v18027_v1 = vld [vmem:[%s21501_s5 + $0x20] sm:$0xff]  }
 0x461   : > { %v20181_v38 = vsel %vm20142_vm0, %v7885_v12, %v7889_v20  ;;  %v8100_v60 = vrot.slane %v8070_v25, 7  ;;  %v8243_v16 = vshrl.u32 %v8205_v28, 16  ;;  %v8256_v13 = vshrl.u32 %v8213_v42, 16 }
 0x462   : > { %v7897_v53 = vcombine.low %v20175_v22, %v20181_v38  ;;  %v8104_v30 = vrot.slane %v8078_v44, 7  ;;  %v8108_v32 = vrot.slane %v8086_v27, 7  ;;  %v8269_v51 = vshrl.u32 %v8221_v19, 16 }
 0x463   : > { %v8282_v6 = vshrl.u32 %v8229_v0, 16  ;;  %v8097_v23 = vsel %vm20201_vm3, %v15753_v31, %v8096_v9  ;;  %v20217_v61 = vsel %vm20201_vm3, %v15754_v15, %v8100_v60  ;;  %vm8233_vm5 = vsmask.f32 4368 }
 0x464   : > { %v20198_v10 = vrot.slane %v7897_v53, %v18527_v33  ;;  %v8238_v55 = vshrl.u32 %v20167_v47, 16  ;;  %v15755_v17 = vrot.slane %v15751_v35, 9  ;;  %v15756_v26 = vrot.slane %v15752_v62, 9  ;;  %vm20239_vm14 = vmor %vm8232_vm8, %vm8233_vm5 }
 0x465   : > { %v8246_v39 = vshll.u32 %v8205_v28, 16  ;;  %v8251_v41 = vshrl.u32 %v20169_v3, 16  ;;  %v8245_v8 = vrot.slane %v8243_v16, 7  ;;  %v8258_v58 = vrot.slane %v8256_v13, 7  ;;  %vm20253_vm15 = vmor %vm20239_vm14, %vm8235_vm9 }
 0x466   : > { %v7912_v34 = vcombine.low %v7904_v52, %v20198_v10  ;;  %v8259_v2 = vshll.u32 %v8213_v42, 16  ;;  %v20228_v40 = vsel %vm20201_vm3, %v15755_v17, %v8104_v30  ;;  %v20232_v48 = vsel %vm20201_vm3, %v15756_v26, %v8108_v32  ;;  %v20295_v16 = vld.sshfl [vmem:[#allocation3 + $0x4] sm:$0x30 pattern:$0x76325410] }
 0x467   : > { %v8271_v18 = vrot.slane %v8269_v51, 7  ;;  %v8284_v54 = vrot.slane %v8282_v6, 7  ;;  %v8115_v50 = vcombine.low %v8097_v23, %v20217_v61  ;;  %v8264_v14 = vshrl.u32 %v20177_v45, 16  ;;  %v18028_v45 = vld [vmem:[%s21501_s5 + $0x28] sm:$0xff]   ;;  %v18031_v23 = vld [vmem:[%s21501_s5 + $0x40] sm:$0xff]  }
 0x468   : > { %17221 = vmatmul.mubr.msk.bf16.vlgmr.msra.gmra.mrb[32].mxu0 %vm7925_vm7, %v7912_v34  ;;  %v8272_v47 = vshll.u32 %v8221_v19, 16  ;;  %v8277_v3 = vshrl.u32 %v20171_v56, 16  ;;  %v8285_v43 = vshll.u32 %v8229_v0, 16  ;;  %v7990_v4 = vcombine.low %v20187_v36, %v18221_v11  ;;  %v18029_v0 = vld [vmem:[%s21501_s5 + $0x30] sm:$0xff]   ;;  %v18030_v34 = vld [vmem:[%s21501_s5 + $0x38] sm:$0xff]  }
 0x469   : > { %17225 = vmatpush3.bf16.msra.mxu0 %v18023_v21  ;;  %17228 = vmatprep.mubr.msk.bf16.mxu0 %vm18302_vm12, %v18301_v46  ;;  %v8116_v62 = vcombine.low %v20228_v40, %v20232_v48  ;;  %v15768_v12 = vrot.slane %v8238_v55, 9  ;;  %v15769_v20 = vrot.slane %v8251_v41, 9  ;;  %v8248_v35 = vor.u32 %v8246_v39, %v8245_v8  ;;  %v15802_v21 = vld.sshfl [vmem:[#allocation3 + $0x10] sm:$0x13 pattern:$0x76325410] }
 0x46a   : > { %17226 = vmatprep.subr.bf16.mxu0 %v18301_v46  ;;  %v8261_v7 = vor.u32 %v8259_v2, %v8258_v58  ;;  %v8274_v25 = vor.u32 %v8272_v47, %v8271_v18  ;;  %v8287_v52 = vor.u32 %v8285_v43, %v8284_v54  ;;  %v15770_v53 = vrot.slane %v8264_v14, 9  ;;  %v15779_v11 = vld.sshfl [vmem:[#allocation3] sm:$0x30 pattern:$0x76325410]  ;;  %v18032_v8 = vld [vmem:[%s21501_s5 + $0x48] sm:$0xff]  }
 0x46b   : > { %v15771_v36 = vrot.slane %v8277_v3, 9  ;;  %v8123_v31 = vrot.slane %v8115_v50, %v18527_v33  ;;  %v20265_v28 = vrot.slane %v8116_v62, %v18527_v33  ;;  %v8249_v42 = vsel %vm20253_vm15, %v15768_v12, %v8248_v35  ;;  %v20302_v32 = vld.sshfl [vmem:[#allocation3 + $0x8] sm:$0x30 pattern:$0x76325410]  ;;  %v18033_v50 = vld [vmem:[%s21501_s5 + $0x50] sm:$0xff]  }
 0x46c   : > { %v20271_v44 = vsel %vm20253_vm15, %v15769_v20, %v8261_v7  ;;  %v20275_v27 = vsel %vm20253_vm15, %v15770_v53, %v8274_v25  ;;  %v20304_v51 = vld.sshfl [vmem:[#allocation3 + $0xc] sm:$0x30 pattern:$0x76325410]  ;;  %v8661_v6 = vshrl.u32 %v15802_v21, 16  ;;  %v15787_v17 = vcombine.high %v15779_v11, %v20295_v16  ;;  %v18034_v62 = vld [vmem:[%s21501_s5 + $0x58] sm:$0xff]  }
 0x46d   : > { %17227 = vmatpush3.bf16.msra.mxu0 %v18024_v5  ;;  %v20279_v19 = vsel %vm20253_vm15, %v15771_v36, %v8287_v52  ;;  %v8131_v9 = vcombine.low %v8123_v31, %v20265_v28  ;;  %v8294_v15 = vcombine.low %v8249_v42, %v20271_v44  ;;  %v8664_v5 = vshll.u32 %v15802_v21, 16  ;;  %v18222_v14 = vld.sshfl [vmem:[#allocation3 + $0xc] sm:$0xf pattern:$0x76325410]  ;;  %v18037_v25 = vld [vmem:[%s21501_s5 + $0x60] sm:$0xff]  }
 0x46e   : > { %17232 = vmatprep.subr.bf16.mxu0 %v18301_v46  ;;  %v8295_v60 = vcombine.low %v20275_v27, %v20279_v19  ;;  %v15788_v26 = vcombine.high %v20302_v32, %v20304_v51  ;;  %v8663_v39 = vrot.slane %v8661_v6, 6  ;;  %v8617_v58 = vcombine.high %v15802_v21, %v15802_v21  ;;  %v15813_v3 = vld.sshfl [vmem:[#allocation3 + $0x10] sm:$0x12 pattern:$0x76325410]  ;;  %v18038_v42 = vld [vmem:[%s21501_s5 + $0x68] sm:$0xff]  }
 0x46f   : > { %v8302_v13 = vrot.slane %v8294_v15, %v18527_v33  ;;  %v8666_v41 = vrot.slane %v8664_v5, 7  ;;  %v8422_v2 = vrot.slane %v15787_v17, %v18527_v33  ;;  %v18223_v43 = vld.sshfl [vmem:[#allocation3 + $0x4] sm:$0xf pattern:$0x76325410]  ;;  %v8793_v35 = vcombine.high %v15813_v3, %v15813_v3  ;;  %v18040_v5 = vld [vmem:[%s21501_s5 + $0x78] sm:$0xff]  }
 0x470   : > { %17229 = vmatmul.mubr.msk.bf16.vlgmr.msra.gmra.mrb[36].mxu0 %vm7925_vm7, %v7990_v4  ;;  %v20300_v30 = vrot.slane %v8295_v60, %v18527_v33  ;;  %v20323_v18 = vrot.slane %v15788_v26, %v18527_v33  ;;  %v15828_v4 = vld.sshfl [vmem:[#allocation3 + $0x10] sm:$0x32 pattern:$0x76325410]  ;;  %v8519_v52 = vcombine.low %v18223_v43, %v18222_v14  ;;  %v8679_v31 = vcombine.low %v20162_v63, %v20175_v22  ;;  %v18078_v56 = vld [vmem:[%s21501_s5 + $0x178] sm:$0xff]  }
 0x471   : > { %17233 = vmatpush3.bf16.msra.mxu0 %v18027_v1  ;;  %17236 = vmatprep.mubr.msk.bf16.mxu0 %vm18302_vm12, %v18301_v46  ;;  %v8667_v54 = vor.u32 %v8666_v41, %v8663_v39  ;;  %v8670_v1 = vshll.u32 %v8617_v58, 16  ;;  %v8929_v7 = vcombine.high %v15828_v4, %v15828_v4  ;;  %v8808_v53 = vrot.slane %v8793_v35, 7  ;;  %v18039_v22 = vld [vmem:[%s21501_s5 + $0x70] sm:$0xff]  }
 0x472   : > { %17234 = vmatprep.subr.bf16.mxu0 %v18301_v46  ;;  %v8310_v55 = vcombine.low %v8302_v13, %v20300_v30  ;;  %v8430_v49 = vcombine.low %v8422_v2, %v20323_v18  ;;  %v8687_v63 = vrot.slane %v8679_v31, %v18527_v33  ;;  %v8970_v60 = vshrl.u32 %v15828_v4, 16  ;;  %v15863_v41 = vld.sshfl [vmem:[#allocation3 + $0x14] sm:$0x13 pattern:$0x76325410] }
 0x473   : > { %v8668_v47 = vrot.slane %v8667_v54, 2  ;;  %v8672_v12 = vrot.slane %v8670_v1, 7  ;;  %v8975_v36 = vshrl.u32 %v8929_v7, 16  ;;  %v8978_v21 = vshll.u32 %v8929_v7, 16 }
 0x474   : > { %v8815_v6 = vcombine.low %v20217_v61, %v20228_v40  ;;  %v18041_v61 = vld [vmem:[%s21501_s5 + $0x80] sm:$0xff]   ;;  %v8987_v39 = vcombine.low %v20271_v44, %v20275_v27  ;;  %v20399_v2 = vld.sshfl [vmem:[#allocation3 + $0x10] sm:$0x30 pattern:$0x76325410]  ;;  %v9356_v54 = vshll.u32 %v15863_v41, 16  ;;  %v9309_v43 = vcombine.high %v15863_v41, %v15863_v41 }
 0x475   : > { %17235 = vmatpush3.bf16.msra.mxu0 %v18028_v45  ;;  %v20339_v20 = vsel %vm20142_vm0, %v8668_v47, %v8672_v12  ;;  %v8977_v15 = vrot.slane %v8975_v36, 7  ;;  %v18043_v44 = vld [vmem:[%s21501_s5 + $0x90] sm:$0xff]   ;;  %v15849_v1 = vcombine.high %v20304_v51, %v20399_v2  ;;  %v15848_v47 = vcombine.high %v20295_v16, %v20302_v32  ;;  %v18045_v16 = vld [vmem:[%s21501_s5 + $0xa0] sm:$0xff]  }
 0x476   : > { %17240 = vmatprep.subr.bf16.mxu0 %v18301_v46  ;;  %v8680_v45 = vcombine.low %v20181_v38, %v20339_v20  ;;  %v8823_v17 = vrot.slane %v8815_v6, %v18527_v33  ;;  %v9358_v14 = vrot.slane %v9356_v54, 7  ;;  %v9362_v32 = vshll.u32 %v9309_v43, 16  ;;  %v18224_v35 = vld.sshfl [vmem:[#allocation3 + $0x10] sm:$0xf pattern:$0x76325410] }
 0x477   : > { %v8980_v13 = vor.u32 %v8978_v21, %v8977_v15  ;;  %v9122_v51 = vrot.slane %v15849_v1, %v18527_v33  ;;  %v18050_v21 = vld [vmem:[%s21501_s5 + $0xb8] sm:$0xff]   ;;  %vm11446_vm11 = vsmask.f32 3340  ;;  %vm11449_vm6 = vsmask.f32 5396 }
 0x478   : > { %17237 = vmatmul.mubr.msk.bf16.vlgmr.msra.gmra.mrb[40].mxu0 %vm7925_vm7, %v8131_v9  ;;  %v8694_v38 = vrot.slane %v8680_v45, %v18527_v33  ;;  %v15889_v45 = vld.sshfl [vmem:[#allocation3 + $0x14] sm:$0x32 pattern:$0x76325410]  ;;  %v9364_v36 = vrot.slane %v9362_v32, 7  ;;  %v18056_v32 = vld [vmem:[%s21501_s5 + $0xe8] sm:$0xff]   ;;  %vm11447_vm4 = vmor %vm20066_vm1, %vm11446_vm11 }
 0x479   : > { %17241 = vmatpush3.bf16.msra.mxu0 %v18029_v0  ;;  %17244 = vmatprep.mubr.msk.bf16.mxu0 %vm18302_vm12, %v18301_v46  ;;  %v15817_v0 = vrot.slane %v15813_v3, 9  ;;  %v18044_v3 = vld [vmem:[%s21501_s5 + $0x98] sm:$0xff]   ;;  %vm11448_vm10 = vmor %vm11447_vm4, %vm8233_vm5  ;;  %vm11382_vm8 = vcmask 517121  }
 0x47a   : > { %17242 = vmatprep.subr.bf16.mxu0 %v18301_v46  ;;  %v15924_v54 = vld.sshfl [vmem:[#allocation3 + $0x18] sm:$0x13 pattern:$0x76325410] }
 0x47b   : > { %v20359_v9 = vsel %vm20201_vm3, %v15817_v0, %v8808_v53  ;;  %v18046_v53 = vld [vmem:[%s21501_s5 + $0xa8] sm:$0xff]   ;;  %v9621_v0 = vcombine.high %v15889_v45, %v15889_v45  ;;  %v10046_v1 = vshrl.u32 %v15924_v54, 16 }
 0x47c   : > { %v8816_v11 = vcombine.low %v20232_v48, %v20359_v9 }
 0x47d   : > { %17243 = vmatpush3.bf16.msra.mxu0 %v18030_v34  ;;  %v8695_v34 = vcombine.low %v8687_v63, %v8694_v38  ;;  %v18049_v38 = vld [vmem:[%s21501_s5 + $0xb0] sm:$0xff]  }
 0x47e   : > { %17248 = vmatprep.subr.bf16.mxu0 %v18301_v46 }
 0x480   : > { %17245 = vmatmul.mubr.msk.bf16.vlgmr.msra.gmra.mrb[44].mxu0 %vm7925_vm7, %v8310_v55  ;;  %v8830_v55 = vrot.slane %v8816_v11, %v18527_v33 }
 0x481   : > { %17249 = vmatpush3.bf16.msra.mxu0 %v18031_v23  ;;  %17252 = vmatprep.mubr.msk.bf16.mxu0 %vm18302_vm12, %v18301_v46  ;;  %v15832_v23 = vrot.slane %v8970_v60, 9  ;;  %v9667_v60 = vshrl.u32 %v9621_v0, 16 }
 0x482   : > { %17250 = vmatprep.subr.bf16.mxu0 %v18301_v46  ;;  %v8831_v40 = vcombine.low %v8823_v17, %v8830_v55  ;;  %v9670_v55 = vshll.u32 %v9621_v0, 16  ;;  %v18227_v0 = vld.sshfl [vmem:[#allocation3 + $0x14] sm:$0xf pattern:$0x76325410] }
 0x483   : > { %v20380_v48 = vsel %vm20253_vm15, %v15832_v23, %v8980_v13  ;;  %v9669_v6 = vrot.slane %v9667_v60, 7  ;;  %v9662_v23 = vshrl.u32 %v15889_v45, 16  ;;  %v18057_v45 = vld [vmem:[%s21501_s5 + $0xf0] sm:$0xff]  }
 0x484   : > { %v8988_v26 = vcombine.low %v20279_v19, %v20380_v48  ;;  %v9353_v19 = vshrl.u32 %v15863_v41, 16  ;;  %v15950_v60 = vld.sshfl [vmem:[#allocation3 + $0x18] sm:$0x32 pattern:$0x76325410] }
 0x485   : > { %17251 = vmatpush3.bf16.msra.mxu0 %v18032_v8  ;;  %v18042_v8 = vld [vmem:[%s21501_s5 + $0x88] sm:$0xff]  }
 0x486   : > { %17256 = vmatprep.subr.bf16.mxu0 %v18301_v46  ;;  %v9002_v58 = vrot.slane %v8988_v26, %v18527_v33  ;;  %v18052_v26 = vld [vmem:[%s21501_s5 + $0xc8] sm:$0xff]  }
 0x488   : > { %17253 = vmatmul.mubr.msk.bf16.vlgmr.msra.gmra.mrb[48].mxu0 %vm7925_vm7, %v8430_v49  ;;  %v9355_v49 = vrot.slane %v9353_v19, 6 }
 0x489   : > { %17257 = vmatpush3.bf16.msra.mxu0 %v18033_v50  ;;  %17260 = vmatprep.mubr.msk.bf16.mxu0 %vm18302_vm12, %v18301_v46  ;;  %v8995_v50 = vrot.slane %v8987_v39, %v18527_v33  ;;  %v15893_v39 = vrot.slane %v9662_v23, 9 }
 0x48a   : > { %17258 = vmatprep.subr.bf16.mxu0 %v18301_v46  ;;  %v9359_v4 = vor.u32 %v9358_v14, %v9355_v49  ;;  %v10049_v49 = vshll.u32 %v15924_v54, 16  ;;  %v18055_v14 = vld [vmem:[%s21501_s5 + $0xe0] sm:$0xff]  }
 0x48b   : > { %v9003_v27 = vcombine.low %v8995_v50, %v9002_v58  ;;  %v18054_v50 = vld [vmem:[%s21501_s5 + $0xd8] sm:$0xff]  }
 0x48c   : > { %v9360_v7 = vrot.slane %v9359_v4, 2  ;;  %v10002_v4 = vcombine.high %v15924_v54, %v15924_v54 }
 0x48d   : > { %17259 = vmatpush3.bf16.msra.mxu0 %v18034_v62  ;;  %v9115_v62 = vrot.slane %v15848_v47, %v18527_v33 }
 0x48e   : > { %17264 = vmatprep.subr.bf16.mxu0 %v18301_v46  ;;  %v20432_v31 = vsel %vm20142_vm0, %v9360_v7, %v9364_v36 }
 0x48f   : > { %v9123_v12 = vcombine.low %v9115_v62, %v9122_v51  ;;  %v9372_v63 = vcombine.low %v20339_v20, %v20432_v31  ;;  %v10048_v62 = vrot.slane %v10046_v1, 6 }
 0x490   : > { %17261 = vmatmul.mubr.msk.bf16.vlgmr.msra.gmra.mrb[52].mxu0 %vm7925_vm7, %v8519_v52  ;;  %v18225_v52 = vld.sshfl [vmem:[#allocation3 + $0x8] sm:$0xf pattern:$0x76325410] }
 0x491   : > { %17265 = vmatpush3.bf16.msra.mxu0 %v18037_v25  ;;  %17268 = vmatprep.mubr.msk.bf16.mxu0 %vm18302_vm12, %v18301_v46  ;;  %v15874_v25 = vld.sshfl [vmem:[#allocation3 + $0x14] sm:$0x12 pattern:$0x76325410]  ;;  %v9211_v15 = vcombine.low %v18225_v52, %v18224_v35  ;;  %v9386_v11 = vrot.slane %v9372_v63, %v18527_v33  ;;  %v10055_v52 = vshll.u32 %v10002_v4, 16 }
 0x492   : > { %17266 = vmatprep.subr.bf16.mxu0 %v18301_v46 }
 0x493   : > { %v9387_v17 = vcombine.low %v20198_v10, %v9386_v11  ;;  %v15932_v11 = vld.sshfl [vmem:[#allocation3 + $0xc] sm:$0x12 pattern:$0x76325410] }
 0x495   : > { %17267 = vmatpush3.bf16.msra.mxu0 %v18038_v42  ;;  %v9485_v42 = vcombine.high %v15874_v25, %v15874_v25 }
 0x496   : > { %17272 = vmatprep.subr.bf16.mxu0 %v18301_v46 }
 0x498   : > { %17269 = vmatmul.mubr.msk.bf16.vlgmr.msra.gmra.mrb[56].mxu0 %vm7925_vm7, %v8695_v34  ;;  %v15878_v34 = vrot.slane %v15874_v25, 9 }
 0x499   : > { %17273 = vmatpush3.bf16.msra.mxu0 %v18039_v22  ;;  %17276 = vmatprep.mubr.msk.bf16.mxu0 %vm18302_vm12, %v18301_v46  ;;  %v9500_v22 = vrot.slane %v9485_v42, 7 }
 0x49a   : > { %17274 = vmatprep.subr.bf16.mxu0 %v18301_v46 }
 0x49b   : > { %v20450_v13 = vsel %vm20201_vm3, %v15878_v34, %v9500_v22  ;;  %v10057_v22 = vrot.slane %v10055_v52, 7  ;;  %v18064_v52 = vld [vmem:[%s21501_s5 + $0x118] sm:$0xff]  }
 0x49d   : > { %17275 = vmatpush3.bf16.msra.mxu0 %v18040_v5  ;;  %v18051_v5 = vld [vmem:[%s21501_s5 + $0xc0] sm:$0xff]  }
 0x49e   : > { %17280 = vmatprep.subr.bf16.mxu0 %v18301_v46 }
 0x4a0   : > { %17277 = vmatmul.mubr.msk.bf16.vlgmr.msra.gmra.mrb[60].mxu0 %vm7925_vm7, %v8831_v40  ;;  %v9672_v40 = vor.u32 %v9670_v55, %v9669_v6  ;;  %v10314_v55 = vcombine.high %v15950_v60, %v15950_v60 }
 0x4a1   : > { %17281 = vmatpush3.bf16.msra.mxu0 %v18041_v61  ;;  %17284 = vmatprep.mubr.msk.bf16.mxu0 %vm18302_vm12, %v18301_v46  ;;  %v9508_v61 = vcombine.low %v20359_v9, %v20450_v13 }
 0x4a2   : > { %17282 = vmatprep.subr.bf16.mxu0 %v18301_v46  ;;  %v20469_v10 = vsel %vm20253_vm15, %v15893_v39, %v9672_v40  ;;  %v10154_v40 = vcombine.high %v15932_v11, %v15932_v11  ;;  %v10360_v54 = vshrl.u32 %v10314_v55, 16 }
 0x4a3   : > { %v9522_v41 = vrot.slane %v9508_v61, %v18527_v33  ;;  %v9680_v19 = vcombine.low %v20380_v48, %v20469_v10 }
 0x4a5   : > { %17283 = vmatpush3.bf16.msra.mxu0 %v18042_v8  ;;  %v18053_v8 = vld [vmem:[%s21501_s5 + $0xd0] sm:$0xff]   ;;  %v9523_v58 = vcombine.low %v20265_v28, %v9522_v41 }
 0x4a6   : > { %17288 = vmatprep.subr.bf16.mxu0 %v18301_v46  ;;  %v20486_v28 = vld.sshfl [vmem:[#allocation3 + $0x14] sm:$0x30 pattern:$0x76325410] }
 0x4a7   : > { %v15910_v51 = vcombine.high %v20399_v2, %v20486_v28 }
 0x4a8   : > { %17285 = vmatmul.mubr.msk.bf16.vlgmr.msra.gmra.mrb[64].mxu0 %vm7925_vm7, %v9003_v27  ;;  %v15921_v27 = vld.sshfl [vmem:[#allocation3 + $0xc] sm:$0x13 pattern:$0x76325410] }
 0x4a9   : > { %17289 = vmatpush3.bf16.msra.mxu0 %v18043_v44  ;;  %17292 = vmatprep.mubr.msk.bf16.mxu0 %vm18302_vm12, %v18301_v46  ;;  %v9694_v44 = vrot.slane %v9680_v19, %v18527_v33  ;;  %v10004_v47 = vshrl.u32 %v15921_v27, 16  ;;  %v9978_v7 = vcombine.high %v15921_v27, %v15921_v27 }
 0x4aa   : > { %17290 = vmatprep.subr.bf16.mxu0 %v18301_v46 }
 0x4ab   : > { %v9695_v43 = vcombine.low %v20300_v30, %v9694_v44  ;;  %v9814_v30 = vrot.slane %v15910_v51, %v18527_v33  ;;  %v10181_v44 = vrot.slane %v10154_v40, 7  ;;  %v18063_v51 = vld [vmem:[%s21501_s5 + $0x110] sm:$0xff]  }
 0x4ac   : > { %v18067_v40 = vld [vmem:[%s21501_s5 + $0x130] sm:$0xff]  }
 0x4ad   : > { %17291 = vmatpush3.bf16.msra.mxu0 %v18044_v3  ;;  %v10007_v3 = vshll.u32 %v15921_v27, 16  ;;  %v9815_v42 = vcombine.low %v20323_v18, %v9814_v30  ;;  %v15947_v18 = vld.sshfl [vmem:[#allocation3 + $0xc] sm:$0x32 pattern:$0x76325410] }
 0x4ae   : > { %17296 = vmatprep.subr.bf16.mxu0 %v18301_v46 }
 0x4af   : > { %v10009_v35 = vrot.slane %v10007_v3, 7  ;;  %v10362_v3 = vrot.slane %v10360_v54, 7 }
 0x4b0   : > { %17293 = vmatmul.mubr.msk.bf16.vlgmr.msra.gmra.mrb[68].mxu0 %vm7925_vm7, %v9123_v12  ;;  %v10006_v12 = vrot.slane %v10004_v47, 6  ;;  %v10355_v47 = vshrl.u32 %v15950_v60, 16  ;;  %v15982_v60 = vld.sshfl [vmem:[#allocation3 + $0x10] sm:$0x13 pattern:$0x76325410] }
 0x4b1   : > { %17297 = vmatpush3.bf16.msra.mxu0 %v18045_v16  ;;  %17300 = vmatprep.mubr.msk.bf16.mxu0 %vm18302_vm12, %v18301_v46  ;;  %v10051_v16 = vrot.slane %v10049_v49, 7  ;;  %v15936_v49 = vrot.slane %v15932_v11, 9 }
 0x4b2   : > { %17298 = vmatprep.subr.bf16.mxu0 %v18301_v46  ;;  %v10010_v36 = vor.u32 %v10009_v35, %v10006_v12  ;;  %v10316_v35 = vshrl.u32 %v15947_v18, 16 }
 0x4b3   : > { %v10052_v25 = vor.u32 %v10051_v16, %v10048_v62  ;;  %v10182_v4 = vsel %vm20201_vm3, %v15936_v49, %v10181_v44  ;;  %v10671_v44 = vcombine.high %v15982_v60, %v15982_v60 }
 0x4b4   : > { %v10011_v34 = vrot.slane %v10010_v36, 2  ;;  %v15951_v36 = vrot.slane %v10316_v35, 9 }
 0x4b5   : > { %17299 = vmatpush3.bf16.msra.mxu0 %v18046_v53  ;;  %v18226_v53 = vld.sshfl [vmem:[#allocation3 + $0xc] sm:$0xf pattern:$0x76325410]  ;;  %v10053_v63 = vrot.slane %v10052_v25, 2 }
 0x4b6   : > { %17304 = vmatprep.subr.bf16.mxu0 %v18301_v46  ;;  %v9904_v39 = vcombine.low %v18226_v53, %v18227_v0  ;;  %v18065_v0 = vld [vmem:[%s21501_s5 + $0x120] sm:$0xff]  }
 0x4b8   : > { %17301 = vmatmul.mubr.msk.bf16.vlgmr.msra.gmra.mrb[72].mxu0 %vm7925_vm7, %v9211_v15  ;;  %v10013_v15 = vshll.u32 %v9978_v7, 16  ;;  %v15954_v7 = vrot.slane %v10355_v47, 9 }
 0x4b9   : > { %17305 = vmatpush3.bf16.msra.mxu0 %v18049_v38  ;;  %17308 = vmatprep.mubr.msk.bf16.mxu0 %vm18302_vm12, %v18301_v46  ;;  %v15935_v38 = vld.sshfl [vmem:[#allocation3 + $0x18] sm:$0x12 pattern:$0x76325410] }
 0x4ba   : > { %17306 = vmatprep.subr.bf16.mxu0 %v18301_v46  ;;  %v10015_v6 = vrot.slane %v10013_v15, 7  ;;  %v10178_v23 = vcombine.high %v15935_v38, %v15935_v38 }
 0x4bc   : > { %v10016_v61 = vsel %vm20142_vm0, %v10011_v34, %v10015_v6  ;;  %v10193_v19 = vrot.slane %v10178_v23, 7  ;;  %v18066_v34 = vld [vmem:[%s21501_s5 + $0x128] sm:$0xff]   ;;  %v10700_v6 = vshll.u32 %v15982_v60, 16 }
 0x4bd   : > { %17307 = vmatpush3.bf16.msra.mxu0 %v18050_v21  ;;  %v18058_v21 = vld [vmem:[%s21501_s5 + $0xf8] sm:$0xff]   ;;  %v10064_v41 = vcombine.low %v10016_v61, %v20339_v20  ;;  %v15962_v61 = vld.sshfl [vmem:[#allocation3 + $0xc] sm:$0x30 pattern:$0x76325410] }
 0x4be   : > { %17312 = vmatprep.subr.bf16.mxu0 %v18301_v46  ;;  %v20581_v23 = vld.sshfl [vmem:[#allocation3 + $0x18] sm:$0x30 pattern:$0x76325410] }
 0x4bf   : > { %v10072_v20 = vrot.slane %v10064_v41, %v18527_v33  ;;  %v15971_v41 = vcombine.high %v20486_v28, %v20581_v23 }
 0x4c0   : > { %17309 = vmatmul.mubr.msk.bf16.vlgmr.msra.gmra.mrb[76].mxu0 %vm7925_vm7, %v9387_v17  ;;  %v18061_v17 = vld [vmem:[%s21501_s5 + $0x100] sm:$0xff]  }
 0x4c1   : > { %17313 = vmatpush3.bf16.msra.mxu0 %v18051_v5  ;;  %17316 = vmatprep.mubr.msk.bf16.mxu0 %vm18302_vm12, %v18301_v46  ;;  %v20517_v5 = vsel %vm20142_vm0, %v10053_v63, %v10057_v22 }
 0x4c2   : > { %17314 = vmatprep.subr.bf16.mxu0 %v18301_v46 }
 0x4c5   : > { %17315 = vmatpush3.bf16.msra.mxu0 %v18052_v26  ;;  %v10290_v26 = vcombine.high %v15947_v18, %v15947_v18  ;;  %v10697_v18 = vshrl.u32 %v15982_v60, 16 }
 0x4c6   : > { %17320 = vmatprep.subr.bf16.mxu0 %v18301_v46 }
 0x4c7   : > { %v10321_v27 = vshrl.u32 %v10290_v26, 16  ;;  %v10324_v30 = vshll.u32 %v10290_v26, 16  ;;  %v15970_v26 = vcombine.high %v15962_v61, %v20399_v2 }
 0x4c8   : > { %17317 = vmatmul.mubr.msk.bf16.vlgmr.msra.gmra.mrb[80].mxu0 %vm7925_vm7, %v9523_v58  ;;  %v15939_v58 = vrot.slane %v15935_v38, 9 }
 0x4c9   : > { %17321 = vmatpush3.bf16.msra.mxu0 %v18053_v8  ;;  %17324 = vmatprep.mubr.msk.bf16.mxu0 %vm18302_vm12, %v18301_v46  ;;  %v10065_v8 = vcombine.low %v20432_v31, %v20517_v5  ;;  %v10323_v62 = vrot.slane %v10321_v27, 7  ;;  %v18068_v27 = vld [vmem:[%s21501_s5 + $0x138] sm:$0xff]   ;;  %v10500_v2 = vrot.slane %v15970_v26, %v18527_v33 }
 0x4ca   : > { %17322 = vmatprep.subr.bf16.mxu0 %v18301_v46 }
 0x4cb   : > { %v10079_v1 = vrot.slane %v10065_v8, %v18527_v33  ;;  %v10699_v8 = vrot.slane %v10697_v18, 6 }
 0x4cd   : > { %17323 = vmatpush3.bf16.msra.mxu0 %v18054_v50  ;;  %v18062_v50 = vld [vmem:[%s21501_s5 + $0x108] sm:$0xff]   ;;  %v10080_v16 = vcombine.low %v10072_v20, %v10079_v1  ;;  %v10507_v20 = vrot.slane %v15971_v41, %v18527_v33 }
 0x4ce   : > { %17328 = vmatprep.subr.bf16.mxu0 %v18301_v46 }
 0x4d0   : > { %17325 = vmatmul.mubr.msk.bf16.vlgmr.msra.gmra.mrb[84].mxu0 %vm7925_vm7, %v9695_v43  ;;  %v10363_v43 = vshll.u32 %v10314_v55, 16 }
 0x4d1   : > { %17329 = vmatpush3.bf16.msra.mxu0 %v18055_v14  ;;  %17332 = vmatprep.mubr.msk.bf16.mxu0 %vm18302_vm12, %v18301_v46  ;;  %v20539_v14 = vsel %vm20201_vm3, %v15939_v58, %v10193_v19  ;;  %v10702_v58 = vrot.slane %v10700_v6, 7 }
 0x4d2   : > { %17330 = vmatprep.subr.bf16.mxu0 %v18301_v46  ;;  %v10201_v12 = vcombine.low %v20450_v13, %v20539_v14  ;;  %v10365_v25 = vor.u32 %v10363_v43, %v10362_v3  ;;  %v18069_v3 = vld [vmem:[%s21501_s5 + $0x140] sm:$0xff]   ;;  %v18228_v43 = vld.sshfl [vmem:[#allocation3 + $0x10] sm:$0xf pattern:$0x76325410] }
 0x4d3   : > { %v10703_v1 = vor.u32 %v10702_v58, %v10699_v8  ;;  %v18075_v8 = vld [vmem:[%s21501_s5 + $0x160] sm:$0xff]  }
 0x4d4   : > { %v10215_v53 = vrot.slane %v10201_v12, %v18527_v33  ;;  %v15996_v12 = vld.sshfl [vmem:[#allocation3 + $0x1c] sm:$0x12 pattern:$0x76325410] }
 0x4d5   : > { %17331 = vmatpush3.bf16.msra.mxu0 %v18056_v32  ;;  %v10200_v32 = vcombine.low %v10182_v4, %v20359_v9  ;;  %v18229_v4 = vld.sshfl [vmem:[#allocation3 + $0x18] sm:$0xf pattern:$0x76325410] }
 0x4d6   : > { %17336 = vmatprep.subr.bf16.mxu0 %v18301_v46 }
 0x4d7   : > { %v10208_v9 = vrot.slane %v10200_v32, %v18527_v33  ;;  %v10704_v32 = vrot.slane %v10703_v1, 2 }
 0x4d8   : > { %17333 = vmatmul.mubr.msk.bf16.vlgmr.msra.gmra.mrb[88].mxu0 %vm7925_vm7, %v9815_v42  ;;  %v20561_v42 = vsel %vm20253_vm15, %v15954_v7, %v10365_v25  ;;  %v16008_v7 = vld.sshfl [vmem:[#allocation3 + $0x10] sm:$0x32 pattern:$0x76325410] }
 0x4d9   : > { %17337 = vmatpush3.bf16.msra.mxu0 %v18057_v45  ;;  %17340 = vmatprep.mubr.msk.bf16.mxu0 %vm18302_vm12, %v18301_v46  ;;  %v10326_v45 = vor.u32 %v10324_v30, %v10323_v62  ;;  %v10216_v15 = vcombine.low %v10208_v9, %v10215_v53  ;;  %v10373_v22 = vcombine.low %v20469_v10, %v20561_v42  ;;  %v15993_v62 = vld.sshfl [vmem:[#allocation3 + $0x10] sm:$0x12 pattern:$0x76325410]  ;;  %v11009_v58 = vshrl.u32 %v16008_v7, 16 }
 0x4da   : > { %17338 = vmatprep.subr.bf16.mxu0 %v18301_v46  ;;  %v10847_v53 = vcombine.high %v15993_v62, %v15993_v62  ;;  %v15997_v6 = vrot.slane %v15993_v62, 9 }
 0x4db   : > { %v10327_v38 = vsel %vm20253_vm15, %v15951_v36, %v10326_v45  ;;  %v18070_v45 = vld [vmem:[%s21501_s5 + $0x148] sm:$0xff]   ;;  %v10871_v36 = vcombine.high %v15996_v12, %v15996_v12  ;;  %v16012_v1 = vrot.slane %v11009_v58, 9 }
 0x4dc   : > { %v10372_v63 = vcombine.low %v10327_v38, %v20380_v48  ;;  %v10387_v48 = vrot.slane %v10373_v22, %v18527_v33  ;;  %v10983_v38 = vcombine.high %v16008_v7, %v16008_v7  ;;  %v18073_v22 = vld [vmem:[%s21501_s5 + $0x150] sm:$0xff]   ;;  %v18080_v7 = vld [vmem:[%s21501_s5 + $0x188] sm:$0xff]  }
 0x4dd   : > { %17339 = vmatpush3.bf16.msra.mxu0 %v18058_v21  ;;  %v15985_v21 = vld.sshfl [vmem:[#allocation3 + $0x1c] sm:$0x13 pattern:$0x76325410] }
 0x4de   : > { %17344 = vmatprep.subr.bf16.mxu0 %v18301_v46  ;;  %v10380_v11 = vrot.slane %v10372_v63, %v18527_v33  ;;  %v10739_v55 = vshrl.u32 %v15985_v21, 16  ;;  %v10695_v19 = vcombine.high %v15985_v21, %v15985_v21  ;;  %v10597_v63 = vcombine.low %v18228_v43, %v18229_v4 }
 0x4df   : > { %v11014_v18 = vshrl.u32 %v10983_v38, 16 }
 0x4e0   : > { %17341 = vmatmul.mubr.msk.bf16.vlgmr.msra.gmra.mrb[92].mxu0 %vm7925_vm7, %v9904_v39  ;;  %v10388_v39 = vcombine.low %v10380_v11, %v10387_v48  ;;  %v10741_v54 = vrot.slane %v10739_v55, 6  ;;  %v10748_v47 = vshll.u32 %v10695_v19, 16  ;;  %v16000_v11 = vrot.slane %v15996_v12, 9  ;;  %v18074_v55 = vld [vmem:[%s21501_s5 + $0x158] sm:$0xff]  }
 0x4e1   : > { %17345 = vmatpush3.bf16.msra.mxu0 %v18061_v17  ;;  %17348 = vmatprep.mubr.msk.bf16.mxu0 %vm18302_vm12, %v18301_v46  ;;  %v10742_v17 = vshll.u32 %v15985_v21, 16  ;;  %v10886_v48 = vrot.slane %v10871_v36, 7  ;;  %v11017_v19 = vshll.u32 %v10983_v38, 16  ;;  %v18083_v38 = vld [vmem:[%s21503_s7 + $0x10] sm:$0xff]  }
 0x4e2   : > { %17346 = vmatprep.subr.bf16.mxu0 %v18301_v46  ;;  %v10750_v30 = vrot.slane %v10748_v47, 7 }
 0x4e3   : > { %v10887_v61 = vsel %vm20201_vm3, %v16000_v11, %v10886_v48 }
 0x4e5   : > { %17347 = vmatpush3.bf16.msra.mxu0 %v18062_v50  ;;  %v10744_v50 = vrot.slane %v10742_v17, 7 }
 0x4e6   : > { %17352 = vmatprep.subr.bf16.mxu0 %v18301_v46 }
 0x4e7   : > { %v10745_v49 = vor.u32 %v10744_v50, %v10741_v54 }
 0x4e8   : > { %17349 = vmatmul.mubr.msk.bf16.vlgmr.msra.gmra.mrb[96].mxu0 %vm7925_vm7, %v10080_v16  ;;  %v10508_v16 = vcombine.low %v10500_v2, %v10507_v20  ;;  %v18076_v20 = vld [vmem:[%s21501_s5 + $0x168] sm:$0xff]  }
 0x4e9   : > { %17353 = vmatpush3.bf16.msra.mxu0 %v18063_v51  ;;  %17356 = vmatprep.mubr.msk.bf16.mxu0 %vm18302_vm12, %v18301_v46  ;;  %v10706_v51 = vshll.u32 %v10671_v44, 16  ;;  %v10746_v35 = vrot.slane %v10745_v49, 2  ;;  %v10894_v44 = vcombine.low %v20539_v14, %v10887_v61  ;;  %v18088_v61 = vld [vmem:[%s21503_s7 + $0x50] sm:$0xff]  }
 0x4ea   : > { %17354 = vmatprep.subr.bf16.mxu0 %v18301_v46 }
 0x4eb   : > { %v10708_v25 = vrot.slane %v10706_v51, 7  ;;  %v10908_v14 = vrot.slane %v10894_v44, %v18527_v33 }
 0x4ed   : > { %17355 = vmatpush3.bf16.msra.mxu0 %v18064_v52  ;;  %v16011_v52 = vld.sshfl [vmem:[#allocation3 + $0x1c] sm:$0x32 pattern:$0x76325410]  ;;  %v10709_v9 = vsel %vm20142_vm0, %v10704_v32, %v10708_v25 }
 0x4ee   : > { %17360 = vmatprep.subr.bf16.mxu0 %v18301_v46  ;;  %v10757_v60 = vcombine.low %v10709_v9, %v20432_v31  ;;  %v11048_v26 = vshrl.u32 %v16011_v52, 16  ;;  %v16023_v32 = vld.sshfl [vmem:[#allocation3 + $0x10] sm:$0x30 pattern:$0x76325410] }
 0x4f0   : > { %17357 = vmatmul.mubr.msk.bf16.vlgmr.msra.gmra.mrb[100].mxu0 %vm7925_vm7, %v10216_v15  ;;  %v11007_v15 = vcombine.high %v16011_v52, %v16011_v52  ;;  %v10765_v31 = vrot.slane %v10757_v60, %v18527_v33  ;;  %v18086_v60 = vld [vmem:[%s21503_s7 + $0x40] sm:$0xff]  }
 0x4f1   : > { %17361 = vmatpush3.bf16.msra.mxu0 %v18065_v0  ;;  %17364 = vmatprep.mubr.msk.bf16.mxu0 %vm18302_vm12, %v18301_v46  ;;  %v10751_v0 = vsel %vm20142_vm0, %v10746_v35, %v10750_v30  ;;  %v16031_v35 = vcombine.high %v16023_v32, %v20486_v28  ;;  %v18081_v28 = vld [vmem:[%s21503_s7] sm:$0xff]   ;;  %vm11520_vm0 = vcmask 523264  }
 0x4f2   : > { %17362 = vmatprep.subr.bf16.mxu0 %v18301_v46  ;;  %v10758_v21 = vcombine.low %v20517_v5, %v10751_v0  ;;  %v11053_v57 = vshrl.u32 %v11007_v15, 16  ;;  %v11056_v41 = vshll.u32 %v11007_v15, 16  ;;  %v18230_v15 = vld.sshfl [vmem:[#allocation4] sm:$0x5 pattern:$0x75316420] }
 0x4f3   : > { %v11193_v25 = vrot.slane %v16031_v35, %v18527_v33 }
 0x4f4   : > { %v10772_v5 = vrot.slane %v10758_v21, %v18527_v33  ;;  %v16071_v21 = vld.sshfl [vmem:[#allocation4] sm:$0x10 pattern:$0x75316420] }
 0x4f5   : > { %17363 = vmatpush3.bf16.msra.mxu0 %v18066_v34  ;;  %v10874_v34 = vrot.slane %v10847_v53, 7  ;;  %v18082_v53 = vld [vmem:[%s21503_s7 + $0x8] sm:$0xff]   ;;  %v11659_v11 = vcombine.high %v16071_v21, %v16071_v21 }
 0x4f6   : > { %17368 = vmatprep.subr.bf16.mxu0 %v18301_v46  ;;  %v10773_v54 = vcombine.low %v10765_v31, %v10772_v5 }
 0x4f7   : > { %v10875_v17 = vsel %vm20201_vm3, %v15997_v6, %v10874_v34  ;;  %v16072_v34 = vld.sshfl [vmem:[#allocation4 + $0x4] sm:$0x10 pattern:$0x75316420]  ;;  %vm11452_vm3 = vsmask.f32 7452 }
 0x4f8   : > { %17365 = vmatmul.mubr.msk.bf16.vlgmr.msra.gmra.mrb[104].mxu0 %vm7925_vm7, %v10388_v39  ;;  %v11055_v39 = vrot.slane %v11053_v57, 7  ;;  %v10893_v50 = vcombine.low %v10875_v17, %v20450_v13  ;;  %v11674_v48 = vcombine.high %v16072_v34, %v16072_v34 }
 0x4f9   : > { %17369 = vmatpush3.bf16.msra.mxu0 %v18067_v40  ;;  %17372 = vmatprep.mubr.msk.bf16.mxu0 %vm18302_vm12, %v18301_v46  ;;  %v11016_v40 = vrot.slane %v11014_v18, 7  ;;  %v18087_v18 = vld [vmem:[%s21503_s7 + $0x48] sm:$0xff]  }
 0x4fa   : > { %17370 = vmatprep.subr.bf16.mxu0 %v18301_v46  ;;  %v11058_v2 = vor.u32 %v11056_v41, %v11055_v39  ;;  %v10901_v13 = vrot.slane %v10893_v50, %v18527_v33  ;;  %v18089_v39 = vld [vmem:[%s21503_s7 + $0x58] sm:$0xff]   ;;  %v18090_v50 = vld [vmem:[%s21503_s7 + $0x60] sm:$0xff]  }
 0x4fb   : > { %v11019_v37 = vor.u32 %v11017_v19, %v11016_v40 }
 0x4fc   : > { %v10909_v43 = vcombine.low %v10901_v13, %v10908_v14  ;;  %v18091_v13 = vld [vmem:[%s21503_s7 + $0x68] sm:$0xff]  }
 0x4fd   : > { %17371 = vmatpush3.bf16.msra.mxu0 %v18068_v27  ;;  %v16015_v27 = vrot.slane %v11048_v26, 9  ;;  %v11020_v49 = vsel %vm20253_vm15, %v16012_v1, %v11019_v37 }
 0x4fe   : > { %17376 = vmatprep.subr.bf16.mxu0 %v18301_v46  ;;  %v11065_v51 = vcombine.low %v11020_v49, %v20469_v10  ;;  %v16026_v10 = vld.sshfl [vmem:[#allocation3 + $0x1c] sm:$0x30 pattern:$0x76325410] }
 0x4ff   : > { %v11059_v47 = vsel %vm20253_vm15, %v16015_v27, %v11058_v2  ;;  %v16032_v30 = vcombine.high %v20581_v23, %v16026_v10  ;;  %v16086_v27 = vld.sshfl [vmem:[#allocation4] sm:$0x12 pattern:$0x75316420] }
 0x500   : > { %17373 = vmatmul.mubr.msk.bf16.vlgmr.msra.gmra.mrb[108].mxu0 %vm7925_vm7, %v10508_v16  ;;  %v11066_v4 = vcombine.low %v20561_v42, %v11059_v47  ;;  %v11073_v62 = vrot.slane %v11065_v51, %v18527_v33  ;;  %v18079_v42 = vld [vmem:[%s21501_s5 + $0x180] sm:$0xff]  }
 0x501   : > { %17377 = vmatpush3.bf16.msra.mxu0 %v18069_v3  ;;  %17380 = vmatprep.mubr.msk.bf16.mxu0 %vm18302_vm12, %v18301_v46  ;;  %v18077_v3 = vld [vmem:[%s21501_s5 + $0x170] sm:$0xff]   ;;  %v11200_v52 = vrot.slane %v16032_v30, %v18527_v33  ;;  %v16087_v2 = vld.sshfl [vmem:[#allocation4 + $0x4] sm:$0x12 pattern:$0x75316420] }
 0x502   : > { %17378 = vmatprep.subr.bf16.mxu0 %v18301_v46  ;;  %v11080_v16 = vrot.slane %v11066_v4, %v18527_v33  ;;  %v11808_v59 = vcombine.high %v16087_v2, %v16087_v2 }
 0x503   : > { %v11201_v23 = vcombine.low %v11193_v25, %v11200_v52  ;;  %v18096_v52 = vld [vmem:[%s21503_s7 + $0x20] sm:$0xff]  }
 0x504   : > { %v11081_v12 = vcombine.low %v11073_v62, %v11080_v16  ;;  %17417 = vmatpush3.bf16.msra.mxu1 %v18096_v52 }
 0x505   : > { %17379 = vmatpush3.bf16.msra.mxu0 %v18070_v45  ;;  %v18303_v45 = vmov 1966171168   ;;  %17418 = vmatprep.subr.bf16.mxu1 %v18301_v46 }
 0x506   : > { %17384 = vmatprep.subr.bf16.mxu0 %v18301_v46  ;;  %v11408_v9 = vunpack.c.l.s4 %v18303_v45  ;;  %v18098_v45 = vld [vmem:[%s21503_s7 + $0x28] sm:$0xff]  }
 0x508   : > { %17381 = vmatmul.mubr.msk.bf16.vlgmr.msra.gmra.mrb[112].mxu0 %vm7925_vm7, %v10597_v63  ;;  %v11409_v36 = vunpack.c.0.s8 %v11408_v9  ;;  %v18084_v63 = vld [vmem:[%s21503_s7 + $0x18] sm:$0xff]   ;;  %17419 = vmatpush3.bf16.msra.mxu1 %v18098_v45 }
 0x509   : > { %17385 = vmatpush3.bf16.msra.mxu0 %v18073_v22  ;;  %17388 = vmatprep.mubr.msk.bf16.mxu0 %vm18302_vm12, %v18301_v46  ;;  %v18093_v9 = vld [vmem:[%s21503_s7 + $0x78] sm:$0xff]  }
 0x50a   : > { %17386 = vmatprep.subr.bf16.mxu0 %v18301_v46  ;;  %v20700_v0 = vsub.s32 %v11409_v36, %v18518_v29  ;;  %17420 = vmatprep.subr.bf16.mxu1 %v18301_v46 }
 0x50c   : > { %v11580_v22 = vrot.slane %v18230_v15, %v20700_v0  ;;  %v11666_v57 = vrot.slane %v11659_v11, %v20700_v0  ;;  %v20724_v6 = vrot.slane %v11674_v48, %v20700_v0  ;;  %v11792_v1 = vrot.slane %v16086_v27, %v20700_v0  ;;  %v18100_v11 = vld [vmem:[%s21503_s7 + $0x30] sm:$0xff]   ;;  %v16103_v48 = vld.sshfl [vmem:[#allocation4] sm:$0x2 pattern:$0x75316420] }
 0x50d   : > { %17387 = vmatpush3.bf16.msra.mxu0 %v18074_v55  ;;  %v11815_v14 = vrot.slane %v16087_v2, %v20700_v0  ;;  %v11822_v51 = vrot.slane %v11808_v59, %v20700_v0  ;;  %17421 = vmatpush3.bf16.msra.mxu1 %v18100_v11 }
 0x50e   : > { %17392 = vmatprep.subr.bf16.mxu0 %v18301_v46  ;;  %v11691_v5 = vcombine.low %v11666_v57, %v20724_v6  ;;  %v11800_v47 = vcombine.high %v11792_v1, %v11792_v1  ;;  %v11951_v57 = vrot.slane %v16103_v48, %v20700_v0  ;;  %17422 = vmatprep.subr.bf16.mxu1 %v18301_v46 }
 0x50f   : > { %v11823_v4 = vcombine.high %v11815_v14, %v11815_v14  ;;  %v18099_v14 = vld [vmem:[%s21503_s7 + $0x98] sm:$0xff]  }
 0x510   : > { %17389 = vmatmul.mubr.msk.bf16.vlgmr.msra.gmra.mrb[116].mxu0 %vm7925_vm7, %v10773_v54  ;;  %v11698_v26 = vrot.slane %v11691_v5, %v20700_v0  ;;  %v11830_v32 = vshll.u32 %v11800_v47, 16  ;;  %v18095_v5 = vld [vmem:[%s21503_s7 + $0x88] sm:$0xff]  }
 0x511   : > { %17393 = vmatpush3.bf16.msra.mxu0 %v18075_v8  ;;  %17396 = vmatprep.mubr.msk.bf16.mxu0 %vm18302_vm12, %v18301_v46  ;;  %v11839_v35 = vshll.u32 %v11823_v4, 16 }
 0x512   : > { %17394 = vmatprep.subr.bf16.mxu0 %v18301_v46  ;;  %v11705_v19 = vrot.slane %v11698_v26, %v20700_v0 }
 0x515   : > { %17395 = vmatpush3.bf16.msra.mxu0 %v18076_v20  ;;  %v11785_v20 = vcombine.high %v16086_v27, %v16086_v27 }
 0x516   : > { %17400 = vmatprep.subr.bf16.mxu0 %v18301_v46 }
 0x517   : > { %v11799_v49 = vrot.slane %v11785_v20, %v20700_v0 }
 0x518   : > { %17397 = vmatmul.mubr.msk.bf16.vlgmr.msra.gmra.mrb[120].mxu0 %vm7925_vm7, %v10909_v43  ;;  %v18179_v43 = vld [vmem:[%s21503_s7 + $0x2f0] sm:$0xff]  }
 0x519   : > { %17401 = vmatpush3.bf16.msra.mxu0 %v18077_v3  ;;  %17404 = vmatprep.mubr.msk.bf16.mxu0 %vm18302_vm12, %v18301_v46  ;;  %v11825_v16 = vshrl.u32 %v11799_v49, 16 }
 0x51a   : > { %17402 = vmatprep.subr.bf16.mxu0 %v18301_v46 }
 0x51d   : > { %17403 = vmatpush3.bf16.msra.mxu0 %v18078_v56 }
 0x51e   : > { %17408 = vmatprep.subr.bf16.mxu0 %v18301_v46 }
 0x520   : > { %17405 = vmatmul.mubr.msk.bf16.vlgmr.msra.gmra.mrb[124].mxu0 %vm7925_vm7, %v11081_v12  ;;  %v11834_v12 = vshrl.u32 %v11822_v51, 16 }
 0x521   : > { %17409 = vmatpush3.bf16.msra.mxu0 %v18079_v42  ;;  %17412 = vmatprep.mubr.msk.bf16.mxu0 %vm18302_vm12, %v18301_v46  ;;  %v18092_v42 = vld [vmem:[%s21503_s7 + $0x70] sm:$0xff]  }
 0x522   : > { %17410 = vmatprep.subr.bf16.mxu0 %v18301_v46 }
 0x525   : > { %17411 = vmatpush3.bf16.msra.mxu0 %v18080_v7 }
 0x526   : > { %17428 = vmatprep.subr.bf16.mxu0 %v18301_v46 }
 0x528   : > { %17413 = vmatmul.mubr.msk.bf16.vlgmr.msra.gmra.mrb[128].mxu0 %vm7925_vm7, %v11201_v23  ;;  %vm11450_vm7 = vmor %vm11448_vm10, %vm11449_vm6 }
 0x529   : > { %17429 = vmatpush3.bf16.msra.mxu0 %v18081_v28  ;;  %17436 = vmatprep.mubr.msk.bf16.mxu0 %vm18302_vm12, %v18301_v46  ;;  %vm11451_vm1 = vmor %vm11450_vm7, %vm8235_vm9 }
 0x52a   : > { %17430 = vmatprep.subr.bf16.mxu0 %v18301_v46  ;;  %vm20756_vm5 = vmor %vm11451_vm1, %vm11452_vm3 }
 0x52b   : > { %v11832_v25 = vsel %vm20756_vm5, %v11825_v16, %v11830_v32  ;;  %v20772_v28 = vsel %vm20756_vm5, %v11834_v12, %v11839_v35 }
 0x52c   : > { %v11851_v23 = vcombine.low %v11832_v25, %v20772_v28 }
 0x52d   : > { %17431 = vmatpush3.bf16.msra.mxu0 %v18082_v53 }
 0x52e   : > { %17432 = vmatprep.subr.bf16.mxu0 %v18301_v46  ;;  %v11858_v53 = vrot.slane %v11851_v23, %v20700_v0 }
 0x531   : > { %17433 = vmatpush3.bf16.msra.mxu0 %v18083_v38 }
 0x532   : > { %17434 = vmatprep.subr.bf16.mxu0 %v18301_v46 }
 0x535   : > { %17435 = vmatpush3.bf16.msra.mxu0 %v18084_v63  ;;  %v11865_v63 = vrot.slane %v11858_v53, %v20700_v0 }
 0x536   : > { %17440 = vmatprep.subr.bf16.mxu0 %v18301_v46 }
 0x538   : > { %17437 = vmatmul.mubr.msk.bf16.vlgmr.msra.gmra.mrb[132].mxu0 %vm11520_vm0, %v11580_v22 }
 0x539   : > { %17441 = vmatpush3.bf16.msra.mxu0 %v18086_v60  ;;  %17448 = vmatprep.mubr.msk.bf16.mxu0 %vm18302_vm12, %v18301_v46  ;;  %v18094_v60 = vld [vmem:[%s21503_s7 + $0x80] sm:$0xff]  }
 0x53a   : > { %17442 = vmatprep.subr.bf16.mxu0 %v18301_v46 }
 0x53b   : > { %v7963_v55 = vpop.f32.mrb[32].mxu0 }
 0x53c   : > { %v17222_v31 = vpop.f32.mrb[33].mxu0 }
 0x53d   : > { %v7966_v17 = vpop.f32.mrb[34].mxu0  ;;  %17443 = vmatpush3.bf16.msra.mxu0 %v18087_v18  ;;  %v16104_v18 = vld.sshfl [vmem:[#allocation4 + $0x4] sm:$0x2 pattern:$0x75316420]  ;;  %v18102_v31 = vld [vmem:[%s21503_s7 + $0x38] sm:$0xff]  }
 0x53e   : > { %v17223_v40 = vpop.f32.mrb[35].mxu0  ;;  %17444 = vmatprep.subr.bf16.mxu0 %v18301_v46  ;;  %17423 = vmatpush3.bf16.msra.mxu1 %v18102_v31 }
 0x53f   : > { %17500 = vmatprep.subr.bf16.mxu1 %v18301_v46 }
 0x541   : > { %17445 = vmatpush3.bf16.msra.mxu0 %v18088_v61 }
 0x542   : > { %17446 = vmatprep.subr.bf16.mxu0 %v18301_v46 }
 0x543   : > { %v8040_v41 = vpop.f32.mrb[36].mxu0 }
 0x544   : > { %v8041_v8 = vadd.f32 %v8040_v41, %v7963_v55  ;;  %v17230_v58 = vpop.f32.mrb[37].mxu0  ;;  %v20796_v55 = vrot.slane %v16104_v18, %v20700_v0 }
 0x545   : > { %v8043_v54 = vpop.f32.mrb[38].mxu0  ;;  %17447 = vmatpush3.bf16.msra.mxu0 %v18089_v39  ;;  %v16049_v39 = vld.sshfl [vmem:[#allocation4] sm:$0x11 pattern:$0x75316420] }
 0x546   : > { %v8044_v44 = vadd.f32 %v8043_v54, %v7966_v17  ;;  %v17231_v37 = vpop.f32.mrb[39].mxu0  ;;  %17452 = vmatprep.subr.bf16.mxu0 %v18301_v46  ;;  %v16113_v26 = vcombine.high %v11951_v57, %v20796_v55  ;;  %v16050_v58 = vld.sshfl [vmem:[#allocation4 + $0x4] sm:$0x11 pattern:$0x75316420]  ;;  %v11413_v54 = vrot.slane %v16049_v39, %v20700_v0 }
 0x547   : > { %v11428_v37 = vcombine.high %v16050_v58, %v16050_v58  ;;  %v11435_v27 = vrot.slane %v16050_v58, %v20700_v0 }
 0x548   : > { %17449 = vmatmul.mubr.msk.bf16.vlgmr.msra.gmra.mrb[136].mxu0 %vm11520_vm0, %v11705_v19  ;;  %v11406_v19 = vcombine.high %v16049_v39, %v16049_v39  ;;  %v11455_v20 = vshrl.u32 %v11413_v54, 16  ;;  %v11984_v1 = vrot.slane %v16113_v26, %v20700_v0 }
 0x549   : > { %17453 = vmatpush3.bf16.msra.mxu0 %v18090_v50  ;;  %17460 = vmatprep.mubr.msk.bf16.mxu0 %vm18302_vm12, %v18301_v46  ;;  %v11464_v59 = vshrl.u32 %v11435_v27, 16 }
 0x54a   : > { %17454 = vmatprep.subr.bf16.mxu0 %v18301_v46  ;;  %v11420_v2 = vrot.slane %v11406_v19, %v20700_v0 }
 0x54b   : > { %v8181_v3 = vpop.f32.mrb[40].mxu0 }
 0x54c   : > { %v8188_v56 = vadd.f32 %v8181_v3, %v8041_v8  ;;  %v17238_v62 = vpop.f32.mrb[41].mxu0  ;;  %v18097_v8 = vld [vmem:[%s21503_s7 + $0x90] sm:$0xff]   ;;  %v11460_v49 = vshll.u32 %v11420_v2, 16 }
 0x54d   : > { %v8184_v10 = vpop.f32.mrb[42].mxu0  ;;  %17455 = vmatpush3.bf16.msra.mxu0 %v18091_v13  ;;  %v11442_v13 = vrot.slane %v11428_v37, %v20700_v0  ;;  %v11991_v62 = vrot.slane %v11984_v1, %v20700_v0 }
 0x54e   : > { %v8189_v30 = vadd.f32 %v8184_v10, %v8044_v44  ;;  %v17239_v7 = vpop.f32.mrb[43].mxu0  ;;  %17456 = vmatprep.subr.bf16.mxu0 %v18301_v46  ;;  %v11462_v51 = vsel %vm20756_vm5, %v11455_v20, %v11460_v49  ;;  %v18101_v10 = vld [vmem:[%s21503_s7 + $0xa0] sm:$0xff]  }
 0x54f   : > { %v11469_v47 = vshll.u32 %v11442_v13, 16  ;;  %v18103_v7 = vld [vmem:[%s21503_s7 + $0xa8] sm:$0xff]  }
 0x551   : > { %17457 = vmatpush3.bf16.msra.mxu0 %v18092_v42  ;;  %v20828_v16 = vsel %vm20756_vm5, %v11464_v59, %v11469_v47  ;;  %v18107_v47 = vld [vmem:[%s21503_s7 + $0xe0] sm:$0xff]  }
 0x552   : > { %17458 = vmatprep.subr.bf16.mxu0 %v18301_v46  ;;  %v11481_v42 = vcombine.low %v11462_v51, %v20828_v16 }
 0x553   : > { %v8360_v36 = vpop.f32.mrb[44].mxu0 }
 0x554   : > { %v8367_v38 = vadd.f32 %v8360_v36, %v8188_v56  ;;  %v17246_v15 = vpop.f32.mrb[45].mxu0  ;;  %v18104_v36 = vld [vmem:[%s21503_s7 + $0xb0] sm:$0xff]  }
 0x555   : > { %v8363_v22 = vpop.f32.mrb[46].mxu0  ;;  %17459 = vmatpush3.bf16.msra.mxu0 %v18093_v9  ;;  %v18231_v9 = vld.sshfl [vmem:[#allocation4 + $0x4] sm:$0x5 pattern:$0x75316420] }
 0x556   : > { %v8368_v21 = vadd.f32 %v8363_v22, %v8189_v30  ;;  %v17247_v34 = vpop.f32.mrb[47].mxu0  ;;  %17464 = vmatprep.subr.bf16.mxu0 %v18301_v46  ;;  %v11488_v30 = vrot.slane %v11481_v42, %v20700_v0 }
 0x557   : > { %v12088_v34 = vrot.slane %v18231_v9, %v20700_v0 }
 0x558   : > { %17461 = vmatmul.mubr.msk.bf16.vlgmr.msra.gmra.mrb[140].mxu0 %vm11520_vm0, %v11865_v63  ;;  %v11495_v25 = vrot.slane %v11488_v30, %v20700_v0  ;;  %v18105_v63 = vld [vmem:[%s21503_s7 + $0xb8] sm:$0xff]   ;;  %v18112_v30 = vld [vmem:[%s21503_s7 + $0xd0] sm:$0xff]  }
 0x559   : > { %17465 = vmatpush3.bf16.msra.mxu0 %v18094_v60  ;;  %17472 = vmatprep.mubr.msk.bf16.mxu0 %vm18302_vm12, %v18301_v46 }
 0x55a   : > { %17466 = vmatprep.subr.bf16.mxu0 %v18301_v46  ;;  %17425 = vmatmul.mubr.msk.bf16.vlgmr.msra.gmra.mrb[8].mxu1 %vm11520_vm0, %v11495_v25 }
 0x55b   : > { %v8480_v17 = vpop.f32.mrb[48].mxu0  ;;  %17508 = vmatprep.mubr.msk.bf16.mxu1 %vm18302_vm12, %v18301_v46  ;;  %17501 = vmatpush3.bf16.msra.mxu1 %v18107_v47 }
 0x55c   : > { %v8487_v61 = vadd.f32 %v8480_v17, %v8367_v38  ;;  %v17254_v40 = vpop.f32.mrb[49].mxu0  ;;  %17502 = vmatprep.subr.bf16.mxu1 %v18301_v46 }
 0x55d   : > { %v8483_v41 = vpop.f32.mrb[50].mxu0  ;;  %17467 = vmatpush3.bf16.msra.mxu0 %v18095_v5 }
 0x55e   : > { %v8488_v50 = vadd.f32 %v8483_v41, %v8368_v21  ;;  %v17255_v44 = vpop.f32.mrb[51].mxu0  ;;  %17468 = vmatprep.subr.bf16.mxu0 %v18301_v46 }
 0x561   : > { %17469 = vmatpush3.bf16.msra.mxu0 %v18097_v8 }
 0x562   : > { %17470 = vmatprep.subr.bf16.mxu0 %v18301_v46 }
 0x563   : > { %v8569_v3 = vpop.f32.mrb[52].mxu0 }
 0x564   : > { %v8576_v4 = vadd.f32 %v8569_v3, %v8487_v61  ;;  %v17262_v56 = vpop.f32.mrb[53].mxu0  ;;  %v18108_v3 = vld [vmem:[%s21503_s7 + $0xc0] sm:$0xff]  }
 0x565   : > { %v8572_v32 = vpop.f32.mrb[54].mxu0  ;;  %17471 = vmatpush3.bf16.msra.mxu0 %v18099_v14 }
 0x566   : > { %v8577_v12 = vadd.f32 %v8572_v32, %v8488_v50  ;;  %v17263_v35 = vpop.f32.mrb[55].mxu0  ;;  %17476 = vmatprep.subr.bf16.mxu0 %v18301_v46  ;;  %v18110_v32 = vld [vmem:[%s21503_s7 + $0xc8] sm:$0xff]  }
 0x567   : > { %v18111_v35 = vld [vmem:[%s21503_s7 + $0xf0] sm:$0xff]  }
 0x568   : > { %17473 = vmatmul.mubr.msk.bf16.vlgmr.msra.gmra.mrb[144].mxu0 %vm11520_vm0, %v11991_v62  ;;  %v18109_v62 = vld [vmem:[%s21503_s7 + $0xe8] sm:$0xff]  }
 0x569   : > { %17477 = vmatpush3.bf16.msra.mxu0 %v18101_v10  ;;  %17484 = vmatprep.mubr.msk.bf16.mxu0 %vm18302_vm12, %v18301_v46 }
 0x56a   : > { %17478 = vmatprep.subr.bf16.mxu0 %v18301_v46  ;;  %17503 = vmatpush3.bf16.msra.mxu1 %v18109_v62 }
 0x56b   : > { %v8745_v52 = vpop.f32.mrb[56].mxu0  ;;  %17504 = vmatprep.subr.bf16.mxu1 %v18301_v46 }
 0x56c   : > { %v8752_v23 = vadd.f32 %v8745_v52, %v8576_v4  ;;  %v17270_v45 = vpop.f32.mrb[57].mxu0 }
 0x56d   : > { %v8748_v53 = vpop.f32.mrb[58].mxu0  ;;  %17479 = vmatpush3.bf16.msra.mxu0 %v18103_v7  ;;  %v18114_v45 = vld [vmem:[%s21503_s7 + $0xd8] sm:$0xff]  }
 0x56e   : > { %v8753_v38 = vadd.f32 %v8748_v53, %v8577_v12  ;;  %v17271_v15 = vpop.f32.mrb[59].mxu0  ;;  %17480 = vmatprep.subr.bf16.mxu0 %v18301_v46  ;;  %17505 = vmatpush3.bf16.msra.mxu1 %v18111_v35 }
 0x56f   : > { %17506 = vmatprep.subr.bf16.mxu1 %v18301_v46 }
 0x571   : > { %17481 = vmatpush3.bf16.msra.mxu0 %v18104_v36 }
 0x572   : > { %17482 = vmatprep.subr.bf16.mxu0 %v18301_v46 }
 0x573   : > { %v8881_v22 = vpop.f32.mrb[60].mxu0 }
 0x574   : > { %v8888_v60 = vadd.f32 %v8881_v22, %v8752_v23  ;;  %v17278_v21 = vpop.f32.mrb[61].mxu0  ;;  %v18113_v23 = vld [vmem:[%s21503_s7 + $0xf8] sm:$0xff]  }
 0x575   : > { %v8884_v11 = vpop.f32.mrb[62].mxu0  ;;  %17483 = vmatpush3.bf16.msra.mxu0 %v18105_v63  ;;  %17507 = vmatpush3.bf16.msra.mxu1 %v18113_v23 }
 0x576   : > { %v8889_v48 = vadd.f32 %v8884_v11, %v8753_v38  ;;  %v17279_v18 = vpop.f32.mrb[63].mxu0  ;;  %17488 = vmatprep.subr.bf16.mxu0 %v18301_v46  ;;  %17524 = vmatprep.subr.bf16.mxu1 %v18301_v46 }
 0x578   : > { %17485 = vmatmul.mubr.msk.bf16.vlgmr.msra.gmra.mrb[148].mxu0 %vm11520_vm0, %v12088_v34 }
 0x579   : > { %17496 = vmatprep.mubr.msk.bf16.mxu0 %vm18302_vm12, %v18301_v46  ;;  %17489 = vmatpush3.bf16.msra.mxu0 %v18108_v3 }
 0x57a   : > { %17490 = vmatprep.subr.bf16.mxu0 %v18301_v46 }
 0x57b   : > { %v9053_v57 = vpop.f32.mrb[64].mxu0 }
 0x57c   : > { %v9060_v31 = vadd.f32 %v9053_v57, %v8888_v60  ;;  %v17286_v5 = vpop.f32.mrb[65].mxu0 }
 0x57d   : > { %v9056_v17 = vpop.f32.mrb[66].mxu0  ;;  %17491 = vmatpush3.bf16.msra.mxu0 %v18110_v32 }
 0x57e   : > { %v9061_v61 = vadd.f32 %v9056_v17, %v8889_v48  ;;  %v17287_v40 = vpop.f32.mrb[67].mxu0  ;;  %17492 = vmatprep.subr.bf16.mxu0 %v18301_v46 }
 0x581   : > { %17493 = vmatpush3.bf16.msra.mxu0 %v18112_v30 }
 0x582   : > { %17494 = vmatprep.subr.bf16.mxu0 %v18301_v46 }
 0x583   : > { %v9173_v26 = vpop.f32.mrb[68].mxu0 }
 0x584   : > { %v9180_v39 = vadd.f32 %v9173_v26, %v9060_v31  ;;  %v17294_v41 = vpop.f32.mrb[69].mxu0 }
 0x585   : > { %v9176_v8 = vpop.f32.mrb[70].mxu0  ;;  %17495 = vmatpush3.bf16.msra.mxu0 %v18114_v45 }
 0x586   : > { %v9181_v58 = vadd.f32 %v9176_v8, %v9061_v61  ;;  %v17295_v19 = vpop.f32.mrb[71].mxu0  ;;  %17512 = vmatprep.subr.bf16.mxu0 %v18301_v46 }
 0x58b   : > { %v9261_v54 = vpop.f32.mrb[72].mxu0 }
 0x58c   : > { %v9268_v50 = vadd.f32 %v9261_v54, %v9180_v39  ;;  %v17302_v44 = vpop.f32.mrb[73].mxu0 }
 0x58d   : > { %v9264_v37 = vpop.f32.mrb[74].mxu0 }
 0x58e   : > { %v9269_v27 = vadd.f32 %v9264_v37, %v9181_v58  ;;  %v17303_v2 = vpop.f32.mrb[75].mxu0 }
 0x593   : > { %v9437_v20 = vpop.f32.mrb[76].mxu0 }
 0x594   : > { %v9444_v1 = vadd.f32 %v9437_v20, %v9268_v50  ;;  %v17310_v13 = vpop.f32.mrb[77].mxu0 }
 0x595   : > { %v9440_v59 = vpop.f32.mrb[78].mxu0 }
 0x596   : > { %v9445_v14 = vadd.f32 %v9440_v59, %v9269_v27  ;;  %v17311_v49 = vpop.f32.mrb[79].mxu0 }
 0x59b   : > { %v9573_v51 = vpop.f32.mrb[80].mxu0 }
 0x59c   : > { %v9580_v4 = vadd.f32 %v9573_v51, %v9444_v1  ;;  %v17318_v56 = vpop.f32.mrb[81].mxu0 }
 0x59d   : > { %v9576_v10 = vpop.f32.mrb[82].mxu0 }
 0x59e   : > { %v9581_v42 = vadd.f32 %v9576_v10, %v9445_v14  ;;  %v17319_v12 = vpop.f32.mrb[83].mxu0 }
 0x5a3   : > { %v9745_v7 = vpop.f32.mrb[84].mxu0 }
 0x5a4   : > { %v9752_v25 = vadd.f32 %v9745_v7, %v9580_v4  ;;  %v17326_v52 = vpop.f32.mrb[85].mxu0 }
 0x5a5   : > { %v9748_v9 = vpop.f32.mrb[86].mxu0 }
 0x5a6   : > { %v9753_v53 = vadd.f32 %v9748_v9, %v9581_v42  ;;  %v17327_v36 = vpop.f32.mrb[87].mxu0 }
 0x5ab   : > { %v9865_v38 = vpop.f32.mrb[88].mxu0 }
 0x5ac   : > { %v9872_v15 = vadd.f32 %v9865_v38, %v9752_v25  ;;  %v17334_v63 = vpop.f32.mrb[89].mxu0 }
 0x5ad   : > { %v9868_v22 = vpop.f32.mrb[90].mxu0 }
 0x5ae   : > { %v9873_v60 = vadd.f32 %v9868_v22, %v9753_v53  ;;  %v17335_v21 = vpop.f32.mrb[91].mxu0 }
 0x5b3   : > { %v9954_v34 = vpop.f32.mrb[92].mxu0 }
 0x5b4   : > { %v9961_v11 = vadd.f32 %v9954_v34, %v9872_v15  ;;  %v17342_v48 = vpop.f32.mrb[93].mxu0 }
 0x5b5   : > { %v9957_v18 = vpop.f32.mrb[94].mxu0 }
 0x5b6   : > { %v9962_v57 = vadd.f32 %v9957_v18, %v9873_v60  ;;  %v17343_v31 = vpop.f32.mrb[95].mxu0 }
 0x5bb   : > { %v10130_v5 = vpop.f32.mrb[96].mxu0 }
 0x5bc   : > { %v10137_v17 = vadd.f32 %v10130_v5, %v9961_v11  ;;  %v17350_v61 = vpop.f32.mrb[97].mxu0  ;;  %v16036_v11 = vld [vmem:[%s21502_s6] ss:$0 sm:$0xff] }
 0x5bd   : > { %v10133_v40 = vpop.f32.mrb[98].mxu0 }
 0x5be   : > { %v10138_v26 = vadd.f32 %v10133_v40, %v9962_v57  ;;  %v17351_v39 = vpop.f32.mrb[99].mxu0 }
 0x5c3   : > { %v10266_v41 = vpop.f32.mrb[100].mxu0 }
 0x5c4   : > { %v10273_v8 = vadd.f32 %v10266_v41, %v10137_v17  ;;  %v17358_v58 = vpop.f32.mrb[101].mxu0 }
 0x5c5   : > { %v10269_v19 = vpop.f32.mrb[102].mxu0 }
 0x5c6   : > { %v10274_v54 = vadd.f32 %v10269_v19, %v10138_v26  ;;  %v17359_v50 = vpop.f32.mrb[103].mxu0 }
 0x5cb   : > { %v10438_v44 = vpop.f32.mrb[104].mxu0 }
 0x5cc   : > { %v10445_v37 = vadd.f32 %v10438_v44, %v10273_v8  ;;  %v17366_v27 = vpop.f32.mrb[105].mxu0 }
 0x5cd   : > { %v10441_v2 = vpop.f32.mrb[106].mxu0 }
 0x5ce   : > { %v10446_v20 = vadd.f32 %v10441_v2, %v10274_v54  ;;  %v17367_v1 = vpop.f32.mrb[107].mxu0 }
 0x5d3   : > { %v10558_v13 = vpop.f32.mrb[108].mxu0 }
 0x5d4   : > { %v10565_v59 = vadd.f32 %v10558_v13, %v10445_v37  ;;  %v17374_v14 = vpop.f32.mrb[109].mxu0 }
 0x5d5   : > { %v10561_v49 = vpop.f32.mrb[110].mxu0 }
 0x5d6   : > { %v10566_v47 = vadd.f32 %v10561_v49, %v10446_v20  ;;  %v17375_v3 = vpop.f32.mrb[111].mxu0 }
 0x5db   : > { %v10647_v51 = vpop.f32.mrb[112].mxu0 }
 0x5dc   : > { %v10654_v4 = vadd.f32 %v10647_v51, %v10565_v59  ;;  %v17382_v56 = vpop.f32.mrb[113].mxu0 }
 0x5dd   : > { %v10650_v62 = vpop.f32.mrb[114].mxu0 }
 0x5de   : > { %v10655_v32 = vadd.f32 %v10650_v62, %v10566_v47  ;;  %v17383_v10 = vpop.f32.mrb[115].mxu0 }
 0x5e3   : > { %v10823_v42 = vpop.f32.mrb[116].mxu0 }
 0x5e4   : > { %v10830_v12 = vadd.f32 %v10823_v42, %v10654_v4  ;;  %v17390_v35 = vpop.f32.mrb[117].mxu0 }
 0x5e5   : > { %v10826_v30 = vpop.f32.mrb[118].mxu0 }
 0x5e6   : > { %v10831_v7 = vadd.f32 %v10826_v30, %v10655_v32  ;;  %v17391_v25 = vpop.f32.mrb[119].mxu0 }
 0x5eb   : > { %v10959_v52 = vpop.f32.mrb[120].mxu0 }
 0x5ec   : > { %v10966_v23 = vadd.f32 %v10959_v52, %v10830_v12  ;;  %v17398_v45 = vpop.f32.mrb[121].mxu0 }
 0x5ed   : > { %v10962_v9 = vpop.f32.mrb[122].mxu0 }
 0x5ee   : > { %v10967_v53 = vadd.f32 %v10962_v9, %v10831_v7  ;;  %v17399_v36 = vpop.f32.mrb[123].mxu0 }
 0x5f3   : > { %v11131_v38 = vpop.f32.mrb[124].mxu0 }
 0x5f4   : > { %v11138_v15 = vadd.f32 %v11131_v38, %v10966_v23  ;;  %v17406_v63 = vpop.f32.mrb[125].mxu0 }
 0x5f5   : > { %v11134_v22 = vpop.f32.mrb[126].mxu0 }
 0x5f6   : > { %v11139_v60 = vadd.f32 %v11134_v22, %v10967_v53  ;;  %v17407_v21 = vpop.f32.mrb[127].mxu0 }
 0x5fb   : > { %v11251_v34 = vpop.f32.mrb[128].mxu0 }
 0x5fc   : > { %v11258_v48 = vadd.f32 %v11251_v34, %v11138_v15  ;;  %v17414_v18 = vpop.f32.mrb[129].mxu0 }
 0x5fd   : > { %v11254_v57 = vpop.f32.mrb[130].mxu0 }
 0x5fe   : > { %v11267_v31 = vadd.f32 %v16036_v11, %v11258_v48  ;;  %v11259_v5 = vadd.f32 %v11254_v57, %v11139_v60  ;;  %v17415_v17 = vpop.f32.mrb[131].mxu0 }
 0x600   : > { %v11269_v61 = vmax.f32 %v11267_v31, 0.0  ;;  %v11268_v40 = vadd.f32 %v16036_v11, %v11259_v5 }
 0x602   : > { %v11273_v26 = vcombine.high %v11269_v61, %v11269_v61  ;;  %v11280_v39 = vrot.slane %v11269_v61, %v18527_v33  ;;  %v11270_v41 = vmax.f32 %v11268_v40, 0.0 }
 0x604   : > { %v11287_v8 = vrot.slane %v11273_v26, %v18527_v33  ;;  %v11288_v58 = vcombine.high %v11280_v39, %v11280_v39  ;;  %v16037_v19 = vrot.slane %v11280_v39, 9  ;;  %v11290_v54 = vcombine.high %v11270_v41, %v11270_v41 }
 0x605   : > { %v11297_v50 = vrot.slane %v11270_v41, %v18527_v33 }
 0x606   : > { %v11289_v44 = vcombine.high %v11287_v8, %v11287_v8  ;;  %v16038_v37 = vrot.slane %v11288_v58, 9  ;;  %v16039_v27 = vrot.slane %v11287_v8, 9  ;;  %v11304_v2 = vrot.slane %v11290_v54, %v18527_v33 }
 0x607   : > { %v11305_v20 = vcombine.high %v11297_v50, %v11297_v50  ;;  %v16041_v1 = vrot.slane %v11297_v50, 9  ;;  %v11339_v59 = vmax.f32 %v11280_v39, %v16037_v19 }
 0x608   : > { %v16040_v13 = vrot.slane %v11289_v44, 9  ;;  %v11341_v14 = vmax.f32 %v11287_v8, %v16039_v27  ;;  %v11306_v49 = vcombine.high %v11304_v2, %v11304_v2  ;;  %v16043_v3 = vrot.slane %v11304_v2, 9 }
 0x609   : > { %v16042_v47 = vrot.slane %v11305_v20, 9  ;;  %v11340_v51 = vmax.f32 %v11288_v58, %v16038_v37  ;;  %v11343_v32 = vmax.f32 %v11297_v50, %v16041_v1  ;;  %v18115_v50 = vld [vmem:[%s21503_s7 + $0x120] sm:$0xff]   ;;  %v16182_v37 = vld.sshfl [vmem:[#allocation4 + $0x8] sm:$0x2 pattern:$0x75316420] }
 0x60a   : > { %v11342_v4 = vmax.f32 %v11289_v44, %v16040_v13  ;;  %v11347_v56 = vmax.f32 %v11339_v59, %v11341_v14  ;;  %v16044_v62 = vrot.slane %v11306_v49, 9  ;;  %v11345_v10 = vmax.f32 %v11304_v2, %v16043_v3  ;;  %v18116_v3 = vld [vmem:[%s21503_s7 + $0x100] sm:$0xff]  }
 0x60b   : > { %v11344_v35 = vmax.f32 %v11305_v20, %v16042_v47  ;;  %v20917_v27 = vpop.f32.mrb[132].mxu0 }
 0x60c   : > { %v11348_v42 = vmax.f32 %v11340_v51, %v11342_v4  ;;  %v16543_v12 = vpack.c.bf16 %v11347_v56, %v11347_v56  ;;  %v11346_v30 = vmax.f32 %v11306_v49, %v16044_v62  ;;  %v11349_v7 = vmax.f32 %v11343_v32, %v11345_v10  ;;  %v17438_v20 = vpop.f32.mrb[133].mxu0 }
 0x60d   : > { %v11645_v59 = vpop.f32.mrb[134].mxu0  ;;  %v20926_v49 = vrot.slane %v16182_v37, %v20700_v0 }
 0x60e   : > { %v16544_v25 = vpack.c.bf16 %v11348_v42, %v11348_v42  ;;  %v11367_v52 = vunpack.c.l.b16 %v16543_v12  ;;  %v11350_v23 = vmax.f32 %v11344_v35, %v11346_v30  ;;  %v16545_v45 = vpack.c.bf16 %v11349_v7, %v11349_v7  ;;  %v17439_v47 = vpop.f32.mrb[135].mxu0  ;;  %v18118_v30 = vld [vmem:[%s21503_s7 + $0x108] sm:$0xff]   ;;  %v18119_v7 = vld [vmem:[%s21503_s7 + $0x130] sm:$0xff]  }
 0x60f   : > { %v16191_v42 = vcombine.high %v20796_v55, %v20926_v49 }
 0x610   : > { %v11368_v9 = vunpack.c.l.b16 %v16544_v25  ;;  %v16546_v53 = vpack.c.bf16 %v11350_v23, %v11350_v23  ;;  %v11369_v36 = vunpack.c.l.b16 %v16545_v45  ;;  %v11371_v38 = vrot.slane %v11367_v52, 6 }
 0x612   : > { %v11372_v15 = vrot.slane %v11368_v9, 5  ;;  %v11370_v63 = vunpack.c.l.b16 %v16546_v53  ;;  %v11374_v21 = vrot.slane %v11369_v36, 6  ;;  %v12651_v9 = vrot.slane %v16191_v42, %v20700_v0  ;;  %v18120_v36 = vld [vmem:[%s21503_s7 + $0x110] sm:$0xff]  }
 0x614   : > { %v11373_v22 = vsel %vm2475_vm2, %v11372_v15, %v11371_v38  ;;  %v11375_v34 = vrot.slane %v11370_v63, 5  ;;  %v18121_v38 = vld [vmem:[%s21503_s7 + $0x138] sm:$0xff]  }
 0x615   : > { %v11377_v60 = vpack.c.b16 %v11373_v22, %v11373_v22  ;;  %v12658_v22 = vrot.slane %v12651_v9, %v20700_v0 }
 0x616   : > { %v11376_v11 = vsel %vm2475_vm2, %v11375_v34, %v11374_v21  ;;  %v18123_v21 = vld [vmem:[%s21503_s7 + $0x160] sm:$0xff]  }
 0x617   : > { %11383 = vst.msk [vmem:[#allocation4 + $0x8] sm:$0x2] %vm11382_vm8, %v11377_v60  ;;  %v11378_v48 = vpack.c.b16 %v11376_v11, %v11376_v11  ;;  %v18122_v60 = vld [vmem:[%s21503_s7 + $0x118] sm:$0xff]  }
 0x619   : > { %11384 = vst.msk [vmem:[#allocation4 + $0xc] sm:$0x2] %vm11382_vm8, %v11378_v48  ;;  %v18124_v48 = vld [vmem:[%s21503_s7 + $0x140] sm:$0xff]  }
 0x61b   : > { %v20936_v51 = vpop.f32.mrb[136].mxu0 }
 0x61c   : > { %v17450_v56 = vpop.f32.mrb[137].mxu0 }
 0x61d   : > { %v11770_v10 = vpop.f32.mrb[138].mxu0  ;;  %v18131_v56 = vld [vmem:[%s21503_s7 + $0x1a0] sm:$0xff]  }
 0x61e   : > { %v16150_v18 = vld.sshfl [vmem:[#allocation4 + $0x8] sm:$0x10 pattern:$0x75316420]  ;;  %v17451_v35 = vpop.f32.mrb[139].mxu0 }
 0x61f   : > { %v12341_v57 = vcombine.high %v16150_v18, %v16150_v18  ;;  %v16133_v31 = vld.sshfl [vmem:[#allocation4 + $0x8] sm:$0x11 pattern:$0x75316420]  ;;  %v18133_v35 = vld [vmem:[%s21503_s7 + $0x180] sm:$0xff]  }
 0x620   : > { %v12190_v5 = vcombine.high %v16133_v31, %v16133_v31  ;;  %v12197_v17 = vrot.slane %v16133_v31, %v20700_v0  ;;  %v16165_v40 = vld.sshfl [vmem:[#allocation4 + $0x8] sm:$0x12 pattern:$0x75316420] }
 0x621   : > { %v20903_v61 = vrot.slane %v12341_v57, %v20700_v0  ;;  %v12475_v58 = vcombine.high %v16165_v40, %v16165_v40  ;;  %v12482_v19 = vrot.slane %v16165_v40, %v20700_v0  ;;  %v16211_v12 = vld.sshfl [vmem:[#allocation4 + $0xc] sm:$0x11 pattern:$0x75316420] }
 0x622   : > { %v12204_v26 = vrot.slane %v12190_v5, %v20700_v0  ;;  %v12215_v41 = vshrl.u32 %v12197_v17, 16  ;;  %v12856_v23 = vcombine.high %v16211_v12, %v16211_v12  ;;  %v12863_v34 = vrot.slane %v16211_v12, %v20700_v0  ;;  %v18125_v18 = vld [vmem:[%s21503_s7 + $0x168] sm:$0xff]  }
 0x623   : > { %v12358_v39 = vcombine.low %v20724_v6, %v20903_v61  ;;  %v12489_v1 = vrot.slane %v12475_v58, %v20700_v0  ;;  %v12490_v13 = vcombine.high %v12482_v19, %v12482_v19  ;;  %v16228_v42 = vld.sshfl [vmem:[#allocation4 + $0xc] sm:$0x10 pattern:$0x75316420] }
 0x624   : > { %v12220_v8 = vshll.u32 %v12204_v26, 16  ;;  %v12870_v63 = vrot.slane %v12856_v23, %v20700_v0  ;;  %v12881_v57 = vshrl.u32 %v12863_v34, 16  ;;  %v16243_v26 = vld.sshfl [vmem:[#allocation4 + $0xc] sm:$0x12 pattern:$0x75316420] }
 0x625   : > { %v12365_v54 = vrot.slane %v12358_v39, %v20700_v0  ;;  %v12501_v62 = vshrl.u32 %v12489_v1, 16  ;;  %v12506_v32 = vshll.u32 %v12490_v13, 16  ;;  %v18232_v1 = vld.sshfl [vmem:[#allocation4 + $0x8] sm:$0x5 pattern:$0x75316420] }
 0x626   : > { %v20915_v44 = vsel %vm20756_vm5, %v12215_v41, %v12220_v8  ;;  %v12886_v11 = vshll.u32 %v12870_v63, 16  ;;  %v18126_v41 = vld [vmem:[%s21503_s7 + $0x148] sm:$0xff]   ;;  %v18127_v8 = vld [vmem:[%s21503_s7 + $0x170] sm:$0xff]   ;;  %v12754_v12 = vrot.slane %v18232_v1, %v20700_v0  ;;  %v18139_v34 = vld [vmem:[%s21503_s7 + $0x198] sm:$0xff]  }
 0x627   : > { %v12372_v6 = vrot.slane %v12365_v54, %v20700_v0  ;;  %v12232_v2 = vcombine.low %v20828_v16, %v20915_v44  ;;  %v18117_v16 = vld [vmem:[%s21503_s7 + $0x128] sm:$0xff]   ;;  %v20957_v55 = vsel %vm20756_vm5, %v12501_v62, %v12506_v32 }
 0x628   : > { %v12518_v15 = vcombine.low %v20772_v28, %v20957_v55  ;;  %v20996_v17 = vsel %vm20756_vm5, %v12881_v57, %v12886_v11  ;;  %v16260_v57 = vld.sshfl [vmem:[#allocation4 + $0xc] sm:$0x2 pattern:$0x75316420] }
 0x629   : > { %17509 = vmatmul.mubr.msk.bf16.vlgmr.msra.gmra.mrb[12].mxu1 %vm11520_vm0, %v12372_v6  ;;  %v12239_v14 = vrot.slane %v12232_v2, %v20700_v0  ;;  %v12898_v54 = vcombine.low %v20915_v44, %v20996_v17  ;;  %v13141_v6 = vcombine.high %v16243_v26, %v16243_v26  ;;  %v13148_v2 = vrot.slane %v16243_v26, %v20700_v0  ;;  %v18128_v44 = vld [vmem:[%s21503_s7 + $0x150] sm:$0xff]   ;;  %v18143_v26 = vld [vmem:[%s21503_s7 + $0x1c8] sm:$0xff]  }
 0x62a   : > { %17525 = vmatpush3.bf16.msra.mxu1 %v18115_v50  ;;  %17532 = vmatprep.mubr.msk.bf16.mxu1 %vm18302_vm12, %v18301_v46  ;;  %v12525_v28 = vrot.slane %v12518_v15, %v20700_v0 }
 0x62b   : > { %v12246_v4 = vrot.slane %v12239_v14, %v20700_v0  ;;  %17526 = vmatprep.subr.bf16.mxu1 %v18301_v46  ;;  %v20949_v25 = vpop.f32.mrb[140].mxu0  ;;  %v12905_v14 = vrot.slane %v12898_v54, %v20700_v0  ;;  %v16306_v54 = vld.sshfl [vmem:[#allocation4 + $0x10] sm:$0x10 pattern:$0x75316420] }
 0x62c   : > { %v17462_v52 = vpop.f32.mrb[141].mxu0  ;;  %v12532_v31 = vrot.slane %v12525_v28, %v20700_v0  ;;  %v18140_v28 = vld [vmem:[%s21503_s7 + $0x1e0] sm:$0xff]  }
 0x62d   : > { %17497 = vmatmul.mubr.msk.bf16.vlgmr.msra.gmra.mrb[152].mxu0 %vm11520_vm0, %v12246_v4  ;;  %v11930_v45 = vpop.f32.mrb[142].mxu0  ;;  %v11558_v58 = vpop.f32.mrb[8].mxu1  ;;  %v18130_v4 = vld [vmem:[%s21503_s7 + $0x158] sm:$0xff]   ;;  %v12912_v62 = vrot.slane %v12905_v14, %v20700_v0 }
 0x62e   : > { %17513 = vmatpush3.bf16.msra.mxu0 %v18116_v3  ;;  %17527 = vmatpush3.bf16.msra.mxu1 %v18117_v16  ;;  %v17463_v53 = vpop.f32.mrb[143].mxu0  ;;  %v11643_v50 = vadd.f32 %v20917_v27, %v11558_v58  ;;  %v17426_v37 = vpop.f32.mrb[9].mxu1  ;;  %v18129_v27 = vld [vmem:[%s21503_s7 + $0x178] sm:$0xff]   ;;  %v13155_v3 = vrot.slane %v13141_v6, %v20700_v0  ;;  %v13156_v16 = vcombine.high %v13148_v2, %v13148_v2  ;;  %v18145_v58 = vld [vmem:[%s21503_s7 + $0x1d0] sm:$0xff]   ;;  %v18149_v2 = vld [vmem:[%s21503_s7 + $0x220] sm:$0xff]  }
 0x62f   : > { %17514 = vmatprep.subr.bf16.mxu0 %v18301_v46  ;;  %17528 = vmatprep.subr.bf16.mxu1 %v18301_v46  ;;  %v11561_v20 = vpop.f32.mrb[10].mxu1  ;;  %v18135_v53 = vld [vmem:[%s21503_s7 + $0x188] sm:$0xff]   ;;  %v18147_v6 = vld [vmem:[%s21503_s7 + $0x1d8] sm:$0xff]  }
 0x630   : > { %17520 = vmatprep.mubr.msk.bf16.mxu0 %vm18302_vm12, %v18301_v46  ;;  %v11773_v13 = vadd.f32 %v20936_v51, %v11643_v50  ;;  %v17427_v59 = vpop.f32.mrb[11].mxu1  ;;  %v13167_v32 = vshrl.u32 %v13155_v3, 16  ;;  %v13172_v10 = vshll.u32 %v13156_v16, 16  ;;  %v13674_v20 = vcombine.high %v16306_v54, %v16306_v54  ;;  %v18152_v16 = vld [vmem:[%s21503_s7 + $0x208] sm:$0xff]  }
 0x632   : > { %17515 = vmatpush3.bf16.msra.mxu0 %v18118_v30  ;;  %17529 = vmatpush3.bf16.msra.mxu1 %v18119_v7  ;;  %v11933_v47 = vadd.f32 %v20949_v25, %v11773_v13  ;;  %v18134_v30 = vld [vmem:[%s21503_s7 + $0x1a8] sm:$0xff]   ;;  %v13007_v7 = vcombine.high %v16228_v42, %v16228_v42  ;;  %v21048_v52 = vsel %vm20756_vm5, %v13167_v32, %v13172_v10  ;;  %v18154_v32 = vld [vmem:[%s21503_s7 + $0x210] sm:$0xff]   ;;  %v18155_v10 = vld [vmem:[%s21503_s7 + $0x238] sm:$0xff]  }
 0x633   : > { %17516 = vmatprep.subr.bf16.mxu0 %v18301_v46  ;;  %17530 = vmatprep.subr.bf16.mxu1 %v18301_v46  ;;  %v13184_v15 = vcombine.low %v20957_v55, %v21048_v52  ;;  %v21148_v14 = vrot.slane %v13674_v20, %v20700_v0  ;;  %v18167_v20 = vld [vmem:[%s21503_s7 + $0x288] sm:$0xff]  }
 0x634   : > { %v21064_v63 = vrot.slane %v13007_v7, %v20700_v0  ;;  %v18156_v7 = vld [vmem:[%s21503_s7 + $0x218] sm:$0xff]  }
 0x635   : > { %v13191_v55 = vrot.slane %v13184_v15, %v20700_v0  ;;  %v18157_v15 = vld [vmem:[%s21503_s7 + $0x240] sm:$0xff]  }
 0x636   : > { %17517 = vmatpush3.bf16.msra.mxu0 %v18120_v36  ;;  %17531 = vmatpush3.bf16.msra.mxu1 %v18121_v38  ;;  %v18136_v36 = vld [vmem:[%s21503_s7 + $0x1b0] sm:$0xff]  }
 0x637   : > { %17518 = vmatprep.subr.bf16.mxu0 %v18301_v46  ;;  %17548 = vmatprep.subr.bf16.mxu1 %v18301_v46  ;;  %v13198_v11 = vrot.slane %v13191_v55, %v20700_v0 }
 0x639   : > { %17533 = vmatmul.mubr.msk.bf16.vlgmr.msra.gmra.mrb[16].mxu1 %vm11520_vm0, %v12658_v22  ;;  %v18137_v22 = vld [vmem:[%s21503_s7 + $0x190] sm:$0xff]  }
 0x63a   : > { %17519 = vmatpush3.bf16.msra.mxu0 %v18122_v60  ;;  %17549 = vmatpush3.bf16.msra.mxu1 %v18123_v21  ;;  %v18138_v60 = vld [vmem:[%s21503_s7 + $0x1b8] sm:$0xff]   ;;  %v13024_v21 = vcombine.low %v20903_v61, %v21064_v63  ;;  %v18141_v61 = vld [vmem:[%s21503_s7 + $0x1c0] sm:$0xff]  }
 0x63b   : > { %17536 = vmatprep.subr.bf16.mxu0 %v18301_v46  ;;  %17550 = vmatprep.subr.bf16.mxu1 %v18301_v46  ;;  %v12053_v5 = vpop.f32.mrb[144].mxu0 }
 0x63c   : > { %17556 = vmatprep.mubr.msk.bf16.mxu1 %vm18302_vm12, %v18301_v46  ;;  %v17474_v40 = vpop.f32.mrb[145].mxu0  ;;  %v12059_v51 = vadd.f32 %v12053_v5, %v11933_v47  ;;  %v18233_v5 = vld.sshfl [vmem:[#allocation4 + $0xc] sm:$0x5 pattern:$0x75316420] }
 0x63d   : > { %17521 = vmatmul.mubr.msk.bf16.vlgmr.msra.gmra.mrb[156].mxu0 %vm11520_vm0, %v12532_v31  ;;  %v12056_v39 = vpop.f32.mrb[146].mxu0  ;;  %v21103_v40 = vrot.slane %v16260_v57, %v20700_v0  ;;  %v13421_v37 = vrot.slane %v18233_v5, %v20700_v0  ;;  %v18161_v57 = vld [vmem:[%s21503_s7 + $0x250] sm:$0xff]  }
 0x63e   : > { %17537 = vmatpush3.bf16.msra.mxu0 %v18124_v48  ;;  %17551 = vmatpush3.bf16.msra.mxu1 %v18125_v18  ;;  %v17475_v19 = vpop.f32.mrb[147].mxu0  ;;  %v13031_v48 = vrot.slane %v13024_v21, %v20700_v0  ;;  %v18142_v18 = vld [vmem:[%s21503_s7 + $0x1e8] sm:$0xff]   ;;  %v18144_v39 = vld [vmem:[%s21503_s7 + $0x1f0] sm:$0xff]  }
 0x63f   : > { %17538 = vmatprep.subr.bf16.mxu0 %v18301_v46  ;;  %17552 = vmatprep.subr.bf16.mxu1 %v18301_v46  ;;  %v18146_v19 = vld [vmem:[%s21503_s7 + $0x1f8] sm:$0xff]  }
 0x640   : > { %17544 = vmatprep.mubr.msk.bf16.mxu0 %vm18302_vm12, %v18301_v46  ;;  %v13038_v31 = vrot.slane %v13031_v48, %v20700_v0 }
 0x642   : > { %17539 = vmatpush3.bf16.msra.mxu0 %v18126_v41  ;;  %17553 = vmatpush3.bf16.msra.mxu1 %v18127_v8  ;;  %v16269_v41 = vcombine.high %v20926_v49, %v21103_v40  ;;  %v16289_v8 = vld.sshfl [vmem:[#allocation4 + $0x10] sm:$0x11 pattern:$0x75316420] }
 0x643   : > { %17540 = vmatprep.subr.bf16.mxu0 %v18301_v46  ;;  %17554 = vmatprep.subr.bf16.mxu1 %v18301_v46  ;;  %v13523_v50 = vcombine.high %v16289_v8, %v16289_v8  ;;  %v13530_v1 = vrot.slane %v16289_v8, %v20700_v0  ;;  %v18166_v8 = vld [vmem:[%s21503_s7 + $0x2a0] sm:$0xff]  }
 0x644   : > { %v13317_v49 = vrot.slane %v16269_v41, %v20700_v0  ;;  %v18163_v41 = vld [vmem:[%s21503_s7 + $0x258] sm:$0xff]  }
 0x645   : > { %v13537_v13 = vrot.slane %v13523_v50, %v20700_v0  ;;  %v13548_v47 = vshrl.u32 %v13530_v1, 16  ;;  %v18168_v50 = vld [vmem:[%s21503_s7 + $0x2a8] sm:$0xff]   ;;  %v18170_v1 = vld [vmem:[%s21503_s7 + $0x2b0] sm:$0xff]  }
 0x646   : > { %17541 = vmatpush3.bf16.msra.mxu0 %v18128_v44  ;;  %17555 = vmatpush3.bf16.msra.mxu1 %v18129_v27  ;;  %v13324_v59 = vrot.slane %v13317_v49, %v20700_v0  ;;  %v18150_v44 = vld [vmem:[%s21503_s7 + $0x200] sm:$0xff]   ;;  %v18151_v27 = vld [vmem:[%s21503_s7 + $0x228] sm:$0xff]  }
 0x647   : > { %17542 = vmatprep.subr.bf16.mxu0 %v18301_v46  ;;  %17572 = vmatprep.subr.bf16.mxu1 %v18301_v46  ;;  %v13553_v3 = vshll.u32 %v13537_v13, 16 }
 0x649   : > { %17557 = vmatmul.mubr.msk.bf16.vlgmr.msra.gmra.mrb[20].mxu1 %vm11520_vm0, %v12912_v62  ;;  %v16321_v62 = vld.sshfl [vmem:[#allocation4 + $0x10] sm:$0x12 pattern:$0x75316420] }
 0x64a   : > { %17543 = vmatpush3.bf16.msra.mxu0 %v18130_v4  ;;  %17573 = vmatpush3.bf16.msra.mxu1 %v18131_v56  ;;  %v13691_v4 = vcombine.low %v21064_v63, %v21148_v14  ;;  %v21167_v56 = vsel %vm20756_vm5, %v13548_v47, %v13553_v3  ;;  %v18160_v63 = vld [vmem:[%s21503_s7 + $0x268] sm:$0xff]   ;;  %v18169_v47 = vld [vmem:[%s21503_s7 + $0x290] sm:$0xff]   ;;  %v18172_v3 = vld [vmem:[%s21503_s7 + $0x2b8] sm:$0xff]  }
 0x64b   : > { %17560 = vmatprep.subr.bf16.mxu0 %v18301_v46  ;;  %17574 = vmatprep.subr.bf16.mxu1 %v18301_v46  ;;  %v12150_v25 = vpop.f32.mrb[148].mxu0 }
 0x64c   : > { %17580 = vmatprep.mubr.msk.bf16.mxu1 %vm18302_vm12, %v18301_v46  ;;  %v21050_v23 = vadd.f32 %v12150_v25, %v12059_v51  ;;  %v17486_v45 = vpop.f32.mrb[149].mxu0  ;;  %v18153_v51 = vld [vmem:[%s21503_s7 + $0x230] sm:$0xff]   ;;  %v13698_v42 = vrot.slane %v13691_v4, %v20700_v0  ;;  %v18158_v25 = vld [vmem:[%s21503_s7 + $0x260] sm:$0xff]   ;;  %v18171_v4 = vld [vmem:[%s21503_s7 + $0x298] sm:$0xff]  }
 0x64d   : > { %17545 = vmatmul.mubr.msk.bf16.vlgmr.msra.gmra.mrb[160].mxu0 %vm11520_vm0, %v12754_v12  ;;  %v12153_v9 = vpop.f32.mrb[150].mxu0  ;;  %v13565_v12 = vcombine.low %v20996_v17, %v21167_v56  ;;  %v16338_v45 = vld.sshfl [vmem:[#allocation4 + $0x10] sm:$0x2 pattern:$0x75316420] }
 0x64e   : > { %17561 = vmatpush3.bf16.msra.mxu0 %v18133_v35  ;;  %17575 = vmatpush3.bf16.msra.mxu1 %v18134_v30  ;;  %v17487_v38 = vpop.f32.mrb[151].mxu0  ;;  %v13808_v35 = vcombine.high %v16321_v62, %v16321_v62  ;;  %v13815_v30 = vrot.slane %v16321_v62, %v20700_v0  ;;  %v13705_v9 = vrot.slane %v13698_v42, %v20700_v0  ;;  %v18175_v62 = vld [vmem:[%s21503_s7 + $0x2e0] sm:$0xff]  }
 0x64f   : > { %17562 = vmatprep.subr.bf16.mxu0 %v18301_v46  ;;  %17576 = vmatprep.subr.bf16.mxu1 %v18301_v46  ;;  %v13572_v17 = vrot.slane %v13565_v12, %v20700_v0  ;;  %v21194_v38 = vrot.slane %v16338_v45, %v20700_v0 }
 0x650   : > { %17568 = vmatprep.mubr.msk.bf16.mxu0 %vm18302_vm12, %v18301_v46 }
 0x652   : > { %17563 = vmatpush3.bf16.msra.mxu0 %v18135_v53  ;;  %17577 = vmatpush3.bf16.msra.mxu1 %v18136_v36  ;;  %v13822_v53 = vrot.slane %v13808_v35, %v20700_v0  ;;  %v13823_v36 = vcombine.high %v13815_v30, %v13815_v30  ;;  %v18174_v30 = vld [vmem:[%s21503_s7 + $0x2c0] sm:$0xff]  }
 0x653   : > { %17564 = vmatprep.subr.bf16.mxu0 %v18301_v46  ;;  %17578 = vmatprep.subr.bf16.mxu1 %v18301_v46 }
 0x654   : > { %v13834_v55 = vshrl.u32 %v13822_v53, 16  ;;  %v13839_v21 = vshll.u32 %v13823_v36, 16 }
 0x656   : > { %17565 = vmatpush3.bf16.msra.mxu0 %v18137_v22  ;;  %17579 = vmatpush3.bf16.msra.mxu1 %v18138_v60  ;;  %v13579_v22 = vrot.slane %v13572_v17, %v20700_v0  ;;  %v16367_v60 = vld.sshfl [vmem:[#allocation4 + $0x14] sm:$0x11 pattern:$0x75316420]  ;;  %v18176_v17 = vld [vmem:[%s21503_s7 + $0x2c8] sm:$0xff]  }
 0x657   : > { %17566 = vmatprep.subr.bf16.mxu0 %v18301_v46  ;;  %17596 = vmatprep.subr.bf16.mxu1 %v18301_v46  ;;  %v14190_v48 = vcombine.high %v16367_v60, %v16367_v60  ;;  %v14197_v5 = vrot.slane %v16367_v60, %v20700_v0  ;;  %v18180_v60 = vld [vmem:[%s21503_s7 + $0x2d8] sm:$0xff]  }
 0x659   : > { %17581 = vmatmul.mubr.msk.bf16.vlgmr.msra.gmra.mrb[24].mxu1 %vm11520_vm0, %v13198_v11  ;;  %v18162_v11 = vld [vmem:[%s21503_s7 + $0x270] sm:$0xff]  }
 0x65a   : > { %17567 = vmatpush3.bf16.msra.mxu0 %v18139_v34  ;;  %17597 = vmatpush3.bf16.msra.mxu1 %v18140_v28  ;;  %v16347_v34 = vcombine.high %v21103_v40, %v21194_v38  ;;  %v18159_v28 = vld [vmem:[%s21503_s7 + $0x248] sm:$0xff]   ;;  %v14204_v40 = vrot.slane %v14190_v48, %v20700_v0 }
 0x65b   : > { %17584 = vmatprep.subr.bf16.mxu0 %v18301_v46  ;;  %17598 = vmatprep.subr.bf16.mxu1 %v18301_v46 }
 0x65c   : > { %17604 = vmatprep.mubr.msk.bf16.mxu1 %vm18302_vm12, %v18301_v46 }
 0x65d   : > { %17569 = vmatmul.mubr.msk.bf16.vlgmr.msra.gmra.mrb[164].mxu0 %vm11520_vm0, %v13038_v31  ;;  %v18164_v31 = vld [vmem:[%s21503_s7 + $0x278] sm:$0xff]  }
 0x65e   : > { %17585 = vmatpush3.bf16.msra.mxu0 %v18141_v61  ;;  %17599 = vmatpush3.bf16.msra.mxu1 %v18142_v18  ;;  %v21222_v61 = vsel %vm20756_vm5, %v13834_v55, %v13839_v21  ;;  %v13984_v18 = vrot.slane %v16347_v34, %v20700_v0  ;;  %v18182_v21 = vld [vmem:[%s21503_s7 + $0x300] sm:$0xff]   ;;  %v16416_v34 = vld.sshfl [vmem:[#allocation4 + $0x14] sm:$0x2 pattern:$0x75316420] }
 0x65f   : > { %17586 = vmatprep.subr.bf16.mxu0 %v18301_v46  ;;  %17600 = vmatprep.subr.bf16.mxu1 %v18301_v46 }
 0x660   : > { %17592 = vmatprep.mubr.msk.bf16.mxu0 %vm18302_vm12, %v18301_v46 }
 0x662   : > { %17587 = vmatpush3.bf16.msra.mxu0 %v18143_v26  ;;  %17601 = vmatpush3.bf16.msra.mxu1 %v18144_v39  ;;  %v13851_v26 = vcombine.low %v21048_v52, %v21222_v61  ;;  %v13991_v39 = vrot.slane %v13984_v18, %v20700_v0  ;;  %v18165_v52 = vld [vmem:[%s21503_s7 + $0x280] sm:$0xff]   ;;  %v18185_v18 = vld [vmem:[%s21503_s7 + $0x318] sm:$0xff]  }
 0x663   : > { %17588 = vmatprep.subr.bf16.mxu0 %v18301_v46  ;;  %17602 = vmatprep.subr.bf16.mxu1 %v18301_v46 }
 0x664   : > { %v13858_v54 = vrot.slane %v13851_v26, %v20700_v0 }
 0x666   : > { %17589 = vmatpush3.bf16.msra.mxu0 %v18145_v58  ;;  %17603 = vmatpush3.bf16.msra.mxu1 %v18146_v19  ;;  %v14215_v58 = vshrl.u32 %v14197_v5, 16  ;;  %v14220_v19 = vshll.u32 %v14204_v40, 16  ;;  %v13865_v49 = vrot.slane %v13858_v54, %v20700_v0 }
 0x667   : > { %17590 = vmatprep.subr.bf16.mxu0 %v18301_v46  ;;  %17620 = vmatprep.subr.bf16.mxu1 %v18301_v46 }
 0x669   : > { %17605 = vmatmul.mubr.msk.bf16.vlgmr.msra.gmra.mrb[28].mxu1 %vm11520_vm0, %v13421_v37  ;;  %v14222_v37 = vsel %vm20756_vm5, %v14215_v58, %v14220_v19 }
 0x66a   : > { %17591 = vmatpush3.bf16.msra.mxu0 %v18147_v6  ;;  %17621 = vmatpush3.bf16.msra.mxu1 %v18149_v2  ;;  %v16399_v6 = vld.sshfl [vmem:[#allocation4 + $0x14] sm:$0x12 pattern:$0x75316420]  ;;  %v14232_v2 = vcombine.low %v21167_v56, %v14222_v37 }
 0x66b   : > { %17608 = vmatprep.subr.bf16.mxu0 %v18301_v46  ;;  %17622 = vmatprep.subr.bf16.mxu1 %v18301_v46  ;;  %v14475_v13 = vcombine.high %v16399_v6, %v16399_v6 }
 0x66c   : > { %17628 = vmatprep.mubr.msk.bf16.mxu1 %vm18302_vm12, %v18301_v46 }
 0x66d   : > { %17593 = vmatmul.mubr.msk.bf16.vlgmr.msra.gmra.mrb[168].mxu0 %vm11520_vm0, %v13324_v59  ;;  %v14482_v59 = vrot.slane %v16399_v6, %v20700_v0 }
 0x66e   : > { %17609 = vmatpush3.bf16.msra.mxu0 %v18150_v44  ;;  %17623 = vmatpush3.bf16.msra.mxu1 %v18151_v27  ;;  %v18234_v44 = vld.sshfl [vmem:[#allocation4 + $0x10] sm:$0x5 pattern:$0x75316420]  ;;  %v14239_v27 = vrot.slane %v14232_v2, %v20700_v0 }
 0x66f   : > { %17610 = vmatprep.subr.bf16.mxu0 %v18301_v46  ;;  %17624 = vmatprep.subr.bf16.mxu1 %v18301_v46  ;;  %v14088_v12 = vrot.slane %v18234_v44, %v20700_v0 }
 0x670   : > { %17616 = vmatprep.mubr.msk.bf16.mxu0 %vm18302_vm12, %v18301_v46  ;;  %v14246_v56 = vrot.slane %v14239_v27, %v20700_v0  ;;  %v18188_v27 = vld [vmem:[%s21505_s9 + $0x4] ss:$8 sps:$4 sm:$0xff]  }
 0x672   : > { %17611 = vmatpush3.bf16.msra.mxu0 %v18152_v16  ;;  %17625 = vmatpush3.bf16.msra.mxu1 %v18153_v51  ;;  %v14489_v16 = vrot.slane %v14475_v13, %v20700_v0  ;;  %v14490_v51 = vcombine.high %v14482_v59, %v14482_v59 }
 0x673   : > { %17612 = vmatprep.subr.bf16.mxu0 %v18301_v46  ;;  %17626 = vmatprep.subr.bf16.mxu1 %v18301_v46 }
 0x674   : > { %v14506_v42 = vshll.u32 %v14490_v51, 16 }
 0x676   : > { %17613 = vmatpush3.bf16.msra.mxu0 %v18154_v32  ;;  %17627 = vmatpush3.bf16.msra.mxu1 %v18155_v10  ;;  %v16384_v32 = vld.sshfl [vmem:[#allocation4 + $0x14] sm:$0x10 pattern:$0x75316420]  ;;  %v14501_v10 = vshrl.u32 %v14489_v16, 16 }
 0x677   : > { %17614 = vmatprep.subr.bf16.mxu0 %v18301_v46  ;;  %17644 = vmatprep.subr.bf16.mxu1 %v18301_v46  ;;  %v14341_v35 = vcombine.high %v16384_v32, %v16384_v32 }
 0x679   : > { %17629 = vmatmul.mubr.msk.bf16.vlgmr.msra.gmra.mrb[32].mxu1 %vm11520_vm0, %v13705_v9  ;;  %v14348_v45 = vrot.slane %v14341_v35, %v20700_v0  ;;  %v18200_v35 = vld [vmem:[%s21507_s11 + $0x48] sm:$0xff]  }
 0x67a   : > { %17615 = vmatpush3.bf16.msra.mxu0 %v18156_v7  ;;  %17645 = vmatpush3.bf16.msra.mxu1 %v18158_v25  ;;  %v18177_v7 = vld [vmem:[%s21503_s7 + $0x2e8] sm:$0xff]   ;;  %v14508_v25 = vsel %vm20756_vm5, %v14501_v10, %v14506_v42  ;;  %v18198_v42 = vld [vmem:[%s21507_s11 + $0x40] sm:$0xff]  }
 0x67b   : > { %17632 = vmatprep.subr.bf16.mxu0 %v18301_v46  ;;  %17646 = vmatprep.subr.bf16.mxu1 %v18301_v46  ;;  %v14518_v9 = vcombine.low %v21222_v61, %v14508_v25  ;;  %v14358_v53 = vcombine.low %v21148_v14, %v14348_v45  ;;  %v18197_v25 = vld [vmem:[%s21505_s9 + $0x34] ss:$8 sps:$4 sm:$0xff]  }
 0x67c   : > { %17652 = vmatprep.mubr.msk.bf16.mxu1 %vm18302_vm12, %v18301_v46  ;;  %v18202_v45 = vld [vmem:[%s21507_s11 + $0x50] sm:$0xff]  }
 0x67d   : > { %17617 = vmatmul.mubr.msk.bf16.vlgmr.msra.gmra.mrb[172].mxu0 %vm11520_vm0, %v13579_v22  ;;  %v14525_v36 = vrot.slane %v14518_v9, %v20700_v0  ;;  %v14365_v22 = vrot.slane %v14358_v53, %v20700_v0  ;;  %v18195_v9 = vld [vmem:[%s21505_s9 + $0x30] ss:$8 sps:$4 sm:$0xff]  }
 0x67e   : > { %17633 = vmatpush3.bf16.msra.mxu0 %v18157_v15  ;;  %17647 = vmatpush3.bf16.msra.mxu1 %v18160_v63  ;;  %v18178_v15 = vld [vmem:[%s21503_s7 + $0x2d0] sm:$0xff]   ;;  %v18181_v63 = vld [vmem:[%s21503_s7 + $0x2f8] sm:$0xff]  }
 0x67f   : > { %17634 = vmatprep.subr.bf16.mxu0 %v18301_v46  ;;  %17648 = vmatprep.subr.bf16.mxu1 %v18301_v46  ;;  %v14532_v14 = vrot.slane %v14525_v36, %v20700_v0  ;;  %v14372_v55 = vrot.slane %v14365_v22, %v20700_v0 }
 0x680   : > { %17640 = vmatprep.mubr.msk.bf16.mxu0 %vm18302_vm12, %v18301_v46 }
 0x682   : > { %17635 = vmatpush3.bf16.msra.mxu0 %v18159_v28  ;;  %17649 = vmatpush3.bf16.msra.mxu1 %v18162_v11  ;;  %v14633_v28 = vrot.slane %v16416_v34, %v20700_v0  ;;  %v18183_v11 = vld [vmem:[%s21503_s7 + $0x308] sm:$0xff]  }
 0x683   : > { %17636 = vmatprep.subr.bf16.mxu0 %v18301_v46  ;;  %17650 = vmatprep.subr.bf16.mxu1 %v18301_v46 }
 0x684   : > { %v16425_v48 = vcombine.high %v21194_v38, %v14633_v28  ;;  %v18207_v28 = vld [vmem:[%s21507_s11 + $0x20] sm:$0xff]  }
 0x686   : > { %17637 = vmatpush3.bf16.msra.mxu0 %v18161_v57  ;;  %17651 = vmatpush3.bf16.msra.mxu1 %v18164_v31  ;;  %v14651_v61 = vrot.slane %v16425_v48, %v20700_v0 }
 0x687   : > { %17638 = vmatprep.subr.bf16.mxu0 %v18301_v46  ;;  %17668 = vmatprep.subr.bf16.mxu1 %v18301_v46 }
 0x688   : > { %v14658_v57 = vrot.slane %v14651_v61, %v20700_v0  ;;  %v18209_v61 = vld [vmem:[%s21507_s11 + $0x28] sm:$0xff]  }
 0x689   : > { %17653 = vmatmul.mubr.msk.bf16.vlgmr.msra.gmra.mrb[36].mxu1 %vm11520_vm0, %v13991_v39 }
 0x68a   : > { %17639 = vmatpush3.bf16.msra.mxu0 %v18163_v41  ;;  %17669 = vmatpush3.bf16.msra.mxu1 %v18166_v8 }
 0x68b   : > { %17656 = vmatprep.subr.bf16.mxu0 %v18301_v46  ;;  %17670 = vmatprep.subr.bf16.mxu1 %v18301_v46 }
 0x68c   : > { %17676 = vmatprep.mubr.msk.bf16.mxu1 %vm18302_vm12, %v18301_v46 }
 0x68d   : > { %17641 = vmatmul.mubr.msk.bf16.vlgmr.msra.gmra.mrb[176].mxu0 %vm11520_vm0, %v13865_v49 }
 0x68e   : > { %17657 = vmatpush3.bf16.msra.mxu0 %v18165_v52  ;;  %17671 = vmatpush3.bf16.msra.mxu1 %v18168_v50 }
 0x68f   : > { %17658 = vmatprep.subr.bf16.mxu0 %v18301_v46  ;;  %17672 = vmatprep.subr.bf16.mxu1 %v18301_v46 }
 0x690   : > { %17664 = vmatprep.mubr.msk.bf16.mxu0 %vm18302_vm12, %v18301_v46 }
 0x692   : > { %17659 = vmatpush3.bf16.msra.mxu0 %v18167_v20  ;;  %17673 = vmatpush3.bf16.msra.mxu1 %v18170_v1 }
 0x693   : > { %17660 = vmatprep.subr.bf16.mxu0 %v18301_v46  ;;  %17674 = vmatprep.subr.bf16.mxu1 %v18301_v46 }
 0x696   : > { %17661 = vmatpush3.bf16.msra.mxu0 %v18169_v47  ;;  %17675 = vmatpush3.bf16.msra.mxu1 %v18172_v3  ;;  %v18191_v3 = vld [vmem:[%s21505_s9 + $0x14] ss:$8 sps:$4 sm:$0xff]  }
 0x697   : > { %17662 = vmatprep.subr.bf16.mxu0 %v18301_v46  ;;  %17692 = vmatprep.subr.bf16.mxu1 %v18301_v46 }
 0x699   : > { %17677 = vmatmul.mubr.msk.bf16.vlgmr.msra.gmra.mrb[40].mxu1 %vm11520_vm0, %v14246_v56  ;;  %v18189_v56 = vld [vmem:[%s21505_s9 + $0x10] ss:$8 sps:$4 sm:$0xff]  }
 0x69a   : > { %17663 = vmatpush3.bf16.msra.mxu0 %v18171_v4  ;;  %17693 = vmatpush3.bf16.msra.mxu1 %v18175_v62  ;;  %v18194_v62 = vld [vmem:[%s21505_s9 + $0x24] ss:$8 sps:$4 sm:$0xff]  }
 0x69b   : > { %17680 = vmatprep.subr.bf16.mxu0 %v18301_v46  ;;  %17694 = vmatprep.subr.bf16.mxu1 %v18301_v46 }
 0x69c   : > { %17700 = vmatprep.mubr.msk.bf16.mxu1 %vm18302_vm12, %v18301_v46 }
 0x69d   : > { %17665 = vmatmul.mubr.msk.bf16.vlgmr.msra.gmra.mrb[180].mxu0 %vm11520_vm0, %v14088_v12  ;;  %v18199_v12 = vld [vmem:[%s21507_s11] sm:$0xff]  }
 0x69e   : > { %17681 = vmatpush3.bf16.msra.mxu0 %v18174_v30  ;;  %17695 = vmatpush3.bf16.msra.mxu1 %v18177_v7  ;;  %v18192_v30 = vld [vmem:[%s21505_s9 + $0x20] ss:$8 sps:$4 sm:$0xff]  }
 0x69f   : > { %17682 = vmatprep.subr.bf16.mxu0 %v18301_v46  ;;  %17696 = vmatprep.subr.bf16.mxu1 %v18301_v46  ;;  %v18201_v7 = vld [vmem:[%s21507_s11 + $0x8] sm:$0xff]  }
 0x6a0   : > { %17688 = vmatprep.mubr.msk.bf16.mxu0 %vm18302_vm12, %v18301_v46 }
 0x6a2   : > { %17683 = vmatpush3.bf16.msra.mxu0 %v18176_v17  ;;  %17697 = vmatpush3.bf16.msra.mxu1 %v18179_v43  ;;  %v18203_v17 = vld [vmem:[%s21507_s11 + $0x10] sm:$0xff]   ;;  %v18204_v43 = vld [vmem:[%s21507_s11 + $0x58] sm:$0xff]  }
 0x6a3   : > { %17684 = vmatprep.subr.bf16.mxu0 %v18301_v46  ;;  %17698 = vmatprep.subr.bf16.mxu1 %v18301_v46 }
 0x6a6   : > { %17685 = vmatpush3.bf16.msra.mxu0 %v18178_v15  ;;  %17699 = vmatpush3.bf16.msra.mxu1 %v18181_v63  ;;  %v18205_v63 = vld [vmem:[%s21507_s11 + $0x18] sm:$0xff]  }
 0x6a7   : > { %17686 = vmatprep.subr.bf16.mxu0 %v18301_v46  ;;  %14820 = vmatprep.subr.bf16.mxu1 %v18188_v27 }
 0x6a9   : > { %17701 = vmatmul.mubr.msk.bf16.vlgmr.msra.gmra.mrb[44].mxu1 %vm11520_vm0, %v14532_v14  ;;  %v18206_v14 = vld [vmem:[%s21507_s11 + $0x60] sm:$0xff]  }
 0x6aa   : > { %17687 = vmatpush3.bf16.msra.mxu0 %v18180_v60  ;;  %14852 = vmatprep.mubr.bf16.mxu1 %v18299_v24  ;;  %v18184_v24 = vld [vmem:[%s21503_s7 + $0x310] sm:$0xff]  }
 0x6ab   : > { %17704 = vmatprep.subr.bf16.mxu0 %v18301_v46 }
 0x6ad   : > { %17689 = vmatmul.mubr.msk.bf16.vlgmr.msra.gmra.mrb[184].mxu0 %vm11520_vm0, %v14372_v55 }
 0x6ae   : > { %17705 = vmatpush3.bf16.msra.mxu0 %v18182_v21  ;;  %17712 = vmatprep.mubr.msk.bf16.mxu0 %vm18302_vm12, %v18301_v46 }
 0x6af   : > { %17706 = vmatprep.subr.bf16.mxu0 %v18301_v46 }
 0x6b2   : > { %17707 = vmatpush3.bf16.msra.mxu0 %v18183_v11 }
 0x6b3   : > { %17708 = vmatprep.subr.bf16.mxu0 %v18301_v46 }
 0x6b6   : > { %17709 = vmatpush3.bf16.msra.mxu0 %v18184_v24  ;;  %v18208_v24 = vld [vmem:[%s21507_s11 + $0x68] sm:$0xff]  }
 0x6b7   : > { %17710 = vmatprep.subr.bf16.mxu0 %v18301_v46 }
 0x6ba   : > { %17711 = vmatpush3.bf16.msra.mxu0 %v18185_v18 }
 0x6bb   : > { %16896 = vmatprep.subr.bf16.mxu0 %v18198_v42 }
 0x6bd   : > { %17713 = vmatmul.mubr.msk.bf16.vlgmr.msra.gmra.mrb[188].mxu0 %vm11520_vm0, %v14658_v57 }
 0x6be   : > { %16897 = vmatpush3.bf16.msra.mxu0 %v18199_v12 }
 0x6bf   : > { %16898 = vmatprep.subr.bf16.mxu0 %v18200_v35 }
 0x6c2   : > { %16899 = vmatpush3.bf16.msra.mxu0 %v18201_v7 }
 0x6c3   : > { %16900 = vmatprep.subr.bf16.mxu0 %v18202_v45 }
 0x6c6   : > { %16901 = vmatpush3.bf16.msra.mxu0 %v18203_v17 }
 0x6c7   : > { %16902 = vmatprep.subr.bf16.mxu0 %v18204_v43 }
 0x6ca   : > { %16903 = vmatpush3.bf16.msra.mxu0 %v18205_v63 }
 0x6cb   : > { %16904 = vmatprep.subr.bf16.mxu0 %v18206_v14 }
 0x6ce   : > { %16905 = vmatpush3.bf16.msra.mxu0 %v18207_v28 }
 0x6cf   : > { %16906 = vmatprep.subr.bf16.mxu0 %v18208_v24 }
 0x6d2   : > { %16907 = vmatpush3.bf16.msra.mxu0 %v18209_v61 }
 0x6fc   : > { %v12434_v38 = vpop.f32.mrb[12].mxu1 }
 0x6fd   : > { %v17510_v31 = vpop.f32.mrb[13].mxu1 }
 0x6fe   : > { %v12437_v5 = vpop.f32.mrb[14].mxu1 }
 0x6ff   : > { %v17511_v40 = vpop.f32.mrb[15].mxu1 }
 0x700   : > { %v12308_v26 = vpop.f32.mrb[152].mxu0 }
 0x701   : > { %v12314_v39 = vadd.f32 %v12308_v26, %v21050_v23  ;;  %v17498_v41 = vpop.f32.mrb[153].mxu0  ;;  %v18186_v23 = vld [vmem:[%s21505_s9] ss:$8 sps:$4 sm:$0xff]  }
 0x702   : > { %v12311_v8 = vpop.f32.mrb[154].mxu0  ;;  %14821 = vmatpush1.bf16.msra.mxu1 %v18186_v23 }
 0x703   : > { %v17499_v58 = vpop.f32.mrb[155].mxu0  ;;  %v12440_v19 = vadd.f32 %v12434_v38, %v12314_v39  ;;  %14822 = vmatprep.subr.bf16.mxu1 %v18191_v3 }
 0x706   : > { %14823 = vmatpush1.bf16.msra.mxu1 %v18189_v56 }
 0x707   : > { %14824 = vmatprep.subr.bf16.mxu1 %v18194_v62 }
 0x70a   : > { %14825 = vmatpush1.bf16.msra.mxu1 %v18192_v30 }
 0x70b   : > { %14826 = vmatprep.subr.bf16.mxu1 %v18197_v25 }
 0x70c   : > { %v12720_v54 = vpop.f32.mrb[16].mxu1 }
 0x70d   : > { %v17534_v52 = vpop.f32.mrb[17].mxu1 }
 0x70e   : > { %v12723_v50 = vpop.f32.mrb[18].mxu1  ;;  %14827 = vmatpush1.bf16.msra.mxu1 %v18195_v9 }
 0x70f   : > { %v17535_v46 = vpop.f32.mrb[19].mxu1 }
 0x710   : > { %v12594_v37 = vpop.f32.mrb[156].mxu0 }
 0x711   : > { %v12600_v0 = vadd.f32 %v12594_v37, %v12440_v19  ;;  %v17522_v49 = vpop.f32.mrb[157].mxu0 }
 0x712   : > { %v12597_v6 = vpop.f32.mrb[158].mxu0 }
 0x713   : > { %v12726_v2 = vadd.f32 %v12720_v54, %v12600_v0  ;;  %v17523_v20 = vpop.f32.mrb[159].mxu0 }
 0x71c   : > { %v12974_v1 = vpop.f32.mrb[20].mxu1 }
 0x71d   : > { %v17558_v13 = vpop.f32.mrb[21].mxu1 }
 0x71e   : > { %v12977_v59 = vpop.f32.mrb[22].mxu1 }
 0x71f   : > { %v17559_v44 = vpop.f32.mrb[23].mxu1 }
 0x720   : > { %v12816_v47 = vpop.f32.mrb[160].mxu0 }
 0x721   : > { %v12822_v16 = vadd.f32 %v12816_v47, %v12726_v2  ;;  %v17546_v51 = vpop.f32.mrb[161].mxu0 }
 0x722   : > { %v12819_v4 = vpop.f32.mrb[162].mxu0 }
 0x723   : > { %v17547_v32 = vpop.f32.mrb[163].mxu0  ;;  %v12980_v10 = vadd.f32 %v12974_v1, %v12822_v16 }
 0x72c   : > { %v13260_v53 = vpop.f32.mrb[24].mxu1 }
 0x72d   : > { %v17582_v36 = vpop.f32.mrb[25].mxu1 }
 0x72e   : > { %v13263_v15 = vpop.f32.mrb[26].mxu1 }
 0x72f   : > { %v17583_v22 = vpop.f32.mrb[27].mxu1 }
 0x730   : > { %v13100_v60 = vpop.f32.mrb[164].mxu0  ;;  %v16431_v22 = vld [vmem:[%s21504_s8] ss:$0 sm:$0xff] }
 0x731   : > { %v13106_v55 = vadd.f32 %v13100_v60, %v12980_v10  ;;  %v17570_v21 = vpop.f32.mrb[165].mxu0 }
 0x732   : > { %v13103_v34 = vpop.f32.mrb[166].mxu0 }
 0x733   : > { %v17571_v11 = vpop.f32.mrb[167].mxu0  ;;  %v13266_v48 = vadd.f32 %v13260_v53, %v13106_v55 }
 0x73c   : > { %v13483_v18 = vpop.f32.mrb[28].mxu1 }
 0x73d   : > { %v17606_v57 = vpop.f32.mrb[29].mxu1 }
 0x73e   : > { %v13486_v38 = vpop.f32.mrb[30].mxu1 }
 0x73f   : > { %v17607_v31 = vpop.f32.mrb[31].mxu1 }
 0x740   : > { %v13386_v5 = vpop.f32.mrb[168].mxu0 }
 0x741   : > { %v13392_v40 = vadd.f32 %v13386_v5, %v13266_v48  ;;  %v17594_v26 = vpop.f32.mrb[169].mxu0  ;;  %v18210_v5 = vld [vmem:[%s21507_s11 + $0x70] sm:$0xff]  }
 0x742   : > { %v13389_v39 = vpop.f32.mrb[170].mxu0  ;;  %16908 = vmatprep.subr.bf16.mxu0 %v18210_v5  ;;  %v18213_v26 = vld [vmem:[%s21507_s11 + $0x38] sm:$0xff]  }
 0x743   : > { %v13489_v41 = vadd.f32 %v13483_v18, %v13392_v40  ;;  %v17595_v8 = vpop.f32.mrb[171].mxu0  ;;  %v18211_v40 = vld [vmem:[%s21507_s11 + $0x30] sm:$0xff]   ;;  %v14809_v39 = vsub.s32 0, %v18518_v29 }
 0x744   : > { %16909 = vmatpush3.bf16.msra.mxu0 %v18211_v40  ;;  %v14813_v8 = vsub.s32 1, %v18518_v29  ;;  %v14897_v29 = vld [vmem:[%s21508_s12] sm:$0x1] }
 0x74c   : > { %v13767_v58 = vpop.f32.mrb[32].mxu1 }
 0x74d   : > { %v17630_v19 = vpop.f32.mrb[33].mxu1 }
 0x74e   : > { %v13770_v54 = vpop.f32.mrb[34].mxu1 }
 0x74f   : > { %v17631_v52 = vpop.f32.mrb[35].mxu1 }
 0x750   : > { %v13641_v50 = vpop.f32.mrb[172].mxu0 }
 0x751   : > { %v13647_v46 = vadd.f32 %v13641_v50, %v13489_v41  ;;  %v17618_v37 = vpop.f32.mrb[173].mxu0  ;;  %v14765_v41 = vld [vmem:[%s21506_s10] sm:$0x3] }
 0x752   : > { %v13644_v0 = vpop.f32.mrb[174].mxu0  ;;  %v14814_v19 = vrot.slane %v14765_v41, %v14813_v8 }
 0x753   : > { %v17619_v49 = vpop.f32.mrb[175].mxu0  ;;  %v13773_v6 = vadd.f32 %v13767_v58, %v13647_v46  ;;  %v14810_v58 = vrot.slane %v14765_v41, %v14809_v39 }
 0x75c   : > { %v14053_v2 = vpop.f32.mrb[36].mxu1 }
 0x75d   : > { %v17654_v20 = vpop.f32.mrb[37].mxu1 }
 0x75e   : > { %v14056_v1 = vpop.f32.mrb[38].mxu1 }
 0x75f   : > { %v17655_v13 = vpop.f32.mrb[39].mxu1 }
 0x760   : > { %v13927_v59 = vpop.f32.mrb[176].mxu0 }
 0x761   : > { %v13933_v44 = vadd.f32 %v13927_v59, %v13773_v6  ;;  %v17642_v23 = vpop.f32.mrb[177].mxu0 }
 0x762   : > { %v13930_v27 = vpop.f32.mrb[178].mxu0 }
 0x763   : > { %v14059_v47 = vadd.f32 %v14053_v2, %v13933_v44  ;;  %v17643_v3 = vpop.f32.mrb[179].mxu0 }
 0x76c   : > { %v14308_v16 = vpop.f32.mrb[40].mxu1 }
 0x76d   : > { %v17678_v51 = vpop.f32.mrb[41].mxu1 }
 0x76e   : > { %v14311_v4 = vpop.f32.mrb[42].mxu1 }
 0x76f   : > { %v17679_v56 = vpop.f32.mrb[43].mxu1 }
 0x770   : > { %v14150_v62 = vpop.f32.mrb[180].mxu0 }
 0x771   : > { %v14156_v32 = vadd.f32 %v14150_v62, %v14059_v47  ;;  %v17666_v10 = vpop.f32.mrb[181].mxu0 }
 0x772   : > { %v14153_v42 = vpop.f32.mrb[182].mxu0 }
 0x773   : > { %v14314_v12 = vadd.f32 %v14308_v16, %v14156_v32  ;;  %v17667_v35 = vpop.f32.mrb[183].mxu0 }
 0x77c   : > { %v14594_v30 = vpop.f32.mrb[44].mxu1 }
 0x77d   : > { %v17702_v7 = vpop.f32.mrb[45].mxu1 }
 0x77e   : > { %v14597_v25 = vpop.f32.mrb[46].mxu1 }
 0x77f   : > { %v17703_v45 = vpop.f32.mrb[47].mxu1 }
 0x780   : > { %v14434_v9 = vpop.f32.mrb[184].mxu0 }
 0x781   : > { %v14440_v17 = vadd.f32 %v14434_v9, %v14314_v12  ;;  %v17690_v43 = vpop.f32.mrb[185].mxu0 }
 0x782   : > { %v14437_v53 = vpop.f32.mrb[186].mxu0 }
 0x783   : > { %v14600_v36 = vadd.f32 %v14594_v30, %v14440_v17  ;;  %v17691_v15 = vpop.f32.mrb[187].mxu0 }
 0x790   : > { %v14720_v63 = vpop.f32.mrb[188].mxu0 }
 0x791   : > { %v14726_v14 = vadd.f32 %v14720_v63, %v14600_v36  ;;  %v17714_v60 = vpop.f32.mrb[189].mxu0 }
 0x792   : > { %v14723_v55 = vpop.f32.mrb[190].mxu0 }
 0x793   : > { %v14734_v21 = vadd.f32 %v16431_v22, %v14726_v14  ;;  %v17715_v34 = vpop.f32.mrb[191].mxu0 }
 0x795   : > { %v14735_v28 = vmax.f32 %v14734_v21, 0.0 }
 0x797   : > { %v14743_v11 = vrot.slane %v14735_v28, %v18527_v33  ;;  %v18212_v33 = vld [vmem:[%s21507_s11 + $0x78] sm:$0xff]  }
 0x798   : > { %16910 = vmatprep.subr.bf16.mxu0 %v18212_v33 }
 0x799   : > { %v14744_v48 = vcombine.high %v14743_v11, %v14743_v11  ;;  %v16432_v24 = vrot.slane %v14743_v11, 9  ;;  %16911 = vmatpush3.bf16.msra.mxu0 %v18213_v26 }
 0x79b   : > { %v16433_v61 = vrot.slane %v14744_v48, 9  ;;  %v14753_v18 = vmax.f32 %v14743_v11, %v16432_v24 }
 0x79d   : > { %v14754_v57 = vmax.f32 %v14744_v48, %v16433_v61 }
 0x79f   : > { %v14755_v38 = vmax.f32 %v14753_v18, %v14754_v57 }
 0x7a1   : > { %v14756_v31 = vpack.c.bf16 %v14755_v38, %v14755_v38 }
 0x7a3   : > { %16442 = vmatmul.mubr.msk.bf16.vlgmr.msra.gmra.mrb[48].mxu1 %vm11520_vm0, %v14756_v31 }
 0x876   : > { %v14854_v54 = vpop.f32.mrb[48].mxu1 }
 0x877   : > { %v14855_v52 = vadd.f32 %v14854_v54, %v14810_v58  ;;  %v14856_v50 = vpop.f32.mrb[49].mxu1 }
 0x878   : > { %v14857_v46 = vadd.f32 %v14856_v50, %v14814_v19  ;;  %v14858_v37 = vpop.f32.mrb[50].mxu1 }
 0x879   : > { %v14861_v0 = vmax.f32 %v14855_v52, 0.0  ;;  %v14859_v49 = vpop.f32.mrb[51].mxu1 }
 0x87a   : > { %v14862_v6 = vmax.f32 %v14857_v46, 0.0 }
 0x87b   : > { %v14863_v20 = vpack.c.bf16 %v14861_v0, %v14861_v0 }
 0x87c   : > { %v14864_v2 = vpack.c.bf16 %v14862_v6, %v14862_v6 }
 0x87e   : > { %15026 = vmatprep.mubr.bf16.mxu0 %v14864_v2 }
 0x87f   : > { %15027 = vmatmul.mubr.bf16.vlgmr.msra.gmra.mrb[192].mxu0 %v14863_v20 }
 0x952   : > { %v16912_v1 = vpop.f32.mrb[192].mxu0 }
 0x953   : > { %v16913_v13 = vpop.f32.mrb[193].mxu0 }
 0x954   : > { %v16914_v59 = vadd.f32 %v16913_v13, %v16912_v1  ;;  %v16915_v44 = vpop.f32.mrb[194].mxu0 }
 0x955   : > { %v16916_v23 = vpop.f32.mrb[195].mxu0 }
 0x956   : > { %v15029_v27 = vadd.f32 %v16914_v59, %v14897_v29 }
 0x958   : > { %v15034_v47 = vsub.f32 0.0, %v15029_v27 }
 0x95a   : > { %v15035_v3 = vmul.f32 1.442695, %v15034_v47 }
 0x95c   : > { %18214 = vpow2.f32 %v15035_v3 }
 0x966   : > { %v18215_v16 = vpop.eup %18214 }
 0x967   : > { %v15037_v51 = vadd.f32 1.0, %v18215_v16 }
 0x969   : > { %18216 = vrcp.f32 %v15037_v51 }
 0x973   : > { %v18217_v4 = vpop.eup %18216 }
 0x974   : > { %v15039_v56 = vmax.f32 %v18217_v4, 0.0 }
 0x976   : > { %v15040_v62 = vmin.f32 %v15039_v56, 1.0 }
 0x978   : > { %15041 = vst [vmem:[%s432_s30] sm:$0x1] %v15040_v62 }
 0x979   : > { %18248 = shalt.err (!%p18245_p3)
}
 0x97a   : > { %s18249_s14 = scalar_lea.hbm %s21454_s21, 16  ;;  %s18253_s16 = scalar_lea.hbm %s21509_s13, 32 }
 0x97b   : > { %p18250_p4 = scmp.ne.s32.totalorder %s21454_s21, %s18249_s14  ;;  %p18254_p9 = scmp.lt.u32.totalorder %s21454_s21, %s21509_s13 }
 0x97c   : > { %p18255_p10 = scmp.lt.u32.totalorder %s18253_s16, %s18249_s14  ;;  %p18257_p12 = scmp.lt.u32.totalorder %s18249_s14, %s21454_s21 }
 0x97d   : > { %p18251_p7 = pnand %p18250_p4, %p18413_p5 }
 0x97e   : > { %p18256_p11 = por %p18255_p10, %p18254_p9 }
 0x97f   : > { %p18252_p8 = pneg %p18251_p7 }
 0x980   : > { %p18258_p13 = por %p18257_p12, %p18256_p11 }
 0x982   : > { %p18259_p0 = pnand %p18258_p13, %p18252_p8 }
 0x984   : > { %18262 = shalt.err (!%p18259_p0)
}
 0x985   : > { %17908 = dma.vmem_to_hbm [thread:$0]  (%p18413_p5), %s21456_s15, 16, %s21454_s21, %s15043_s22  }
 0x986 PF: > { %p17914_p1 = scmp.ge.s32.totalorder %s18297_s28, 2  ;;  %s15067_s23 = sand.u32 1, %s18285_s25  }
 0x987   : > { %s15068_s27 = scalar_lea.sflag [#allocation6], %s15067_s23 }
 0x988   : > { %p17911_p2 = pnand %p17914_p1, %p18417_p6 }
 0x98a   : > { %18280 = dma.done.wait (!%p17911_p2), %s15068_s27, 16  }
 0x98b   : > { %18282 = vsyncadd (!%p17911_p2), %s15068_s27, 4294967280  ;;  %s21538_s28 = sld [smem:[#allocation9_spill]]  ;;  %s21539_s17 = sld [smem:[#allocation8_spill]] }
 0x98c   : > { %s21540_s27 = sld [smem:[#allocation10_spill]]  ;;  %s21541_s25 = smov %s18289_s26 }
 0x991   : > { %p23_p3 = scmp.ge.s32.totalorder %s21538_s28, 4   ;;  %s21542_s26 = smov %s21539_s17 }
 0x993   :  { %25 = sbr.rel (!%p23_p3) target bundleno = 3 (0x3), region = 191 }
 0x99a   :  { %15072 = vsyncpa [#allocation6], 1 }
 0x99b   :  { %15074 = vsyncpa [#allocation6 + $0x1], 1 }

</bundles_post_ra>
